<compile_context>
chip_gen: v7x
topology: tpu7x:2x2x1
jax: 0.10.0
libtpu: 0.0.40
codegen_flags: <defaults>
</compile_context>

<pallas_src>
import functools

import jax
import jax.numpy as jnp
from jax.experimental import pallas as pl
from jax.experimental.pallas import tpu as pltpu

BN_EPS = 1e-5
LANE = 128
VMEM_LIMIT_BYTES = 32 * 1024 * 1024


def _round_up(x: int, m: int) -> int:
    return ((x + m - 1) // m) * m


def _pad_cols(a, width):
    return jnp.pad(a, ((0, 0), (0, width - a.shape[1])))


# --------------------------------------------------------------------------- #
# Kernels
# --------------------------------------------------------------------------- #
def _stats_kernel(src_ref, dest_ref, edge_ref, w1a_ref, w1b_ref, w1c_ref,
                  sum_ref, sumsq_ref, *, tile, half_tiles, num_edges,
                  needs_mask):
    """Pass 1: per-shard column-wise sum(g) and sum(g*g), g = x @ W1 (no bias).

    Grid = (shard, tile-within-shard).  Each shard owns its own (1,1,H_PAD)
    accumulator rows (summed across shards inside the apply kernel).
    Rows >= num_edges (ragged last tile / clamped duplicate tiles) are zeroed
    with a select so garbage (incl. NaN) from partial DMAs cannot leak.
    """
    g = (jnp.dot(src_ref[...], w1a_ref[...], preferred_element_type=jnp.float32)
         + jnp.dot(dest_ref[...], w1b_ref[...], preferred_element_type=jnp.float32)
         + jnp.dot(edge_ref[...], w1c_ref[...], preferred_element_type=jnp.float32))

    if needs_mask:
        # Unclamped global tile index -> true row range of this grid step.
        t = pl.program_id(0) * half_tiles + pl.program_id(1)
        row = jax.lax.broadcasted_iota(jnp.int32, (tile, 1), 0)
        valid = row < (num_edges - t * tile)
        g = jnp.where(valid, g, 0.0)          # select (NaN-safe), not multiply

    @pl.when(pl.program_id(1) == 0)
    def _():
        sum_ref[...] = jnp.zeros_like(sum_ref)
        sumsq_ref[...] = jnp.zeros_like(sumsq_ref)

    # Cross-sublane reduction (XLU); kernel is HBM-bound so this is not the
    # binding slot.
    # TODO(synk): for very large E consider an offset/Welford-style update to
    # avoid E[g^2]-E[g]^2 cancellation; fine in f32 at these scales.
    sum_ref[...] += jnp.sum(g, axis=0, keepdims=True).reshape(sum_ref.shape)
    sumsq_ref[...] += jnp.sum(g * g, axis=0, keepdims=True).reshape(sumsq_ref.shape)


def _apply_kernel(src_ref, dest_ref, edge_ref, w1a_ref, w1b_ref, w1c_ref,
                  sums_ref, sumsqs_ref, gamma_ref, beta_ref, w2_ref, b2_ref,
                  o_ref, *, inv_e):
    """Pass 2: fold BN scale/shift from raw sums, recompute g, ReLU, Linear2."""
    # Training-mode BN (biased var) + first-layer bias folded into per-column
    # scale/shift (b1 cancels exactly inside BN).  Recomputed per tile (one
    # rsqrt + a few (1,128) VPU ops) instead of cached in scratch so the grid
    # axis can stay 'parallel' (megacore-safe: no cross-core scratch init).
    sum_g = jnp.sum(sums_ref[...], axis=0)            # (1, H_PAD)
    sumsq_g = jnp.sum(sumsqs_ref[...], axis=0)
    mean_g = sum_g * inv_e
    var = jnp.maximum(sumsq_g * inv_e - mean_g * mean_g, 0.0)
    inv_std = jax.lax.rsqrt(var + BN_EPS)
    scale = gamma_ref[...] * inv_std
    shift = beta_ref[...] - mean_g * scale

    g = (jnp.dot(src_ref[...], w1a_ref[...], preferred_element_type=jnp.float32)
         + jnp.dot(dest_ref[...], w1b_ref[...], preferred_element_type=jnp.float32)
         + jnp.dot(edge_ref[...], w1c_ref[...], preferred_element_type=jnp.float32))
    hr = jnp.maximum(g * scale + shift, 0.0)          # BN + ReLU (VPU)
    out = jnp.dot(hr, w2_ref[...], preferred_element_type=jnp.float32) + b2_ref[...]
    o_ref[...] = out.astype(o_ref.dtype)              # (tile, hidden) store


# --------------------------------------------------------------------------- #
# Parameters
# --------------------------------------------------------------------------- #
def make_edge_model_params(node_size: int, edge_attr_size: int, hidden: int, key):
    """Init mimicking PyTorch Linear defaults; weights stored transposed (in, out)."""
    fin = node_size * 2 + edge_attr_size
    k1, k2, k3, k4 = jax.random.split(key, 4)
    bound1 = 1.0 / jnp.sqrt(jnp.float32(fin))
    bound2 = 1.0 / jnp.sqrt(jnp.float32(hidden))
    return {
        "w1": jax.random.uniform(k1, (fin, hidden), jnp.float32, -bound1, bound1),
        "b1": jax.random.uniform(k2, (1, hidden), jnp.float32, -bound1, bound1),
        "gamma": jnp.ones((1, hidden), jnp.float32),
        "beta": jnp.zeros((1, hidden), jnp.float32),
        "w2": jax.random.uniform(k3, (hidden, hidden), jnp.float32, -bound2, bound2),
        "b2": jax.random.uniform(k4, (1, hidden), jnp.float32, -bound2, bound2),
    }


# --------------------------------------------------------------------------- #
# Forward
# --------------------------------------------------------------------------- #
@functools.partial(jax.jit, static_argnames=("tile_e",))
def _forward_impl(params, src, dest, edge_attr, *, tile_e):
    E, fx = src.shape
    fe = edge_attr.shape[1]
    fin = 2 * fx + fe
    hidden = params["w2"].shape[1]
    h_pad = _round_up(hidden, LANE)

    # Row tiling: no wrapper-side padding/copies of the (E, *) inputs.
    if E <= tile_e:
        tile = E                          # full-extent block: legal for any E
    else:
        tile = _round_up(tile_e, 8)
    n_tiles = pl.cdiv(E, tile)

    # Pass-1 stats split across (up to) two megacore shards (v7x: 2 TCs).
    num_shards = 2 if n_tiles >= 2 else 1
    half_tiles = pl.cdiv(n_tiles, num_shards)
    needs_mask = (num_shards * half_tiles * tile) != E

    # Params: pad only the internal hidden (K) dimension to 128 lanes.
    # W2's output dim and b2 stay exactly `hidden` (lane-thin but few bytes).
    w1 = _pad_cols(params["w1"].astype(jnp.float32), h_pad)
    w1a, w1b, w1c = w1[:fx], w1[fx:2 * fx], w1[2 * fx:]
    gamma = _pad_cols(params["gamma"].astype(jnp.float32), h_pad)   # pads = 0
    beta = _pad_cols(params["beta"].astype(jnp.float32), h_pad)
    w2 = jnp.pad(params["w2"].astype(jnp.float32), ((0, h_pad - hidden), (0, 0)))
    b2 = params["b2"].astype(jnp.float32)

    def shard_row_map(c, i):
        # Clamp so duplicate tail tiles of an odd split stay in-bounds for the
        # DMA; the in-kernel mask zeroes their contribution.
        return (jnp.minimum(c * half_tiles + i, n_tiles - 1), 0)

    def const_w(c, i):
        return (0, 0)

    # ---- pass 1: exact full-batch BN statistics --------------------------- #
    stats_kernel = functools.partial(
        _stats_kernel, tile=tile, half_tiles=half_tiles, num_edges=E,
        needs_mask=needs_mask)

    sums, sumsqs = pl.pallas_call(
        stats_kernel,
        out_shape=(jax.ShapeDtypeStruct((num_shards, 1, h_pad), jnp.float32),
                   jax.ShapeDtypeStruct((num_shards, 1, h_pad), jnp.float32)),
        grid_spec=pltpu.PrefetchScalarGridSpec(
            num_scalar_prefetch=0,
            grid=(num_shards, half_tiles),
            in_specs=[pl.BlockSpec((tile, fx), shard_row_map),
                      pl.BlockSpec((tile, fx), shard_row_map),
                      pl.BlockSpec((tile, fe), shard_row_map),
                      pl.BlockSpec((fx, h_pad), const_w),
                      pl.BlockSpec((fx, h_pad), const_w),
                      pl.BlockSpec((fe, h_pad), const_w)],
            out_specs=(pl.BlockSpec((1, 1, h_pad), lambda c, i: (c, 0, 0)),
                       pl.BlockSpec((1, 1, h_pad), lambda c, i: (c, 0, 0))),
        ),
        compiler_params=pltpu.CompilerParams(
            dimension_semantics=("parallel", "arbitrary"),
            vmem_limit_bytes=VMEM_LIMIT_BYTES),
        cost_estimate=pl.CostEstimate(
            flops=2 * num_shards * half_tiles * tile * fin * h_pad,
            transcendentals=0,
            bytes_accessed=4 * (E * fin + fin * h_pad + 2 * num_shards * h_pad)),
    )(src, dest, edge_attr, w1a, w1b, w1c)

    # TODO(synk): PyTorch training mode also mutates BN running_mean/running_var;
    # expose (sum/E + b1, var) to the caller if those buffers must be updated.

    # ---- pass 2: BN fold + ReLU + second Linear (E axis parallel) ---------- #
    apply_kernel = functools.partial(_apply_kernel, inv_e=1.0 / float(E))
    row_map = lambda i: (i, 0)
    const1 = lambda i: (0, 0)

    out = pl.pallas_call(
        apply_kernel,
        out_shape=jax.ShapeDtypeStruct((E, hidden), jnp.float32),
        grid_spec=pltpu.PrefetchScalarGridSpec(
            num_scalar_prefetch=0,
            grid=(n_tiles,),
            in_specs=[pl.BlockSpec((tile, fx), row_map),
                      pl.BlockSpec((tile, fx), row_map),
                      pl.BlockSpec((tile, fe), row_map),
                      pl.BlockSpec((fx, h_pad), const1),
                      pl.BlockSpec((fx, h_pad), const1),
                      pl.BlockSpec((fe, h_pad), const1),
                      pl.BlockSpec((num_shards, 1, h_pad), lambda i: (0, 0, 0)),
                      pl.BlockSpec((num_shards, 1, h_pad), lambda i: (0, 0, 0)),
                      pl.BlockSpec((1, h_pad), const1),
                      pl.BlockSpec((1, h_pad), const1),
                      pl.BlockSpec((h_pad, hidden), const1),
                      pl.BlockSpec((1, hidden), const1)],
            out_specs=pl.BlockSpec((tile, hidden), row_map),
        ),
        compiler_params=pltpu.CompilerParams(
            dimension_semantics=("parallel",),
            vmem_limit_bytes=VMEM_LIMIT_BYTES),
        cost_estimate=pl.CostEstimate(
            flops=2 * E * (fin * h_pad + h_pad * hidden),
            transcendentals=0,
            bytes_accessed=4 * (E * (fin + hidden) + fin * h_pad
                                + h_pad * hidden + 6 * h_pad)),
    )(src, dest, edge_attr, w1a, w1b, w1c, sums, sumsqs, gamma, beta, w2, b2)

    return out


def edge_model_forward(params, src, dest, edge_attr, u=None, batch=None, *,
                       tile_e=4096):
    """Pallas-backed EdgeModel.forward. `u` and `batch` are unused (as in PyTorch)."""
    if edge_attr.ndim == 1:
        edge_attr = edge_attr.reshape(-1, 1)
    return _forward_impl(params,
                         src.astype(jnp.float32),
                         dest.astype(jnp.float32),
                         edge_attr.astype(jnp.float32),
                         tile_e=int(tile_e))


# --------------------------------------------------------------------------- #
# Pure-JAX reference for correctness checking
# --------------------------------------------------------------------------- #
def _reference_forward(params, src, dest, edge_attr):
    if edge_attr.ndim == 1:
        edge_attr = edge_attr.reshape(-1, 1)
    x = jnp.concatenate([src, dest, edge_attr], axis=1).astype(jnp.float32)
    h = x @ params["w1"] + params["b1"]
    mean = jnp.mean(h, axis=0, keepdims=True)
    var = jnp.mean((h - mean) ** 2, axis=0, keepdims=True)
    hn = (h - mean) / jnp.sqrt(var + BN_EPS) * params["gamma"] + params["beta"]
    hr = jnp.maximum(hn, 0.0)
    return hr @ params["w2"] + params["b2"]


if __name__ == "__main__":
    # Small, module-consistent shapes.
    E = 1000
    node_size = 8
    edge_attr_size = 4
    hidden = 32

    key = jax.random.PRNGKey(0)
    kp, ks, kd, ke = jax.random.split(key, 4)

    params = make_edge_model_params(node_size, edge_attr_size, hidden, kp)

    src = jax.random.normal(ks, (E, node_size), jnp.float32)
    dest = jax.random.normal(kd, (E, node_size), jnp.float32)
    edge_attr = jax.random.normal(ke, (E, edge_attr_size), jnp.float32)
    u = None
    batch = jnp.zeros((E,), jnp.int32)  # unused by forward (parity with PyTorch signature)

    ref = _reference_forward(params, src, dest, edge_attr)

    # tile_e=4096: single full-extent tile.  tile_e=144: 7 tiles -> exercises
    # the 2-shard stats split, the clamped duplicate tail tile and the ragged
    # last-tile mask / masked output store.
    for tile_e in (4096, 144):
        out = edge_model_forward(params, src, dest, edge_attr, u, batch,
                                 tile_e=tile_e)
        out = jax.block_until_ready(out)
        assert out.shape == (E, hidden), (tile_e, out.shape)
        max_err = float(jnp.max(jnp.abs(out - ref)))
        assert jnp.allclose(out, ref, atol=2e-4, rtol=2e-4), (tile_e, max_err)

    print("KERNEL_OK")
</pallas_src>

<mosaic_0001>
module attributes {stable_mosaic.version = 11 : i64} {
  func.func @_apply_kernel(%arg0: i32, %arg1: memref<1000x8xf32, #tpu.memory_space<vmem>>, %arg2: memref<1000x8xf32, #tpu.memory_space<vmem>>, %arg3: memref<1000x4xf32, #tpu.memory_space<vmem>>, %arg4: memref<8x128xf32, #tpu.memory_space<vmem>>, %arg5: memref<8x128xf32, #tpu.memory_space<vmem>>, %arg6: memref<4x128xf32, #tpu.memory_space<vmem>>, %arg7: memref<1x1x128xf32, #tpu.memory_space<vmem>>, %arg8: memref<1x1x128xf32, #tpu.memory_space<vmem>>, %arg9: memref<1x128xf32, #tpu.memory_space<vmem>>, %arg10: memref<1x128xf32, #tpu.memory_space<vmem>>, %arg11: memref<128x32xf32, #tpu.memory_space<vmem>>, %arg12: memref<1x32xf32, #tpu.memory_space<vmem>>, %arg13: memref<1000x32xf32, #tpu.memory_space<vmem>>) attributes {dimension_semantics = [#tpu.dimension_semantics<parallel>], iteration_bounds = array<i64: 1>, scalar_prefetch = 0 : i64, scratch_operands = 0 : i64, tpu.core_type = #tpu.core_type<tc>, window_params = [{transform_indices = @transform_0, window_bounds = array<i64: 1000, 8>}, {transform_indices = @transform_1, window_bounds = array<i64: 1000, 8>}, {transform_indices = @transform_2, window_bounds = array<i64: 1000, 4>}, {pipeline_mode = #tpu.pipeline_mode<synchronous>, transform_indices = @transform_3, window_bounds = array<i64: 8, 128>}, {pipeline_mode = #tpu.pipeline_mode<synchronous>, transform_indices = @transform_4, window_bounds = array<i64: 8, 128>}, {pipeline_mode = #tpu.pipeline_mode<synchronous>, transform_indices = @transform_5, window_bounds = array<i64: 4, 128>}, {pipeline_mode = #tpu.pipeline_mode<synchronous>, transform_indices = @transform_6, window_bounds = array<i64: 1, 1, 128>}, {pipeline_mode = #tpu.pipeline_mode<synchronous>, transform_indices = @transform_7, window_bounds = array<i64: 1, 1, 128>}, {pipeline_mode = #tpu.pipeline_mode<synchronous>, transform_indices = @transform_8, window_bounds = array<i64: 1, 128>}, {pipeline_mode = #tpu.pipeline_mode<synchronous>, transform_indices = @transform_9, window_bounds = array<i64: 1, 128>}, {pipeline_mode = #tpu.pipeline_mode<synchronous>, transform_indices = @transform_10, window_bounds = array<i64: 128, 32>}, {pipeline_mode = #tpu.pipeline_mode<synchronous>, transform_indices = @transform_11, window_bounds = array<i64: 1, 32>}, {transform_indices = @transform_12, window_bounds = array<i64: 1000, 32>}]} {
    %c0 = arith.constant 0 : index
    %c0_0 = arith.constant 0 : index
    %c0_1 = arith.constant 0 : index
    %0 = vector.load %arg7[%c0, %c0_0, %c0_1] : memref<1x1x128xf32, #tpu.memory_space<vmem>>, vector<1x1x128xf32>
    %cst = arith.constant dense<0.000000e+00> : vector<1x128xf32>
    %1 = vector.multi_reduction <add>, %0, %cst [0] : vector<1x1x128xf32> to vector<1x128xf32>
    %c0_2 = arith.constant 0 : index
    %c0_3 = arith.constant 0 : index
    %c0_4 = arith.constant 0 : index
    %2 = vector.load %arg8[%c0_2, %c0_3, %c0_4] : memref<1x1x128xf32, #tpu.memory_space<vmem>>, vector<1x1x128xf32>
    %cst_5 = arith.constant dense<0.000000e+00> : vector<1x128xf32>
    %3 = vector.multi_reduction <add>, %2, %cst_5 [0] : vector<1x1x128xf32> to vector<1x128xf32>
    %cst_6 = arith.constant 1.000000e-03 : f32
    %4 = vector.broadcast %cst_6 : f32 to vector<1x128xf32>
    %5 = arith.mulf %1, %4 : vector<1x128xf32>
    %cst_7 = arith.constant 1.000000e-03 : f32
    %6 = vector.broadcast %cst_7 : f32 to vector<1x128xf32>
    %7 = arith.mulf %3, %6 : vector<1x128xf32>
    %8 = arith.mulf %5, %5 : vector<1x128xf32>
    %9 = arith.subf %7, %8 : vector<1x128xf32>
    %cst_8 = arith.constant 0.000000e+00 : f32
    %10 = vector.broadcast %cst_8 : f32 to vector<1x128xf32>
    %11 = arith.maximumf %9, %10 : vector<1x128xf32>
    %cst_9 = arith.constant 9.99999974E-6 : f32
    %12 = vector.broadcast %cst_9 : f32 to vector<1x128xf32>
    %13 = arith.addf %11, %12 : vector<1x128xf32>
    %14 = math.rsqrt %13 : vector<1x128xf32>
    %c0_10 = arith.constant 0 : index
    %c0_11 = arith.constant 0 : index
    %15 = vector.load %arg9[%c0_10, %c0_11] : memref<1x128xf32, #tpu.memory_space<vmem>>, vector<1x128xf32>
    %16 = arith.mulf %15, %14 : vector<1x128xf32>
    %c0_12 = arith.constant 0 : index
    %c0_13 = arith.constant 0 : index
    %17 = vector.load %arg10[%c0_12, %c0_13] : memref<1x128xf32, #tpu.memory_space<vmem>>, vector<1x128xf32>
    %18 = arith.mulf %5, %16 : vector<1x128xf32>
    %19 = arith.subf %17, %18 : vector<1x128xf32>
    %c0_14 = arith.constant 0 : index
    %c0_15 = arith.constant 0 : index
    %20 = vector.load %arg1[%c0_14, %c0_15] : memref<1000x8xf32, #tpu.memory_space<vmem>>, vector<1000x8xf32>
    %c0_16 = arith.constant 0 : index
    %c0_17 = arith.constant 0 : index
    %21 = vector.load %arg4[%c0_16, %c0_17] : memref<8x128xf32, #tpu.memory_space<vmem>>, vector<8x128xf32>
    %cst_18 = arith.constant dense<0.000000e+00> : vector<1000x128xf32>
    %22 = tpu.matmul %20, %21, %cst_18 {dimension_numbers = #tpu.dot_dimension_numbers<[1], [0], [0], [1], [0, 0, 1, 1], [], []>} : vector<1000x8xf32>, vector<8x128xf32>, vector<1000x128xf32> -> vector<1000x128xf32>
    %c0_19 = arith.constant 0 : index
    %c0_20 = arith.constant 0 : index
    %23 = vector.load %arg2[%c0_19, %c0_20] : memref<1000x8xf32, #tpu.memory_space<vmem>>, vector<1000x8xf32>
    %c0_21 = arith.constant 0 : index
    %c0_22 = arith.constant 0 : index
    %24 = vector.load %arg5[%c0_21, %c0_22] : memref<8x128xf32, #tpu.memory_space<vmem>>, vector<8x128xf32>
    %cst_23 = arith.constant dense<0.000000e+00> : vector<1000x128xf32>
    %25 = tpu.matmul %23, %24, %cst_23 {dimension_numbers = #tpu.dot_dimension_numbers<[1], [0], [0], [1], [0, 0, 1, 1], [], []>} : vector<1000x8xf32>, vector<8x128xf32>, vector<1000x128xf32> -> vector<1000x128xf32>
    %26 = arith.addf %22, %25 : vector<1000x128xf32>
    %c0_24 = arith.constant 0 : index
    %c0_25 = arith.constant 0 : index
    %27 = vector.load %arg3[%c0_24, %c0_25] : memref<1000x4xf32, #tpu.memory_space<vmem>>, vector<1000x4xf32>
    %c0_26 = arith.constant 0 : index
    %c0_27 = arith.constant 0 : index
    %28 = vector.load %arg6[%c0_26, %c0_27] : memref<4x128xf32, #tpu.memory_space<vmem>>, vector<4x128xf32>
    %cst_28 = arith.constant dense<0.000000e+00> : vector<1000x128xf32>
    %29 = tpu.matmul %27, %28, %cst_28 {dimension_numbers = #tpu.dot_dimension_numbers<[1], [0], [0], [1], [0, 0, 1, 1], [], []>} : vector<1000x4xf32>, vector<4x128xf32>, vector<1000x128xf32> -> vector<1000x128xf32>
    %30 = arith.addf %26, %29 : vector<1000x128xf32>
    %31 = vector.broadcast %16 : vector<1x128xf32> to vector<1000x128xf32>
    %32 = arith.mulf %30, %31 : vector<1000x128xf32>
    %33 = vector.broadcast %19 : vector<1x128xf32> to vector<1000x128xf32>
    %34 = arith.addf %32, %33 : vector<1000x128xf32>
    %cst_29 = arith.constant 0.000000e+00 : f32
    %35 = vector.broadcast %cst_29 : f32 to vector<1000x128xf32>
    %36 = arith.maximumf %34, %35 : vector<1000x128xf32>
    %c0_30 = arith.constant 0 : index
    %c0_31 = arith.constant 0 : index
    %37 = vector.load %arg11[%c0_30, %c0_31] : memref<128x32xf32, #tpu.memory_space<vmem>>, vector<128x32xf32>
    %cst_32 = arith.constant dense<0.000000e+00> : vector<1000x32xf32>
    %38 = tpu.matmul %36, %37, %cst_32 {dimension_numbers = #tpu.dot_dimension_numbers<[1], [0], [0], [1], [0, 0, 1, 1], [], []>} : vector<1000x128xf32>, vector<128x32xf32>, vector<1000x32xf32> -> vector<1000x32xf32>
    %c0_33 = arith.constant 0 : index
    %c0_34 = arith.constant 0 : index
    %39 = vector.load %arg12[%c0_33, %c0_34] : memref<1x32xf32, #tpu.memory_space<vmem>>, vector<1x32xf32>
    %40 = vector.broadcast %39 : vector<1x32xf32> to vector<1000x32xf32>
    %41 = arith.addf %38, %40 : vector<1000x32xf32>
    %c0_35 = arith.constant 0 : index
    %c0_36 = arith.constant 0 : index
    %42 = vector.load %arg13[%c0_35, %c0_36] : memref<1000x32xf32, #tpu.memory_space<vmem>>, vector<1000x32xf32>
    tpu.vector_store %arg13[%c0_35, %c0_36], %41 {strides = array<i32>} : memref<1000x32xf32, #tpu.memory_space<vmem>>, vector<1000x32xf32>,
    return
  }
  func.func @transform_0(%arg0: i32) -> (i32, i32) {
    %c0_i32 = arith.constant 0 : i32
    %c0_i32_0 = arith.constant 0 : i32
    return %arg0, %c0_i32 : i32, i32
  }
  func.func @transform_1(%arg0: i32) -> (i32, i32) {
    %c0_i32 = arith.constant 0 : i32
    %c0_i32_0 = arith.constant 0 : i32
    return %arg0, %c0_i32 : i32, i32
  }
  func.func @transform_2(%arg0: i32) -> (i32, i32) {
    %c0_i32 = arith.constant 0 : i32
    %c0_i32_0 = arith.constant 0 : i32
    return %arg0, %c0_i32 : i32, i32
  }
  func.func @transform_3(%arg0: i32) -> (i32, i32) {
    %c0_i32 = arith.constant 0 : i32
    %c0_i32_0 = arith.constant 0 : i32
    %c0_i32_1 = arith.constant 0 : i32
    return %c0_i32, %c0_i32_0 : i32, i32
  }
  func.func @transform_4(%arg0: i32) -> (i32, i32) {
    %c0_i32 = arith.constant 0 : i32
    %c0_i32_0 = arith.constant 0 : i32
    %c0_i32_1 = arith.constant 0 : i32
    return %c0_i32, %c0_i32_0 : i32, i32
  }
  func.func @transform_5(%arg0: i32) -> (i32, i32) {
    %c0_i32 = arith.constant 0 : i32
    %c0_i32_0 = arith.constant 0 : i32
    %c0_i32_1 = arith.constant 0 : i32
    return %c0_i32, %c0_i32_0 : i32, i32
  }
  func.func @transform_6(%arg0: i32) -> (i32, i32, i32) {
    %c0_i32 = arith.constant 0 : i32
    %c0_i32_0 = arith.constant 0 : i32
    %c0_i32_1 = arith.constant 0 : i32
    %c0_i32_2 = arith.constant 0 : i32
    return %c0_i32, %c0_i32_0, %c0_i32_1 : i32, i32, i32
  }
  func.func @transform_7(%arg0: i32) -> (i32, i32, i32) {
    %c0_i32 = arith.constant 0 : i32
    %c0_i32_0 = arith.constant 0 : i32
    %c0_i32_1 = arith.constant 0 : i32
    %c0_i32_2 = arith.constant 0 : i32
    return %c0_i32, %c0_i32_0, %c0_i32_1 : i32, i32, i32
  }
  func.func @transform_8(%arg0: i32) -> (i32, i32) {
    %c0_i32 = arith.constant 0 : i32
    %c0_i32_0 = arith.constant 0 : i32
    %c0_i32_1 = arith.constant 0 : i32
    return %c0_i32, %c0_i32_0 : i32, i32
  }
  func.func @transform_9(%arg0: i32) -> (i32, i32) {
    %c0_i32 = arith.constant 0 : i32
    %c0_i32_0 = arith.constant 0 : i32
    %c0_i32_1 = arith.constant 0 : i32
    return %c0_i32, %c0_i32_0 : i32, i32
  }
  func.func @transform_10(%arg0: i32) -> (i32, i32) {
    %c0_i32 = arith.constant 0 : i32
    %c0_i32_0 = arith.constant 0 : i32
    %c0_i32_1 = arith.constant 0 : i32
    return %c0_i32, %c0_i32_0 : i32, i32
  }
  func.func @transform_11(%arg0: i32) -> (i32, i32) {
    %c0_i32 = arith.constant 0 : i32
    %c0_i32_0 = arith.constant 0 : i32
    %c0_i32_1 = arith.constant 0 : i32
    return %c0_i32, %c0_i32_0 : i32, i32
  }
  func.func @transform_12(%arg0: i32) -> (i32, i32) {
    %c0_i32 = arith.constant 0 : i32
    %c0_i32_0 = arith.constant 0 : i32
    return %arg0, %c0_i32 : i32, i32
  }
}

module attributes {stable_mosaic.version = 11 : i64} {
  func.func @_stats_kernel(%arg0: i32, %arg1: i32, %arg2: memref<1000x8xf32, #tpu.memory_space<vmem>>, %arg3: memref<1000x8xf32, #tpu.memory_space<vmem>>, %arg4: memref<1000x4xf32, #tpu.memory_space<vmem>>, %arg5: memref<8x128xf32, #tpu.memory_space<vmem>>, %arg6: memref<8x128xf32, #tpu.memory_space<vmem>>, %arg7: memref<4x128xf32, #tpu.memory_space<vmem>>, %arg8: memref<1x1x128xf32, #tpu.memory_space<vmem>>, %arg9: memref<1x1x128xf32, #tpu.memory_space<vmem>>) attributes {dimension_semantics = [#tpu.dimension_semantics<parallel>, #tpu.dimension_semantics<arbitrary>], iteration_bounds = array<i64: 1, 1>, scalar_prefetch = 0 : i64, scratch_operands = 0 : i64, tpu.core_type = #tpu.core_type<tc>, window_params = [{transform_indices = @transform_0, window_bounds = array<i64: 1000, 8>}, {transform_indices = @transform_1, window_bounds = array<i64: 1000, 8>}, {transform_indices = @transform_2, window_bounds = array<i64: 1000, 4>}, {pipeline_mode = #tpu.pipeline_mode<synchronous>, transform_indices = @transform_3, window_bounds = array<i64: 8, 128>}, {pipeline_mode = #tpu.pipeline_mode<synchronous>, transform_indices = @transform_4, window_bounds = array<i64: 8, 128>}, {pipeline_mode = #tpu.pipeline_mode<synchronous>, transform_indices = @transform_5, window_bounds = array<i64: 4, 128>}, {transform_indices = @transform_6, window_bounds = array<i64: 1, 1, 128>}, {transform_indices = @transform_7, window_bounds = array<i64: 1, 1, 128>}]} {
    %c0 = arith.constant 0 : index
    %c0_0 = arith.constant 0 : index
    %0 = vector.load %arg2[%c0, %c0_0] : memref<1000x8xf32, #tpu.memory_space<vmem>>, vector<1000x8xf32>
    %c0_1 = arith.constant 0 : index
    %c0_2 = arith.constant 0 : index
    %1 = vector.load %arg5[%c0_1, %c0_2] : memref<8x128xf32, #tpu.memory_space<vmem>>, vector<8x128xf32>
    %cst = arith.constant dense<0.000000e+00> : vector<1000x128xf32>
    %2 = tpu.matmul %0, %1, %cst {dimension_numbers = #tpu.dot_dimension_numbers<[1], [0], [0], [1], [0, 0, 1, 1], [], []>} : vector<1000x8xf32>, vector<8x128xf32>, vector<1000x128xf32> -> vector<1000x128xf32>
    %c0_3 = arith.constant 0 : index
    %c0_4 = arith.constant 0 : index
    %3 = vector.load %arg3[%c0_3, %c0_4] : memref<1000x8xf32, #tpu.memory_space<vmem>>, vector<1000x8xf32>
    %c0_5 = arith.constant 0 : index
    %c0_6 = arith.constant 0 : index
    %4 = vector.load %arg6[%c0_5, %c0_6] : memref<8x128xf32, #tpu.memory_space<vmem>>, vector<8x128xf32>
    %cst_7 = arith.constant dense<0.000000e+00> : vector<1000x128xf32>
    %5 = tpu.matmul %3, %4, %cst_7 {dimension_numbers = #tpu.dot_dimension_numbers<[1], [0], [0], [1], [0, 0, 1, 1], [], []>} : vector<1000x8xf32>, vector<8x128xf32>, vector<1000x128xf32> -> vector<1000x128xf32>
    %6 = arith.addf %2, %5 : vector<1000x128xf32>
    %c0_8 = arith.constant 0 : index
    %c0_9 = arith.constant 0 : index
    %7 = vector.load %arg4[%c0_8, %c0_9] : memref<1000x4xf32, #tpu.memory_space<vmem>>, vector<1000x4xf32>
    %c0_10 = arith.constant 0 : index
    %c0_11 = arith.constant 0 : index
    %8 = vector.load %arg7[%c0_10, %c0_11] : memref<4x128xf32, #tpu.memory_space<vmem>>, vector<4x128xf32>
    %cst_12 = arith.constant dense<0.000000e+00> : vector<1000x128xf32>
    %9 = tpu.matmul %7, %8, %cst_12 {dimension_numbers = #tpu.dot_dimension_numbers<[1], [0], [0], [1], [0, 0, 1, 1], [], []>} : vector<1000x4xf32>, vector<4x128xf32>, vector<1000x128xf32> -> vector<1000x128xf32>
    %10 = arith.addf %6, %9 : vector<1000x128xf32>
    %c0_i32 = arith.constant 0 : i32
    %11 = arith.cmpi eq, %arg1, %c0_i32 : i32
    %12 = arith.extui %11 : i1 to i32
    %c0_i32_13 = arith.constant 0 : i32
    %13 = arith.cmpi ne, %12, %c0_i32_13 : i32
    scf.if %13 {
      %cst_28 = arith.constant 0.000000e+00 : f32
      %27 = vector.broadcast %cst_28 : f32 to vector<1x1x128xf32>
      %c0_29 = arith.constant 0 : index
      %c0_30 = arith.constant 0 : index
      %c0_31 = arith.constant 0 : index
      %28 = vector.load %arg8[%c0_29, %c0_30, %c0_31] : memref<1x1x128xf32, #tpu.memory_space<vmem>>, vector<1x1x128xf32>
      tpu.vector_store %arg8[%c0_29, %c0_30, %c0_31], %27 {strides = array<i32>} : memref<1x1x128xf32, #tpu.memory_space<vmem>>, vector<1x1x128xf32>,
      %cst_32 = arith.constant 0.000000e+00 : f32
      %29 = vector.broadcast %cst_32 : f32 to vector<1x1x128xf32>
      %c0_33 = arith.constant 0 : index
      %c0_34 = arith.constant 0 : index
      %c0_35 = arith.constant 0 : index
      %30 = vector.load %arg9[%c0_33, %c0_34, %c0_35] : memref<1x1x128xf32, #tpu.memory_space<vmem>>, vector<1x1x128xf32>
      tpu.vector_store %arg9[%c0_33, %c0_34, %c0_35], %29 {strides = array<i32>} : memref<1x1x128xf32, #tpu.memory_space<vmem>>, vector<1x1x128xf32>,
    } else {
    }
    %c0_14 = arith.constant 0 : index
    %c0_15 = arith.constant 0 : index
    %c0_16 = arith.constant 0 : index
    %14 = vector.load %arg8[%c0_14, %c0_15, %c0_16] : memref<1x1x128xf32, #tpu.memory_space<vmem>>, vector<1x1x128xf32>
    %cst_17 = arith.constant dense<0.000000e+00> : vector<128xf32>
    %15 = vector.multi_reduction <add>, %10, %cst_17 [0] : vector<1000x128xf32> to vector<128xf32>
    %16 = vector.shape_cast %15 : vector<128xf32> to vector<1x128xf32>
    %17 = vector.shape_cast %16 : vector<1x128xf32> to vector<1x1x128xf32>
    %18 = arith.addf %14, %17 : vector<1x1x128xf32>
    %c0_18 = arith.constant 0 : index
    %c0_19 = arith.constant 0 : index
    %c0_20 = arith.constant 0 : index
    %19 = vector.load %arg8[%c0_18, %c0_19, %c0_20] : memref<1x1x128xf32, #tpu.memory_space<vmem>>, vector<1x1x128xf32>
    tpu.vector_store %arg8[%c0_18, %c0_19, %c0_20], %18 {strides = array<i32>} : memref<1x1x128xf32, #tpu.memory_space<vmem>>, vector<1x1x128xf32>,
    %c0_21 = arith.constant 0 : index
    %c0_22 = arith.constant 0 : index
    %c0_23 = arith.constant 0 : index
    %20 = vector.load %arg9[%c0_21, %c0_22, %c0_23] : memref<1x1x128xf32, #tpu.memory_space<vmem>>, vector<1x1x128xf32>
    %21 = arith.mulf %10, %10 : vector<1000x128xf32>
    %cst_24 = arith.constant dense<0.000000e+00> : vector<128xf32>
    %22 = vector.multi_reduction <add>, %21, %cst_24 [0] : vector<1000x128xf32> to vector<128xf32>
    %23 = vector.shape_cast %22 : vector<128xf32> to vector<1x128xf32>
    %24 = vector.shape_cast %23 : vector<1x128xf32> to vector<1x1x128xf32>
    %25 = arith.addf %20, %24 : vector<1x1x128xf32>
    %c0_25 = arith.constant 0 : index
    %c0_26 = arith.constant 0 : index
    %c0_27 = arith.constant 0 : index
    %26 = vector.load %arg9[%c0_25, %c0_26, %c0_27] : memref<1x1x128xf32, #tpu.memory_space<vmem>>, vector<1x1x128xf32>
    tpu.vector_store %arg9[%c0_25, %c0_26, %c0_27], %25 {strides = array<i32>} : memref<1x1x128xf32, #tpu.memory_space<vmem>>, vector<1x1x128xf32>,
    return
  }
  func.func @transform_0(%arg0: i32, %arg1: i32) -> (i32, i32) {
    %c1_i32 = arith.constant 1 : i32
    %0 = arith.muli %arg0, %c1_i32 : i32
    %1 = arith.addi %0, %arg1 : i32
    %c0_i32 = arith.constant 0 : i32
    %2 = arith.minsi %1, %c0_i32 : i32
    %c0_i32_0 = arith.constant 0 : i32
    %c0_i32_1 = arith.constant 0 : i32
    return %2, %c0_i32_0 : i32, i32
  }
  func.func @transform_1(%arg0: i32, %arg1: i32) -> (i32, i32) {
    %c1_i32 = arith.constant 1 : i32
    %0 = arith.muli %arg0, %c1_i32 : i32
    %1 = arith.addi %0, %arg1 : i32
    %c0_i32 = arith.constant 0 : i32
    %2 = arith.minsi %1, %c0_i32 : i32
    %c0_i32_0 = arith.constant 0 : i32
    %c0_i32_1 = arith.constant 0 : i32
    return %2, %c0_i32_0 : i32, i32
  }
  func.func @transform_2(%arg0: i32, %arg1: i32) -> (i32, i32) {
    %c1_i32 = arith.constant 1 : i32
    %0 = arith.muli %arg0, %c1_i32 : i32
    %1 = arith.addi %0, %arg1 : i32
    %c0_i32 = arith.constant 0 : i32
    %2 = arith.minsi %1, %c0_i32 : i32
    %c0_i32_0 = arith.constant 0 : i32
    %c0_i32_1 = arith.constant 0 : i32
    return %2, %c0_i32_0 : i32, i32
  }
  func.func @transform_3(%arg0: i32, %arg1: i32) -> (i32, i32) {
    %c0_i32 = arith.constant 0 : i32
    %c0_i32_0 = arith.constant 0 : i32
    %c0_i32_1 = arith.constant 0 : i32
    return %c0_i32, %c0_i32_0 : i32, i32
  }
  func.func @transform_4(%arg0: i32, %arg1: i32) -> (i32, i32) {
    %c0_i32 = arith.constant 0 : i32
    %c0_i32_0 = arith.constant 0 : i32
    %c0_i32_1 = arith.constant 0 : i32
    return %c0_i32, %c0_i32_0 : i32, i32
  }
  func.func @transform_5(%arg0: i32, %arg1: i32) -> (i32, i32) {
    %c0_i32 = arith.constant 0 : i32
    %c0_i32_0 = arith.constant 0 : i32
    %c0_i32_1 = arith.constant 0 : i32
    return %c0_i32, %c0_i32_0 : i32, i32
  }
  func.func @transform_6(%arg0: i32, %arg1: i32) -> (i32, i32, i32) {
    %c0_i32 = arith.constant 0 : i32
    %c0_i32_0 = arith.constant 0 : i32
    %c0_i32_1 = arith.constant 0 : i32
    return %arg0, %c0_i32, %c0_i32_0 : i32, i32, i32
  }
  func.func @transform_7(%arg0: i32, %arg1: i32) -> (i32, i32, i32) {
    %c0_i32 = arith.constant 0 : i32
    %c0_i32_0 = arith.constant 0 : i32
    %c0_i32_1 = arith.constant 0 : i32
    return %arg0, %c0_i32, %c0_i32_0 : i32, i32, i32
  }
}

</mosaic_0001>

<bundles_post_ra>
// kernel: _forward_impl.2
= control target key start
LH: loop header
LB: loop body
LE: loop exit
PB: predicated region body
PF: predicated region fallthrough
CT: control target
= control target key end

     0   :  { %v6512_v0 = vmov 0.0   ;;  %vm373_vm0 = vcmask 64512   ;;  %vm6513_vm1 = vmmov 0   ;;  %vm3006_vm2 = vcmask 1043456   ;;  %s9026_s4 = inlined_call_operand.vmem [shape: f32[8,128], index: 4, kind: input, shape index: {}]   ;;  %s9027_s3 = inlined_call_operand.vmem [shape: f32[8,128], index: 3, kind: input, shape index: {}]   ;;  %s9028_s1 = inlined_call_operand.vmem [shape: f32[1000,8], index: 1, kind: input, shape index: {}]   ;;  %s9029_s0 = inlined_call_operand.vmem [shape: f32[1000,8], index: 0, kind: input, shape index: {}]   ;;  %s9030_s5 = inlined_call_operand.vmem [shape: f32[4,128], index: 5, kind: input, shape index: {}]   ;;  %s9031_s2 = inlined_call_operand.vmem [shape: f32[1000,4], index: 2, kind: input, shape index: {}]   ;;  %s9032_s6 = inlined_call_operand.vmem [shape: f32[1,1,128], index: 6, kind: output, shape index: {0}]   ;;  %s9033_s7 = inlined_call_operand.vmem [shape: f32[1,1,128], index: 7, kind: output, shape index: {1}]  }
   0x1   :  { %5002 = vmatprep.subr.mxu1 %v6512_v0  ;;  %5379 = vmatprep.subr.mxu0 %v6512_v0  ;;  %v372_v1 = vld [vmem:[%s9026_s4] sm:$0xff]  ;;  %v248_v6 = vld [vmem:[%s9028_s1 + $0x8] sm:$0xff]  ;;  %v249_v8 = vld [vmem:[%s9028_s1 + $0x10] sm:$0xff]  ;;  %vm2630_vm3 = vcmask 31744   ;;  %3829 = vst [vmem:[%s9032_s6] sm:$0x1] %v6512_v0 }
   0x2   :  { %v246_v2 = vld [vmem:[%s9027_s3] sm:$0xff]  ;;  %5003 = vmatpush3.msra.mxu1 %v372_v1  ;;  %5004 = vmatprep.mubr.msk.f32.mxu1 %vm6513_vm1, %v6512_v0  ;;  %v122_v7 = vld [vmem:[%s9029_s0 + $0x8] sm:$0xff]  ;;  %v123_v9 = vld [vmem:[%s9029_s0 + $0x10] sm:$0xff]  ;;  %3830 = vst [vmem:[%s9033_s7] sm:$0x1] %v6512_v0 }
   0x3   :  { %v247_v3 = vld [vmem:[%s9028_s1] sm:$0xff]  ;;  %5380 = vmatpush3.msra.mxu0 %v246_v2  ;;  %5381 = vmatprep.mubr.msk.f32.mxu0 %vm6513_vm1, %v6512_v0  ;;  %v250_v10 = vld [vmem:[%s9028_s1 + $0x18] sm:$0xff]  ;;  %v252_v14 = vld [vmem:[%s9028_s1 + $0x28] sm:$0xff] }
   0x4   :  { %v121_v4 = vld [vmem:[%s9029_s0] sm:$0xff]  ;;  %5005 = vmatmul.mubr.msk.f32.vlgmr.msra.gmra.mrb[0].mxu1 %vm373_vm0, %v247_v3  ;;  %5756 = vmatprep.subr.mxu0 %v6512_v0  ;;  %v124_v11 = vld [vmem:[%s9029_s0 + $0x18] sm:$0xff]  ;;  %v126_v15 = vld [vmem:[%s9029_s0 + $0x28] sm:$0xff] }
   0x5   :  { %v2629_v5 = vld [vmem:[%s9030_s5] sm:$0xf]  ;;  %5382 = vmatmul.mubr.msk.f32.vlgmr.msra.gmra.mrb[0].mxu0 %vm373_vm0, %v121_v4  ;;  %5007 = vmatprep.mubr.msk.f32.mxu1 %vm6513_vm1, %v6512_v0  ;;  %v253_v16 = vld [vmem:[%s9028_s1 + $0x30] sm:$0xff]  ;;  %v254_v18 = vld [vmem:[%s9028_s1 + $0x38] sm:$0xff] }
   0x6   :  { %5757 = vmatpush3.msk.msra.mxu0 %vm3006_vm2, %v2629_v5  ;;  %5384 = vmatprep.mubr.msk.f32.mxu0 %vm6513_vm1, %v6512_v0  ;;  %v251_v12 = vld [vmem:[%s9028_s1 + $0x20] sm:$0xff]  ;;  %v127_v17 = vld [vmem:[%s9029_s0 + $0x30] sm:$0xff]  ;;  %v128_v19 = vld [vmem:[%s9029_s0 + $0x38] sm:$0xff] }
   0x7   :  { %6133 = vmatprep.subr.mxu1 %v6512_v0  ;;  %v125_v13 = vld [vmem:[%s9029_s0 + $0x20] sm:$0xff]  ;;  %v256_v22 = vld [vmem:[%s9028_s1 + $0x48] sm:$0xff]  ;;  %v257_v24 = vld [vmem:[%s9028_s1 + $0x50] sm:$0xff] }
   0x8   :  { %5008 = vmatmul.mubr.msk.f32.gmra.mrb[2].mxu1 %vm373_vm0, %v248_v6  ;;  %v255_v20 = vld [vmem:[%s9028_s1 + $0x40] sm:$0xff]  ;;  %v130_v23 = vld [vmem:[%s9029_s0 + $0x48] sm:$0xff]  ;;  %v131_v25 = vld [vmem:[%s9029_s0 + $0x50] sm:$0xff] }
   0x9   :  { %5385 = vmatmul.mubr.msk.f32.gmra.mrb[2].mxu0 %vm373_vm0, %v122_v7  ;;  %6134 = vmatpush3.msra.mxu1 %v246_v2  ;;  %v129_v21 = vld [vmem:[%s9029_s0 + $0x40] sm:$0xff]  ;;  %v258_v26 = vld [vmem:[%s9028_s1 + $0x58] sm:$0xff]  ;;  %v260_v30 = vld [vmem:[%s9028_s1 + $0x68] sm:$0xff] }
   0xa   :  { %5010 = vmatprep.mubr.msk.f32.mxu1 %vm6513_vm1, %v6512_v0  ;;  %5387 = vmatprep.mubr.msk.f32.mxu0 %vm6513_vm1, %v6512_v0  ;;  %v132_v27 = vld [vmem:[%s9029_s0 + $0x58] sm:$0xff]  ;;  %v259_v28 = vld [vmem:[%s9028_s1 + $0x60] sm:$0xff]  ;;  %v134_v31 = vld [vmem:[%s9029_s0 + $0x68] sm:$0xff] }
   0xb   :  { %v133_v29 = vld [vmem:[%s9029_s0 + $0x60] sm:$0xff]  ;;  %v261_v32 = vld [vmem:[%s9028_s1 + $0x70] sm:$0xff]  ;;  %v262_v34 = vld [vmem:[%s9028_s1 + $0x78] sm:$0xff] }
   0xc   :  { %5011 = vmatmul.mubr.msk.f32.gmra.mrb[4].mxu1 %vm373_vm0, %v249_v8  ;;  %v135_v33 = vld [vmem:[%s9029_s0 + $0x70] sm:$0xff]  ;;  %v136_v35 = vld [vmem:[%s9029_s0 + $0x78] sm:$0xff]  ;;  %v263_v36 = vld [vmem:[%s9028_s1 + $0x80] sm:$0xff] }
   0xd   :  { %5388 = vmatmul.mubr.msk.f32.gmra.mrb[4].mxu0 %vm373_vm0, %v123_v9  ;;  %5013 = vmatprep.mubr.msk.f32.mxu1 %vm6513_vm1, %v6512_v0  ;;  %v137_v37 = vld [vmem:[%s9029_s0 + $0x80] sm:$0xff]  ;;  %v264_v38 = vld [vmem:[%s9028_s1 + $0x88] sm:$0xff]  ;;  %v265_v40 = vld [vmem:[%s9028_s1 + $0x90] sm:$0xff] }
   0xe   :  { %5390 = vmatprep.mubr.msk.f32.mxu0 %vm6513_vm1, %v6512_v0  ;;  %v138_v39 = vld [vmem:[%s9029_s0 + $0x88] sm:$0xff]  ;;  %v139_v41 = vld [vmem:[%s9029_s0 + $0x90] sm:$0xff]  ;;  %v266_v42 = vld [vmem:[%s9028_s1 + $0x98] sm:$0xff] }
   0xf   :  { %v140_v43 = vld [vmem:[%s9029_s0 + $0x98] sm:$0xff]  ;;  %v267_v44 = vld [vmem:[%s9028_s1 + $0xa0] sm:$0xff]  ;;  %v268_v46 = vld [vmem:[%s9028_s1 + $0xa8] sm:$0xff] }
  0x10   :  { %5014 = vmatmul.mubr.msk.f32.gmra.mrb[6].mxu1 %vm373_vm0, %v250_v10  ;;  %v141_v45 = vld [vmem:[%s9029_s0 + $0xa0] sm:$0xff]  ;;  %v142_v47 = vld [vmem:[%s9029_s0 + $0xa8] sm:$0xff]  ;;  %v269_v48 = vld [vmem:[%s9028_s1 + $0xb0] sm:$0xff] }
  0x11   :  { %5391 = vmatmul.mubr.msk.f32.gmra.mrb[6].mxu0 %vm373_vm0, %v124_v11  ;;  %5016 = vmatprep.mubr.msk.f32.mxu1 %vm6513_vm1, %v6512_v0  ;;  %v143_v49 = vld [vmem:[%s9029_s0 + $0xb0] sm:$0xff]  ;;  %v270_v50 = vld [vmem:[%s9028_s1 + $0xb8] sm:$0xff]  ;;  %v271_v52 = vld [vmem:[%s9028_s1 + $0xc0] sm:$0xff] }
  0x12   :  { %5393 = vmatprep.mubr.msk.f32.mxu0 %vm6513_vm1, %v6512_v0  ;;  %v144_v51 = vld [vmem:[%s9029_s0 + $0xb8] sm:$0xff]  ;;  %v145_v53 = vld [vmem:[%s9029_s0 + $0xc0] sm:$0xff]  ;;  %v272_v54 = vld [vmem:[%s9028_s1 + $0xc8] sm:$0xff] }
  0x13   :  { %v146_v55 = vld [vmem:[%s9029_s0 + $0xc8] sm:$0xff]  ;;  %v273_v56 = vld [vmem:[%s9028_s1 + $0xd0] sm:$0xff]  ;;  %v274_v58 = vld [vmem:[%s9028_s1 + $0xd8] sm:$0xff] }
  0x14   :  { %5017 = vmatmul.mubr.msk.f32.gmra.mrb[8].mxu1 %vm373_vm0, %v251_v12  ;;  %v147_v57 = vld [vmem:[%s9029_s0 + $0xd0] sm:$0xff]  ;;  %v148_v59 = vld [vmem:[%s9029_s0 + $0xd8] sm:$0xff]  ;;  %v275_v60 = vld [vmem:[%s9028_s1 + $0xe0] sm:$0xff] }
  0x15   :  { %5394 = vmatmul.mubr.msk.f32.gmra.mrb[8].mxu0 %vm373_vm0, %v125_v13  ;;  %5019 = vmatprep.mubr.msk.f32.mxu1 %vm6513_vm1, %v6512_v0  ;;  %v149_v61 = vld [vmem:[%s9029_s0 + $0xe0] sm:$0xff]  ;;  %v276_v62 = vld [vmem:[%s9028_s1 + $0xe8] sm:$0xff]  ;;  %v277_v1 = vld [vmem:[%s9028_s1 + $0xf0] sm:$0xff] }
  0x16   :  { %5396 = vmatprep.mubr.msk.f32.mxu0 %vm6513_vm1, %v6512_v0  ;;  %v150_v63 = vld [vmem:[%s9029_s0 + $0xe8] sm:$0xff]  ;;  %v151_v2 = vld [vmem:[%s9029_s0 + $0xf0] sm:$0xff]  ;;  %v278_v3 = vld [vmem:[%s9028_s1 + $0xf8] sm:$0xff] }
  0x17   :  { %v152_v4 = vld [vmem:[%s9029_s0 + $0xf8] sm:$0xff]  ;;  %v279_v5 = vld [vmem:[%s9028_s1 + $0x100] sm:$0xff]  ;;  %v280_v7 = vld [vmem:[%s9028_s1 + $0x108] sm:$0xff] }
  0x18   :  { %5020 = vmatmul.mubr.msk.f32.gmra.mrb[10].mxu1 %vm373_vm0, %v252_v14  ;;  %v153_v6 = vld [vmem:[%s9029_s0 + $0x100] sm:$0xff]  ;;  %v154_v8 = vld [vmem:[%s9029_s0 + $0x108] sm:$0xff]  ;;  %v281_v9 = vld [vmem:[%s9028_s1 + $0x110] sm:$0xff] }
  0x19   :  { %5397 = vmatmul.mubr.msk.f32.gmra.mrb[10].mxu0 %vm373_vm0, %v126_v15  ;;  %5022 = vmatprep.mubr.msk.f32.mxu1 %vm6513_vm1, %v6512_v0  ;;  %v155_v10 = vld [vmem:[%s9029_s0 + $0x110] sm:$0xff]  ;;  %v282_v11 = vld [vmem:[%s9028_s1 + $0x118] sm:$0xff]  ;;  %v283_v13 = vld [vmem:[%s9028_s1 + $0x120] sm:$0xff] }
  0x1a   :  { %5399 = vmatprep.mubr.msk.f32.mxu0 %vm6513_vm1, %v6512_v0  ;;  %v156_v12 = vld [vmem:[%s9029_s0 + $0x118] sm:$0xff]  ;;  %v157_v14 = vld [vmem:[%s9029_s0 + $0x120] sm:$0xff]  ;;  %v284_v15 = vld [vmem:[%s9028_s1 + $0x128] sm:$0xff] }
  0x1c   :  { %5023 = vmatmul.mubr.msk.f32.gmra.mrb[12].mxu1 %vm373_vm0, %v253_v16  ;;  %v158_v16 = vld [vmem:[%s9029_s0 + $0x128] sm:$0xff] }
  0x1d   :  { %5400 = vmatmul.mubr.msk.f32.gmra.mrb[12].mxu0 %vm373_vm0, %v127_v17  ;;  %5025 = vmatprep.mubr.msk.f32.mxu1 %vm6513_vm1, %v6512_v0  ;;  %v285_v17 = vld [vmem:[%s9028_s1 + $0x130] sm:$0xff] }
  0x1e   :  { %5402 = vmatprep.mubr.msk.f32.mxu0 %vm6513_vm1, %v6512_v0 }
  0x20   :  { %5026 = vmatmul.mubr.msk.f32.gmra.mrb[14].mxu1 %vm373_vm0, %v254_v18  ;;  %v159_v18 = vld [vmem:[%s9029_s0 + $0x130] sm:$0xff] }
  0x21   :  { %5403 = vmatmul.mubr.msk.f32.gmra.mrb[14].mxu0 %vm373_vm0, %v128_v19  ;;  %5028 = vmatprep.mubr.msk.f32.mxu1 %vm6513_vm1, %v6512_v0  ;;  %v286_v19 = vld [vmem:[%s9028_s1 + $0x138] sm:$0xff] }
  0x22   :  { %5405 = vmatprep.mubr.msk.f32.mxu0 %vm6513_vm1, %v6512_v0 }
  0x24   :  { %5029 = vmatmul.mubr.msk.f32.gmra.mrb[16].mxu1 %vm373_vm0, %v255_v20  ;;  %v160_v20 = vld [vmem:[%s9029_s0 + $0x138] sm:$0xff] }
  0x25   :  { %5406 = vmatmul.mubr.msk.f32.gmra.mrb[16].mxu0 %vm373_vm0, %v129_v21  ;;  %5031 = vmatprep.mubr.msk.f32.mxu1 %vm6513_vm1, %v6512_v0  ;;  %v287_v21 = vld [vmem:[%s9028_s1 + $0x140] sm:$0xff] }
  0x26   :  { %5408 = vmatprep.mubr.msk.f32.mxu0 %vm6513_vm1, %v6512_v0 }
  0x28   :  { %5032 = vmatmul.mubr.msk.f32.gmra.mrb[18].mxu1 %vm373_vm0, %v256_v22  ;;  %v161_v22 = vld [vmem:[%s9029_s0 + $0x140] sm:$0xff] }
  0x29   :  { %5409 = vmatmul.mubr.msk.f32.gmra.mrb[18].mxu0 %vm373_vm0, %v130_v23  ;;  %5034 = vmatprep.mubr.msk.f32.mxu1 %vm6513_vm1, %v6512_v0  ;;  %v288_v23 = vld [vmem:[%s9028_s1 + $0x148] sm:$0xff] }
  0x2a   :  { %5411 = vmatprep.mubr.msk.f32.mxu0 %vm6513_vm1, %v6512_v0 }
  0x2c   :  { %5035 = vmatmul.mubr.msk.f32.gmra.mrb[20].mxu1 %vm373_vm0, %v257_v24  ;;  %v162_v24 = vld [vmem:[%s9029_s0 + $0x148] sm:$0xff] }
  0x2d   :  { %5412 = vmatmul.mubr.msk.f32.gmra.mrb[20].mxu0 %vm373_vm0, %v131_v25  ;;  %5037 = vmatprep.mubr.msk.f32.mxu1 %vm6513_vm1, %v6512_v0  ;;  %v289_v25 = vld [vmem:[%s9028_s1 + $0x150] sm:$0xff] }
  0x2e   :  { %5414 = vmatprep.mubr.msk.f32.mxu0 %vm6513_vm1, %v6512_v0 }
  0x30   :  { %5038 = vmatmul.mubr.msk.f32.gmra.mrb[22].mxu1 %vm373_vm0, %v258_v26  ;;  %v163_v26 = vld [vmem:[%s9029_s0 + $0x150] sm:$0xff] }
  0x31   :  { %5415 = vmatmul.mubr.msk.f32.gmra.mrb[22].mxu0 %vm373_vm0, %v132_v27  ;;  %5040 = vmatprep.mubr.msk.f32.mxu1 %vm6513_vm1, %v6512_v0  ;;  %v290_v27 = vld [vmem:[%s9028_s1 + $0x158] sm:$0xff] }
  0x32   :  { %5417 = vmatprep.mubr.msk.f32.mxu0 %vm6513_vm1, %v6512_v0 }
  0x34   :  { %5041 = vmatmul.mubr.msk.f32.gmra.mrb[24].mxu1 %vm373_vm0, %v259_v28  ;;  %v164_v28 = vld [vmem:[%s9029_s0 + $0x158] sm:$0xff] }
  0x35   :  { %5418 = vmatmul.mubr.msk.f32.gmra.mrb[24].mxu0 %vm373_vm0, %v133_v29  ;;  %5043 = vmatprep.mubr.msk.f32.mxu1 %vm6513_vm1, %v6512_v0  ;;  %v291_v29 = vld [vmem:[%s9028_s1 + $0x160] sm:$0xff] }
  0x36   :  { %5420 = vmatprep.mubr.msk.f32.mxu0 %vm6513_vm1, %v6512_v0 }
  0x38   :  { %5044 = vmatmul.mubr.msk.f32.gmra.mrb[26].mxu1 %vm373_vm0, %v260_v30  ;;  %v165_v30 = vld [vmem:[%s9029_s0 + $0x160] sm:$0xff] }
  0x39   :  { %5421 = vmatmul.mubr.msk.f32.gmra.mrb[26].mxu0 %vm373_vm0, %v134_v31  ;;  %5046 = vmatprep.mubr.msk.f32.mxu1 %vm6513_vm1, %v6512_v0  ;;  %v292_v31 = vld [vmem:[%s9028_s1 + $0x168] sm:$0xff] }
  0x3a   :  { %5423 = vmatprep.mubr.msk.f32.mxu0 %vm6513_vm1, %v6512_v0 }
  0x3c   :  { %5047 = vmatmul.mubr.msk.f32.gmra.mrb[28].mxu1 %vm373_vm0, %v261_v32  ;;  %v166_v32 = vld [vmem:[%s9029_s0 + $0x168] sm:$0xff] }
  0x3d   :  { %5424 = vmatmul.mubr.msk.f32.gmra.mrb[28].mxu0 %vm373_vm0, %v135_v33  ;;  %5049 = vmatprep.mubr.msk.f32.mxu1 %vm6513_vm1, %v6512_v0  ;;  %v293_v33 = vld [vmem:[%s9028_s1 + $0x170] sm:$0xff] }
  0x3e   :  { %5426 = vmatprep.mubr.msk.f32.mxu0 %vm6513_vm1, %v6512_v0 }
  0x40   :  { %5050 = vmatmul.mubr.msk.f32.gmra.mrb[30].mxu1 %vm373_vm0, %v262_v34  ;;  %v167_v34 = vld [vmem:[%s9029_s0 + $0x170] sm:$0xff] }
  0x41   :  { %5427 = vmatmul.mubr.msk.f32.gmra.mrb[30].mxu0 %vm373_vm0, %v136_v35  ;;  %5052 = vmatprep.mubr.msk.f32.mxu1 %vm6513_vm1, %v6512_v0  ;;  %v294_v35 = vld [vmem:[%s9028_s1 + $0x178] sm:$0xff] }
  0x42   :  { %5429 = vmatprep.mubr.msk.f32.mxu0 %vm6513_vm1, %v6512_v0 }
  0x44   :  { %5053 = vmatmul.mubr.msk.f32.gmra.mrb[32].mxu1 %vm373_vm0, %v263_v36  ;;  %v168_v36 = vld [vmem:[%s9029_s0 + $0x178] sm:$0xff] }
  0x45   :  { %5430 = vmatmul.mubr.msk.f32.gmra.mrb[32].mxu0 %vm373_vm0, %v137_v37  ;;  %5055 = vmatprep.mubr.msk.f32.mxu1 %vm6513_vm1, %v6512_v0  ;;  %v295_v37 = vld [vmem:[%s9028_s1 + $0x180] sm:$0xff] }
  0x46   :  { %5432 = vmatprep.mubr.msk.f32.mxu0 %vm6513_vm1, %v6512_v0 }
  0x48   :  { %5056 = vmatmul.mubr.msk.f32.gmra.mrb[34].mxu1 %vm373_vm0, %v264_v38  ;;  %v169_v38 = vld [vmem:[%s9029_s0 + $0x180] sm:$0xff] }
  0x49   :  { %5433 = vmatmul.mubr.msk.f32.gmra.mrb[34].mxu0 %vm373_vm0, %v138_v39  ;;  %5058 = vmatprep.mubr.msk.f32.mxu1 %vm6513_vm1, %v6512_v0  ;;  %v296_v39 = vld [vmem:[%s9028_s1 + $0x188] sm:$0xff] }
  0x4a   :  { %5435 = vmatprep.mubr.msk.f32.mxu0 %vm6513_vm1, %v6512_v0 }
  0x4c   :  { %5059 = vmatmul.mubr.msk.f32.gmra.mrb[36].mxu1 %vm373_vm0, %v265_v40  ;;  %v170_v40 = vld [vmem:[%s9029_s0 + $0x188] sm:$0xff] }
  0x4d   :  { %5436 = vmatmul.mubr.msk.f32.gmra.mrb[36].mxu0 %vm373_vm0, %v139_v41  ;;  %5061 = vmatprep.mubr.msk.f32.mxu1 %vm6513_vm1, %v6512_v0  ;;  %v297_v41 = vld [vmem:[%s9028_s1 + $0x190] sm:$0xff] }
  0x4e   :  { %5438 = vmatprep.mubr.msk.f32.mxu0 %vm6513_vm1, %v6512_v0 }
  0x50   :  { %5062 = vmatmul.mubr.msk.f32.gmra.mrb[38].mxu1 %vm373_vm0, %v266_v42  ;;  %v171_v42 = vld [vmem:[%s9029_s0 + $0x190] sm:$0xff] }
  0x51   :  { %5439 = vmatmul.mubr.msk.f32.gmra.mrb[38].mxu0 %vm373_vm0, %v140_v43  ;;  %5064 = vmatprep.mubr.msk.f32.mxu1 %vm6513_vm1, %v6512_v0  ;;  %v298_v43 = vld [vmem:[%s9028_s1 + $0x198] sm:$0xff] }
  0x52   :  { %5441 = vmatprep.mubr.msk.f32.mxu0 %vm6513_vm1, %v6512_v0 }
  0x54   :  { %5065 = vmatmul.mubr.msk.f32.gmra.mrb[40].mxu1 %vm373_vm0, %v267_v44  ;;  %v172_v44 = vld [vmem:[%s9029_s0 + $0x198] sm:$0xff] }
  0x55   :  { %5442 = vmatmul.mubr.msk.f32.gmra.mrb[40].mxu0 %vm373_vm0, %v141_v45  ;;  %5067 = vmatprep.mubr.msk.f32.mxu1 %vm6513_vm1, %v6512_v0  ;;  %v299_v45 = vld [vmem:[%s9028_s1 + $0x1a0] sm:$0xff] }
  0x56   :  { %5444 = vmatprep.mubr.msk.f32.mxu0 %vm6513_vm1, %v6512_v0 }
  0x58   :  { %5068 = vmatmul.mubr.msk.f32.gmra.mrb[42].mxu1 %vm373_vm0, %v268_v46  ;;  %v173_v46 = vld [vmem:[%s9029_s0 + $0x1a0] sm:$0xff] }
  0x59   :  { %5445 = vmatmul.mubr.msk.f32.gmra.mrb[42].mxu0 %vm373_vm0, %v142_v47  ;;  %5070 = vmatprep.mubr.msk.f32.mxu1 %vm6513_vm1, %v6512_v0  ;;  %v300_v47 = vld [vmem:[%s9028_s1 + $0x1a8] sm:$0xff] }
  0x5a   :  { %5447 = vmatprep.mubr.msk.f32.mxu0 %vm6513_vm1, %v6512_v0 }
  0x5c   :  { %5071 = vmatmul.mubr.msk.f32.gmra.mrb[44].mxu1 %vm373_vm0, %v269_v48  ;;  %v174_v48 = vld [vmem:[%s9029_s0 + $0x1a8] sm:$0xff] }
  0x5d   :  { %5448 = vmatmul.mubr.msk.f32.gmra.mrb[44].mxu0 %vm373_vm0, %v143_v49  ;;  %5073 = vmatprep.mubr.msk.f32.mxu1 %vm6513_vm1, %v6512_v0 }
  0x5e   :  { %5450 = vmatprep.mubr.msk.f32.mxu0 %vm6513_vm1, %v6512_v0 }
  0x60   :  { %5074 = vmatmul.mubr.msk.f32.gmra.mrb[46].mxu1 %vm373_vm0, %v270_v50 }
  0x61   :  { %5451 = vmatmul.mubr.msk.f32.gmra.mrb[46].mxu0 %vm373_vm0, %v144_v51  ;;  %5076 = vmatprep.mubr.msk.f32.mxu1 %vm6513_vm1, %v6512_v0  ;;  %v301_v51 = vld [vmem:[%s9028_s1 + $0x1b0] sm:$0xff] }
  0x62   :  { %5453 = vmatprep.mubr.msk.f32.mxu0 %vm6513_vm1, %v6512_v0 }
  0x64   :  { %5077 = vmatmul.mubr.msk.f32.gmra.mrb[48].mxu1 %vm373_vm0, %v271_v52  ;;  %v175_v52 = vld [vmem:[%s9029_s0 + $0x1b0] sm:$0xff] }
  0x65   :  { %5454 = vmatmul.mubr.msk.f32.gmra.mrb[48].mxu0 %vm373_vm0, %v145_v53  ;;  %5079 = vmatprep.mubr.msk.f32.mxu1 %vm6513_vm1, %v6512_v0 }
  0x66   :  { %5456 = vmatprep.mubr.msk.f32.mxu0 %vm6513_vm1, %v6512_v0 }
  0x68   :  { %5080 = vmatmul.mubr.msk.f32.gmra.mrb[50].mxu1 %vm373_vm0, %v272_v54 }
  0x69   :  { %5457 = vmatmul.mubr.msk.f32.gmra.mrb[50].mxu0 %vm373_vm0, %v146_v55  ;;  %5082 = vmatprep.mubr.msk.f32.mxu1 %vm6513_vm1, %v6512_v0  ;;  %v302_v55 = vld [vmem:[%s9028_s1 + $0x1b8] sm:$0xff] }
  0x6a   :  { %5459 = vmatprep.mubr.msk.f32.mxu0 %vm6513_vm1, %v6512_v0 }
  0x6c   :  { %5083 = vmatmul.mubr.msk.f32.gmra.mrb[52].mxu1 %vm373_vm0, %v273_v56  ;;  %v176_v56 = vld [vmem:[%s9029_s0 + $0x1b8] sm:$0xff] }
  0x6d   :  { %5460 = vmatmul.mubr.msk.f32.gmra.mrb[52].mxu0 %vm373_vm0, %v147_v57  ;;  %5085 = vmatprep.mubr.msk.f32.mxu1 %vm6513_vm1, %v6512_v0 }
  0x6e   :  { %5462 = vmatprep.mubr.msk.f32.mxu0 %vm6513_vm1, %v6512_v0 }
  0x70   :  { %5086 = vmatmul.mubr.msk.f32.gmra.mrb[54].mxu1 %vm373_vm0, %v274_v58 }
  0x71   :  { %5463 = vmatmul.mubr.msk.f32.gmra.mrb[54].mxu0 %vm373_vm0, %v148_v59  ;;  %5088 = vmatprep.mubr.msk.f32.mxu1 %vm6513_vm1, %v6512_v0  ;;  %v303_v59 = vld [vmem:[%s9028_s1 + $0x1c0] sm:$0xff] }
  0x72   :  { %5465 = vmatprep.mubr.msk.f32.mxu0 %vm6513_vm1, %v6512_v0 }
  0x74   :  { %5089 = vmatmul.mubr.msk.f32.gmra.mrb[56].mxu1 %vm373_vm0, %v275_v60  ;;  %v177_v60 = vld [vmem:[%s9029_s0 + $0x1c0] sm:$0xff] }
  0x75   :  { %5466 = vmatmul.mubr.msk.f32.gmra.mrb[56].mxu0 %vm373_vm0, %v149_v61  ;;  %5091 = vmatprep.mubr.msk.f32.mxu1 %vm6513_vm1, %v6512_v0 }
  0x76   :  { %5468 = vmatprep.mubr.msk.f32.mxu0 %vm6513_vm1, %v6512_v0 }
  0x78   :  { %5092 = vmatmul.mubr.msk.f32.gmra.mrb[58].mxu1 %vm373_vm0, %v276_v62 }
  0x79   :  { %5469 = vmatmul.mubr.msk.f32.gmra.mrb[58].mxu0 %vm373_vm0, %v150_v63  ;;  %5094 = vmatprep.mubr.msk.f32.mxu1 %vm6513_vm1, %v6512_v0  ;;  %v304_v63 = vld [vmem:[%s9028_s1 + $0x1c8] sm:$0xff] }
  0x7a   :  { %5471 = vmatprep.mubr.msk.f32.mxu0 %vm6513_vm1, %v6512_v0 }
  0x7c   :  { %5095 = vmatmul.mubr.msk.f32.gmra.mrb[60].mxu1 %vm373_vm0, %v277_v1  ;;  %v178_v1 = vld [vmem:[%s9029_s0 + $0x1c8] sm:$0xff] }
  0x7d   :  { %5472 = vmatmul.mubr.msk.f32.gmra.mrb[60].mxu0 %vm373_vm0, %v151_v2  ;;  %5097 = vmatprep.mubr.msk.f32.mxu1 %vm6513_vm1, %v6512_v0 }
  0x7e   :  { %5474 = vmatprep.mubr.msk.f32.mxu0 %vm6513_vm1, %v6512_v0 }
  0x80   :  { %5098 = vmatmul.mubr.msk.f32.gmra.mrb[62].mxu1 %vm373_vm0, %v278_v3 }
  0x81   :  { %5475 = vmatmul.mubr.msk.f32.gmra.mrb[62].mxu0 %vm373_vm0, %v152_v4  ;;  %5100 = vmatprep.mubr.msk.f32.mxu1 %vm6513_vm1, %v6512_v0  ;;  %v305_v4 = vld [vmem:[%s9028_s1 + $0x1d0] sm:$0xff] }
  0x82   :  { %5477 = vmatprep.mubr.msk.f32.mxu0 %vm6513_vm1, %v6512_v0 }
  0x84   :  { %5101 = vmatmul.mubr.msk.f32.gmra.mrb[64].mxu1 %vm373_vm0, %v279_v5  ;;  %v179_v5 = vld [vmem:[%s9029_s0 + $0x1d0] sm:$0xff] }
  0x85   :  { %5478 = vmatmul.mubr.msk.f32.gmra.mrb[64].mxu0 %vm373_vm0, %v153_v6  ;;  %5103 = vmatprep.mubr.msk.f32.mxu1 %vm6513_vm1, %v6512_v0 }
  0x86   :  { %5480 = vmatprep.mubr.msk.f32.mxu0 %vm6513_vm1, %v6512_v0 }
  0x88   :  { %5104 = vmatmul.mubr.msk.f32.gmra.mrb[66].mxu1 %vm373_vm0, %v280_v7 }
  0x89   :  { %5481 = vmatmul.mubr.msk.f32.gmra.mrb[66].mxu0 %vm373_vm0, %v154_v8  ;;  %5106 = vmatprep.mubr.msk.f32.mxu1 %vm6513_vm1, %v6512_v0  ;;  %v306_v8 = vld [vmem:[%s9028_s1 + $0x1d8] sm:$0xff] }
  0x8a   :  { %5483 = vmatprep.mubr.msk.f32.mxu0 %vm6513_vm1, %v6512_v0 }
  0x8c   :  { %5107 = vmatmul.mubr.msk.f32.gmra.mrb[68].mxu1 %vm373_vm0, %v281_v9  ;;  %v180_v9 = vld [vmem:[%s9029_s0 + $0x1d8] sm:$0xff] }
  0x8d   :  { %5484 = vmatmul.mubr.msk.f32.gmra.mrb[68].mxu0 %vm373_vm0, %v155_v10  ;;  %5109 = vmatprep.mubr.msk.f32.mxu1 %vm6513_vm1, %v6512_v0 }
  0x8e   :  { %5486 = vmatprep.mubr.msk.f32.mxu0 %vm6513_vm1, %v6512_v0 }
  0x90   :  { %5110 = vmatmul.mubr.msk.f32.gmra.mrb[70].mxu1 %vm373_vm0, %v282_v11 }
  0x91   :  { %5487 = vmatmul.mubr.msk.f32.gmra.mrb[70].mxu0 %vm373_vm0, %v156_v12  ;;  %5112 = vmatprep.mubr.msk.f32.mxu1 %vm6513_vm1, %v6512_v0  ;;  %v307_v12 = vld [vmem:[%s9028_s1 + $0x1e0] sm:$0xff] }
  0x92   :  { %5489 = vmatprep.mubr.msk.f32.mxu0 %vm6513_vm1, %v6512_v0 }
  0x94   :  { %5113 = vmatmul.mubr.msk.f32.gmra.mrb[72].mxu1 %vm373_vm0, %v283_v13  ;;  %v181_v13 = vld [vmem:[%s9029_s0 + $0x1e0] sm:$0xff] }
  0x95   :  { %5490 = vmatmul.mubr.msk.f32.gmra.mrb[72].mxu0 %vm373_vm0, %v157_v14  ;;  %5115 = vmatprep.mubr.msk.f32.mxu1 %vm6513_vm1, %v6512_v0 }
  0x96   :  { %5492 = vmatprep.mubr.msk.f32.mxu0 %vm6513_vm1, %v6512_v0 }
  0x98   :  { %5116 = vmatmul.mubr.msk.f32.gmra.mrb[74].mxu1 %vm373_vm0, %v284_v15 }
  0x99   :  { %5493 = vmatmul.mubr.msk.f32.gmra.mrb[74].mxu0 %vm373_vm0, %v158_v16  ;;  %5118 = vmatprep.mubr.msk.f32.mxu1 %vm6513_vm1, %v6512_v0  ;;  %v308_v16 = vld [vmem:[%s9028_s1 + $0x1e8] sm:$0xff] }
  0x9a   :  { %5495 = vmatprep.mubr.msk.f32.mxu0 %vm6513_vm1, %v6512_v0 }
  0x9c   :  { %5119 = vmatmul.mubr.msk.f32.gmra.mrb[76].mxu1 %vm373_vm0, %v285_v17  ;;  %v182_v17 = vld [vmem:[%s9029_s0 + $0x1e8] sm:$0xff] }
  0x9d   :  { %5496 = vmatmul.mubr.msk.f32.gmra.mrb[76].mxu0 %vm373_vm0, %v159_v18  ;;  %5121 = vmatprep.mubr.msk.f32.mxu1 %vm6513_vm1, %v6512_v0 }
  0x9e   :  { %5498 = vmatprep.mubr.msk.f32.mxu0 %vm6513_vm1, %v6512_v0 }
  0xa0   :  { %5122 = vmatmul.mubr.msk.f32.gmra.mrb[78].mxu1 %vm373_vm0, %v286_v19 }
  0xa1   :  { %5499 = vmatmul.mubr.msk.f32.gmra.mrb[78].mxu0 %vm373_vm0, %v160_v20  ;;  %5124 = vmatprep.mubr.msk.f32.mxu1 %vm6513_vm1, %v6512_v0  ;;  %v309_v20 = vld [vmem:[%s9028_s1 + $0x1f0] sm:$0xff] }
  0xa2   :  { %5501 = vmatprep.mubr.msk.f32.mxu0 %vm6513_vm1, %v6512_v0 }
  0xa4   :  { %5125 = vmatmul.mubr.msk.f32.gmra.mrb[80].mxu1 %vm373_vm0, %v287_v21  ;;  %v183_v21 = vld [vmem:[%s9029_s0 + $0x1f0] sm:$0xff] }
  0xa5   :  { %5502 = vmatmul.mubr.msk.f32.gmra.mrb[80].mxu0 %vm373_vm0, %v161_v22  ;;  %5127 = vmatprep.mubr.msk.f32.mxu1 %vm6513_vm1, %v6512_v0 }
  0xa6   :  { %5504 = vmatprep.mubr.msk.f32.mxu0 %vm6513_vm1, %v6512_v0 }
  0xa8   :  { %5128 = vmatmul.mubr.msk.f32.gmra.mrb[82].mxu1 %vm373_vm0, %v288_v23 }
  0xa9   :  { %5505 = vmatmul.mubr.msk.f32.gmra.mrb[82].mxu0 %vm373_vm0, %v162_v24  ;;  %5130 = vmatprep.mubr.msk.f32.mxu1 %vm6513_vm1, %v6512_v0  ;;  %v310_v24 = vld [vmem:[%s9028_s1 + $0x1f8] sm:$0xff] }
  0xaa   :  { %5507 = vmatprep.mubr.msk.f32.mxu0 %vm6513_vm1, %v6512_v0 }
  0xac   :  { %5131 = vmatmul.mubr.msk.f32.gmra.mrb[84].mxu1 %vm373_vm0, %v289_v25  ;;  %v2504_v25 = vld [vmem:[%s9031_s2] sm:$0xff] }
  0xad   :  { %5508 = vmatmul.mubr.msk.f32.gmra.mrb[84].mxu0 %vm373_vm0, %v163_v26  ;;  %5133 = vmatprep.mubr.msk.f32.mxu1 %vm6513_vm1, %v6512_v0 }
  0xae   :  { %5510 = vmatprep.mubr.msk.f32.mxu0 %vm6513_vm1, %v6512_v0 }
  0xb0   :  { %5134 = vmatmul.mubr.msk.f32.gmra.mrb[86].mxu1 %vm373_vm0, %v290_v27 }
  0xb1   :  { %5511 = vmatmul.mubr.msk.f32.gmra.mrb[86].mxu0 %vm373_vm0, %v164_v28  ;;  %5136 = vmatprep.mubr.msk.f32.mxu1 %vm6513_vm1, %v6512_v0  ;;  %v311_v28 = vld [vmem:[%s9028_s1 + $0x200] sm:$0xff] }
  0xb2   :  { %5513 = vmatprep.mubr.msk.f32.mxu0 %vm6513_vm1, %v6512_v0 }
  0xb4   :  { %5137 = vmatmul.mubr.msk.f32.gmra.mrb[88].mxu1 %vm373_vm0, %v291_v29  ;;  %v2505_v29 = vld [vmem:[%s9031_s2 + $0x8] sm:$0xff] }
  0xb5   :  { %5514 = vmatmul.mubr.msk.f32.gmra.mrb[88].mxu0 %vm373_vm0, %v165_v30  ;;  %5139 = vmatprep.mubr.msk.f32.mxu1 %vm6513_vm1, %v6512_v0 }
  0xb6   :  { %5516 = vmatprep.mubr.msk.f32.mxu0 %vm6513_vm1, %v6512_v0 }
  0xb8   :  { %5140 = vmatmul.mubr.msk.f32.gmra.mrb[90].mxu1 %vm373_vm0, %v292_v31 }
  0xb9   :  { %5517 = vmatmul.mubr.msk.f32.gmra.mrb[90].mxu0 %vm373_vm0, %v166_v32  ;;  %5142 = vmatprep.mubr.msk.f32.mxu1 %vm6513_vm1, %v6512_v0  ;;  %v312_v32 = vld [vmem:[%s9028_s1 + $0x208] sm:$0xff] }
  0xba   :  { %5519 = vmatprep.mubr.msk.f32.mxu0 %vm6513_vm1, %v6512_v0 }
  0xbc   :  { %5143 = vmatmul.mubr.msk.f32.gmra.mrb[92].mxu1 %vm373_vm0, %v293_v33  ;;  %v2506_v33 = vld [vmem:[%s9031_s2 + $0x10] sm:$0xff] }
  0xbd   :  { %5520 = vmatmul.mubr.msk.f32.gmra.mrb[92].mxu0 %vm373_vm0, %v167_v34  ;;  %5145 = vmatprep.mubr.msk.f32.mxu1 %vm6513_vm1, %v6512_v0 }
  0xbe   :  { %5522 = vmatprep.mubr.msk.f32.mxu0 %vm6513_vm1, %v6512_v0 }
  0xc0   :  { %5146 = vmatmul.mubr.msk.f32.gmra.mrb[94].mxu1 %vm373_vm0, %v294_v35 }
  0xc1   :  { %5523 = vmatmul.mubr.msk.f32.gmra.mrb[94].mxu0 %vm373_vm0, %v168_v36  ;;  %5148 = vmatprep.mubr.msk.f32.mxu1 %vm6513_vm1, %v6512_v0  ;;  %v313_v36 = vld [vmem:[%s9028_s1 + $0x210] sm:$0xff] }
  0xc2   :  { %5525 = vmatprep.mubr.msk.f32.mxu0 %vm6513_vm1, %v6512_v0 }
  0xc4   :  { %5149 = vmatmul.mubr.msk.f32.gmra.mrb[96].mxu1 %vm373_vm0, %v295_v37  ;;  %v2507_v37 = vld [vmem:[%s9031_s2 + $0x18] sm:$0xff] }
  0xc5   :  { %5526 = vmatmul.mubr.msk.f32.gmra.mrb[96].mxu0 %vm373_vm0, %v169_v38  ;;  %5151 = vmatprep.mubr.msk.f32.mxu1 %vm6513_vm1, %v6512_v0 }
  0xc6   :  { %5528 = vmatprep.mubr.msk.f32.mxu0 %vm6513_vm1, %v6512_v0 }
  0xc8   :  { %5152 = vmatmul.mubr.msk.f32.gmra.mrb[98].mxu1 %vm373_vm0, %v296_v39 }
  0xc9   :  { %5529 = vmatmul.mubr.msk.f32.gmra.mrb[98].mxu0 %vm373_vm0, %v170_v40  ;;  %5154 = vmatprep.mubr.msk.f32.mxu1 %vm6513_vm1, %v6512_v0  ;;  %v314_v40 = vld [vmem:[%s9028_s1 + $0x218] sm:$0xff] }
  0xca   :  { %5531 = vmatprep.mubr.msk.f32.mxu0 %vm6513_vm1, %v6512_v0 }
  0xcc   :  { %5155 = vmatmul.mubr.msk.f32.gmra.mrb[100].mxu1 %vm373_vm0, %v297_v41  ;;  %v2508_v41 = vld [vmem:[%s9031_s2 + $0x20] sm:$0xff] }
  0xcd   :  { %5532 = vmatmul.mubr.msk.f32.gmra.mrb[100].mxu0 %vm373_vm0, %v171_v42  ;;  %5157 = vmatprep.mubr.msk.f32.mxu1 %vm6513_vm1, %v6512_v0 }
  0xce   :  { %5534 = vmatprep.mubr.msk.f32.mxu0 %vm6513_vm1, %v6512_v0 }
  0xd0   :  { %5158 = vmatmul.mubr.msk.f32.gmra.mrb[102].mxu1 %vm373_vm0, %v298_v43 }
  0xd1   :  { %5535 = vmatmul.mubr.msk.f32.gmra.mrb[102].mxu0 %vm373_vm0, %v172_v44  ;;  %5160 = vmatprep.mubr.msk.f32.mxu1 %vm6513_vm1, %v6512_v0  ;;  %v315_v44 = vld [vmem:[%s9028_s1 + $0x220] sm:$0xff] }
  0xd2   :  { %5537 = vmatprep.mubr.msk.f32.mxu0 %vm6513_vm1, %v6512_v0 }
  0xd4   :  { %5161 = vmatmul.mubr.msk.f32.gmra.mrb[104].mxu1 %vm373_vm0, %v299_v45  ;;  %v2509_v45 = vld [vmem:[%s9031_s2 + $0x28] sm:$0xff] }
  0xd5   :  { %5538 = vmatmul.mubr.msk.f32.gmra.mrb[104].mxu0 %vm373_vm0, %v173_v46  ;;  %5163 = vmatprep.mubr.msk.f32.mxu1 %vm6513_vm1, %v6512_v0 }
  0xd6   :  { %5540 = vmatprep.mubr.msk.f32.mxu0 %vm6513_vm1, %v6512_v0 }
  0xd7   :  { %v7213_v49 = vpop.f32.mrb[0].mxu1 }
  0xd8   :  { %5164 = vmatmul.mubr.msk.f32.gmra.mrb[106].mxu1 %vm373_vm0, %v300_v47  ;;  %v5006_v50 = vpop.f32.mrb[1].mxu1 }
  0xd9   :  { %5541 = vmatmul.mubr.msk.f32.gmra.mrb[106].mxu0 %vm373_vm0, %v174_v48  ;;  %5166 = vmatprep.mubr.msk.f32.mxu1 %vm6513_vm1, %v6512_v0  ;;  %v316_v48 = vld [vmem:[%s9028_s1 + $0x228] sm:$0xff]  ;;  %v2510_v50 = vld [vmem:[%s9031_s2 + $0x30] sm:$0xff] }
  0xda   :  { %5543 = vmatprep.mubr.msk.f32.mxu0 %vm6513_vm1, %v6512_v0 }
  0xdb   :  { %v7227_v53 = vpop.f32.mrb[2].mxu1 }
  0xdc   :  { %5167 = vmatmul.mubr.msk.f32.gmra.mrb[108].mxu1 %vm373_vm0, %v301_v51  ;;  %v5009_v54 = vpop.f32.mrb[3].mxu1 }
  0xdd   :  { %5544 = vmatmul.mubr.msk.f32.gmra.mrb[108].mxu0 %vm373_vm0, %v175_v52  ;;  %5169 = vmatprep.mubr.msk.f32.mxu1 %vm6513_vm1, %v6512_v0  ;;  %v317_v54 = vld [vmem:[%s9028_s1 + $0x230] sm:$0xff] }
  0xde   :  { %5546 = vmatprep.mubr.msk.f32.mxu0 %vm6513_vm1, %v6512_v0 }
  0xdf   :  { %v7241_v57 = vpop.f32.mrb[4].mxu1 }
  0xe0   :  { %5170 = vmatmul.mubr.msk.f32.gmra.mrb[110].mxu1 %vm373_vm0, %v302_v55  ;;  %v5012_v58 = vpop.f32.mrb[5].mxu1  ;;  %v2511_v55 = vld [vmem:[%s9031_s2 + $0x38] sm:$0xff] }
  0xe1   :  { %5547 = vmatmul.mubr.msk.f32.gmra.mrb[110].mxu0 %vm373_vm0, %v176_v56  ;;  %5172 = vmatprep.mubr.msk.f32.mxu1 %vm6513_vm1, %v6512_v0 }
  0xe2   :  { %5549 = vmatprep.mubr.msk.f32.mxu0 %vm6513_vm1, %v6512_v0 }
  0xe3   :  { %v7255_v61 = vpop.f32.mrb[6].mxu1 }
  0xe4   :  { %5173 = vmatmul.mubr.msk.f32.gmra.mrb[112].mxu1 %vm373_vm0, %v303_v59  ;;  %v5015_v62 = vpop.f32.mrb[7].mxu1  ;;  %v318_v59 = vld [vmem:[%s9028_s1 + $0x238] sm:$0xff] }
  0xe5   :  { %5550 = vmatmul.mubr.msk.f32.gmra.mrb[112].mxu0 %vm373_vm0, %v177_v60  ;;  %5175 = vmatprep.mubr.msk.f32.mxu1 %vm6513_vm1, %v6512_v0  ;;  %v2512_v60 = vld [vmem:[%s9031_s2 + $0x40] sm:$0xff] }
  0xe6   :  { %5552 = vmatprep.mubr.msk.f32.mxu0 %vm6513_vm1, %v6512_v0 }
  0xe7   :  { %v7269_v2 = vpop.f32.mrb[8].mxu1 }
  0xe8   :  { %5176 = vmatmul.mubr.msk.f32.gmra.mrb[114].mxu1 %vm373_vm0, %v304_v63  ;;  %v5018_v3 = vpop.f32.mrb[9].mxu1 }
  0xe9   :  { %5553 = vmatmul.mubr.msk.f32.gmra.mrb[114].mxu0 %vm373_vm0, %v178_v1  ;;  %5178 = vmatprep.mubr.msk.f32.mxu1 %vm6513_vm1, %v6512_v0  ;;  %v319_v1 = vld [vmem:[%s9028_s1 + $0x240] sm:$0xff]  ;;  %v2513_v3 = vld [vmem:[%s9031_s2 + $0x48] sm:$0xff] }
  0xea   :  { %5555 = vmatprep.mubr.msk.f32.mxu0 %vm6513_vm1, %v6512_v0 }
  0xeb   :  { %v7283_v6 = vpop.f32.mrb[10].mxu1 }
  0xec   :  { %5179 = vmatmul.mubr.msk.f32.gmra.mrb[116].mxu1 %vm373_vm0, %v305_v4  ;;  %v5021_v7 = vpop.f32.mrb[11].mxu1 }
  0xed   :  { %5556 = vmatmul.mubr.msk.f32.gmra.mrb[116].mxu0 %vm373_vm0, %v179_v5  ;;  %5181 = vmatprep.mubr.msk.f32.mxu1 %vm6513_vm1, %v6512_v0  ;;  %v320_v7 = vld [vmem:[%s9028_s1 + $0x248] sm:$0xff] }
  0xee   :  { %5558 = vmatprep.mubr.msk.f32.mxu0 %vm6513_vm1, %v6512_v0 }
  0xef   :  { %v7297_v10 = vpop.f32.mrb[12].mxu1 }
  0xf0   :  { %5182 = vmatmul.mubr.msk.f32.gmra.mrb[118].mxu1 %vm373_vm0, %v306_v8  ;;  %v5024_v11 = vpop.f32.mrb[13].mxu1  ;;  %v2514_v8 = vld [vmem:[%s9031_s2 + $0x50] sm:$0xff] }
  0xf1   :  { %5559 = vmatmul.mubr.msk.f32.gmra.mrb[118].mxu0 %vm373_vm0, %v180_v9  ;;  %5184 = vmatprep.mubr.msk.f32.mxu1 %vm6513_vm1, %v6512_v0 }
  0xf2   :  { %5561 = vmatprep.mubr.msk.f32.mxu0 %vm6513_vm1, %v6512_v0 }
  0xf3   :  { %v7311_v14 = vpop.f32.mrb[14].mxu1 }
  0xf4   :  { %5185 = vmatmul.mubr.msk.f32.gmra.mrb[120].mxu1 %vm373_vm0, %v307_v12  ;;  %v5027_v15 = vpop.f32.mrb[15].mxu1  ;;  %v321_v12 = vld [vmem:[%s9028_s1 + $0x250] sm:$0xff] }
  0xf5   :  { %5562 = vmatmul.mubr.msk.f32.gmra.mrb[120].mxu0 %vm373_vm0, %v181_v13  ;;  %5187 = vmatprep.mubr.msk.f32.mxu1 %vm6513_vm1, %v6512_v0  ;;  %v2515_v13 = vld [vmem:[%s9031_s2 + $0x58] sm:$0xff] }
  0xf6   :  { %5564 = vmatprep.mubr.msk.f32.mxu0 %vm6513_vm1, %v6512_v0 }
  0xf7   :  { %v7325_v18 = vpop.f32.mrb[16].mxu1 }
  0xf8   :  { %5188 = vmatmul.mubr.msk.f32.gmra.mrb[122].mxu1 %vm373_vm0, %v308_v16  ;;  %v5030_v19 = vpop.f32.mrb[17].mxu1 }
  0xf9   :  { %5565 = vmatmul.mubr.msk.f32.gmra.mrb[122].mxu0 %vm373_vm0, %v182_v17  ;;  %5190 = vmatprep.mubr.msk.f32.mxu1 %vm6513_vm1, %v6512_v0  ;;  %v322_v17 = vld [vmem:[%s9028_s1 + $0x258] sm:$0xff]  ;;  %v2516_v19 = vld [vmem:[%s9031_s2 + $0x60] sm:$0xff] }
  0xfa   :  { %5567 = vmatprep.mubr.msk.f32.mxu0 %vm6513_vm1, %v6512_v0 }
  0xfb   :  { %v7339_v22 = vpop.f32.mrb[18].mxu1 }
  0xfc   :  { %5191 = vmatmul.mubr.msk.f32.gmra.mrb[124].mxu1 %vm373_vm0, %v309_v20  ;;  %v5033_v23 = vpop.f32.mrb[19].mxu1 }
  0xfd   :  { %5568 = vmatmul.mubr.msk.f32.gmra.mrb[124].mxu0 %vm373_vm0, %v183_v21  ;;  %5193 = vmatprep.mubr.msk.f32.mxu1 %vm6513_vm1, %v6512_v0  ;;  %v323_v23 = vld [vmem:[%s9028_s1 + $0x260] sm:$0xff] }
  0xfe   :  { %5758 = vmatprep.mubr.msk.f32.mxu0 %vm6513_vm1, %v6512_v0 }
  0xff   :  { %v7353_v26 = vpop.f32.mrb[20].mxu1 }
 0x100   :  { %5194 = vmatmul.mubr.msk.f32.gmra.mrb[126].mxu1 %vm373_vm0, %v310_v24  ;;  %v5036_v27 = vpop.f32.mrb[21].mxu1  ;;  %v2517_v24 = vld [vmem:[%s9031_s2 + $0x68] sm:$0xff] }
 0x101   :  { %5759 = vmatmul.mubr.msk.f32.vlgmr.msra.gmra.mrb[0].mxu0 %vm2630_vm3, %v2504_v25  ;;  %5196 = vmatprep.mubr.msk.f32.mxu1 %vm6513_vm1, %v6512_v0 }
 0x102   :  { %5761 = vmatprep.mubr.msk.f32.mxu0 %vm6513_vm1, %v6512_v0 }
 0x103   :  { %v7367_v30 = vpop.f32.mrb[22].mxu1 }
 0x104   :  { %5197 = vmatmul.mubr.msk.f32.gmra.mrb[128].mxu1 %vm373_vm0, %v311_v28  ;;  %v5039_v31 = vpop.f32.mrb[23].mxu1  ;;  %v324_v28 = vld [vmem:[%s9028_s1 + $0x268] sm:$0xff] }
 0x105   :  { %5762 = vmatmul.mubr.msk.f32.gmra.mrb[2].mxu0 %vm2630_vm3, %v2505_v29  ;;  %5199 = vmatprep.mubr.msk.f32.mxu1 %vm6513_vm1, %v6512_v0  ;;  %v2518_v29 = vld [vmem:[%s9031_s2 + $0x70] sm:$0xff] }
 0x106   :  { %5764 = vmatprep.mubr.msk.f32.mxu0 %vm6513_vm1, %v6512_v0 }
 0x107   :  { %v7381_v34 = vpop.f32.mrb[24].mxu1 }
 0x108   :  { %5200 = vmatmul.mubr.msk.f32.gmra.mrb[130].mxu1 %vm373_vm0, %v312_v32  ;;  %v5042_v35 = vpop.f32.mrb[25].mxu1 }
 0x109   :  { %5765 = vmatmul.mubr.msk.f32.gmra.mrb[4].mxu0 %vm2630_vm3, %v2506_v33  ;;  %5202 = vmatprep.mubr.msk.f32.mxu1 %vm6513_vm1, %v6512_v0  ;;  %v325_v33 = vld [vmem:[%s9028_s1 + $0x270] sm:$0xff]  ;;  %v2519_v35 = vld [vmem:[%s9031_s2 + $0x78] sm:$0xff] }
 0x10a   :  { %5767 = vmatprep.mubr.msk.f32.mxu0 %vm6513_vm1, %v6512_v0 }
 0x10b   :  { %v7395_v38 = vpop.f32.mrb[26].mxu1 }
 0x10c   :  { %5203 = vmatmul.mubr.msk.f32.gmra.mrb[132].mxu1 %vm373_vm0, %v313_v36  ;;  %v5045_v39 = vpop.f32.mrb[27].mxu1 }
 0x10d   :  { %5768 = vmatmul.mubr.msk.f32.gmra.mrb[6].mxu0 %vm2630_vm3, %v2507_v37  ;;  %5205 = vmatprep.mubr.msk.f32.mxu1 %vm6513_vm1, %v6512_v0  ;;  %v326_v39 = vld [vmem:[%s9028_s1 + $0x278] sm:$0xff] }
 0x10e   :  { %5770 = vmatprep.mubr.msk.f32.mxu0 %vm6513_vm1, %v6512_v0 }
 0x10f   :  { %v7409_v42 = vpop.f32.mrb[28].mxu1 }
 0x110   :  { %5206 = vmatmul.mubr.msk.f32.gmra.mrb[134].mxu1 %vm373_vm0, %v314_v40  ;;  %v5048_v43 = vpop.f32.mrb[29].mxu1  ;;  %v2520_v40 = vld [vmem:[%s9031_s2 + $0x80] sm:$0xff] }
 0x111   :  { %5771 = vmatmul.mubr.msk.f32.gmra.mrb[8].mxu0 %vm2630_vm3, %v2508_v41  ;;  %5208 = vmatprep.mubr.msk.f32.mxu1 %vm6513_vm1, %v6512_v0 }
 0x112   :  { %5773 = vmatprep.mubr.msk.f32.mxu0 %vm6513_vm1, %v6512_v0 }
 0x113   :  { %v7423_v46 = vpop.f32.mrb[30].mxu1 }
 0x114   :  { %5209 = vmatmul.mubr.msk.f32.gmra.mrb[136].mxu1 %vm373_vm0, %v315_v44  ;;  %v5051_v47 = vpop.f32.mrb[31].mxu1  ;;  %v327_v44 = vld [vmem:[%s9028_s1 + $0x280] sm:$0xff] }
 0x115   :  { %5774 = vmatmul.mubr.msk.f32.gmra.mrb[10].mxu0 %vm2630_vm3, %v2509_v45  ;;  %5211 = vmatprep.mubr.msk.f32.mxu1 %vm6513_vm1, %v6512_v0  ;;  %v2521_v45 = vld [vmem:[%s9031_s2 + $0x88] sm:$0xff] }
 0x116   :  { %5776 = vmatprep.mubr.msk.f32.mxu0 %vm6513_vm1, %v6512_v0 }
 0x117   :  { %v7437_v51 = vpop.f32.mrb[32].mxu1 }
 0x118   :  { %5212 = vmatmul.mubr.msk.f32.gmra.mrb[138].mxu1 %vm373_vm0, %v316_v48  ;;  %v5054_v52 = vpop.f32.mrb[33].mxu1 }
 0x119   :  { %5777 = vmatmul.mubr.msk.f32.gmra.mrb[12].mxu0 %vm2630_vm3, %v2510_v50  ;;  %5214 = vmatprep.mubr.msk.f32.mxu1 %vm6513_vm1, %v6512_v0  ;;  %v328_v50 = vld [vmem:[%s9028_s1 + $0x288] sm:$0xff]  ;;  %v2522_v52 = vld [vmem:[%s9031_s2 + $0x90] sm:$0xff] }
 0x11a   :  { %5779 = vmatprep.mubr.msk.f32.mxu0 %vm6513_vm1, %v6512_v0 }
 0x11b   :  { %v7451_v56 = vpop.f32.mrb[34].mxu1 }
 0x11c   :  { %5215 = vmatmul.mubr.msk.f32.gmra.mrb[140].mxu1 %vm373_vm0, %v317_v54  ;;  %v5057_v58 = vpop.f32.mrb[35].mxu1 }
 0x11d   :  { %5780 = vmatmul.mubr.msk.f32.gmra.mrb[14].mxu0 %vm2630_vm3, %v2511_v55  ;;  %5217 = vmatprep.mubr.msk.f32.mxu1 %vm6513_vm1, %v6512_v0  ;;  %v329_v58 = vld [vmem:[%s9028_s1 + $0x290] sm:$0xff] }
 0x11e   :  { %5782 = vmatprep.mubr.msk.f32.mxu0 %vm6513_vm1, %v6512_v0 }
 0x11f   :  { %v7465_v62 = vpop.f32.mrb[36].mxu1 }
 0x120   :  { %5218 = vmatmul.mubr.msk.f32.gmra.mrb[142].mxu1 %vm373_vm0, %v318_v59  ;;  %v5060_v63 = vpop.f32.mrb[37].mxu1  ;;  %v2523_v59 = vld [vmem:[%s9031_s2 + $0x98] sm:$0xff] }
 0x121   :  { %5783 = vmatmul.mubr.msk.f32.gmra.mrb[16].mxu0 %vm2630_vm3, %v2512_v60  ;;  %5220 = vmatprep.mubr.msk.f32.mxu1 %vm6513_vm1, %v6512_v0 }
 0x122   :  { %5785 = vmatprep.mubr.msk.f32.mxu0 %vm6513_vm1, %v6512_v0 }
 0x123   :  { %v7479_v4 = vpop.f32.mrb[38].mxu1 }
 0x124   :  { %5221 = vmatmul.mubr.msk.f32.gmra.mrb[144].mxu1 %vm373_vm0, %v319_v1  ;;  %v5063_v5 = vpop.f32.mrb[39].mxu1  ;;  %v330_v1 = vld [vmem:[%s9028_s1 + $0x298] sm:$0xff] }
 0x125   :  { %5786 = vmatmul.mubr.msk.f32.gmra.mrb[18].mxu0 %vm2630_vm3, %v2513_v3  ;;  %5223 = vmatprep.mubr.msk.f32.mxu1 %vm6513_vm1, %v6512_v0  ;;  %v2524_v3 = vld [vmem:[%s9031_s2 + $0xa0] sm:$0xff] }
 0x126   :  { %5788 = vmatprep.mubr.msk.f32.mxu0 %vm6513_vm1, %v6512_v0 }
 0x127   :  { %v7493_v9 = vpop.f32.mrb[40].mxu1 }
 0x128   :  { %5224 = vmatmul.mubr.msk.f32.gmra.mrb[146].mxu1 %vm373_vm0, %v320_v7  ;;  %v5066_v11 = vpop.f32.mrb[41].mxu1 }
 0x129   :  { %5789 = vmatmul.mubr.msk.f32.gmra.mrb[20].mxu0 %vm2630_vm3, %v2514_v8  ;;  %5226 = vmatprep.mubr.msk.f32.mxu1 %vm6513_vm1, %v6512_v0  ;;  %v331_v8 = vld [vmem:[%s9028_s1 + $0x2a0] sm:$0xff]  ;;  %v2525_v11 = vld [vmem:[%s9031_s2 + $0xa8] sm:$0xff] }
 0x12a   :  { %5791 = vmatprep.mubr.msk.f32.mxu0 %vm6513_vm1, %v6512_v0 }
 0x12b   :  { %v7507_v15 = vpop.f32.mrb[42].mxu1 }
 0x12c   :  { %5227 = vmatmul.mubr.msk.f32.gmra.mrb[148].mxu1 %vm373_vm0, %v321_v12  ;;  %v5069_v16 = vpop.f32.mrb[43].mxu1 }
 0x12d   :  { %5792 = vmatmul.mubr.msk.f32.gmra.mrb[22].mxu0 %vm2630_vm3, %v2515_v13  ;;  %5229 = vmatprep.mubr.msk.f32.mxu1 %vm6513_vm1, %v6512_v0  ;;  %v332_v16 = vld [vmem:[%s9028_s1 + $0x2a8] sm:$0xff] }
 0x12e   :  { %5794 = vmatprep.mubr.msk.f32.mxu0 %vm6513_vm1, %v6512_v0 }
 0x12f   :  { %v7521_v20 = vpop.f32.mrb[44].mxu1 }
 0x130   :  { %5230 = vmatmul.mubr.msk.f32.gmra.mrb[150].mxu1 %vm373_vm0, %v322_v17  ;;  %v5072_v21 = vpop.f32.mrb[45].mxu1  ;;  %v2526_v17 = vld [vmem:[%s9031_s2 + $0xb0] sm:$0xff] }
 0x131   :  { %5795 = vmatmul.mubr.msk.f32.gmra.mrb[24].mxu0 %vm2630_vm3, %v2516_v19  ;;  %5232 = vmatprep.mubr.msk.f32.mxu1 %vm6513_vm1, %v6512_v0 }
 0x132   :  { %5797 = vmatprep.mubr.msk.f32.mxu0 %vm6513_vm1, %v6512_v0 }
 0x133   :  { %v7535_v25 = vpop.f32.mrb[46].mxu1 }
 0x134   :  { %5233 = vmatmul.mubr.msk.f32.gmra.mrb[152].mxu1 %vm373_vm0, %v323_v23  ;;  %v5075_v27 = vpop.f32.mrb[47].mxu1  ;;  %v333_v23 = vld [vmem:[%s9028_s1 + $0x2b0] sm:$0xff] }
 0x135   :  { %5798 = vmatmul.mubr.msk.f32.gmra.mrb[26].mxu0 %vm2630_vm3, %v2517_v24  ;;  %5235 = vmatprep.mubr.msk.f32.mxu1 %vm6513_vm1, %v6512_v0  ;;  %v2527_v24 = vld [vmem:[%s9031_s2 + $0xb8] sm:$0xff] }
 0x136   :  { %5800 = vmatprep.mubr.msk.f32.mxu0 %vm6513_vm1, %v6512_v0 }
 0x137   :  { %v7549_v31 = vpop.f32.mrb[48].mxu1 }
 0x138   :  { %5236 = vmatmul.mubr.msk.f32.gmra.mrb[154].mxu1 %vm373_vm0, %v324_v28  ;;  %v5078_v32 = vpop.f32.mrb[49].mxu1 }
 0x139   :  { %5801 = vmatmul.mubr.msk.f32.gmra.mrb[28].mxu0 %vm2630_vm3, %v2518_v29  ;;  %5238 = vmatprep.mubr.msk.f32.mxu1 %vm6513_vm1, %v6512_v0  ;;  %v334_v29 = vld [vmem:[%s9028_s1 + $0x2b8] sm:$0xff]  ;;  %v2528_v32 = vld [vmem:[%s9031_s2 + $0xc0] sm:$0xff] }
 0x13a   :  { %5803 = vmatprep.mubr.msk.f32.mxu0 %vm6513_vm1, %v6512_v0 }
 0x13b   :  { %v7563_v36 = vpop.f32.mrb[50].mxu1 }
 0x13c   :  { %5239 = vmatmul.mubr.msk.f32.gmra.mrb[156].mxu1 %vm373_vm0, %v325_v33  ;;  %v5081_v37 = vpop.f32.mrb[51].mxu1 }
 0x13d   :  { %5804 = vmatmul.mubr.msk.f32.gmra.mrb[30].mxu0 %vm2630_vm3, %v2519_v35  ;;  %5241 = vmatprep.mubr.msk.f32.mxu1 %vm6513_vm1, %v6512_v0  ;;  %v335_v37 = vld [vmem:[%s9028_s1 + $0x2c0] sm:$0xff] }
 0x13e   :  { %5806 = vmatprep.mubr.msk.f32.mxu0 %vm6513_vm1, %v6512_v0 }
 0x13f   :  { %v7577_v41 = vpop.f32.mrb[52].mxu1 }
 0x140   :  { %5242 = vmatmul.mubr.msk.f32.gmra.mrb[158].mxu1 %vm373_vm0, %v326_v39  ;;  %v5084_v43 = vpop.f32.mrb[53].mxu1  ;;  %v2529_v39 = vld [vmem:[%s9031_s2 + $0xc8] sm:$0xff] }
 0x141   :  { %5807 = vmatmul.mubr.msk.f32.gmra.mrb[32].mxu0 %vm2630_vm3, %v2520_v40  ;;  %5244 = vmatprep.mubr.msk.f32.mxu1 %vm6513_vm1, %v6512_v0 }
 0x142   :  { %5809 = vmatprep.mubr.msk.f32.mxu0 %vm6513_vm1, %v6512_v0 }
 0x143   :  { %v7591_v47 = vpop.f32.mrb[54].mxu1 }
 0x144   :  { %5245 = vmatmul.mubr.msk.f32.gmra.mrb[160].mxu1 %vm373_vm0, %v327_v44  ;;  %v5087_v48 = vpop.f32.mrb[55].mxu1  ;;  %v336_v44 = vld [vmem:[%s9028_s1 + $0x2c8] sm:$0xff] }
 0x145   :  { %5810 = vmatmul.mubr.msk.f32.gmra.mrb[34].mxu0 %vm2630_vm3, %v2521_v45  ;;  %5247 = vmatprep.mubr.msk.f32.mxu1 %vm6513_vm1, %v6512_v0  ;;  %v2530_v45 = vld [vmem:[%s9031_s2 + $0xd0] sm:$0xff] }
 0x146   :  { %5812 = vmatprep.mubr.msk.f32.mxu0 %vm6513_vm1, %v6512_v0 }
 0x147   :  { %v7605_v54 = vpop.f32.mrb[56].mxu1 }
 0x148   :  { %5248 = vmatmul.mubr.msk.f32.gmra.mrb[162].mxu1 %vm373_vm0, %v328_v50  ;;  %v5090_v55 = vpop.f32.mrb[57].mxu1 }
 0x149   :  { %5813 = vmatmul.mubr.msk.f32.gmra.mrb[36].mxu0 %vm2630_vm3, %v2522_v52  ;;  %5250 = vmatprep.mubr.msk.f32.mxu1 %vm6513_vm1, %v6512_v0  ;;  %v337_v52 = vld [vmem:[%s9028_s1 + $0x2d0] sm:$0xff]  ;;  %v2531_v55 = vld [vmem:[%s9031_s2 + $0xd8] sm:$0xff] }
 0x14a   :  { %5815 = vmatprep.mubr.msk.f32.mxu0 %vm6513_vm1, %v6512_v0 }
 0x14b   :  { %v7619_v60 = vpop.f32.mrb[58].mxu1 }
 0x14c   :  { %5251 = vmatmul.mubr.msk.f32.gmra.mrb[164].mxu1 %vm373_vm0, %v329_v58  ;;  %v5093_v63 = vpop.f32.mrb[59].mxu1 }
 0x14d   :  { %5816 = vmatmul.mubr.msk.f32.gmra.mrb[38].mxu0 %vm2630_vm3, %v2523_v59  ;;  %5253 = vmatprep.mubr.msk.f32.mxu1 %vm6513_vm1, %v6512_v0  ;;  %v338_v63 = vld [vmem:[%s9028_s1 + $0x2d8] sm:$0xff] }
 0x14e   :  { %5818 = vmatprep.mubr.msk.f32.mxu0 %vm6513_vm1, %v6512_v0 }
 0x14f   :  { %v7633_v5 = vpop.f32.mrb[60].mxu1 }
 0x150   :  { %5254 = vmatmul.mubr.msk.f32.gmra.mrb[166].mxu1 %vm373_vm0, %v330_v1  ;;  %v5096_v7 = vpop.f32.mrb[61].mxu1  ;;  %v2532_v1 = vld [vmem:[%s9031_s2 + $0xe0] sm:$0xff] }
 0x151   :  { %5819 = vmatmul.mubr.msk.f32.gmra.mrb[40].mxu0 %vm2630_vm3, %v2524_v3  ;;  %5256 = vmatprep.mubr.msk.f32.mxu1 %vm6513_vm1, %v6512_v0 }
 0x152   :  { %5821 = vmatprep.mubr.msk.f32.mxu0 %vm6513_vm1, %v6512_v0 }
 0x153   :  { %v7647_v12 = vpop.f32.mrb[62].mxu1 }
 0x154   :  { %5257 = vmatmul.mubr.msk.f32.gmra.mrb[168].mxu1 %vm373_vm0, %v331_v8  ;;  %v5099_v13 = vpop.f32.mrb[63].mxu1  ;;  %v339_v8 = vld [vmem:[%s9028_s1 + $0x2e0] sm:$0xff] }
 0x155   :  { %5822 = vmatmul.mubr.msk.f32.gmra.mrb[42].mxu0 %vm2630_vm3, %v2525_v11  ;;  %5259 = vmatprep.mubr.msk.f32.mxu1 %vm6513_vm1, %v6512_v0  ;;  %v2533_v11 = vld [vmem:[%s9031_s2 + $0xe8] sm:$0xff] }
 0x156   :  { %5824 = vmatprep.mubr.msk.f32.mxu0 %vm6513_vm1, %v6512_v0 }
 0x157   :  { %v7661_v19 = vpop.f32.mrb[64].mxu1 }
 0x158   :  { %5260 = vmatmul.mubr.msk.f32.gmra.mrb[170].mxu1 %vm373_vm0, %v332_v16  ;;  %v5102_v21 = vpop.f32.mrb[65].mxu1 }
 0x159   :  { %5825 = vmatmul.mubr.msk.f32.gmra.mrb[44].mxu0 %vm2630_vm3, %v2526_v17  ;;  %5262 = vmatprep.mubr.msk.f32.mxu1 %vm6513_vm1, %v6512_v0  ;;  %v340_v17 = vld [vmem:[%s9028_s1 + $0x2e8] sm:$0xff]  ;;  %v2534_v21 = vld [vmem:[%s9031_s2 + $0xf0] sm:$0xff] }
 0x15a   :  { %5827 = vmatprep.mubr.msk.f32.mxu0 %vm6513_vm1, %v6512_v0 }
 0x15b   :  { %v7675_v27 = vpop.f32.mrb[66].mxu1 }
 0x15c   :  { %5263 = vmatmul.mubr.msk.f32.gmra.mrb[172].mxu1 %vm373_vm0, %v333_v23  ;;  %v5105_v28 = vpop.f32.mrb[67].mxu1 }
 0x15d   :  { %5828 = vmatmul.mubr.msk.f32.gmra.mrb[46].mxu0 %vm2630_vm3, %v2527_v24  ;;  %5265 = vmatprep.mubr.msk.f32.mxu1 %vm6513_vm1, %v6512_v0  ;;  %v341_v28 = vld [vmem:[%s9028_s1 + $0x2f0] sm:$0xff] }
 0x15e   :  { %5830 = vmatprep.mubr.msk.f32.mxu0 %vm6513_vm1, %v6512_v0 }
 0x15f   :  { %v7689_v33 = vpop.f32.mrb[68].mxu1 }
 0x160   :  { %5266 = vmatmul.mubr.msk.f32.gmra.mrb[174].mxu1 %vm373_vm0, %v334_v29  ;;  %v5108_v35 = vpop.f32.mrb[69].mxu1  ;;  %v2535_v29 = vld [vmem:[%s9031_s2 + $0xf8] sm:$0xff] }
 0x161   :  { %5831 = vmatmul.mubr.msk.f32.gmra.mrb[48].mxu0 %vm2630_vm3, %v2528_v32  ;;  %5268 = vmatprep.mubr.msk.f32.mxu1 %vm6513_vm1, %v6512_v0 }
 0x162   :  { %5833 = vmatprep.mubr.msk.f32.mxu0 %vm6513_vm1, %v6512_v0 }
 0x163   :  { %v7703_v40 = vpop.f32.mrb[70].mxu1 }
 0x164   :  { %5269 = vmatmul.mubr.msk.f32.gmra.mrb[176].mxu1 %vm373_vm0, %v335_v37  ;;  %v5111_v43 = vpop.f32.mrb[71].mxu1  ;;  %v342_v37 = vld [vmem:[%s9028_s1 + $0x2f8] sm:$0xff] }
 0x165   :  { %5834 = vmatmul.mubr.msk.f32.gmra.mrb[50].mxu0 %vm2630_vm3, %v2529_v39  ;;  %5271 = vmatprep.mubr.msk.f32.mxu1 %vm6513_vm1, %v6512_v0  ;;  %v2536_v39 = vld [vmem:[%s9031_s2 + $0x100] sm:$0xff] }
 0x166   :  { %5836 = vmatprep.mubr.msk.f32.mxu0 %vm6513_vm1, %v6512_v0 }
 0x167   :  { %v7717_v48 = vpop.f32.mrb[72].mxu1 }
 0x168   :  { %5272 = vmatmul.mubr.msk.f32.gmra.mrb[178].mxu1 %vm373_vm0, %v336_v44  ;;  %v5114_v50 = vpop.f32.mrb[73].mxu1 }
 0x169   :  { %5837 = vmatmul.mubr.msk.f32.gmra.mrb[52].mxu0 %vm2630_vm3, %v2530_v45  ;;  %5274 = vmatprep.mubr.msk.f32.mxu1 %vm6513_vm1, %v6512_v0  ;;  %v343_v45 = vld [vmem:[%s9028_s1 + $0x300] sm:$0xff]  ;;  %v2537_v50 = vld [vmem:[%s9031_s2 + $0x108] sm:$0xff] }
 0x16a   :  { %5839 = vmatprep.mubr.msk.f32.mxu0 %vm6513_vm1, %v6512_v0 }
 0x16b   :  { %v7731_v58 = vpop.f32.mrb[74].mxu1 }
 0x16c   :  { %5275 = vmatmul.mubr.msk.f32.gmra.mrb[180].mxu1 %vm373_vm0, %v337_v52  ;;  %v5117_v59 = vpop.f32.mrb[75].mxu1 }
 0x16d   :  { %5840 = vmatmul.mubr.msk.f32.gmra.mrb[54].mxu0 %vm2630_vm3, %v2531_v55  ;;  %5277 = vmatprep.mubr.msk.f32.mxu1 %vm6513_vm1, %v6512_v0  ;;  %v344_v59 = vld [vmem:[%s9028_s1 + $0x308] sm:$0xff] }
 0x16e   :  { %5842 = vmatprep.mubr.msk.f32.mxu0 %vm6513_vm1, %v6512_v0 }
 0x16f   :  { %v7745_v3 = vpop.f32.mrb[76].mxu1 }
 0x170   :  { %5278 = vmatmul.mubr.msk.f32.gmra.mrb[182].mxu1 %vm373_vm0, %v338_v63  ;;  %v5120_v7 = vpop.f32.mrb[77].mxu1  ;;  %v2538_v63 = vld [vmem:[%s9031_s2 + $0x110] sm:$0xff] }
 0x171   :  { %5843 = vmatmul.mubr.msk.f32.gmra.mrb[56].mxu0 %vm2630_vm3, %v2532_v1  ;;  %5280 = vmatprep.mubr.msk.f32.mxu1 %vm6513_vm1, %v6512_v0 }
 0x172   :  { %5845 = vmatprep.mubr.msk.f32.mxu0 %vm6513_vm1, %v6512_v0 }
 0x173   :  { %v7759_v13 = vpop.f32.mrb[78].mxu1 }
 0x174   :  { %5281 = vmatmul.mubr.msk.f32.gmra.mrb[184].mxu1 %vm373_vm0, %v339_v8  ;;  %v5123_v16 = vpop.f32.mrb[79].mxu1  ;;  %v345_v8 = vld [vmem:[%s9028_s1 + $0x310] sm:$0xff] }
 0x175   :  { %5846 = vmatmul.mubr.msk.f32.gmra.mrb[58].mxu0 %vm2630_vm3, %v2533_v11  ;;  %5283 = vmatprep.mubr.msk.f32.mxu1 %vm6513_vm1, %v6512_v0  ;;  %v2539_v11 = vld [vmem:[%s9031_s2 + $0x118] sm:$0xff] }
 0x176   :  { %5848 = vmatprep.mubr.msk.f32.mxu0 %vm6513_vm1, %v6512_v0 }
 0x177   :  { %v7773_v23 = vpop.f32.mrb[80].mxu1 }
 0x178   :  { %5284 = vmatmul.mubr.msk.f32.gmra.mrb[186].mxu1 %vm373_vm0, %v340_v17  ;;  %v5126_v24 = vpop.f32.mrb[81].mxu1 }
 0x179   :  { %5849 = vmatmul.mubr.msk.f32.gmra.mrb[60].mxu0 %vm2630_vm3, %v2534_v21  ;;  %5286 = vmatprep.mubr.msk.f32.mxu1 %vm6513_vm1, %v6512_v0  ;;  %v346_v21 = vld [vmem:[%s9028_s1 + $0x318] sm:$0xff]  ;;  %v2540_v24 = vld [vmem:[%s9031_s2 + $0x120] sm:$0xff] }
 0x17a   :  { %5851 = vmatprep.mubr.msk.f32.mxu0 %vm6513_vm1, %v6512_v0 }
 0x17b   :  { %v7787_v32 = vpop.f32.mrb[82].mxu1 }
 0x17c   :  { %5287 = vmatmul.mubr.msk.f32.gmra.mrb[188].mxu1 %vm373_vm0, %v341_v28  ;;  %v5129_v35 = vpop.f32.mrb[83].mxu1 }
 0x17d   :  { %5852 = vmatmul.mubr.msk.f32.gmra.mrb[62].mxu0 %vm2630_vm3, %v2535_v29  ;;  %5289 = vmatprep.mubr.msk.f32.mxu1 %vm6513_vm1, %v6512_v0  ;;  %v347_v35 = vld [vmem:[%s9028_s1 + $0x320] sm:$0xff] }
 0x17e   :  { %5854 = vmatprep.mubr.msk.f32.mxu0 %vm6513_vm1, %v6512_v0 }
 0x17f   :  { %v7801_v43 = vpop.f32.mrb[84].mxu1 }
 0x180   :  { %5290 = vmatmul.mubr.msk.f32.gmra.mrb[190].mxu1 %vm373_vm0, %v342_v37  ;;  %v5132_v44 = vpop.f32.mrb[85].mxu1  ;;  %v2541_v37 = vld [vmem:[%s9031_s2 + $0x128] sm:$0xff] }
 0x181   :  { %5855 = vmatmul.mubr.msk.f32.gmra.mrb[64].mxu0 %vm2630_vm3, %v2536_v39  ;;  %5292 = vmatprep.mubr.msk.f32.mxu1 %vm6513_vm1, %v6512_v0 }
 0x182   :  { %5857 = vmatprep.mubr.msk.f32.mxu0 %vm6513_vm1, %v6512_v0 }
 0x183   :  { %v7815_v52 = vpop.f32.mrb[86].mxu1 }
 0x184   :  { %5293 = vmatmul.mubr.msk.f32.gmra.mrb[192].mxu1 %vm373_vm0, %v343_v45  ;;  %v5135_v55 = vpop.f32.mrb[87].mxu1  ;;  %v348_v45 = vld [vmem:[%s9028_s1 + $0x328] sm:$0xff] }
 0x185   :  { %5858 = vmatmul.mubr.msk.f32.gmra.mrb[66].mxu0 %vm2630_vm3, %v2537_v50  ;;  %5295 = vmatprep.mubr.msk.f32.mxu1 %vm6513_vm1, %v6512_v0  ;;  %v2542_v50 = vld [vmem:[%s9031_s2 + $0x130] sm:$0xff] }
 0x186   :  { %5860 = vmatprep.mubr.msk.f32.mxu0 %vm6513_vm1, %v6512_v0 }
 0x187   :  { %v7829_v1 = vpop.f32.mrb[88].mxu1 }
 0x188   :  { %5296 = vmatmul.mubr.msk.f32.gmra.mrb[194].mxu1 %vm373_vm0, %v344_v59  ;;  %v5138_v7 = vpop.f32.mrb[89].mxu1 }
 0x189   :  { %5861 = vmatmul.mubr.msk.f32.gmra.mrb[68].mxu0 %vm2630_vm3, %v2538_v63  ;;  %5298 = vmatprep.mubr.msk.f32.mxu1 %vm6513_vm1, %v6512_v0  ;;  %v349_v63 = vld [vmem:[%s9028_s1 + $0x330] sm:$0xff]  ;;  %v2543_v7 = vld [vmem:[%s9031_s2 + $0x138] sm:$0xff] }
 0x18a   :  { %5863 = vmatprep.mubr.msk.f32.mxu0 %vm6513_vm1, %v6512_v0 }
 0x18b   :  { %v7843_v16 = vpop.f32.mrb[90].mxu1 }
 0x18c   :  { %5299 = vmatmul.mubr.msk.f32.gmra.mrb[196].mxu1 %vm373_vm0, %v345_v8  ;;  %v5141_v17 = vpop.f32.mrb[91].mxu1 }
 0x18d   :  { %5864 = vmatmul.mubr.msk.f32.gmra.mrb[70].mxu0 %vm2630_vm3, %v2539_v11  ;;  %5301 = vmatprep.mubr.msk.f32.mxu1 %vm6513_vm1, %v6512_v0  ;;  %v350_v17 = vld [vmem:[%s9028_s1 + $0x338] sm:$0xff] }
 0x18e   :  { %5866 = vmatprep.mubr.msk.f32.mxu0 %vm6513_vm1, %v6512_v0 }
 0x18f   :  { %v7857_v28 = vpop.f32.mrb[92].mxu1 }
 0x190   :  { %5302 = vmatmul.mubr.msk.f32.gmra.mrb[198].mxu1 %vm373_vm0, %v346_v21  ;;  %v5144_v29 = vpop.f32.mrb[93].mxu1  ;;  %v2544_v21 = vld [vmem:[%s9031_s2 + $0x140] sm:$0xff] }
 0x191   :  { %5867 = vmatmul.mubr.msk.f32.gmra.mrb[72].mxu0 %vm2630_vm3, %v2540_v24  ;;  %5304 = vmatprep.mubr.msk.f32.mxu1 %vm6513_vm1, %v6512_v0 }
 0x192   :  { %5869 = vmatprep.mubr.msk.f32.mxu0 %vm6513_vm1, %v6512_v0 }
 0x193   :  { %v7871_v39 = vpop.f32.mrb[94].mxu1 }
 0x194   :  { %5305 = vmatmul.mubr.msk.f32.gmra.mrb[200].mxu1 %vm373_vm0, %v347_v35  ;;  %v5147_v44 = vpop.f32.mrb[95].mxu1  ;;  %v351_v35 = vld [vmem:[%s9028_s1 + $0x340] sm:$0xff] }
 0x195   :  { %5870 = vmatmul.mubr.msk.f32.gmra.mrb[74].mxu0 %vm2630_vm3, %v2541_v37  ;;  %5307 = vmatprep.mubr.msk.f32.mxu1 %vm6513_vm1, %v6512_v0  ;;  %v2545_v37 = vld [vmem:[%s9031_s2 + $0x148] sm:$0xff] }
 0x196   :  { %5872 = vmatprep.mubr.msk.f32.mxu0 %vm6513_vm1, %v6512_v0 }
 0x197   :  { %v7885_v55 = vpop.f32.mrb[96].mxu1 }
 0x198   :  { %5308 = vmatmul.mubr.msk.f32.gmra.mrb[202].mxu1 %vm373_vm0, %v348_v45  ;;  %v5150_v59 = vpop.f32.mrb[97].mxu1 }
 0x199   :  { %5873 = vmatmul.mubr.msk.f32.gmra.mrb[76].mxu0 %vm2630_vm3, %v2542_v50  ;;  %5310 = vmatprep.mubr.msk.f32.mxu1 %vm6513_vm1, %v6512_v0  ;;  %v352_v50 = vld [vmem:[%s9028_s1 + $0x348] sm:$0xff]  ;;  %v2546_v59 = vld [vmem:[%s9031_s2 + $0x150] sm:$0xff] }
 0x19a   :  { %5875 = vmatprep.mubr.msk.f32.mxu0 %vm6513_vm1, %v6512_v0 }
 0x19b   :  { %v7899_v8 = vpop.f32.mrb[98].mxu1 }
 0x19c   :  { %5311 = vmatmul.mubr.msk.f32.gmra.mrb[204].mxu1 %vm373_vm0, %v349_v63  ;;  %v5153_v11 = vpop.f32.mrb[99].mxu1 }
 0x19d   :  { %5876 = vmatmul.mubr.msk.f32.gmra.mrb[78].mxu0 %vm2630_vm3, %v2543_v7  ;;  %5313 = vmatprep.mubr.msk.f32.mxu1 %vm6513_vm1, %v6512_v0  ;;  %v353_v11 = vld [vmem:[%s9028_s1 + $0x350] sm:$0xff] }
 0x19e   :  { %5878 = vmatprep.mubr.msk.f32.mxu0 %vm6513_vm1, %v6512_v0 }
 0x19f   :  { %v7913_v24 = vpop.f32.mrb[100].mxu1 }
 0x1a0   :  { %5314 = vmatmul.mubr.msk.f32.gmra.mrb[206].mxu1 %vm373_vm0, %v350_v17  ;;  %v5156_v29 = vpop.f32.mrb[101].mxu1  ;;  %v2547_v17 = vld [vmem:[%s9031_s2 + $0x158] sm:$0xff] }
 0x1a1   :  { %5879 = vmatmul.mubr.msk.f32.gmra.mrb[80].mxu0 %vm2630_vm3, %v2544_v21  ;;  %5316 = vmatprep.mubr.msk.f32.mxu1 %vm6513_vm1, %v6512_v0 }
 0x1a2   :  { %5881 = vmatprep.mubr.msk.f32.mxu0 %vm6513_vm1, %v6512_v0 }
 0x1a3   :  { %v7927_v44 = vpop.f32.mrb[102].mxu1 }
 0x1a4   :  { %5317 = vmatmul.mubr.msk.f32.gmra.mrb[208].mxu1 %vm373_vm0, %v351_v35  ;;  %v5159_v45 = vpop.f32.mrb[103].mxu1  ;;  %v354_v35 = vld [vmem:[%s9028_s1 + $0x358] sm:$0xff] }
 0x1a5   :  { %5882 = vmatmul.mubr.msk.f32.gmra.mrb[82].mxu0 %vm2630_vm3, %v2545_v37  ;;  %5319 = vmatprep.mubr.msk.f32.mxu1 %vm6513_vm1, %v6512_v0  ;;  %v2548_v37 = vld [vmem:[%s9031_s2 + $0x160] sm:$0xff] }
 0x1a6   :  { %5884 = vmatprep.mubr.msk.f32.mxu0 %vm6513_vm1, %v6512_v0 }
 0x1a7   :  { %v7941_v63 = vpop.f32.mrb[104].mxu1 }
 0x1a8   :  { %5320 = vmatmul.mubr.msk.f32.gmra.mrb[210].mxu1 %vm373_vm0, %v352_v50  ;;  %v5162_v7 = vpop.f32.mrb[105].mxu1 }
 0x1a9   :  { %5885 = vmatmul.mubr.msk.f32.gmra.mrb[84].mxu0 %vm2630_vm3, %v2546_v59  ;;  %5322 = vmatprep.mubr.msk.f32.mxu1 %vm6513_vm1, %v6512_v0  ;;  %v355_v59 = vld [vmem:[%s9028_s1 + $0x360] sm:$0xff]  ;;  %v2549_v7 = vld [vmem:[%s9031_s2 + $0x168] sm:$0xff] }
 0x1aa   :  { %5887 = vmatprep.mubr.msk.f32.mxu0 %vm6513_vm1, %v6512_v0 }
 0x1ab   :  { %v7955_v21 = vpop.f32.mrb[106].mxu1 }
 0x1ac   :  { %5323 = vmatmul.mubr.msk.f32.gmra.mrb[212].mxu1 %vm373_vm0, %v353_v11  ;;  %v5165_v29 = vpop.f32.mrb[107].mxu1 }
 0x1ad   :  { %5888 = vmatmul.mubr.msk.f32.gmra.mrb[86].mxu0 %vm2630_vm3, %v2547_v17  ;;  %5325 = vmatprep.mubr.msk.f32.mxu1 %vm6513_vm1, %v6512_v0  ;;  %v356_v29 = vld [vmem:[%s9028_s1 + $0x368] sm:$0xff] }
 0x1ae   :  { %5890 = vmatprep.mubr.msk.f32.mxu0 %vm6513_vm1, %v6512_v0 }
 0x1af   :  { %v7969_v45 = vpop.f32.mrb[108].mxu1 }
 0x1b0   :  { %9034 = vst [vmem:[#allocation2_spill] sm:$0xff] %v7969_v45  ;;  %5326 = vmatmul.mubr.msk.f32.gmra.mrb[214].mxu1 %vm373_vm0, %v354_v35  ;;  %v5168_v50 = vpop.f32.mrb[109].mxu1  ;;  %v2550_v35 = vld [vmem:[%s9031_s2 + $0x170] sm:$0xff] }
 0x1b1   :  { %5891 = vmatmul.mubr.msk.f32.gmra.mrb[88].mxu0 %vm2630_vm3, %v2548_v37  ;;  %5328 = vmatprep.mubr.msk.f32.mxu1 %vm6513_vm1, %v6512_v0 }
 0x1b2   :  { %5893 = vmatprep.mubr.msk.f32.mxu0 %vm6513_vm1, %v6512_v0 }
 0x1b3   :  { %v7983_v11 = vpop.f32.mrb[110].mxu1 }
 0x1b4   :  { %9035 = vst [vmem:[#allocation3_spill] sm:$0xff] %v7983_v11  ;;  %5329 = vmatmul.mubr.msk.f32.gmra.mrb[216].mxu1 %vm373_vm0, %v355_v59  ;;  %v5171_v17 = vpop.f32.mrb[111].mxu1  ;;  %v357_v59 = vld [vmem:[%s9028_s1 + $0x370] sm:$0xff] }
 0x1b5   :  { %5894 = vmatmul.mubr.msk.f32.gmra.mrb[90].mxu0 %vm2630_vm3, %v2549_v7  ;;  %5331 = vmatprep.mubr.msk.f32.mxu1 %vm6513_vm1, %v6512_v0  ;;  %v2551_v7 = vld [vmem:[%s9031_s2 + $0x178] sm:$0xff] }
 0x1b6   :  { %5896 = vmatprep.mubr.msk.f32.mxu0 %vm6513_vm1, %v6512_v0 }
 0x1b7   :  { %v7997_v37 = vpop.f32.mrb[112].mxu1 }
 0x1b8   :  { %9036 = vst [vmem:[#allocation4_spill] sm:$0xff] %v7997_v37  ;;  %5332 = vmatmul.mubr.msk.f32.gmra.mrb[218].mxu1 %vm373_vm0, %v356_v29  ;;  %v5174_v50 = vpop.f32.mrb[113].mxu1  ;;  %v2558_v37 = vld [vmem:[%s9031_s2 + $0x1b0] sm:$0xff] }
 0x1b9   :  { %5897 = vmatmul.mubr.msk.f32.gmra.mrb[92].mxu0 %vm2630_vm3, %v2550_v35  ;;  %5334 = vmatprep.mubr.msk.f32.mxu1 %vm6513_vm1, %v6512_v0  ;;  %v358_v35 = vld [vmem:[%s9028_s1 + $0x378] sm:$0xff]  ;;  %v2552_v50 = vld [vmem:[%s9031_s2 + $0x180] sm:$0xff] }
 0x1ba   :  { %5899 = vmatprep.mubr.msk.f32.mxu0 %vm6513_vm1, %v6512_v0 }
 0x1bb   :  { %v8011_v17 = vpop.f32.mrb[114].mxu1 }
 0x1bc   :  { %9037 = vst [vmem:[#allocation5_spill] sm:$0xff] %v8011_v17  ;;  %5335 = vmatmul.mubr.msk.f32.gmra.mrb[220].mxu1 %vm373_vm0, %v357_v59  ;;  %v5177_v29 = vpop.f32.mrb[115].mxu1 }
 0x1bd   :  { %5900 = vmatmul.mubr.msk.f32.gmra.mrb[94].mxu0 %vm2630_vm3, %v2551_v7  ;;  %5337 = vmatprep.mubr.msk.f32.mxu1 %vm6513_vm1, %v6512_v0  ;;  %v359_v7 = vld [vmem:[%s9028_s1 + $0x380] sm:$0xff]  ;;  %v2553_v29 = vld [vmem:[%s9031_s2 + $0x188] sm:$0xff] }
 0x1be   :  { %5902 = vmatprep.mubr.msk.f32.mxu0 %vm6513_vm1, %v6512_v0 }
 0x1bf   :  { %v8025_v17 = vpop.f32.mrb[116].mxu1 }
 0x1c0   :  { %9038 = vst [vmem:[#allocation6_spill] sm:$0xff] %v8025_v17  ;;  %5338 = vmatmul.mubr.msk.f32.gmra.mrb[222].mxu1 %vm373_vm0, %v358_v35  ;;  %v5180_v59 = vpop.f32.mrb[117].mxu1 }
 0x1c1   :  { %5903 = vmatmul.mubr.msk.f32.gmra.mrb[96].mxu0 %vm2630_vm3, %v2552_v50  ;;  %5340 = vmatprep.mubr.msk.f32.mxu1 %vm6513_vm1, %v6512_v0  ;;  %v360_v50 = vld [vmem:[%s9028_s1 + $0x388] sm:$0xff]  ;;  %v2554_v59 = vld [vmem:[%s9031_s2 + $0x190] sm:$0xff] }
 0x1c2   :  { %5905 = vmatprep.mubr.msk.f32.mxu0 %vm6513_vm1, %v6512_v0 }
 0x1c3   :  { %v8039_v17 = vpop.f32.mrb[118].mxu1 }
 0x1c4   :  { %9039 = vst [vmem:[#allocation7_spill] sm:$0xff] %v8039_v17  ;;  %5341 = vmatmul.mubr.msk.f32.gmra.mrb[224].mxu1 %vm373_vm0, %v359_v7  ;;  %v5183_v35 = vpop.f32.mrb[119].mxu1 }
 0x1c5   :  { %5906 = vmatmul.mubr.msk.f32.gmra.mrb[98].mxu0 %vm2630_vm3, %v2553_v29  ;;  %5343 = vmatprep.mubr.msk.f32.mxu1 %vm6513_vm1, %v6512_v0  ;;  %v361_v29 = vld [vmem:[%s9028_s1 + $0x390] sm:$0xff]  ;;  %v2555_v35 = vld [vmem:[%s9031_s2 + $0x198] sm:$0xff] }
 0x1c6   :  { %5908 = vmatprep.mubr.msk.f32.mxu0 %vm6513_vm1, %v6512_v0 }
 0x1c7   :  { %v8053_v17 = vpop.f32.mrb[120].mxu1 }
 0x1c8   :  { %9040 = vst [vmem:[#allocation8_spill] sm:$0xff] %v8053_v17  ;;  %5344 = vmatmul.mubr.msk.f32.gmra.mrb[226].mxu1 %vm373_vm0, %v360_v50  ;;  %v5186_v7 = vpop.f32.mrb[121].mxu1 }
 0x1c9   :  { %5909 = vmatmul.mubr.msk.f32.gmra.mrb[100].mxu0 %vm2630_vm3, %v2554_v59  ;;  %5346 = vmatprep.mubr.msk.f32.mxu1 %vm6513_vm1, %v6512_v0  ;;  %v362_v59 = vld [vmem:[%s9028_s1 + $0x398] sm:$0xff]  ;;  %v2556_v7 = vld [vmem:[%s9031_s2 + $0x1a0] sm:$0xff] }
 0x1ca   :  { %5911 = vmatprep.mubr.msk.f32.mxu0 %vm6513_vm1, %v6512_v0 }
 0x1cb   :  { %v8067_v17 = vpop.f32.mrb[122].mxu1 }
 0x1cc   :  { %9041 = vst [vmem:[#allocation9_spill] sm:$0xff] %v8067_v17  ;;  %5347 = vmatmul.mubr.msk.f32.gmra.mrb[228].mxu1 %vm373_vm0, %v361_v29  ;;  %v5189_v50 = vpop.f32.mrb[123].mxu1 }
 0x1cd   :  { %5912 = vmatmul.mubr.msk.f32.gmra.mrb[102].mxu0 %vm2630_vm3, %v2555_v35  ;;  %5349 = vmatprep.mubr.msk.f32.mxu1 %vm6513_vm1, %v6512_v0  ;;  %v363_v35 = vld [vmem:[%s9028_s1 + $0x3a0] sm:$0xff]  ;;  %v2557_v50 = vld [vmem:[%s9031_s2 + $0x1a8] sm:$0xff] }
 0x1ce   :  { %5914 = vmatprep.mubr.msk.f32.mxu0 %vm6513_vm1, %v6512_v0 }
 0x1cf   :  { %v8081_v17 = vpop.f32.mrb[124].mxu1 }
 0x1d0   :  { %9042 = vst [vmem:[#allocation10_spill] sm:$0xff] %v8081_v17  ;;  %5350 = vmatmul.mubr.msk.f32.gmra.mrb[230].mxu1 %vm373_vm0, %v362_v59  ;;  %v5192_v29 = vpop.f32.mrb[125].mxu1 }
 0x1d1   :  { %5915 = vmatmul.mubr.msk.f32.gmra.mrb[104].mxu0 %vm2630_vm3, %v2556_v7  ;;  %5352 = vmatprep.mubr.msk.f32.mxu1 %vm6513_vm1, %v6512_v0  ;;  %v364_v29 = vld [vmem:[%s9028_s1 + $0x3a8] sm:$0xff] }
 0x1d2   :  { %5917 = vmatprep.mubr.msk.f32.mxu0 %vm6513_vm1, %v6512_v0 }
 0x1d4   :  { %v3076_v17 = vpop.f32.mrb[0].mxu0  ;;  %5353 = vmatmul.mubr.msk.f32.gmra.mrb[232].mxu1 %vm373_vm0, %v363_v35 }
 0x1d5   :  { %v6135_v59 = vadd.f32 %v3076_v17, %v7213_v49  ;;  %v5760_v7 = vpop.f32.mrb[1].mxu0  ;;  %5918 = vmatmul.mubr.msk.f32.gmra.mrb[106].mxu0 %vm2630_vm3, %v2557_v50  ;;  %5355 = vmatprep.mubr.msk.f32.mxu1 %vm6513_vm1, %v6512_v0  ;;  %v365_v50 = vld [vmem:[%s9028_s1 + $0x3b0] sm:$0xff] }
 0x1d6   :  { %5920 = vmatprep.mubr.msk.f32.mxu0 %vm6513_vm1, %v6512_v0  ;;  %v2559_v7 = vld [vmem:[%s9031_s2 + $0x1b8] sm:$0xff] }
 0x1d8   :  { %v3081_v49 = vpop.f32.mrb[2].mxu0  ;;  %5356 = vmatmul.mubr.msk.f32.gmra.mrb[234].mxu1 %vm373_vm0, %v364_v29 }
 0x1d9   :  { %v6136_v17 = vadd.f32 %v3081_v49, %v7227_v53  ;;  %v5763_v35 = vpop.f32.mrb[3].mxu0  ;;  %5921 = vmatmul.mubr.msk.f32.gmra.mrb[108].mxu0 %vm2630_vm3, %v2558_v37  ;;  %5358 = vmatprep.mubr.msk.f32.mxu1 %vm6513_vm1, %v6512_v0  ;;  %v3965_v53 = vmul.f32 %v6135_v59, %v6135_v59 }
 0x1da   :  { %5923 = vmatprep.mubr.msk.f32.mxu0 %vm6513_vm1, %v6512_v0 }
 0x1db   :  { %v3832_v49 = vadd.f32 %v6136_v17, %v6135_v59  ;;  %v3966_v29 = vmul.f32 %v6136_v17, %v6136_v17  ;;  %v366_v59 = vld [vmem:[%s9028_s1 + $0x3b8] sm:$0xff]  ;;  %v2560_v17 = vld [vmem:[%s9031_s2 + $0x1c0] sm:$0xff] }
 0x1dc   :  { %v3086_v35 = vpop.f32.mrb[4].mxu0  ;;  %5359 = vmatmul.mubr.msk.f32.gmra.mrb[236].mxu1 %vm373_vm0, %v365_v50 }
 0x1dd   :  { %v4090_v11 = vadd.f32 %v3966_v29, %v3965_v53  ;;  %v6137_v37 = vadd.f32 %v3086_v35, %v7241_v57  ;;  %v5766_v45 = vpop.f32.mrb[5].mxu0  ;;  %5924 = vmatmul.mubr.msk.f32.gmra.mrb[110].mxu0 %vm2630_vm3, %v2559_v7  ;;  %5361 = vmatprep.mubr.msk.f32.mxu1 %vm6513_vm1, %v6512_v0 }
 0x1de   :  { %5926 = vmatprep.mubr.msk.f32.mxu0 %vm6513_vm1, %v6512_v0 }
 0x1df   :  { %v3833_v57 = vadd.f32 %v6137_v37, %v3832_v49  ;;  %v3967_v53 = vmul.f32 %v6137_v37, %v6137_v37  ;;  %v367_v49 = vld [vmem:[%s9028_s1 + $0x3c0] sm:$0xff] }
 0x1e0   :  { %v3091_v50 = vpop.f32.mrb[6].mxu0  ;;  %5362 = vmatmul.mubr.msk.f32.gmra.mrb[238].mxu1 %vm373_vm0, %v366_v59 }
 0x1e1   :  { %v4091_v45 = vadd.f32 %v4090_v11, %v3967_v53  ;;  %v6138_v7 = vadd.f32 %v3091_v50, %v7255_v61  ;;  %v5769_v29 = vpop.f32.mrb[7].mxu0  ;;  %5927 = vmatmul.mubr.msk.f32.gmra.mrb[112].mxu0 %vm2630_vm3, %v2560_v17  ;;  %5364 = vmatprep.mubr.msk.f32.mxu1 %vm6513_vm1, %v6512_v0  ;;  %v2561_v11 = vld [vmem:[%s9031_s2 + $0x1c8] sm:$0xff]  ;;  %v2562_v50 = vld [vmem:[%s9031_s2 + $0x1d0] sm:$0xff] }
 0x1e2   :  { %5929 = vmatprep.mubr.msk.f32.mxu0 %vm6513_vm1, %v6512_v0 }
 0x1e3   :  { %v3834_v61 = vadd.f32 %v6138_v7, %v3833_v57  ;;  %v3968_v35 = vmul.f32 %v6138_v7, %v6138_v7  ;;  %v368_v57 = vld [vmem:[%s9028_s1 + $0x3c8] sm:$0xff] }
 0x1e4   :  { %v3096_v37 = vpop.f32.mrb[8].mxu0  ;;  %5365 = vmatmul.mubr.msk.f32.gmra.mrb[240].mxu1 %vm373_vm0, %v367_v49 }
 0x1e5   :  { %v4092_v59 = vadd.f32 %v4091_v45, %v3968_v35  ;;  %v6139_v17 = vadd.f32 %v3096_v37, %v7269_v2  ;;  %v5772_v53 = vpop.f32.mrb[9].mxu0  ;;  %5930 = vmatmul.mubr.msk.f32.gmra.mrb[114].mxu0 %vm2630_vm3, %v2561_v11  ;;  %5367 = vmatprep.mubr.msk.f32.mxu1 %vm6513_vm1, %v6512_v0  ;;  %v2563_v35 = vld [vmem:[%s9031_s2 + $0x1d8] sm:$0xff] }
 0x1e6   :  { %5932 = vmatprep.mubr.msk.f32.mxu0 %vm6513_vm1, %v6512_v0 }
 0x1e7   :  { %v3835_v2 = vadd.f32 %v6139_v17, %v3834_v61  ;;  %v3969_v45 = vmul.f32 %v6139_v17, %v6139_v17  ;;  %v369_v61 = vld [vmem:[%s9028_s1 + $0x3d0] sm:$0xff] }
 0x1e8   :  { %v3101_v7 = vpop.f32.mrb[10].mxu0  ;;  %5368 = vmatmul.mubr.msk.f32.gmra.mrb[242].mxu1 %vm373_vm0, %v368_v57 }
 0x1e9   :  { %v4093_v29 = vadd.f32 %v4092_v59, %v3969_v45  ;;  %v6140_v49 = vadd.f32 %v3101_v7, %v7283_v6  ;;  %v5775_v11 = vpop.f32.mrb[11].mxu0  ;;  %5933 = vmatmul.mubr.msk.f32.gmra.mrb[116].mxu0 %vm2630_vm3, %v2562_v50  ;;  %5370 = vmatprep.mubr.msk.f32.mxu1 %vm6513_vm1, %v6512_v0  ;;  %v370_v50 = vld [vmem:[%s9028_s1 + $0x3d8] sm:$0xff] }
 0x1ea   :  { %5935 = vmatprep.mubr.msk.f32.mxu0 %vm6513_vm1, %v6512_v0 }
 0x1eb   :  { %v3836_v6 = vadd.f32 %v6140_v49, %v3835_v2  ;;  %v3970_v37 = vmul.f32 %v6140_v49, %v6140_v49  ;;  %v2564_v2 = vld [vmem:[%s9031_s2 + $0x1e0] sm:$0xff] }
 0x1ec   :  { %v3106_v59 = vpop.f32.mrb[12].mxu0  ;;  %5371 = vmatmul.mubr.msk.f32.gmra.mrb[244].mxu1 %vm373_vm0, %v369_v61  ;;  %v371_v61 = vld [vmem:[%s9028_s1 + $0x3e0] sm:$0xff] }
 0x1ed   :  { %v4094_v17 = vadd.f32 %v4093_v29, %v3970_v37  ;;  %v6141_v53 = vadd.f32 %v3106_v59, %v7297_v10  ;;  %v5778_v57 = vpop.f32.mrb[13].mxu0  ;;  %5936 = vmatmul.mubr.msk.f32.gmra.mrb[118].mxu0 %vm2630_vm3, %v2563_v35  ;;  %5373 = vmatprep.mubr.msk.f32.mxu1 %vm6513_vm1, %v6512_v0  ;;  %v2565_v35 = vld [vmem:[%s9031_s2 + $0x1e8] sm:$0xff] }
 0x1ee   :  { %5938 = vmatprep.mubr.msk.f32.mxu0 %vm6513_vm1, %v6512_v0  ;;  %v184_v57 = vld [vmem:[%s9029_s0 + $0x1f8] sm:$0xff] }
 0x1ef   :  { %v3837_v10 = vadd.f32 %v6141_v53, %v3836_v6  ;;  %v3971_v45 = vmul.f32 %v6141_v53, %v6141_v53 }
 0x1f0   :  { %v3111_v7 = vpop.f32.mrb[14].mxu0  ;;  %5374 = vmatmul.mubr.msk.f32.gmra.mrb[246].mxu1 %vm373_vm0, %v370_v50  ;;  %v2566_v50 = vld [vmem:[%s9031_s2 + $0x1f0] sm:$0xff] }
 0x1f1   :  { %v4095_v29 = vadd.f32 %v4094_v17, %v3971_v45  ;;  %v6142_v49 = vadd.f32 %v3111_v7, %v7311_v14  ;;  %v5781_v11 = vpop.f32.mrb[15].mxu0  ;;  %5939 = vmatmul.mubr.msk.f32.gmra.mrb[120].mxu0 %vm2630_vm3, %v2564_v2  ;;  %5376 = vmatprep.mubr.msk.f32.mxu1 %vm6513_vm1, %v6512_v0 }
 0x1f2   :  { %5941 = vmatprep.mubr.msk.f32.mxu0 %vm6513_vm1, %v6512_v0  ;;  %v2567_v11 = vld [vmem:[%s9031_s2 + $0x1f8] sm:$0xff] }
 0x1f3   :  { %v3838_v14 = vadd.f32 %v6142_v49, %v3837_v10  ;;  %v3972_v6 = vmul.f32 %v6142_v49, %v6142_v49  ;;  %v185_v49 = vld [vmem:[%s9029_s0 + $0x200] sm:$0xff] }
 0x1f4   :  { %v3116_v37 = vpop.f32.mrb[16].mxu0  ;;  %5377 = vmatmul.mubr.msk.f32.gmra.mrb[248].mxu1 %vm373_vm0, %v371_v61 }
 0x1f5   :  { %v4096_v59 = vadd.f32 %v4095_v29, %v3972_v6  ;;  %v6143_v17 = vadd.f32 %v3116_v37, %v7325_v18  ;;  %v5784_v53 = vpop.f32.mrb[17].mxu0  ;;  %5942 = vmatmul.mubr.msk.f32.gmra.mrb[122].mxu0 %vm2630_vm3, %v2565_v35  ;;  %5570 = vmatprep.mubr.msk.f32.mxu1 %vm6513_vm1, %v6512_v0 }
 0x1f6   :  { %5944 = vmatprep.mubr.msk.f32.mxu0 %vm6513_vm1, %v6512_v0 }
 0x1f7   :  { %v3839_v18 = vadd.f32 %v6143_v17, %v3838_v14  ;;  %v3973_v2 = vmul.f32 %v6143_v17, %v6143_v17  ;;  %v2568_v17 = vld [vmem:[%s9031_s2 + $0x200] sm:$0xff] }
 0x1f8   :  { %v3121_v10 = vpop.f32.mrb[18].mxu0  ;;  %5571 = vmatmul.mubr.msk.f32.vlgmr.msra.gmra.mrb[126].mxu1 %vm373_vm0, %v184_v57 }
 0x1f9   :  { %v4097_v45 = vadd.f32 %v4096_v59, %v3973_v2  ;;  %v6144_v7 = vadd.f32 %v3121_v10, %v7339_v22  ;;  %v5787_v29 = vpop.f32.mrb[19].mxu0  ;;  %5945 = vmatmul.mubr.msk.f32.gmra.mrb[124].mxu0 %vm2630_vm3, %v2566_v50  ;;  %5573 = vmatprep.mubr.msk.f32.mxu1 %vm6513_vm1, %v6512_v0  ;;  %v186_v59 = vld [vmem:[%s9029_s0 + $0x208] sm:$0xff]  ;;  %v187_v10 = vld [vmem:[%s9029_s0 + $0x210] sm:$0xff] }
 0x1fa   :  { %5947 = vmatprep.mubr.msk.f32.mxu0 %vm6513_vm1, %v6512_v0 }
 0x1fb   :  { %v3840_v22 = vadd.f32 %v6144_v7, %v3839_v18  ;;  %v3974_v61 = vmul.f32 %v6144_v7, %v6144_v7 }
 0x1fc   :  { %v3126_v35 = vpop.f32.mrb[20].mxu0  ;;  %5574 = vmatmul.mubr.msk.f32.gmra.mrb[128].mxu1 %vm373_vm0, %v185_v49 }
 0x1fd   :  { %v4098_v14 = vadd.f32 %v4097_v45, %v3974_v61  ;;  %v6145_v6 = vadd.f32 %v3126_v35, %v7353_v26  ;;  %v5790_v37 = vpop.f32.mrb[21].mxu0  ;;  %5948 = vmatmul.mubr.msk.f32.gmra.mrb[126].mxu0 %vm2630_vm3, %v2567_v11  ;;  %5576 = vmatprep.mubr.msk.f32.mxu1 %vm6513_vm1, %v6512_v0  ;;  %v2569_v45 = vld [vmem:[%s9031_s2 + $0x208] sm:$0xff]  ;;  %v188_v61 = vld [vmem:[%s9029_s0 + $0x218] sm:$0xff]  ;;  %v2570_v35 = vld [vmem:[%s9031_s2 + $0x210] sm:$0xff] }
 0x1fe   :  { %5950 = vmatprep.mubr.msk.f32.mxu0 %vm6513_vm1, %v6512_v0 }
 0x1ff   :  { %v3841_v26 = vadd.f32 %v6145_v6, %v3840_v22  ;;  %v3975_v53 = vmul.f32 %v6145_v6, %v6145_v6 }
 0x200   :  { %v3131_v57 = vpop.f32.mrb[22].mxu0  ;;  %5577 = vmatmul.mubr.msk.f32.gmra.mrb[130].mxu1 %vm373_vm0, %v186_v59 }
 0x201   :  { %v4099_v50 = vadd.f32 %v4098_v14, %v3975_v53  ;;  %v6146_v18 = vadd.f32 %v3131_v57, %v7367_v30  ;;  %v5793_v2 = vpop.f32.mrb[23].mxu0  ;;  %5951 = vmatmul.mubr.msk.f32.gmra.mrb[128].mxu0 %vm2630_vm3, %v2568_v17  ;;  %5579 = vmatprep.mubr.msk.f32.mxu1 %vm6513_vm1, %v6512_v0  ;;  %v2571_v53 = vld [vmem:[%s9031_s2 + $0x218] sm:$0xff] }
 0x202   :  { %5953 = vmatprep.mubr.msk.f32.mxu0 %vm6513_vm1, %v6512_v0 }
 0x203   :  { %v3842_v30 = vadd.f32 %v6146_v18, %v3841_v26  ;;  %v3976_v7 = vmul.f32 %v6146_v18, %v6146_v18  ;;  %v189_v26 = vld [vmem:[%s9029_s0 + $0x220] sm:$0xff] }
 0x204   :  { %v3136_v29 = vpop.f32.mrb[24].mxu0  ;;  %5580 = vmatmul.mubr.msk.f32.gmra.mrb[132].mxu1 %vm373_vm0, %v187_v10 }
 0x205   :  { %v4100_v49 = vadd.f32 %v4099_v50, %v3976_v7  ;;  %v6147_v11 = vadd.f32 %v3136_v29, %v7381_v34  ;;  %v5796_v22 = vpop.f32.mrb[25].mxu0  ;;  %5954 = vmatmul.mubr.msk.f32.gmra.mrb[130].mxu0 %vm2630_vm3, %v2569_v45  ;;  %5582 = vmatprep.mubr.msk.f32.mxu1 %vm6513_vm1, %v6512_v0  ;;  %v190_v45 = vld [vmem:[%s9029_s0 + $0x228] sm:$0xff] }
 0x206   :  { %5956 = vmatprep.mubr.msk.f32.mxu0 %vm6513_vm1, %v6512_v0 }
 0x207   :  { %v3843_v34 = vadd.f32 %v6147_v11, %v3842_v30  ;;  %v3977_v14 = vmul.f32 %v6147_v11, %v6147_v11  ;;  %v2572_v30 = vld [vmem:[%s9031_s2 + $0x220] sm:$0xff] }
 0x208   :  { %v3141_v6 = vpop.f32.mrb[26].mxu0  ;;  %5583 = vmatmul.mubr.msk.f32.gmra.mrb[134].mxu1 %vm373_vm0, %v188_v61  ;;  %v191_v61 = vld [vmem:[%s9029_s0 + $0x230] sm:$0xff] }
 0x209   :  { %v4101_v37 = vadd.f32 %v4100_v49, %v3977_v14  ;;  %v6148_v59 = vadd.f32 %v3141_v6, %v7395_v38  ;;  %v5799_v17 = vpop.f32.mrb[27].mxu0  ;;  %5957 = vmatmul.mubr.msk.f32.gmra.mrb[132].mxu0 %vm2630_vm3, %v2570_v35  ;;  %5585 = vmatprep.mubr.msk.f32.mxu1 %vm6513_vm1, %v6512_v0  ;;  %v2573_v35 = vld [vmem:[%s9031_s2 + $0x228] sm:$0xff] }
 0x20a   :  { %5959 = vmatprep.mubr.msk.f32.mxu0 %vm6513_vm1, %v6512_v0  ;;  %v192_v17 = vld [vmem:[%s9029_s0 + $0x238] sm:$0xff] }
 0x20b   :  { %v3844_v38 = vadd.f32 %v6148_v59, %v3843_v34  ;;  %v3978_v57 = vmul.f32 %v6148_v59, %v6148_v59 }
 0x20c   :  { %v3146_v50 = vpop.f32.mrb[28].mxu0  ;;  %5586 = vmatmul.mubr.msk.f32.gmra.mrb[136].mxu1 %vm373_vm0, %v189_v26  ;;  %v2574_v26 = vld [vmem:[%s9031_s2 + $0x230] sm:$0xff] }
 0x20d   :  { %v4102_v18 = vadd.f32 %v4101_v37, %v3978_v57  ;;  %v6149_v2 = vadd.f32 %v3146_v50, %v7409_v42  ;;  %v5802_v10 = vpop.f32.mrb[29].mxu0  ;;  %5960 = vmatmul.mubr.msk.f32.gmra.mrb[134].mxu0 %vm2630_vm3, %v2571_v53  ;;  %5588 = vmatprep.mubr.msk.f32.mxu1 %vm6513_vm1, %v6512_v0 }
 0x20e   :  { %5962 = vmatprep.mubr.msk.f32.mxu0 %vm6513_vm1, %v6512_v0  ;;  %v2575_v10 = vld [vmem:[%s9031_s2 + $0x238] sm:$0xff] }
 0x20f   :  { %v3845_v42 = vadd.f32 %v6149_v2, %v3844_v38  ;;  %v3979_v7 = vmul.f32 %v6149_v2, %v6149_v2  ;;  %v193_v2 = vld [vmem:[%s9029_s0 + $0x240] sm:$0xff] }
 0x210   :  { %v3151_v29 = vpop.f32.mrb[30].mxu0  ;;  %5589 = vmatmul.mubr.msk.f32.gmra.mrb[138].mxu1 %vm373_vm0, %v190_v45 }
 0x211   :  { %v4103_v49 = vadd.f32 %v4102_v18, %v3979_v7  ;;  %v6150_v11 = vadd.f32 %v3151_v29, %v7423_v46  ;;  %v5805_v22 = vpop.f32.mrb[31].mxu0  ;;  %5963 = vmatmul.mubr.msk.f32.gmra.mrb[136].mxu0 %vm2630_vm3, %v2572_v30  ;;  %5591 = vmatprep.mubr.msk.f32.mxu1 %vm6513_vm1, %v6512_v0 }
 0x212   :  { %5965 = vmatprep.mubr.msk.f32.mxu0 %vm6513_vm1, %v6512_v0 }
 0x213   :  { %v3846_v46 = vadd.f32 %v6150_v11, %v3845_v42  ;;  %v3980_v34 = vmul.f32 %v6150_v11, %v6150_v11  ;;  %v2576_v11 = vld [vmem:[%s9031_s2 + $0x240] sm:$0xff] }
 0x214   :  { %v3156_v14 = vpop.f32.mrb[32].mxu0  ;;  %5592 = vmatmul.mubr.msk.f32.gmra.mrb[140].mxu1 %vm373_vm0, %v191_v61 }
 0x215   :  { %v4104_v6 = vadd.f32 %v4103_v49, %v3980_v34  ;;  %v6151_v37 = vadd.f32 %v3156_v14, %v7437_v51  ;;  %v5808_v59 = vpop.f32.mrb[33].mxu0  ;;  %5966 = vmatmul.mubr.msk.f32.gmra.mrb[138].mxu0 %vm2630_vm3, %v2573_v35  ;;  %5594 = vmatprep.mubr.msk.f32.mxu1 %vm6513_vm1, %v6512_v0  ;;  %v194_v49 = vld [vmem:[%s9029_s0 + $0x248] sm:$0xff]  ;;  %v195_v14 = vld [vmem:[%s9029_s0 + $0x250] sm:$0xff] }
 0x216   :  { %5968 = vmatprep.mubr.msk.f32.mxu0 %vm6513_vm1, %v6512_v0 }
 0x217   :  { %v3847_v51 = vadd.f32 %v6151_v37, %v3846_v46  ;;  %v3981_v53 = vmul.f32 %v6151_v37, %v6151_v37 }
 0x218   :  { %v3161_v38 = vpop.f32.mrb[34].mxu0  ;;  %5595 = vmatmul.mubr.msk.f32.gmra.mrb[142].mxu1 %vm373_vm0, %v192_v17 }
 0x219   :  { %v4105_v57 = vadd.f32 %v4104_v6, %v3981_v53  ;;  %v6152_v50 = vadd.f32 %v3161_v38, %v7451_v56  ;;  %v5811_v18 = vpop.f32.mrb[35].mxu0  ;;  %5969 = vmatmul.mubr.msk.f32.gmra.mrb[140].mxu0 %vm2630_vm3, %v2574_v26  ;;  %5597 = vmatprep.mubr.msk.f32.mxu1 %vm6513_vm1, %v6512_v0  ;;  %v2577_v6 = vld [vmem:[%s9031_s2 + $0x248] sm:$0xff]  ;;  %v196_v53 = vld [vmem:[%s9029_s0 + $0x258] sm:$0xff]  ;;  %v2578_v38 = vld [vmem:[%s9031_s2 + $0x250] sm:$0xff] }
 0x21a   :  { %5971 = vmatprep.mubr.msk.f32.mxu0 %vm6513_vm1, %v6512_v0 }
 0x21b   :  { %v3848_v56 = vadd.f32 %v6152_v50, %v3847_v51  ;;  %v3982_v45 = vmul.f32 %v6152_v50, %v6152_v50 }
 0x21c   :  { %v3166_v30 = vpop.f32.mrb[36].mxu0  ;;  %5598 = vmatmul.mubr.msk.f32.gmra.mrb[144].mxu1 %vm373_vm0, %v193_v2 }
 0x21d   :  { %v4106_v42 = vadd.f32 %v4105_v57, %v3982_v45  ;;  %v6153_v7 = vadd.f32 %v3166_v30, %v7465_v62  ;;  %v5814_v29 = vpop.f32.mrb[37].mxu0  ;;  %5972 = vmatmul.mubr.msk.f32.gmra.mrb[142].mxu0 %vm2630_vm3, %v2575_v10  ;;  %5600 = vmatprep.mubr.msk.f32.mxu1 %vm6513_vm1, %v6512_v0  ;;  %v2579_v45 = vld [vmem:[%s9031_s2 + $0x258] sm:$0xff] }
 0x21e   :  { %5974 = vmatprep.mubr.msk.f32.mxu0 %vm6513_vm1, %v6512_v0 }
 0x21f   :  { %v3849_v62 = vadd.f32 %v6153_v7, %v3848_v56  ;;  %v3983_v22 = vmul.f32 %v6153_v7, %v6153_v7  ;;  %v197_v56 = vld [vmem:[%s9029_s0 + $0x260] sm:$0xff] }
 0x220   :  { %v3171_v61 = vpop.f32.mrb[38].mxu0  ;;  %5601 = vmatmul.mubr.msk.f32.gmra.mrb[146].mxu1 %vm373_vm0, %v194_v49 }
 0x221   :  { %v4107_v35 = vadd.f32 %v4106_v42, %v3983_v22  ;;  %v6154_v46 = vadd.f32 %v3171_v61, %v7479_v4  ;;  %v5817_v34 = vpop.f32.mrb[39].mxu0  ;;  %5975 = vmatmul.mubr.msk.f32.gmra.mrb[144].mxu0 %vm2630_vm3, %v2576_v11  ;;  %5603 = vmatprep.mubr.msk.f32.mxu1 %vm6513_vm1, %v6512_v0  ;;  %v198_v11 = vld [vmem:[%s9029_s0 + $0x268] sm:$0xff] }
 0x222   :  { %5977 = vmatprep.mubr.msk.f32.mxu0 %vm6513_vm1, %v6512_v0 }
 0x223   :  { %v3850_v4 = vadd.f32 %v6154_v46, %v3849_v62  ;;  %v3984_v37 = vmul.f32 %v6154_v46, %v6154_v46  ;;  %v2580_v62 = vld [vmem:[%s9031_s2 + $0x260] sm:$0xff] }
 0x224   :  { %v3176_v59 = vpop.f32.mrb[40].mxu0  ;;  %5604 = vmatmul.mubr.msk.f32.gmra.mrb[148].mxu1 %vm373_vm0, %v195_v14  ;;  %v199_v14 = vld [vmem:[%s9029_s0 + $0x270] sm:$0xff] }
 0x225   :  { %v4108_v17 = vadd.f32 %v4107_v35, %v3984_v37  ;;  %v6155_v26 = vadd.f32 %v3176_v59, %v7493_v9  ;;  %v5820_v51 = vpop.f32.mrb[41].mxu0  ;;  %5978 = vmatmul.mubr.msk.f32.gmra.mrb[146].mxu0 %vm2630_vm3, %v2577_v6  ;;  %5606 = vmatprep.mubr.msk.f32.mxu1 %vm6513_vm1, %v6512_v0  ;;  %v2581_v6 = vld [vmem:[%s9031_s2 + $0x268] sm:$0xff] }
 0x226   :  { %5980 = vmatprep.mubr.msk.f32.mxu0 %vm6513_vm1, %v6512_v0  ;;  %v200_v51 = vld [vmem:[%s9029_s0 + $0x278] sm:$0xff] }
 0x227   :  { %v3851_v9 = vadd.f32 %v6155_v26, %v3850_v4  ;;  %v3985_v57 = vmul.f32 %v6155_v26, %v6155_v26 }
 0x228   :  { %v3181_v50 = vpop.f32.mrb[42].mxu0  ;;  %5607 = vmatmul.mubr.msk.f32.gmra.mrb[150].mxu1 %vm373_vm0, %v196_v53  ;;  %v2582_v53 = vld [vmem:[%s9031_s2 + $0x270] sm:$0xff] }
 0x229   :  { %v4109_v18 = vadd.f32 %v4108_v17, %v3985_v57  ;;  %v6156_v2 = vadd.f32 %v3181_v50, %v7507_v15  ;;  %v5823_v10 = vpop.f32.mrb[43].mxu0  ;;  %5981 = vmatmul.mubr.msk.f32.gmra.mrb[148].mxu0 %vm2630_vm3, %v2578_v38  ;;  %5609 = vmatprep.mubr.msk.f32.mxu1 %vm6513_vm1, %v6512_v0 }
 0x22a   :  { %5983 = vmatprep.mubr.msk.f32.mxu0 %vm6513_vm1, %v6512_v0  ;;  %v2583_v10 = vld [vmem:[%s9031_s2 + $0x278] sm:$0xff] }
 0x22b   :  { %v3852_v15 = vadd.f32 %v6156_v2, %v3851_v9  ;;  %v3986_v30 = vmul.f32 %v6156_v2, %v6156_v2  ;;  %v201_v2 = vld [vmem:[%s9029_s0 + $0x280] sm:$0xff] }
 0x22c   :  { %v3186_v42 = vpop.f32.mrb[44].mxu0  ;;  %5610 = vmatmul.mubr.msk.f32.gmra.mrb[152].mxu1 %vm373_vm0, %v197_v56 }
 0x22d   :  { %v4110_v7 = vadd.f32 %v4109_v18, %v3986_v30  ;;  %v6157_v29 = vadd.f32 %v3186_v42, %v7521_v20  ;;  %v5826_v49 = vpop.f32.mrb[45].mxu0  ;;  %5984 = vmatmul.mubr.msk.f32.gmra.mrb[150].mxu0 %vm2630_vm3, %v2579_v45  ;;  %5612 = vmatprep.mubr.msk.f32.mxu1 %vm6513_vm1, %v6512_v0 }
 0x22e   :  { %5986 = vmatprep.mubr.msk.f32.mxu0 %vm6513_vm1, %v6512_v0 }
 0x22f   :  { %v3853_v20 = vadd.f32 %v6157_v29, %v3852_v15  ;;  %v3987_v22 = vmul.f32 %v6157_v29, %v6157_v29  ;;  %v2584_v29 = vld [vmem:[%s9031_s2 + $0x280] sm:$0xff] }
 0x230   :  { %v3191_v61 = vpop.f32.mrb[46].mxu0  ;;  %5613 = vmatmul.mubr.msk.f32.gmra.mrb[154].mxu1 %vm373_vm0, %v198_v11 }
 0x231   :  { %v4111_v35 = vadd.f32 %v4110_v7, %v3987_v22  ;;  %v6158_v46 = vadd.f32 %v3191_v61, %v7535_v25  ;;  %v5829_v34 = vpop.f32.mrb[47].mxu0  ;;  %5987 = vmatmul.mubr.msk.f32.gmra.mrb[152].mxu0 %vm2630_vm3, %v2580_v62  ;;  %5615 = vmatprep.mubr.msk.f32.mxu1 %vm6513_vm1, %v6512_v0  ;;  %v202_v7 = vld [vmem:[%s9029_s0 + $0x288] sm:$0xff]  ;;  %v203_v61 = vld [vmem:[%s9029_s0 + $0x290] sm:$0xff] }
 0x232   :  { %5989 = vmatprep.mubr.msk.f32.mxu0 %vm6513_vm1, %v6512_v0 }
 0x233   :  { %v3854_v25 = vadd.f32 %v6158_v46, %v3853_v20  ;;  %v3988_v4 = vmul.f32 %v6158_v46, %v6158_v46 }
 0x234   :  { %v3196_v37 = vpop.f32.mrb[48].mxu0  ;;  %5616 = vmatmul.mubr.msk.f32.gmra.mrb[156].mxu1 %vm373_vm0, %v199_v14 }
 0x235   :  { %v4112_v59 = vadd.f32 %v4111_v35, %v3988_v4  ;;  %v6159_v17 = vadd.f32 %v3196_v37, %v7549_v31  ;;  %v5832_v26 = vpop.f32.mrb[49].mxu0  ;;  %5990 = vmatmul.mubr.msk.f32.gmra.mrb[154].mxu0 %vm2630_vm3, %v2581_v6  ;;  %5618 = vmatprep.mubr.msk.f32.mxu1 %vm6513_vm1, %v6512_v0  ;;  %v2585_v35 = vld [vmem:[%s9031_s2 + $0x288] sm:$0xff]  ;;  %v204_v4 = vld [vmem:[%s9029_s0 + $0x298] sm:$0xff]  ;;  %v2586_v37 = vld [vmem:[%s9031_s2 + $0x290] sm:$0xff] }
 0x236   :  { %5992 = vmatprep.mubr.msk.f32.mxu0 %vm6513_vm1, %v6512_v0 }
 0x237   :  { %v3855_v31 = vadd.f32 %v6159_v17, %v3854_v25  ;;  %v3989_v38 = vmul.f32 %v6159_v17, %v6159_v17 }
 0x238   :  { %v3201_v9 = vpop.f32.mrb[50].mxu0  ;;  %5619 = vmatmul.mubr.msk.f32.gmra.mrb[158].mxu1 %vm373_vm0, %v200_v51 }
 0x239   :  { %v4113_v57 = vadd.f32 %v4112_v59, %v3989_v38  ;;  %v6160_v50 = vadd.f32 %v3201_v9, %v7563_v36  ;;  %v5835_v18 = vpop.f32.mrb[51].mxu0  ;;  %5993 = vmatmul.mubr.msk.f32.gmra.mrb[156].mxu0 %vm2630_vm3, %v2582_v53  ;;  %5621 = vmatprep.mubr.msk.f32.mxu1 %vm6513_vm1, %v6512_v0  ;;  %v2587_v38 = vld [vmem:[%s9031_s2 + $0x298] sm:$0xff] }
 0x23a   :  { %5995 = vmatprep.mubr.msk.f32.mxu0 %vm6513_vm1, %v6512_v0 }
 0x23b   :  { %v3856_v36 = vadd.f32 %v6160_v50, %v3855_v31  ;;  %v3990_v56 = vmul.f32 %v6160_v50, %v6160_v50  ;;  %v205_v31 = vld [vmem:[%s9029_s0 + $0x2a0] sm:$0xff] }
 0x23c   :  { %v3206_v45 = vpop.f32.mrb[52].mxu0  ;;  %5622 = vmatmul.mubr.msk.f32.gmra.mrb[160].mxu1 %vm373_vm0, %v201_v2 }
 0x23d   :  { %v4114_v15 = vadd.f32 %v4113_v57, %v3990_v56  ;;  %v6161_v30 = vadd.f32 %v3206_v45, %v7577_v41  ;;  %v5838_v42 = vpop.f32.mrb[53].mxu0  ;;  %5996 = vmatmul.mubr.msk.f32.gmra.mrb[158].mxu0 %vm2630_vm3, %v2583_v10  ;;  %5624 = vmatprep.mubr.msk.f32.mxu1 %vm6513_vm1, %v6512_v0  ;;  %v206_v10 = vld [vmem:[%s9029_s0 + $0x2a8] sm:$0xff] }
 0x23e   :  { %5998 = vmatprep.mubr.msk.f32.mxu0 %vm6513_vm1, %v6512_v0 }
 0x23f   :  { %v3857_v41 = vadd.f32 %v6161_v30, %v3856_v36  ;;  %v3991_v49 = vmul.f32 %v6161_v30, %v6161_v30  ;;  %v2588_v36 = vld [vmem:[%s9031_s2 + $0x2a0] sm:$0xff] }
 0x240   :  { %v3211_v11 = vpop.f32.mrb[54].mxu0  ;;  %5625 = vmatmul.mubr.msk.f32.gmra.mrb[162].mxu1 %vm373_vm0, %v202_v7  ;;  %v207_v7 = vld [vmem:[%s9029_s0 + $0x2b0] sm:$0xff] }
 0x241   :  { %v4115_v62 = vadd.f32 %v4114_v15, %v3991_v49  ;;  %v6162_v20 = vadd.f32 %v3211_v11, %v7591_v47  ;;  %v5841_v22 = vpop.f32.mrb[55].mxu0  ;;  %5999 = vmatmul.mubr.msk.f32.gmra.mrb[160].mxu0 %vm2630_vm3, %v2584_v29  ;;  %5627 = vmatprep.mubr.msk.f32.mxu1 %vm6513_vm1, %v6512_v0  ;;  %v2589_v29 = vld [vmem:[%s9031_s2 + $0x2a8] sm:$0xff] }
 0x242   :  { %6001 = vmatprep.mubr.msk.f32.mxu0 %vm6513_vm1, %v6512_v0  ;;  %v208_v22 = vld [vmem:[%s9029_s0 + $0x2b8] sm:$0xff] }
 0x243   :  { %v3858_v47 = vadd.f32 %v6162_v20, %v3857_v41  ;;  %v3992_v46 = vmul.f32 %v6162_v20, %v6162_v20 }
 0x244   :  { %v3216_v34 = vpop.f32.mrb[56].mxu0  ;;  %5628 = vmatmul.mubr.msk.f32.gmra.mrb[164].mxu1 %vm373_vm0, %v203_v61  ;;  %v2590_v61 = vld [vmem:[%s9031_s2 + $0x2b0] sm:$0xff] }
 0x245   :  { %v4116_v14 = vadd.f32 %v4115_v62, %v3992_v46  ;;  %v6163_v6 = vadd.f32 %v3216_v34, %v7605_v54  ;;  %v5844_v25 = vpop.f32.mrb[57].mxu0  ;;  %6002 = vmatmul.mubr.msk.f32.gmra.mrb[162].mxu0 %vm2630_vm3, %v2585_v35  ;;  %5630 = vmatprep.mubr.msk.f32.mxu1 %vm6513_vm1, %v6512_v0 }
 0x246   :  { %6004 = vmatprep.mubr.msk.f32.mxu0 %vm6513_vm1, %v6512_v0  ;;  %v2591_v25 = vld [vmem:[%s9031_s2 + $0x2b8] sm:$0xff] }
 0x247   :  { %v3859_v54 = vadd.f32 %v6163_v6, %v3858_v47  ;;  %v3993_v59 = vmul.f32 %v6163_v6, %v6163_v6  ;;  %v209_v6 = vld [vmem:[%s9029_s0 + $0x2c0] sm:$0xff] }
 0x248   :  { %v3221_v17 = vpop.f32.mrb[58].mxu0  ;;  %5631 = vmatmul.mubr.msk.f32.gmra.mrb[166].mxu1 %vm373_vm0, %v204_v4 }
 0x249   :  { %v4117_v26 = vadd.f32 %v4116_v14, %v3993_v59  ;;  %v6164_v51 = vadd.f32 %v3221_v17, %v7619_v60  ;;  %v5847_v53 = vpop.f32.mrb[59].mxu0  ;;  %6005 = vmatmul.mubr.msk.f32.gmra.mrb[164].mxu0 %vm2630_vm3, %v2586_v37  ;;  %5633 = vmatprep.mubr.msk.f32.mxu1 %vm6513_vm1, %v6512_v0 }
 0x24a   :  { %6007 = vmatprep.mubr.msk.f32.mxu0 %vm6513_vm1, %v6512_v0 }
 0x24b   :  { %v3860_v60 = vadd.f32 %v6164_v51, %v3859_v54  ;;  %v3994_v9 = vmul.f32 %v6164_v51, %v6164_v51  ;;  %v2592_v51 = vld [vmem:[%s9031_s2 + $0x2c0] sm:$0xff] }
 0x24c   :  { %v3226_v57 = vpop.f32.mrb[60].mxu0  ;;  %5634 = vmatmul.mubr.msk.f32.gmra.mrb[168].mxu1 %vm373_vm0, %v205_v31 }
 0x24d   :  { %v4118_v50 = vadd.f32 %v4117_v26, %v3994_v9  ;;  %v6165_v18 = vadd.f32 %v3226_v57, %v7633_v5  ;;  %v5850_v2 = vpop.f32.mrb[61].mxu0  ;;  %6008 = vmatmul.mubr.msk.f32.gmra.mrb[166].mxu0 %vm2630_vm3, %v2587_v38  ;;  %5636 = vmatprep.mubr.msk.f32.mxu1 %vm6513_vm1, %v6512_v0  ;;  %v210_v26 = vld [vmem:[%s9029_s0 + $0x2c8] sm:$0xff]  ;;  %v211_v57 = vld [vmem:[%s9029_s0 + $0x2d0] sm:$0xff] }
 0x24e   :  { %6010 = vmatprep.mubr.msk.f32.mxu0 %vm6513_vm1, %v6512_v0 }
 0x24f   :  { %v3861_v5 = vadd.f32 %v6165_v18, %v3860_v60  ;;  %v3995_v56 = vmul.f32 %v6165_v18, %v6165_v18 }
 0x250   :  { %v3231_v45 = vpop.f32.mrb[62].mxu0  ;;  %5637 = vmatmul.mubr.msk.f32.gmra.mrb[170].mxu1 %vm373_vm0, %v206_v10 }
 0x251   :  { %v4119_v15 = vadd.f32 %v4118_v50, %v3995_v56  ;;  %v6166_v30 = vadd.f32 %v3231_v45, %v7647_v12  ;;  %v5853_v42 = vpop.f32.mrb[63].mxu0  ;;  %6011 = vmatmul.mubr.msk.f32.gmra.mrb[168].mxu0 %vm2630_vm3, %v2588_v36  ;;  %5639 = vmatprep.mubr.msk.f32.mxu1 %vm6513_vm1, %v6512_v0  ;;  %v2593_v50 = vld [vmem:[%s9031_s2 + $0x2c8] sm:$0xff]  ;;  %v212_v56 = vld [vmem:[%s9029_s0 + $0x2d8] sm:$0xff]  ;;  %v2594_v45 = vld [vmem:[%s9031_s2 + $0x2d0] sm:$0xff] }
 0x252   :  { %6013 = vmatprep.mubr.msk.f32.mxu0 %vm6513_vm1, %v6512_v0 }
 0x253   :  { %v3862_v12 = vadd.f32 %v6166_v30, %v3861_v5  ;;  %v3996_v41 = vmul.f32 %v6166_v30, %v6166_v30 }
 0x254   :  { %v3236_v49 = vpop.f32.mrb[64].mxu0  ;;  %5640 = vmatmul.mubr.msk.f32.gmra.mrb[172].mxu1 %vm373_vm0, %v207_v7 }
 0x255   :  { %v4120_v11 = vadd.f32 %v4119_v15, %v3996_v41  ;;  %v6167_v62 = vadd.f32 %v3236_v49, %v7661_v19  ;;  %v5856_v20 = vpop.f32.mrb[65].mxu0  ;;  %6014 = vmatmul.mubr.msk.f32.gmra.mrb[170].mxu0 %vm2630_vm3, %v2589_v29  ;;  %5642 = vmatprep.mubr.msk.f32.mxu1 %vm6513_vm1, %v6512_v0  ;;  %v2595_v41 = vld [vmem:[%s9031_s2 + $0x2d8] sm:$0xff] }
 0x256   :  { %6016 = vmatprep.mubr.msk.f32.mxu0 %vm6513_vm1, %v6512_v0 }
 0x257   :  { %v3863_v19 = vadd.f32 %v6167_v62, %v3862_v12  ;;  %v3997_v35 = vmul.f32 %v6167_v62, %v6167_v62  ;;  %v213_v12 = vld [vmem:[%s9029_s0 + $0x2e0] sm:$0xff] }
 0x258   :  { %v3241_v47 = vpop.f32.mrb[66].mxu0  ;;  %5643 = vmatmul.mubr.msk.f32.gmra.mrb[174].mxu1 %vm373_vm0, %v208_v22 }
 0x259   :  { %v4121_v46 = vadd.f32 %v4120_v11, %v3997_v35  ;;  %v6168_v34 = vadd.f32 %v3241_v47, %v7675_v27  ;;  %v5859_v14 = vpop.f32.mrb[67].mxu0  ;;  %6017 = vmatmul.mubr.msk.f32.gmra.mrb[172].mxu0 %vm2630_vm3, %v2590_v61  ;;  %5645 = vmatprep.mubr.msk.f32.mxu1 %vm6513_vm1, %v6512_v0  ;;  %v214_v61 = vld [vmem:[%s9029_s0 + $0x2e8] sm:$0xff] }
 0x25a   :  { %6019 = vmatprep.mubr.msk.f32.mxu0 %vm6513_vm1, %v6512_v0 }
 0x25b   :  { %v3864_v27 = vadd.f32 %v6168_v34, %v3863_v19  ;;  %v3998_v4 = vmul.f32 %v6168_v34, %v6168_v34  ;;  %v2596_v19 = vld [vmem:[%s9031_s2 + $0x2e0] sm:$0xff] }
 0x25c   :  { %v3246_v37 = vpop.f32.mrb[68].mxu0  ;;  %5646 = vmatmul.mubr.msk.f32.gmra.mrb[176].mxu1 %vm373_vm0, %v209_v6  ;;  %v215_v6 = vld [vmem:[%s9029_s0 + $0x2f0] sm:$0xff] }
 0x25d   :  { %v4122_v54 = vadd.f32 %v4121_v46, %v3998_v4  ;;  %v6169_v59 = vadd.f32 %v3246_v37, %v7689_v33  ;;  %v5862_v17 = vpop.f32.mrb[69].mxu0  ;;  %6020 = vmatmul.mubr.msk.f32.gmra.mrb[174].mxu0 %vm2630_vm3, %v2591_v25  ;;  %5648 = vmatprep.mubr.msk.f32.mxu1 %vm6513_vm1, %v6512_v0  ;;  %v2597_v25 = vld [vmem:[%s9031_s2 + $0x2e8] sm:$0xff] }
 0x25e   :  { %6022 = vmatprep.mubr.msk.f32.mxu0 %vm6513_vm1, %v6512_v0  ;;  %v216_v17 = vld [vmem:[%s9029_s0 + $0x2f8] sm:$0xff] }
 0x25f   :  { %v3865_v33 = vadd.f32 %v6169_v59, %v3864_v27  ;;  %v3999_v53 = vmul.f32 %v6169_v59, %v6169_v59 }
 0x260   :  { %v3251_v31 = vpop.f32.mrb[70].mxu0  ;;  %5649 = vmatmul.mubr.msk.f32.gmra.mrb[178].mxu1 %vm373_vm0, %v210_v26  ;;  %v2598_v26 = vld [vmem:[%s9031_s2 + $0x2f0] sm:$0xff] }
 0x261   :  { %v4123_v38 = vadd.f32 %v4122_v54, %v3999_v53  ;;  %v6170_v60 = vadd.f32 %v3251_v31, %v7703_v40  ;;  %v5865_v9 = vpop.f32.mrb[71].mxu0  ;;  %6023 = vmatmul.mubr.msk.f32.gmra.mrb[176].mxu0 %vm2630_vm3, %v2592_v51  ;;  %5651 = vmatprep.mubr.msk.f32.mxu1 %vm6513_vm1, %v6512_v0 }
 0x262   :  { %6025 = vmatprep.mubr.msk.f32.mxu0 %vm6513_vm1, %v6512_v0  ;;  %v2599_v9 = vld [vmem:[%s9031_s2 + $0x2f8] sm:$0xff] }
 0x263   :  { %v3866_v40 = vadd.f32 %v6170_v60, %v3865_v33  ;;  %v4000_v18 = vmul.f32 %v6170_v60, %v6170_v60  ;;  %v217_v60 = vld [vmem:[%s9029_s0 + $0x300] sm:$0xff] }
 0x264   :  { %v3256_v2 = vpop.f32.mrb[72].mxu0  ;;  %5652 = vmatmul.mubr.msk.f32.gmra.mrb[180].mxu1 %vm373_vm0, %v211_v57 }
 0x265   :  { %v4124_v10 = vadd.f32 %v4123_v38, %v4000_v18  ;;  %v6171_v36 = vadd.f32 %v3256_v2, %v7717_v48  ;;  %v5868_v5 = vpop.f32.mrb[73].mxu0  ;;  %6026 = vmatmul.mubr.msk.f32.gmra.mrb[178].mxu0 %vm2630_vm3, %v2593_v50  ;;  %5654 = vmatprep.mubr.msk.f32.mxu1 %vm6513_vm1, %v6512_v0 }
 0x266   :  { %6028 = vmatprep.mubr.msk.f32.mxu0 %vm6513_vm1, %v6512_v0 }
 0x267   :  { %v3867_v48 = vadd.f32 %v6171_v36, %v3866_v40  ;;  %v4001_v15 = vmul.f32 %v6171_v36, %v6171_v36  ;;  %v2600_v36 = vld [vmem:[%s9031_s2 + $0x300] sm:$0xff] }
 0x268   :  { %v3261_v30 = vpop.f32.mrb[74].mxu0  ;;  %5655 = vmatmul.mubr.msk.f32.gmra.mrb[182].mxu1 %vm373_vm0, %v212_v56 }
 0x269   :  { %v4125_v42 = vadd.f32 %v4124_v10, %v4001_v15  ;;  %v6172_v7 = vadd.f32 %v3261_v30, %v7731_v58  ;;  %v5871_v29 = vpop.f32.mrb[75].mxu0  ;;  %6029 = vmatmul.mubr.msk.f32.gmra.mrb[180].mxu0 %vm2630_vm3, %v2594_v45  ;;  %5657 = vmatprep.mubr.msk.f32.mxu1 %vm6513_vm1, %v6512_v0  ;;  %v218_v10 = vld [vmem:[%s9029_s0 + $0x308] sm:$0xff]  ;;  %v219_v30 = vld [vmem:[%s9029_s0 + $0x310] sm:$0xff] }
 0x26a   :  { %6031 = vmatprep.mubr.msk.f32.mxu0 %vm6513_vm1, %v6512_v0 }
 0x26b   :  { %v3868_v58 = vadd.f32 %v6172_v7, %v3867_v48  ;;  %v4002_v49 = vmul.f32 %v6172_v7, %v6172_v7 }
 0x26c   :  { %v3266_v11 = vpop.f32.mrb[76].mxu0  ;;  %5658 = vmatmul.mubr.msk.f32.gmra.mrb[184].mxu1 %vm373_vm0, %v213_v12 }
 0x26d   :  { %v4126_v62 = vadd.f32 %v4125_v42, %v4002_v49  ;;  %v6173_v20 = vadd.f32 %v3266_v11, %v7745_v3  ;;  %v5874_v22 = vpop.f32.mrb[77].mxu0  ;;  %6032 = vmatmul.mubr.msk.f32.gmra.mrb[182].mxu0 %vm2630_vm3, %v2595_v41  ;;  %5660 = vmatprep.mubr.msk.f32.mxu1 %vm6513_vm1, %v6512_v0  ;;  %v2601_v42 = vld [vmem:[%s9031_s2 + $0x308] sm:$0xff]  ;;  %v220_v49 = vld [vmem:[%s9029_s0 + $0x318] sm:$0xff]  ;;  %v2602_v11 = vld [vmem:[%s9031_s2 + $0x310] sm:$0xff] }
 0x26e   :  { %6034 = vmatprep.mubr.msk.f32.mxu0 %vm6513_vm1, %v6512_v0 }
 0x26f   :  { %v3869_v3 = vadd.f32 %v6173_v20, %v3868_v58  ;;  %v4003_v35 = vmul.f32 %v6173_v20, %v6173_v20 }
 0x270   :  { %v3271_v47 = vpop.f32.mrb[78].mxu0  ;;  %5661 = vmatmul.mubr.msk.f32.gmra.mrb[186].mxu1 %vm373_vm0, %v214_v61 }
 0x271   :  { %v4127_v46 = vadd.f32 %v4126_v62, %v4003_v35  ;;  %v6174_v34 = vadd.f32 %v3271_v47, %v7759_v13  ;;  %v5877_v14 = vpop.f32.mrb[79].mxu0  ;;  %6035 = vmatmul.mubr.msk.f32.gmra.mrb[184].mxu0 %vm2630_vm3, %v2596_v19  ;;  %5663 = vmatprep.mubr.msk.f32.mxu1 %vm6513_vm1, %v6512_v0  ;;  %v2603_v35 = vld [vmem:[%s9031_s2 + $0x318] sm:$0xff] }
 0x272   :  { %6037 = vmatprep.mubr.msk.f32.mxu0 %vm6513_vm1, %v6512_v0 }
 0x273   :  { %v3870_v13 = vadd.f32 %v6174_v34, %v3869_v3  ;;  %v4004_v27 = vmul.f32 %v6174_v34, %v6174_v34  ;;  %v221_v3 = vld [vmem:[%s9029_s0 + $0x320] sm:$0xff] }
 0x274   :  { %v3276_v4 = vpop.f32.mrb[80].mxu0  ;;  %5664 = vmatmul.mubr.msk.f32.gmra.mrb[188].mxu1 %vm373_vm0, %v215_v6 }
 0x275   :  { %v4128_v37 = vadd.f32 %v4127_v46, %v4004_v27  ;;  %v6175_v54 = vadd.f32 %v3276_v4, %v7773_v23  ;;  %v5880_v59 = vpop.f32.mrb[81].mxu0  ;;  %6038 = vmatmul.mubr.msk.f32.gmra.mrb[186].mxu0 %vm2630_vm3, %v2597_v25  ;;  %5666 = vmatprep.mubr.msk.f32.mxu1 %vm6513_vm1, %v6512_v0  ;;  %v222_v25 = vld [vmem:[%s9029_s0 + $0x328] sm:$0xff] }
 0x276   :  { %6040 = vmatprep.mubr.msk.f32.mxu0 %vm6513_vm1, %v6512_v0 }
 0x277   :  { %v3871_v23 = vadd.f32 %v6175_v54, %v3870_v13  ;;  %v4005_v51 = vmul.f32 %v6175_v54, %v6175_v54  ;;  %v2604_v13 = vld [vmem:[%s9031_s2 + $0x320] sm:$0xff] }
 0x278   :  { %v3281_v33 = vpop.f32.mrb[82].mxu0  ;;  %5667 = vmatmul.mubr.msk.f32.gmra.mrb[190].mxu1 %vm373_vm0, %v216_v17  ;;  %v223_v17 = vld [vmem:[%s9029_s0 + $0x330] sm:$0xff] }
 0x279   :  { %v4129_v53 = vadd.f32 %v4128_v37, %v4005_v51  ;;  %v6176_v31 = vadd.f32 %v3281_v33, %v7787_v32  ;;  %v5883_v38 = vpop.f32.mrb[83].mxu0  ;;  %6041 = vmatmul.mubr.msk.f32.gmra.mrb[188].mxu0 %vm2630_vm3, %v2598_v26  ;;  %5669 = vmatprep.mubr.msk.f32.mxu1 %vm6513_vm1, %v6512_v0  ;;  %v2605_v26 = vld [vmem:[%s9031_s2 + $0x328] sm:$0xff] }
 0x27a   :  { %6043 = vmatprep.mubr.msk.f32.mxu0 %vm6513_vm1, %v6512_v0  ;;  %v224_v38 = vld [vmem:[%s9029_s0 + $0x338] sm:$0xff] }
 0x27b   :  { %v3872_v32 = vadd.f32 %v6176_v31, %v3871_v23  ;;  %v4006_v57 = vmul.f32 %v6176_v31, %v6176_v31 }
 0x27c   :  { %v3286_v50 = vpop.f32.mrb[84].mxu0  ;;  %5670 = vmatmul.mubr.msk.f32.gmra.mrb[192].mxu1 %vm373_vm0, %v217_v60  ;;  %v2606_v60 = vld [vmem:[%s9031_s2 + $0x330] sm:$0xff] }
 0x27d   :  { %v4130_v40 = vadd.f32 %v4129_v53, %v4006_v57  ;;  %v6177_v18 = vadd.f32 %v3286_v50, %v7801_v43  ;;  %v5886_v2 = vpop.f32.mrb[85].mxu0  ;;  %6044 = vmatmul.mubr.msk.f32.gmra.mrb[190].mxu0 %vm2630_vm3, %v2599_v9  ;;  %5672 = vmatprep.mubr.msk.f32.mxu1 %vm6513_vm1, %v6512_v0 }
 0x27e   :  { %6046 = vmatprep.mubr.msk.f32.mxu0 %vm6513_vm1, %v6512_v0  ;;  %v2607_v2 = vld [vmem:[%s9031_s2 + $0x338] sm:$0xff] }
 0x27f   :  { %v3873_v43 = vadd.f32 %v6177_v18, %v3872_v32  ;;  %v4007_v5 = vmul.f32 %v6177_v18, %v6177_v18  ;;  %v225_v18 = vld [vmem:[%s9029_s0 + $0x340] sm:$0xff] }
 0x280   :  { %v3291_v56 = vpop.f32.mrb[86].mxu0  ;;  %5673 = vmatmul.mubr.msk.f32.gmra.mrb[194].mxu1 %vm373_vm0, %v218_v10 }
 0x281   :  { %v4131_v45 = vadd.f32 %v4130_v40, %v4007_v5  ;;  %v6178_v48 = vadd.f32 %v3291_v56, %v7815_v52  ;;  %v5889_v15 = vpop.f32.mrb[87].mxu0  ;;  %6047 = vmatmul.mubr.msk.f32.gmra.mrb[192].mxu0 %vm2630_vm3, %v2600_v36  ;;  %5675 = vmatprep.mubr.msk.f32.mxu1 %vm6513_vm1, %v6512_v0 }
 0x282   :  { %6049 = vmatprep.mubr.msk.f32.mxu0 %vm6513_vm1, %v6512_v0 }
 0x283   :  { %v3874_v52 = vadd.f32 %v6178_v48, %v3873_v43  ;;  %v4008_v7 = vmul.f32 %v6178_v48, %v6178_v48  ;;  %v2608_v48 = vld [vmem:[%s9031_s2 + $0x340] sm:$0xff] }
 0x284   :  { %v3296_v29 = vpop.f32.mrb[88].mxu0  ;;  %5676 = vmatmul.mubr.msk.f32.gmra.mrb[196].mxu1 %vm373_vm0, %v219_v30 }
 0x285   :  { %v4132_v12 = vadd.f32 %v4131_v45, %v4008_v7  ;;  %v6179_v41 = vadd.f32 %v3296_v29, %v7829_v1  ;;  %v5892_v58 = vpop.f32.mrb[89].mxu0  ;;  %6050 = vmatmul.mubr.msk.f32.gmra.mrb[194].mxu0 %vm2630_vm3, %v2601_v42  ;;  %5678 = vmatprep.mubr.msk.f32.mxu1 %vm6513_vm1, %v6512_v0  ;;  %v226_v45 = vld [vmem:[%s9029_s0 + $0x348] sm:$0xff]  ;;  %v227_v29 = vld [vmem:[%s9029_s0 + $0x350] sm:$0xff] }
 0x286   :  { %6052 = vmatprep.mubr.msk.f32.mxu0 %vm6513_vm1, %v6512_v0 }
 0x287   :  { %v3875_v1 = vadd.f32 %v6179_v41, %v3874_v52  ;;  %v4009_v62 = vmul.f32 %v6179_v41, %v6179_v41 }
 0x288   :  { %v3301_v20 = vpop.f32.mrb[90].mxu0  ;;  %5679 = vmatmul.mubr.msk.f32.gmra.mrb[198].mxu1 %vm373_vm0, %v220_v49 }
 0x289   :  { %v4133_v22 = vadd.f32 %v4132_v12, %v4009_v62  ;;  %v6180_v61 = vadd.f32 %v3301_v20, %v7843_v16  ;;  %v5895_v19 = vpop.f32.mrb[91].mxu0  ;;  %6053 = vmatmul.mubr.msk.f32.gmra.mrb[196].mxu0 %vm2630_vm3, %v2602_v11  ;;  %5681 = vmatprep.mubr.msk.f32.mxu1 %vm6513_vm1, %v6512_v0  ;;  %v2609_v12 = vld [vmem:[%s9031_s2 + $0x348] sm:$0xff]  ;;  %v228_v62 = vld [vmem:[%s9029_s0 + $0x358] sm:$0xff]  ;;  %v2610_v20 = vld [vmem:[%s9031_s2 + $0x350] sm:$0xff] }
 0x28a   :  { %6055 = vmatprep.mubr.msk.f32.mxu0 %vm6513_vm1, %v6512_v0 }
 0x28b   :  { %v3876_v16 = vadd.f32 %v6180_v61, %v3875_v1  ;;  %v4010_v47 = vmul.f32 %v6180_v61, %v6180_v61 }
 0x28c   :  { %v3306_v46 = vpop.f32.mrb[92].mxu0  ;;  %5682 = vmatmul.mubr.msk.f32.gmra.mrb[200].mxu1 %vm373_vm0, %v221_v3 }
 0x28d   :  { %v4134_v34 = vadd.f32 %v4133_v22, %v4010_v47  ;;  %v6181_v14 = vadd.f32 %v3306_v46, %v7857_v28  ;;  %v5898_v6 = vpop.f32.mrb[93].mxu0  ;;  %6056 = vmatmul.mubr.msk.f32.gmra.mrb[198].mxu0 %vm2630_vm3, %v2603_v35  ;;  %5684 = vmatprep.mubr.msk.f32.mxu1 %vm6513_vm1, %v6512_v0  ;;  %v2611_v47 = vld [vmem:[%s9031_s2 + $0x358] sm:$0xff] }
 0x28e   :  { %6058 = vmatprep.mubr.msk.f32.mxu0 %vm6513_vm1, %v6512_v0  ;;  %v9043_v6 = vld [vmem:[#allocation2_spill] sm:$0xff] }
 0x28f   :  { %v3877_v28 = vadd.f32 %v6181_v14, %v3876_v16  ;;  %v4011_v27 = vmul.f32 %v6181_v14, %v6181_v14  ;;  %v229_v16 = vld [vmem:[%s9029_s0 + $0x360] sm:$0xff] }
 0x290   :  { %v3311_v4 = vpop.f32.mrb[94].mxu0  ;;  %5685 = vmatmul.mubr.msk.f32.gmra.mrb[202].mxu1 %vm373_vm0, %v222_v25 }
 0x291   :  { %v4135_v37 = vadd.f32 %v4134_v34, %v4011_v27  ;;  %v6182_v54 = vadd.f32 %v3311_v4, %v7871_v39  ;;  %v5901_v59 = vpop.f32.mrb[95].mxu0  ;;  %6059 = vmatmul.mubr.msk.f32.gmra.mrb[200].mxu0 %vm2630_vm3, %v2604_v13  ;;  %5687 = vmatprep.mubr.msk.f32.mxu1 %vm6513_vm1, %v6512_v0  ;;  %v2612_v27 = vld [vmem:[%s9031_s2 + $0x360] sm:$0xff] }
 0x292   :  { %6061 = vmatprep.mubr.msk.f32.mxu0 %vm6513_vm1, %v6512_v0 }
 0x293   :  { %v3878_v39 = vadd.f32 %v6182_v54, %v3877_v28  ;;  %v4012_v23 = vmul.f32 %v6182_v54, %v6182_v54  ;;  %v230_v28 = vld [vmem:[%s9029_s0 + $0x368] sm:$0xff] }
 0x294   :  { %v3316_v51 = vpop.f32.mrb[96].mxu0  ;;  %5688 = vmatmul.mubr.msk.f32.gmra.mrb[204].mxu1 %vm373_vm0, %v223_v17  ;;  %v9044_v17 = vld [vmem:[#allocation3_spill] sm:$0xff] }
 0x295   :  { %v4136_v33 = vadd.f32 %v4135_v37, %v4012_v23  ;;  %v6183_v53 = vadd.f32 %v3316_v51, %v7885_v55  ;;  %v5904_v31 = vpop.f32.mrb[97].mxu0  ;;  %6062 = vmatmul.mubr.msk.f32.gmra.mrb[202].mxu0 %vm2630_vm3, %v2605_v26  ;;  %5690 = vmatprep.mubr.msk.f32.mxu1 %vm6513_vm1, %v6512_v0  ;;  %v231_v23 = vld [vmem:[%s9029_s0 + $0x370] sm:$0xff]  ;;  %v2613_v51 = vld [vmem:[%s9031_s2 + $0x368] sm:$0xff] }
 0x296   :  { %6064 = vmatprep.mubr.msk.f32.mxu0 %vm6513_vm1, %v6512_v0 }
 0x297   :  { %v3879_v55 = vadd.f32 %v6183_v53, %v3878_v39  ;;  %v4013_v9 = vmul.f32 %v6183_v53, %v6183_v53 }
 0x298   :  { %v3321_v32 = vpop.f32.mrb[98].mxu0  ;;  %5691 = vmatmul.mubr.msk.f32.gmra.mrb[206].mxu1 %vm373_vm0, %v224_v38 }
 0x299   :  { %v4137_v57 = vadd.f32 %v4136_v33, %v4013_v9  ;;  %v6184_v50 = vadd.f32 %v3321_v32, %v7899_v8  ;;  %v5907_v40 = vpop.f32.mrb[99].mxu0  ;;  %6065 = vmatmul.mubr.msk.f32.gmra.mrb[204].mxu0 %vm2630_vm3, %v2606_v60  ;;  %5693 = vmatprep.mubr.msk.f32.mxu1 %vm6513_vm1, %v6512_v0  ;;  %v9045_v60 = vld [vmem:[#allocation4_spill] sm:$0xff]  ;;  %v232_v32 = vld [vmem:[%s9029_s0 + $0x378] sm:$0xff] }
 0x29a   :  { %6067 = vmatprep.mubr.msk.f32.mxu0 %vm6513_vm1, %v6512_v0 }
 0x29b   :  { %v3880_v8 = vadd.f32 %v6184_v50, %v3879_v55  ;;  %v4014_v10 = vmul.f32 %v6184_v50, %v6184_v50 }
 0x29c   :  { %v3326_v36 = vpop.f32.mrb[100].mxu0  ;;  %5694 = vmatmul.mubr.msk.f32.gmra.mrb[208].mxu1 %vm373_vm0, %v225_v18 }
 0x29d   :  { %v4138_v43 = vadd.f32 %v4137_v57, %v4014_v10  ;;  %v6185_v5 = vadd.f32 %v3326_v36, %v7913_v24  ;;  %v5910_v56 = vpop.f32.mrb[101].mxu0  ;;  %6068 = vmatmul.mubr.msk.f32.gmra.mrb[206].mxu0 %vm2630_vm3, %v2607_v2  ;;  %5696 = vmatprep.mubr.msk.f32.mxu1 %vm6513_vm1, %v6512_v0  ;;  %v2614_v57 = vld [vmem:[%s9031_s2 + $0x370] sm:$0xff] }
 0x29e   :  { %6070 = vmatprep.mubr.msk.f32.mxu0 %vm6513_vm1, %v6512_v0 }
 0x29f   :  { %v3881_v24 = vadd.f32 %v6185_v5, %v3880_v8  ;;  %v4015_v15 = vmul.f32 %v6185_v5, %v6185_v5  ;;  %v9046_v8 = vld [vmem:[#allocation5_spill] sm:$0xff] }
 0x2a0   :  { %v3331_v30 = vpop.f32.mrb[102].mxu0  ;;  %5697 = vmatmul.mubr.msk.f32.gmra.mrb[210].mxu1 %vm373_vm0, %v226_v45  ;;  %v2615_v5 = vld [vmem:[%s9031_s2 + $0x378] sm:$0xff] }
 0x2a1   :  { %v4139_v42 = vadd.f32 %v4138_v43, %v4015_v15  ;;  %v6186_v52 = vadd.f32 %v3331_v30, %v7927_v44  ;;  %v5913_v7 = vpop.f32.mrb[103].mxu0  ;;  %6071 = vmatmul.mubr.msk.f32.gmra.mrb[208].mxu0 %vm2630_vm3, %v2608_v48  ;;  %5699 = vmatprep.mubr.msk.f32.mxu1 %vm6513_vm1, %v6512_v0  ;;  %v233_v43 = vld [vmem:[%s9029_s0 + $0x380] sm:$0xff] }
 0x2a2   :  { %6073 = vmatprep.mubr.msk.f32.mxu0 %vm6513_vm1, %v6512_v0  ;;  %v9047_v15 = vld [vmem:[#allocation6_spill] sm:$0xff] }
 0x2a3   :  { %v3882_v44 = vadd.f32 %v6186_v52, %v3881_v24  ;;  %v4016_v41 = vmul.f32 %v6186_v52, %v6186_v52  ;;  %v234_v52 = vld [vmem:[%s9029_s0 + $0x388] sm:$0xff]  ;;  %v2616_v7 = vld [vmem:[%s9031_s2 + $0x380] sm:$0xff] }
 0x2a4   :  { %v3336_v58 = vpop.f32.mrb[104].mxu0  ;;  %5700 = vmatmul.mubr.msk.f32.gmra.mrb[212].mxu1 %vm373_vm0, %v227_v29 }
 0x2a5   :  { %v4140_v49 = vadd.f32 %v4139_v42, %v4016_v41  ;;  %v6187_v11 = vadd.f32 %v3336_v58, %v7941_v63  ;;  %v5916_v1 = vpop.f32.mrb[105].mxu0  ;;  %6074 = vmatmul.mubr.msk.f32.gmra.mrb[210].mxu0 %vm2630_vm3, %v2609_v12  ;;  %5702 = vmatprep.mubr.msk.f32.mxu1 %vm6513_vm1, %v6512_v0  ;;  %v9048_v58 = vld [vmem:[#allocation7_spill] sm:$0xff] }
 0x2a6   :  { %6076 = vmatprep.mubr.msk.f32.mxu0 %vm6513_vm1, %v6512_v0  ;;  %v235_v1 = vld [vmem:[%s9029_s0 + $0x390] sm:$0xff] }
 0x2a7   :  { %v3883_v63 = vadd.f32 %v6187_v11, %v3882_v44  ;;  %v4017_v22 = vmul.f32 %v6187_v11, %v6187_v11 }
 0x2a8   :  { %v3341_v61 = vpop.f32.mrb[106].mxu0  ;;  %5703 = vmatmul.mubr.msk.f32.gmra.mrb[214].mxu1 %vm373_vm0, %v228_v62  ;;  %v2617_v62 = vld [vmem:[%s9031_s2 + $0x388] sm:$0xff] }
 0x2a9   :  { %v4141_v19 = vadd.f32 %v4140_v49, %v4017_v22  ;;  %v6188_v3 = vadd.f32 %v3341_v61, %v7955_v21  ;;  %v5919_v35 = vpop.f32.mrb[107].mxu0  ;;  %6077 = vmatmul.mubr.msk.f32.gmra.mrb[212].mxu0 %vm2630_vm3, %v2610_v20  ;;  %5705 = vmatprep.mubr.msk.f32.mxu1 %vm6513_vm1, %v6512_v0 }
 0x2aa   :  { %6079 = vmatprep.mubr.msk.f32.mxu0 %vm6513_vm1, %v6512_v0 }
 0x2ab   :  { %v3884_v21 = vadd.f32 %v6188_v3, %v3883_v63  ;;  %v4018_v46 = vmul.f32 %v6188_v3, %v6188_v3 }
 0x2ac   :  { %v3346_v34 = vpop.f32.mrb[108].mxu0  ;;  %5706 = vmatmul.mubr.msk.f32.gmra.mrb[216].mxu1 %vm373_vm0, %v229_v16  ;;  %v236_v16 = vld [vmem:[%s9029_s0 + $0x398] sm:$0xff] }
 0x2ad   :  { %v4142_v14 = vadd.f32 %v4141_v19, %v4018_v46  ;;  %v6189_v25 = vadd.f32 %v3346_v34, %v9043_v6  ;;  %v5922_v13 = vpop.f32.mrb[109].mxu0  ;;  %6080 = vmatmul.mubr.msk.f32.gmra.mrb[214].mxu0 %vm2630_vm3, %v2611_v47  ;;  %5708 = vmatprep.mubr.msk.f32.mxu1 %vm6513_vm1, %v6512_v0  ;;  %v9049_v19 = vld [vmem:[#allocation8_spill] sm:$0xff]  ;;  %v9050_v6 = vld [vmem:[#allocation9_spill] sm:$0xff] }
 0x2ae   :  { %6082 = vmatprep.mubr.msk.f32.mxu0 %vm6513_vm1, %v6512_v0  ;;  %v2618_v47 = vld [vmem:[%s9031_s2 + $0x390] sm:$0xff] }
 0x2af   :  { %v3885_v4 = vadd.f32 %v6189_v25, %v3884_v21  ;;  %v4019_v37 = vmul.f32 %v6189_v25, %v6189_v25 }
 0x2b0   :  { %v3351_v54 = vpop.f32.mrb[110].mxu0  ;;  %5709 = vmatmul.mubr.msk.f32.gmra.mrb[218].mxu1 %vm373_vm0, %v230_v28  ;;  %v237_v28 = vld [vmem:[%s9029_s0 + $0x3a0] sm:$0xff] }
 0x2b1   :  { %v4143_v59 = vadd.f32 %v4142_v14, %v4019_v37  ;;  %v6190_v26 = vadd.f32 %v3351_v54, %v9044_v17  ;;  %v5925_v39 = vpop.f32.mrb[111].mxu0  ;;  %6083 = vmatmul.mubr.msk.f32.gmra.mrb[216].mxu0 %vm2630_vm3, %v2612_v27  ;;  %5711 = vmatprep.mubr.msk.f32.mxu1 %vm6513_vm1, %v6512_v0  ;;  %v2619_v27 = vld [vmem:[%s9031_s2 + $0x398] sm:$0xff] }
 0x2b2   :  { %6085 = vmatprep.mubr.msk.f32.mxu0 %vm6513_vm1, %v6512_v0 }
 0x2b3   :  { %v3886_v33 = vadd.f32 %v6190_v26, %v3885_v4  ;;  %v4020_v53 = vmul.f32 %v6190_v26, %v6190_v26  ;;  %v9051_v26 = vld [vmem:[#allocation10_spill] sm:$0xff] }
 0x2b4   :  { %v3356_v31 = vpop.f32.mrb[112].mxu0  ;;  %5712 = vmatmul.mubr.msk.f32.gmra.mrb[220].mxu1 %vm373_vm0, %v231_v23 }
 0x2b5   :  { %v4144_v38 = vadd.f32 %v4143_v59, %v4020_v53  ;;  %v6191_v55 = vadd.f32 %v3356_v31, %v9045_v60  ;;  %v5928_v9 = vpop.f32.mrb[113].mxu0  ;;  %6086 = vmatmul.mubr.msk.f32.gmra.mrb[218].mxu0 %vm2630_vm3, %v2613_v51  ;;  %5714 = vmatprep.mubr.msk.f32.mxu1 %vm6513_vm1, %v6512_v0  ;;  %v2620_v53 = vld [vmem:[%s9031_s2 + $0x3a0] sm:$0xff] }
 0x2b6   :  { %6088 = vmatprep.mubr.msk.f32.mxu0 %vm6513_vm1, %v6512_v0 }
 0x2b7   :  { %v3887_v50 = vadd.f32 %v6191_v55, %v3886_v33  ;;  %v4021_v40 = vmul.f32 %v6191_v55, %v6191_v55  ;;  %v238_v33 = vld [vmem:[%s9029_s0 + $0x3a8] sm:$0xff] }
 0x2b8   :  { %v3361_v18 = vpop.f32.mrb[114].mxu0  ;;  %5715 = vmatmul.mubr.msk.f32.gmra.mrb[222].mxu1 %vm373_vm0, %v232_v32 }
 0x2b9   :  { %v4145_v2 = vadd.f32 %v4144_v38, %v4021_v40  ;;  %v6192_v10 = vadd.f32 %v3361_v18, %v9046_v8  ;;  %v5931_v36 = vpop.f32.mrb[115].mxu0  ;;  %6089 = vmatmul.mubr.msk.f32.gmra.mrb[220].mxu0 %vm2630_vm3, %v2614_v57  ;;  %5717 = vmatprep.mubr.msk.f32.mxu1 %vm6513_vm1, %v6512_v0  ;;  %v239_v40 = vld [vmem:[%s9029_s0 + $0x3b0] sm:$0xff]  ;;  %v2621_v18 = vld [vmem:[%s9031_s2 + $0x3a8] sm:$0xff] }
 0x2ba   :  { %6091 = vmatprep.mubr.msk.f32.mxu0 %vm6513_vm1, %v6512_v0 }
 0x2bb   :  { %v3888_v56 = vadd.f32 %v6192_v10, %v3887_v50  ;;  %v4022_v45 = vmul.f32 %v6192_v10, %v6192_v10 }
 0x2bc   :  { %v3366_v48 = vpop.f32.mrb[116].mxu0  ;;  %5718 = vmatmul.mubr.msk.f32.gmra.mrb[224].mxu1 %vm373_vm0, %v233_v43 }
 0x2bd   :  { %v4146_v24 = vadd.f32 %v4145_v2, %v4022_v45  ;;  %v6193_v30 = vadd.f32 %v3366_v48, %v9047_v15  ;;  %v5934_v42 = vpop.f32.mrb[117].mxu0  ;;  %6092 = vmatmul.mubr.msk.f32.gmra.mrb[222].mxu0 %vm2630_vm3, %v2615_v5  ;;  %5720 = vmatprep.mubr.msk.f32.mxu1 %vm6513_vm1, %v6512_v0  ;;  %v240_v48 = vld [vmem:[%s9029_s0 + $0x3b8] sm:$0xff] }
 0x2be   :  { %6094 = vmatprep.mubr.msk.f32.mxu0 %vm6513_vm1, %v6512_v0 }
 0x2bf   :  { %v3889_v29 = vadd.f32 %v6193_v30, %v3888_v56  ;;  %v4023_v12 = vmul.f32 %v6193_v30, %v6193_v30 }
 0x2c0   :  { %v3371_v44 = vpop.f32.mrb[118].mxu0  ;;  %5721 = vmatmul.mubr.msk.f32.gmra.mrb[226].mxu1 %vm373_vm0, %v234_v52 }
 0x2c1   :  { %v4147_v41 = vadd.f32 %v4146_v24, %v4023_v12  ;;  %v6194_v49 = vadd.f32 %v3371_v44, %v9048_v58  ;;  %v5937_v11 = vpop.f32.mrb[119].mxu0  ;;  %6095 = vmatmul.mubr.msk.f32.gmra.mrb[224].mxu0 %vm2630_vm3, %v2616_v7  ;;  %5723 = vmatprep.mubr.msk.f32.mxu1 %vm6513_vm1, %v6512_v0  ;;  %v2622_v24 = vld [vmem:[%s9031_s2 + $0x3b0] sm:$0xff]  ;;  %v2623_v58 = vld [vmem:[%s9031_s2 + $0x3b8] sm:$0xff] }
 0x2c2   :  { %6097 = vmatprep.mubr.msk.f32.mxu0 %vm6513_vm1, %v6512_v0 }
 0x2c3   :  { %v3890_v20 = vadd.f32 %v6194_v49, %v3889_v29  ;;  %v4024_v63 = vmul.f32 %v6194_v49, %v6194_v49 }
 0x2c4   :  { %v3376_v22 = vpop.f32.mrb[120].mxu0  ;;  %5724 = vmatmul.mubr.msk.f32.gmra.mrb[228].mxu1 %vm373_vm0, %v235_v1 }
 0x2c5   :  { %v4148_v61 = vadd.f32 %v4147_v41, %v4024_v63  ;;  %v6195_v3 = vadd.f32 %v3376_v22, %v9049_v19  ;;  %v5940_v35 = vpop.f32.mrb[121].mxu0  ;;  %6098 = vmatmul.mubr.msk.f32.gmra.mrb[226].mxu0 %vm2630_vm3, %v2617_v62  ;;  %5726 = vmatprep.mubr.msk.f32.mxu1 %vm6513_vm1, %v6512_v0  ;;  %v241_v41 = vld [vmem:[%s9029_s0 + $0x3c0] sm:$0xff]  ;;  %v242_v19 = vld [vmem:[%s9029_s0 + $0x3c8] sm:$0xff] }
 0x2c6   :  { %6100 = vmatprep.mubr.msk.f32.mxu0 %vm6513_vm1, %v6512_v0 }
 0x2c7   :  { %v3891_v21 = vadd.f32 %v6195_v3, %v3890_v20  ;;  %v4025_v46 = vmul.f32 %v6195_v3, %v6195_v3  ;;  %v2624_v3 = vld [vmem:[%s9031_s2 + $0x3c0] sm:$0xff] }
 0x2c8   :  { %v3381_v34 = vpop.f32.mrb[122].mxu0  ;;  %5727 = vmatmul.mubr.msk.f32.gmra.mrb[230].mxu1 %vm373_vm0, %v236_v16 }
 0x2c9   :  { %v4149_v14 = vadd.f32 %v4148_v61, %v4025_v46  ;;  %v6196_v25 = vadd.f32 %v3381_v34, %v9050_v6  ;;  %v5943_v13 = vpop.f32.mrb[123].mxu0  ;;  %6101 = vmatmul.mubr.msk.f32.gmra.mrb[228].mxu0 %vm2630_vm3, %v2618_v47  ;;  %5729 = vmatprep.mubr.msk.f32.mxu1 %vm6513_vm1, %v6512_v0 }
 0x2ca   :  { %6103 = vmatprep.mubr.msk.f32.mxu0 %vm6513_vm1, %v6512_v0  ;;  %v2625_v13 = vld [vmem:[%s9031_s2 + $0x3c8] sm:$0xff] }
 0x2cb   :  { %v3892_v4 = vadd.f32 %v6196_v25, %v3891_v21  ;;  %v4026_v37 = vmul.f32 %v6196_v25, %v6196_v25  ;;  %v2195_v54 = vpop.f32.mrb[126].mxu1  ;;  %v243_v25 = vld [vmem:[%s9029_s0 + $0x3d0] sm:$0xff] }
 0x2cc   :  { %v3386_v59 = vpop.f32.mrb[124].mxu0  ;;  %v5572_v23 = vpop.f32.mrb[127].mxu1  ;;  %5730 = vmatmul.mubr.msk.f32.gmra.mrb[232].mxu1 %vm373_vm0, %v237_v28 }
 0x2cd   :  { %v4150_v17 = vadd.f32 %v4149_v14, %v4026_v37  ;;  %v6197_v39 = vadd.f32 %v3386_v59, %v9051_v26  ;;  %v5946_v51 = vpop.f32.mrb[125].mxu0  ;;  %6104 = vmatmul.mubr.msk.f32.gmra.mrb[230].mxu0 %vm2630_vm3, %v2619_v27  ;;  %5732 = vmatprep.mubr.msk.f32.mxu1 %vm6513_vm1, %v6512_v0  ;;  %v2626_v23 = vld [vmem:[%s9031_s2 + $0x3d0] sm:$0xff] }
 0x2ce   :  { %6106 = vmatprep.mubr.msk.f32.mxu0 %vm6513_vm1, %v6512_v0 }
 0x2cf   :  { %v3893_v31 = vadd.f32 %v6197_v39, %v3892_v4  ;;  %v4027_v38 = vmul.f32 %v6197_v39, %v6197_v39  ;;  %v2200_v60 = vpop.f32.mrb[128].mxu1  ;;  %v244_v39 = vld [vmem:[%s9029_s0 + $0x3d8] sm:$0xff] }
 0x2d0   :  { %v3391_v55 = vpop.f32.mrb[126].mxu0  ;;  %v5575_v57 = vpop.f32.mrb[129].mxu1  ;;  %5733 = vmatmul.mubr.msk.f32.gmra.mrb[234].mxu1 %vm373_vm0, %v238_v33 }
 0x2d1   :  { %v4151_v9 = vadd.f32 %v4150_v17, %v4027_v38  ;;  %v6198_v32 = vadd.f32 %v3391_v55, %v2195_v54  ;;  %v5949_v50 = vpop.f32.mrb[127].mxu0  ;;  %6107 = vmatmul.mubr.msk.f32.gmra.mrb[232].mxu0 %vm2630_vm3, %v2620_v53  ;;  %5735 = vmatprep.mubr.msk.f32.mxu1 %vm6513_vm1, %v6512_v0  ;;  %v2627_v57 = vld [vmem:[%s9031_s2 + $0x3d8] sm:$0xff] }
 0x2d2   :  { %6109 = vmatprep.mubr.msk.f32.mxu0 %vm6513_vm1, %v6512_v0 }
 0x2d3   :  { %v3894_v2 = vadd.f32 %v6198_v32, %v3893_v31  ;;  %v4028_v8 = vmul.f32 %v6198_v32, %v6198_v32  ;;  %v2205_v10 = vpop.f32.mrb[130].mxu1  ;;  %v245_v32 = vld [vmem:[%s9029_s0 + $0x3e0] sm:$0xff] }
 0x2d4   :  { %v3396_v36 = vpop.f32.mrb[128].mxu0  ;;  %v5578_v56 = vpop.f32.mrb[131].mxu1  ;;  %5736 = vmatmul.mubr.msk.f32.gmra.mrb[236].mxu1 %vm373_vm0, %v239_v40 }
 0x2d5   :  { %v4152_v43 = vadd.f32 %v4151_v9, %v4028_v8  ;;  %v6199_v5 = vadd.f32 %v3396_v36, %v2200_v60  ;;  %v5952_v45 = vpop.f32.mrb[129].mxu0  ;;  %6110 = vmatmul.mubr.msk.f32.gmra.mrb[234].mxu0 %vm2630_vm3, %v2621_v18  ;;  %5738 = vmatprep.mubr.msk.f32.mxu1 %vm6513_vm1, %v6512_v0 }
 0x2d6   :  { %6112 = vmatprep.mubr.msk.f32.mxu0 %vm6513_vm1, %v6512_v0 }
 0x2d7   :  { %v3895_v15 = vadd.f32 %v6199_v5, %v3894_v2  ;;  %v4029_v30 = vmul.f32 %v6199_v5, %v6199_v5  ;;  %v2210_v42 = vpop.f32.mrb[132].mxu1  ;;  %v2628_v5 = vld [vmem:[%s9031_s2 + $0x3e0] sm:$0xff] }
 0x2d8   :  { %v3401_v52 = vpop.f32.mrb[130].mxu0  ;;  %v5581_v12 = vpop.f32.mrb[133].mxu1  ;;  %5739 = vmatmul.mubr.msk.f32.gmra.mrb[238].mxu1 %vm373_vm0, %v240_v48 }
 0x2d9   :  { %v4153_v7 = vadd.f32 %v4152_v43, %v4029_v30  ;;  %v6200_v29 = vadd.f32 %v3401_v52, %v2205_v10  ;;  %v5955_v44 = vpop.f32.mrb[131].mxu0  ;;  %6113 = vmatmul.mubr.msk.f32.gmra.mrb[236].mxu0 %vm2630_vm3, %v2622_v24  ;;  %5741 = vmatprep.mubr.msk.f32.mxu1 %vm6513_vm1, %v6512_v0 }
 0x2da   :  { %6115 = vmatprep.mubr.msk.f32.mxu0 %vm6513_vm1, %v6512_v0 }
 0x2db   :  { %v3896_v49 = vadd.f32 %v6200_v29, %v3895_v15  ;;  %v4030_v11 = vmul.f32 %v6200_v29, %v6200_v29  ;;  %v2215_v1 = vpop.f32.mrb[134].mxu1 }
 0x2dc   :  { %v3406_v62 = vpop.f32.mrb[132].mxu0  ;;  %v5584_v22 = vpop.f32.mrb[135].mxu1  ;;  %5742 = vmatmul.mubr.msk.f32.gmra.mrb[240].mxu1 %vm373_vm0, %v241_v41 }
 0x2dd   :  { %v4154_v20 = vadd.f32 %v4153_v7, %v4030_v11  ;;  %v6201_v63 = vadd.f32 %v3406_v62, %v2210_v42  ;;  %v5958_v61 = vpop.f32.mrb[133].mxu0  ;;  %6116 = vmatmul.mubr.msk.f32.gmra.mrb[238].mxu0 %vm2630_vm3, %v2623_v58  ;;  %5744 = vmatprep.mubr.msk.f32.mxu1 %vm6513_vm1, %v6512_v0 }
 0x2de   :  { %6118 = vmatprep.mubr.msk.f32.mxu0 %vm6513_vm1, %v6512_v0 }
 0x2df   :  { %v3897_v35 = vadd.f32 %v6201_v63, %v3896_v49  ;;  %v4031_v16 = vmul.f32 %v6201_v63, %v6201_v63  ;;  %v2220_v47 = vpop.f32.mrb[136].mxu1 }
 0x2e0   :  { %v3411_v21 = vpop.f32.mrb[134].mxu0  ;;  %v5587_v14 = vpop.f32.mrb[137].mxu1  ;;  %5745 = vmatmul.mubr.msk.f32.gmra.mrb[242].mxu1 %vm373_vm0, %v242_v19 }
 0x2e1   :  { %v4155_v46 = vadd.f32 %v4154_v20, %v4031_v16  ;;  %v6202_v34 = vadd.f32 %v3411_v21, %v2215_v1  ;;  %v5961_v6 = vpop.f32.mrb[135].mxu0  ;;  %6119 = vmatmul.mubr.msk.f32.gmra.mrb[240].mxu0 %vm2630_vm3, %v2624_v3  ;;  %5747 = vmatprep.mubr.msk.f32.mxu1 %vm6513_vm1, %v6512_v0 }
 0x2e2   :  { %6121 = vmatprep.mubr.msk.f32.mxu0 %vm6513_vm1, %v6512_v0 }
 0x2e3   :  { %v3898_v28 = vadd.f32 %v6202_v34, %v3897_v35  ;;  %v4032_v27 = vmul.f32 %v6202_v34, %v6202_v34  ;;  %v2225_v4 = vpop.f32.mrb[138].mxu1 }
 0x2e4   :  { %v3416_v37 = vpop.f32.mrb[136].mxu0  ;;  %v5590_v17 = vpop.f32.mrb[139].mxu1  ;;  %5748 = vmatmul.mubr.msk.f32.gmra.mrb[244].mxu1 %vm373_vm0, %v243_v25 }
 0x2e5   :  { %v4156_v54 = vadd.f32 %v4155_v46, %v4032_v27  ;;  %v6203_v59 = vadd.f32 %v3416_v37, %v2220_v47  ;;  %v5964_v26 = vpop.f32.mrb[137].mxu0  ;;  %6122 = vmatmul.mubr.msk.f32.gmra.mrb[242].mxu0 %vm2630_vm3, %v2625_v13  ;;  %5750 = vmatprep.mubr.msk.f32.mxu1 %vm6513_vm1, %v6512_v0 }
 0x2e6   :  { %6124 = vmatprep.mubr.msk.f32.mxu0 %vm6513_vm1, %v6512_v0 }
 0x2e7   :  { %v3899_v51 = vadd.f32 %v6203_v59, %v3898_v28  ;;  %v4033_v33 = vmul.f32 %v6203_v59, %v6203_v59  ;;  %v2230_v53 = vpop.f32.mrb[140].mxu1 }
 0x2e8   :  { %v3421_v31 = vpop.f32.mrb[138].mxu0  ;;  %v5593_v55 = vpop.f32.mrb[141].mxu1  ;;  %5751 = vmatmul.mubr.msk.f32.gmra.mrb[246].mxu1 %vm373_vm0, %v244_v39 }
 0x2e9   :  { %v4157_v38 = vadd.f32 %v4156_v54, %v4033_v33  ;;  %v6204_v60 = vadd.f32 %v3421_v31, %v2225_v4  ;;  %v5967_v9 = vpop.f32.mrb[139].mxu0  ;;  %6125 = vmatmul.mubr.msk.f32.gmra.mrb[244].mxu0 %vm2630_vm3, %v2626_v23  ;;  %5753 = vmatprep.mubr.msk.f32.mxu1 %vm6513_vm1, %v6512_v0 }
 0x2ea   :  { %6127 = vmatprep.mubr.msk.f32.mxu0 %vm6513_vm1, %v6512_v0 }
 0x2eb   :  { %v3900_v50 = vadd.f32 %v6204_v60, %v3899_v51  ;;  %v4034_v40 = vmul.f32 %v6204_v60, %v6204_v60  ;;  %v2235_v18 = vpop.f32.mrb[142].mxu1 }
 0x2ec   :  { %v3426_v2 = vpop.f32.mrb[140].mxu0  ;;  %v5596_v36 = vpop.f32.mrb[143].mxu1  ;;  %5754 = vmatmul.mubr.msk.f32.gmra.mrb[248].mxu1 %vm373_vm0, %v245_v32 }
 0x2ed   :  { %v4158_v8 = vadd.f32 %v4157_v38, %v4034_v40  ;;  %v6205_v10 = vadd.f32 %v3426_v2, %v2230_v53  ;;  %v5970_v43 = vpop.f32.mrb[141].mxu0  ;;  %6128 = vmatmul.mubr.msk.f32.gmra.mrb[246].mxu0 %vm2630_vm3, %v2627_v57 }
 0x2ee   :  { %6130 = vmatprep.mubr.msk.f32.mxu0 %vm6513_vm1, %v6512_v0 }
 0x2ef   :  { %v3901_v56 = vadd.f32 %v6205_v10, %v3900_v50  ;;  %v4035_v45 = vmul.f32 %v6205_v10, %v6205_v10  ;;  %v2240_v48 = vpop.f32.mrb[144].mxu1 }
 0x2f0   :  { %v3431_v24 = vpop.f32.mrb[142].mxu0  ;;  %v5599_v42 = vpop.f32.mrb[145].mxu1 }
 0x2f1   :  { %v4159_v15 = vadd.f32 %v4158_v8, %v4035_v45  ;;  %v6206_v30 = vadd.f32 %v3431_v24, %v2235_v18  ;;  %v5973_v52 = vpop.f32.mrb[143].mxu0  ;;  %6131 = vmatmul.mubr.msk.f32.gmra.mrb[248].mxu0 %vm2630_vm3, %v2628_v5 }
 0x2f3   :  { %v3902_v7 = vadd.f32 %v6206_v30, %v3901_v56  ;;  %v4036_v29 = vmul.f32 %v6206_v30, %v6206_v30  ;;  %v2245_v12 = vpop.f32.mrb[146].mxu1 }
 0x2f4   :  { %v3436_v44 = vpop.f32.mrb[144].mxu0  ;;  %v5602_v49 = vpop.f32.mrb[147].mxu1 }
 0x2f5   :  { %v4160_v41 = vadd.f32 %v4159_v15, %v4036_v29  ;;  %v6207_v58 = vadd.f32 %v3436_v44, %v2240_v48  ;;  %v5976_v11 = vpop.f32.mrb[145].mxu0 }
 0x2f7   :  { %v3903_v1 = vadd.f32 %v6207_v58, %v3902_v7  ;;  %v4037_v62 = vmul.f32 %v6207_v58, %v6207_v58  ;;  %v2250_v20 = vpop.f32.mrb[148].mxu1 }
 0x2f8   :  { %v3441_v63 = vpop.f32.mrb[146].mxu0  ;;  %v5605_v19 = vpop.f32.mrb[149].mxu1 }
 0x2f9   :  { %v4161_v22 = vadd.f32 %v4160_v41, %v4037_v62  ;;  %v6208_v61 = vadd.f32 %v3441_v63, %v2245_v12  ;;  %v5979_v3 = vpop.f32.mrb[147].mxu0 }
 0x2fb   :  { %v3904_v35 = vadd.f32 %v6208_v61, %v3903_v1  ;;  %v4038_v16 = vmul.f32 %v6208_v61, %v6208_v61  ;;  %v2255_v47 = vpop.f32.mrb[150].mxu1 }
 0x2fc   :  { %v3446_v21 = vpop.f32.mrb[148].mxu0  ;;  %v5608_v14 = vpop.f32.mrb[151].mxu1 }
 0x2fd   :  { %v4162_v46 = vadd.f32 %v4161_v22, %v4038_v16  ;;  %v6209_v34 = vadd.f32 %v3446_v21, %v2250_v20  ;;  %v5982_v6 = vpop.f32.mrb[149].mxu0 }
 0x2ff   :  { %v3905_v25 = vadd.f32 %v6209_v34, %v3904_v35  ;;  %v4039_v13 = vmul.f32 %v6209_v34, %v6209_v34  ;;  %v2260_v28 = vpop.f32.mrb[152].mxu1 }
 0x300   :  { %v3451_v27 = vpop.f32.mrb[150].mxu0  ;;  %v5611_v54 = vpop.f32.mrb[153].mxu1 }
 0x301   :  { %v4163_v4 = vadd.f32 %v4162_v46, %v4039_v13  ;;  %v6210_v37 = vadd.f32 %v3451_v27, %v2255_v47  ;;  %v5985_v59 = vpop.f32.mrb[151].mxu0 }
 0x303   :  { %v3906_v17 = vadd.f32 %v6210_v37, %v3905_v25  ;;  %v4040_v26 = vmul.f32 %v6210_v37, %v6210_v37  ;;  %v2265_v39 = vpop.f32.mrb[154].mxu1 }
 0x304   :  { %v3456_v23 = vpop.f32.mrb[152].mxu0  ;;  %v5614_v53 = vpop.f32.mrb[155].mxu1 }
 0x305   :  { %v4164_v51 = vadd.f32 %v4163_v4, %v4040_v26  ;;  %v6211_v33 = vadd.f32 %v3456_v23, %v2260_v28  ;;  %v5988_v31 = vpop.f32.mrb[153].mxu0 }
 0x307   :  { %v3907_v38 = vadd.f32 %v6211_v33, %v3906_v17  ;;  %v4041_v60 = vmul.f32 %v6211_v33, %v6211_v33  ;;  %v2270_v55 = vpop.f32.mrb[156].mxu1 }
 0x308   :  { %v3461_v9 = vpop.f32.mrb[154].mxu0  ;;  %v5617_v50 = vpop.f32.mrb[157].mxu1 }
 0x309   :  { %v4165_v32 = vadd.f32 %v4164_v51, %v4041_v60  ;;  %v6212_v57 = vadd.f32 %v3461_v9, %v2265_v39  ;;  %v5991_v40 = vpop.f32.mrb[155].mxu0 }
 0x30b   :  { %v3908_v18 = vadd.f32 %v6212_v57, %v3907_v38  ;;  %v4042_v2 = vmul.f32 %v6212_v57, %v6212_v57  ;;  %v2275_v8 = vpop.f32.mrb[158].mxu1 }
 0x30c   :  { %v3466_v10 = vpop.f32.mrb[156].mxu0  ;;  %v5620_v5 = vpop.f32.mrb[159].mxu1 }
 0x30d   :  { %v4166_v36 = vadd.f32 %v4165_v32, %v4042_v2  ;;  %v6213_v43 = vadd.f32 %v3466_v10, %v2270_v55  ;;  %v5994_v56 = vpop.f32.mrb[157].mxu0 }
 0x30f   :  { %v3909_v45 = vadd.f32 %v6213_v43, %v3908_v18  ;;  %v4043_v48 = vmul.f32 %v6213_v43, %v6213_v43  ;;  %v2280_v24 = vpop.f32.mrb[160].mxu1 }
 0x310   :  { %v3471_v15 = vpop.f32.mrb[158].mxu0  ;;  %v5623_v52 = vpop.f32.mrb[161].mxu1 }
 0x311   :  { %v4167_v30 = vadd.f32 %v4166_v36, %v4043_v48  ;;  %v6214_v42 = vadd.f32 %v3471_v15, %v2275_v8  ;;  %v5997_v7 = vpop.f32.mrb[159].mxu0 }
 0x313   :  { %v3910_v29 = vadd.f32 %v6214_v42, %v3909_v45  ;;  %v4044_v12 = vmul.f32 %v6214_v42, %v6214_v42  ;;  %v2285_v44 = vpop.f32.mrb[162].mxu1 }
 0x314   :  { %v3476_v41 = vpop.f32.mrb[160].mxu0  ;;  %v5626_v11 = vpop.f32.mrb[163].mxu1 }
 0x315   :  { %v4168_v58 = vadd.f32 %v4167_v30, %v4044_v12  ;;  %v6215_v49 = vadd.f32 %v3476_v41, %v2280_v24  ;;  %v6000_v1 = vpop.f32.mrb[161].mxu0 }
 0x317   :  { %v3911_v62 = vadd.f32 %v6215_v49, %v3910_v29  ;;  %v4045_v20 = vmul.f32 %v6215_v49, %v6215_v49  ;;  %v2290_v63 = vpop.f32.mrb[164].mxu1 }
 0x318   :  { %v3481_v22 = vpop.f32.mrb[162].mxu0  ;;  %v5629_v3 = vpop.f32.mrb[165].mxu1 }
 0x319   :  { %v4169_v61 = vadd.f32 %v4168_v58, %v4045_v20  ;;  %v6216_v19 = vadd.f32 %v3481_v22, %v2285_v44  ;;  %v6003_v35 = vpop.f32.mrb[163].mxu0 }
 0x31b   :  { %v3912_v16 = vadd.f32 %v6216_v19, %v3911_v62  ;;  %v4046_v47 = vmul.f32 %v6216_v19, %v6216_v19  ;;  %v2295_v21 = vpop.f32.mrb[166].mxu1 }
 0x31c   :  { %v3486_v46 = vpop.f32.mrb[164].mxu0  ;;  %v5632_v6 = vpop.f32.mrb[167].mxu1 }
 0x31d   :  { %v4170_v34 = vadd.f32 %v4169_v61, %v4046_v47  ;;  %v6217_v14 = vadd.f32 %v3486_v46, %v2290_v63  ;;  %v6006_v25 = vpop.f32.mrb[165].mxu0 }
 0x31f   :  { %v3913_v13 = vadd.f32 %v6217_v14, %v3912_v16  ;;  %v4047_v28 = vmul.f32 %v6217_v14, %v6217_v14  ;;  %v2300_v27 = vpop.f32.mrb[168].mxu1 }
 0x320   :  { %v3491_v4 = vpop.f32.mrb[166].mxu0  ;;  %v5635_v59 = vpop.f32.mrb[169].mxu1 }
 0x321   :  { %v4171_v37 = vadd.f32 %v4170_v34, %v4047_v28  ;;  %v6218_v54 = vadd.f32 %v3491_v4, %v2295_v21  ;;  %v6009_v17 = vpop.f32.mrb[167].mxu0 }
 0x323   :  { %v3914_v26 = vadd.f32 %v6218_v54, %v3913_v13  ;;  %v4048_v39 = vmul.f32 %v6218_v54, %v6218_v54  ;;  %v2305_v23 = vpop.f32.mrb[170].mxu1 }
 0x324   :  { %v3496_v51 = vpop.f32.mrb[168].mxu0  ;;  %v5638_v31 = vpop.f32.mrb[171].mxu1 }
 0x325   :  { %v4172_v33 = vadd.f32 %v4171_v37, %v4048_v39  ;;  %v6219_v53 = vadd.f32 %v3496_v51, %v2300_v27  ;;  %v6012_v38 = vpop.f32.mrb[169].mxu0 }
 0x327   :  { %v3915_v60 = vadd.f32 %v6219_v53, %v3914_v26  ;;  %v4049_v55 = vmul.f32 %v6219_v53, %v6219_v53  ;;  %v2310_v9 = vpop.f32.mrb[172].mxu1 }
 0x328   :  { %v3501_v32 = vpop.f32.mrb[170].mxu0  ;;  %v5641_v40 = vpop.f32.mrb[173].mxu1 }
 0x329   :  { %v4173_v57 = vadd.f32 %v4172_v33, %v4049_v55  ;;  %v6220_v50 = vadd.f32 %v3501_v32, %v2305_v23  ;;  %v6015_v18 = vpop.f32.mrb[171].mxu0 }
 0x32b   :  { %v3916_v2 = vadd.f32 %v6220_v50, %v3915_v60  ;;  %v4050_v8 = vmul.f32 %v6220_v50, %v6220_v50  ;;  %v2315_v10 = vpop.f32.mrb[174].mxu1 }
 0x32c   :  { %v3506_v36 = vpop.f32.mrb[172].mxu0  ;;  %v5644_v56 = vpop.f32.mrb[175].mxu1 }
 0x32d   :  { %v4174_v43 = vadd.f32 %v4173_v57, %v4050_v8  ;;  %v6221_v5 = vadd.f32 %v3506_v36, %v2310_v9  ;;  %v6018_v45 = vpop.f32.mrb[173].mxu0 }
 0x32f   :  { %v3917_v48 = vadd.f32 %v6221_v5, %v3916_v2  ;;  %v4051_v24 = vmul.f32 %v6221_v5, %v6221_v5  ;;  %v2320_v15 = vpop.f32.mrb[176].mxu1 }
 0x330   :  { %v3511_v30 = vpop.f32.mrb[174].mxu0  ;;  %v5647_v7 = vpop.f32.mrb[177].mxu1 }
 0x331   :  { %v4175_v42 = vadd.f32 %v4174_v43, %v4051_v24  ;;  %v6222_v52 = vadd.f32 %v3511_v30, %v2315_v10  ;;  %v6021_v29 = vpop.f32.mrb[175].mxu0 }
 0x333   :  { %v3918_v12 = vadd.f32 %v6222_v52, %v3917_v48  ;;  %v4052_v44 = vmul.f32 %v6222_v52, %v6222_v52  ;;  %v2325_v41 = vpop.f32.mrb[178].mxu1 }
 0x334   :  { %v3516_v58 = vpop.f32.mrb[176].mxu0  ;;  %v5650_v1 = vpop.f32.mrb[179].mxu1 }
 0x335   :  { %v4176_v49 = vadd.f32 %v4175_v42, %v4052_v44  ;;  %v6223_v11 = vadd.f32 %v3516_v58, %v2320_v15  ;;  %v6024_v62 = vpop.f32.mrb[177].mxu0 }
 0x337   :  { %v3919_v20 = vadd.f32 %v6223_v11, %v3918_v12  ;;  %v4053_v63 = vmul.f32 %v6223_v11, %v6223_v11  ;;  %v2330_v22 = vpop.f32.mrb[180].mxu1 }
 0x338   :  { %v3521_v61 = vpop.f32.mrb[178].mxu0  ;;  %v5653_v35 = vpop.f32.mrb[181].mxu1 }
 0x339   :  { %v4177_v19 = vadd.f32 %v4176_v49, %v4053_v63  ;;  %v6224_v3 = vadd.f32 %v3521_v61, %v2325_v41  ;;  %v6027_v16 = vpop.f32.mrb[179].mxu0 }
 0x33b   :  { %v3920_v47 = vadd.f32 %v6224_v3, %v3919_v20  ;;  %v4054_v21 = vmul.f32 %v6224_v3, %v6224_v3  ;;  %v2335_v46 = vpop.f32.mrb[182].mxu1 }
 0x33c   :  { %v3526_v34 = vpop.f32.mrb[180].mxu0  ;;  %v5656_v25 = vpop.f32.mrb[183].mxu1 }
 0x33d   :  { %v4178_v14 = vadd.f32 %v4177_v19, %v4054_v21  ;;  %v6225_v6 = vadd.f32 %v3526_v34, %v2330_v22  ;;  %v6030_v13 = vpop.f32.mrb[181].mxu0 }
 0x33f   :  { %v3921_v28 = vadd.f32 %v6225_v6, %v3920_v47  ;;  %v4055_v27 = vmul.f32 %v6225_v6, %v6225_v6  ;;  %v2340_v4 = vpop.f32.mrb[184].mxu1 }
 0x340   :  { %v3531_v37 = vpop.f32.mrb[182].mxu0  ;;  %v5659_v17 = vpop.f32.mrb[185].mxu1 }
 0x341   :  { %v4179_v54 = vadd.f32 %v4178_v14, %v4055_v27  ;;  %v6226_v59 = vadd.f32 %v3531_v37, %v2335_v46  ;;  %v6033_v26 = vpop.f32.mrb[183].mxu0 }
 0x343   :  { %v3922_v39 = vadd.f32 %v6226_v59, %v3921_v28  ;;  %v4056_v23 = vmul.f32 %v6226_v59, %v6226_v59  ;;  %v2345_v51 = vpop.f32.mrb[186].mxu1 }
 0x344   :  { %v3536_v33 = vpop.f32.mrb[184].mxu0  ;;  %v5662_v38 = vpop.f32.mrb[187].mxu1 }
 0x345   :  { %v4180_v53 = vadd.f32 %v4179_v54, %v4056_v23  ;;  %v6227_v31 = vadd.f32 %v3536_v33, %v2340_v4  ;;  %v6036_v60 = vpop.f32.mrb[185].mxu0 }
 0x347   :  { %v3923_v55 = vadd.f32 %v6227_v31, %v3922_v39  ;;  %v4057_v9 = vmul.f32 %v6227_v31, %v6227_v31  ;;  %v2350_v32 = vpop.f32.mrb[188].mxu1 }
 0x348   :  { %v3541_v57 = vpop.f32.mrb[186].mxu0  ;;  %v5665_v18 = vpop.f32.mrb[189].mxu1 }
 0x349   :  { %v4181_v50 = vadd.f32 %v4180_v53, %v4057_v9  ;;  %v6228_v40 = vadd.f32 %v3541_v57, %v2345_v51  ;;  %v6039_v2 = vpop.f32.mrb[187].mxu0 }
 0x34b   :  { %v3924_v8 = vadd.f32 %v6228_v40, %v3923_v55  ;;  %v4058_v10 = vmul.f32 %v6228_v40, %v6228_v40  ;;  %v2355_v36 = vpop.f32.mrb[190].mxu1 }
 0x34c   :  { %v3546_v43 = vpop.f32.mrb[188].mxu0  ;;  %v5668_v45 = vpop.f32.mrb[191].mxu1 }
 0x34d   :  { %v4182_v5 = vadd.f32 %v4181_v50, %v4058_v10  ;;  %v6229_v56 = vadd.f32 %v3546_v43, %v2350_v32  ;;  %v6042_v48 = vpop.f32.mrb[189].mxu0 }
 0x34f   :  { %v3925_v24 = vadd.f32 %v6229_v56, %v3924_v8  ;;  %v4059_v15 = vmul.f32 %v6229_v56, %v6229_v56  ;;  %v2360_v30 = vpop.f32.mrb[192].mxu1 }
 0x350   :  { %v3551_v0 = vpop.f32.mrb[190].mxu0  ;;  %v5671_v7 = vpop.f32.mrb[193].mxu1 }
 0x351   :  { %v4183_v42 = vadd.f32 %v4182_v5, %v4059_v15  ;;  %v6230_v52 = vadd.f32 %v3551_v0, %v2355_v36  ;;  %v6045_v29 = vpop.f32.mrb[191].mxu0 }
 0x353   :  { %v3926_v12 = vadd.f32 %v6230_v52, %v3925_v24  ;;  %v4060_v44 = vmul.f32 %v6230_v52, %v6230_v52  ;;  %v2365_v41 = vpop.f32.mrb[194].mxu1 }
 0x354   :  { %v3556_v58 = vpop.f32.mrb[192].mxu0  ;;  %v5674_v1 = vpop.f32.mrb[195].mxu1 }
 0x355   :  { %v4184_v49 = vadd.f32 %v4183_v42, %v4060_v44  ;;  %v6231_v11 = vadd.f32 %v3556_v58, %v2360_v30  ;;  %v6048_v62 = vpop.f32.mrb[193].mxu0 }
 0x357   :  { %v3927_v20 = vadd.f32 %v6231_v11, %v3926_v12  ;;  %v4061_v63 = vmul.f32 %v6231_v11, %v6231_v11  ;;  %v2370_v22 = vpop.f32.mrb[196].mxu1 }
 0x358   :  { %v3561_v61 = vpop.f32.mrb[194].mxu0  ;;  %v5677_v35 = vpop.f32.mrb[197].mxu1 }
 0x359   :  { %v4185_v19 = vadd.f32 %v4184_v49, %v4061_v63  ;;  %v6232_v3 = vadd.f32 %v3561_v61, %v2365_v41  ;;  %v6051_v16 = vpop.f32.mrb[195].mxu0 }
 0x35b   :  { %v3928_v47 = vadd.f32 %v6232_v3, %v3927_v20  ;;  %v4062_v21 = vmul.f32 %v6232_v3, %v6232_v3  ;;  %v2375_v46 = vpop.f32.mrb[198].mxu1 }
 0x35c   :  { %v3566_v34 = vpop.f32.mrb[196].mxu0  ;;  %v5680_v25 = vpop.f32.mrb[199].mxu1 }
 0x35d   :  { %v4186_v14 = vadd.f32 %v4185_v19, %v4062_v21  ;;  %v6233_v6 = vadd.f32 %v3566_v34, %v2370_v22  ;;  %v6054_v13 = vpop.f32.mrb[197].mxu0 }
 0x35f   :  { %v3929_v28 = vadd.f32 %v6233_v6, %v3928_v47  ;;  %v4063_v27 = vmul.f32 %v6233_v6, %v6233_v6  ;;  %v2380_v4 = vpop.f32.mrb[200].mxu1 }
 0x360   :  { %v3571_v37 = vpop.f32.mrb[198].mxu0  ;;  %v5683_v17 = vpop.f32.mrb[201].mxu1 }
 0x361   :  { %v4187_v54 = vadd.f32 %v4186_v14, %v4063_v27  ;;  %v6234_v59 = vadd.f32 %v3571_v37, %v2375_v46  ;;  %v6057_v26 = vpop.f32.mrb[199].mxu0 }
 0x363   :  { %v3930_v39 = vadd.f32 %v6234_v59, %v3929_v28  ;;  %v4064_v23 = vmul.f32 %v6234_v59, %v6234_v59  ;;  %v2385_v51 = vpop.f32.mrb[202].mxu1 }
 0x364   :  { %v3576_v33 = vpop.f32.mrb[200].mxu0  ;;  %v5686_v38 = vpop.f32.mrb[203].mxu1 }
 0x365   :  { %v4188_v53 = vadd.f32 %v4187_v54, %v4064_v23  ;;  %v6235_v31 = vadd.f32 %v3576_v33, %v2380_v4  ;;  %v6060_v60 = vpop.f32.mrb[201].mxu0 }
 0x367   :  { %v3931_v55 = vadd.f32 %v6235_v31, %v3930_v39  ;;  %v4065_v9 = vmul.f32 %v6235_v31, %v6235_v31  ;;  %v2390_v32 = vpop.f32.mrb[204].mxu1 }
 0x368   :  { %v3581_v57 = vpop.f32.mrb[202].mxu0  ;;  %v5689_v18 = vpop.f32.mrb[205].mxu1 }
 0x369   :  { %v4189_v50 = vadd.f32 %v4188_v53, %v4065_v9  ;;  %v6236_v40 = vadd.f32 %v3581_v57, %v2385_v51  ;;  %v6063_v2 = vpop.f32.mrb[203].mxu0 }
 0x36b   :  { %v3932_v8 = vadd.f32 %v6236_v40, %v3931_v55  ;;  %v4066_v10 = vmul.f32 %v6236_v40, %v6236_v40  ;;  %v2395_v36 = vpop.f32.mrb[206].mxu1 }
 0x36c   :  { %v3586_v43 = vpop.f32.mrb[204].mxu0  ;;  %v5692_v45 = vpop.f32.mrb[207].mxu1 }
 0x36d   :  { %v4190_v5 = vadd.f32 %v4189_v50, %v4066_v10  ;;  %v6237_v56 = vadd.f32 %v3586_v43, %v2390_v32  ;;  %v6066_v48 = vpop.f32.mrb[205].mxu0 }
 0x36f   :  { %v3933_v24 = vadd.f32 %v6237_v56, %v3932_v8  ;;  %v4067_v15 = vmul.f32 %v6237_v56, %v6237_v56  ;;  %v2400_v30 = vpop.f32.mrb[208].mxu1 }
 0x370   :  { %v3591_v0 = vpop.f32.mrb[206].mxu0  ;;  %v5695_v7 = vpop.f32.mrb[209].mxu1 }
 0x371   :  { %v4191_v42 = vadd.f32 %v4190_v5, %v4067_v15  ;;  %v6238_v52 = vadd.f32 %v3591_v0, %v2395_v36  ;;  %v6069_v29 = vpop.f32.mrb[207].mxu0 }
 0x373   :  { %v3934_v12 = vadd.f32 %v6238_v52, %v3933_v24  ;;  %v4068_v44 = vmul.f32 %v6238_v52, %v6238_v52  ;;  %v2405_v41 = vpop.f32.mrb[210].mxu1 }
 0x374   :  { %v3596_v58 = vpop.f32.mrb[208].mxu0  ;;  %v5698_v1 = vpop.f32.mrb[211].mxu1 }
 0x375   :  { %v4192_v49 = vadd.f32 %v4191_v42, %v4068_v44  ;;  %v6239_v11 = vadd.f32 %v3596_v58, %v2400_v30  ;;  %v6072_v62 = vpop.f32.mrb[209].mxu0 }
 0x377   :  { %v3935_v20 = vadd.f32 %v6239_v11, %v3934_v12  ;;  %v4069_v63 = vmul.f32 %v6239_v11, %v6239_v11  ;;  %v2410_v22 = vpop.f32.mrb[212].mxu1 }
 0x378   :  { %v3601_v61 = vpop.f32.mrb[210].mxu0  ;;  %v5701_v35 = vpop.f32.mrb[213].mxu1 }
 0x379   :  { %v4193_v19 = vadd.f32 %v4192_v49, %v4069_v63  ;;  %v6240_v3 = vadd.f32 %v3601_v61, %v2405_v41  ;;  %v6075_v16 = vpop.f32.mrb[211].mxu0 }
 0x37b   :  { %v3936_v47 = vadd.f32 %v6240_v3, %v3935_v20  ;;  %v4070_v21 = vmul.f32 %v6240_v3, %v6240_v3  ;;  %v2415_v46 = vpop.f32.mrb[214].mxu1 }
 0x37c   :  { %v3606_v34 = vpop.f32.mrb[212].mxu0  ;;  %v5704_v25 = vpop.f32.mrb[215].mxu1 }
 0x37d   :  { %v4194_v14 = vadd.f32 %v4193_v19, %v4070_v21  ;;  %v6241_v6 = vadd.f32 %v3606_v34, %v2410_v22  ;;  %v6078_v13 = vpop.f32.mrb[213].mxu0 }
 0x37f   :  { %v3937_v28 = vadd.f32 %v6241_v6, %v3936_v47  ;;  %v4071_v27 = vmul.f32 %v6241_v6, %v6241_v6  ;;  %v2420_v4 = vpop.f32.mrb[216].mxu1 }
 0x380   :  { %v3611_v37 = vpop.f32.mrb[214].mxu0  ;;  %v5707_v17 = vpop.f32.mrb[217].mxu1 }
 0x381   :  { %v4195_v54 = vadd.f32 %v4194_v14, %v4071_v27  ;;  %v6242_v59 = vadd.f32 %v3611_v37, %v2415_v46  ;;  %v6081_v26 = vpop.f32.mrb[215].mxu0 }
 0x383   :  { %v3938_v39 = vadd.f32 %v6242_v59, %v3937_v28  ;;  %v4072_v23 = vmul.f32 %v6242_v59, %v6242_v59  ;;  %v2425_v51 = vpop.f32.mrb[218].mxu1 }
 0x384   :  { %v3616_v33 = vpop.f32.mrb[216].mxu0  ;;  %v5710_v38 = vpop.f32.mrb[219].mxu1 }
 0x385   :  { %v4196_v53 = vadd.f32 %v4195_v54, %v4072_v23  ;;  %v6243_v31 = vadd.f32 %v3616_v33, %v2420_v4  ;;  %v6084_v60 = vpop.f32.mrb[217].mxu0 }
 0x387   :  { %v3939_v55 = vadd.f32 %v6243_v31, %v3938_v39  ;;  %v4073_v9 = vmul.f32 %v6243_v31, %v6243_v31  ;;  %v2430_v32 = vpop.f32.mrb[220].mxu1 }
 0x388   :  { %v3621_v57 = vpop.f32.mrb[218].mxu0  ;;  %v5713_v18 = vpop.f32.mrb[221].mxu1 }
 0x389   :  { %v4197_v50 = vadd.f32 %v4196_v53, %v4073_v9  ;;  %v6244_v40 = vadd.f32 %v3621_v57, %v2425_v51  ;;  %v6087_v2 = vpop.f32.mrb[219].mxu0 }
 0x38b   :  { %v3940_v8 = vadd.f32 %v6244_v40, %v3939_v55  ;;  %v4074_v10 = vmul.f32 %v6244_v40, %v6244_v40  ;;  %v2435_v36 = vpop.f32.mrb[222].mxu1 }
 0x38c   :  { %v3626_v43 = vpop.f32.mrb[220].mxu0  ;;  %v5716_v45 = vpop.f32.mrb[223].mxu1 }
 0x38d   :  { %v4198_v5 = vadd.f32 %v4197_v50, %v4074_v10  ;;  %v6245_v56 = vadd.f32 %v3626_v43, %v2430_v32  ;;  %v6090_v48 = vpop.f32.mrb[221].mxu0 }
 0x38f   :  { %v3941_v24 = vadd.f32 %v6245_v56, %v3940_v8  ;;  %v4075_v15 = vmul.f32 %v6245_v56, %v6245_v56  ;;  %v2440_v30 = vpop.f32.mrb[224].mxu1 }
 0x390   :  { %v3631_v0 = vpop.f32.mrb[222].mxu0  ;;  %v5719_v7 = vpop.f32.mrb[225].mxu1 }
 0x391   :  { %v4199_v42 = vadd.f32 %v4198_v5, %v4075_v15  ;;  %v6246_v52 = vadd.f32 %v3631_v0, %v2435_v36  ;;  %v6093_v29 = vpop.f32.mrb[223].mxu0 }
 0x393   :  { %v3942_v12 = vadd.f32 %v6246_v52, %v3941_v24  ;;  %v4076_v44 = vmul.f32 %v6246_v52, %v6246_v52  ;;  %v2445_v41 = vpop.f32.mrb[226].mxu1 }
 0x394   :  { %v3636_v58 = vpop.f32.mrb[224].mxu0  ;;  %v5722_v1 = vpop.f32.mrb[227].mxu1 }
 0x395   :  { %v4200_v49 = vadd.f32 %v4199_v42, %v4076_v44  ;;  %v6247_v11 = vadd.f32 %v3636_v58, %v2440_v30  ;;  %v6096_v62 = vpop.f32.mrb[225].mxu0 }
 0x397   :  { %v3943_v20 = vadd.f32 %v6247_v11, %v3942_v12  ;;  %v4077_v63 = vmul.f32 %v6247_v11, %v6247_v11  ;;  %v2450_v22 = vpop.f32.mrb[228].mxu1 }
 0x398   :  { %v3641_v61 = vpop.f32.mrb[226].mxu0  ;;  %v5725_v35 = vpop.f32.mrb[229].mxu1 }
 0x399   :  { %v4201_v19 = vadd.f32 %v4200_v49, %v4077_v63  ;;  %v6248_v3 = vadd.f32 %v3641_v61, %v2445_v41  ;;  %v6099_v16 = vpop.f32.mrb[227].mxu0 }
 0x39b   :  { %v3944_v47 = vadd.f32 %v6248_v3, %v3943_v20  ;;  %v4078_v21 = vmul.f32 %v6248_v3, %v6248_v3  ;;  %v2455_v46 = vpop.f32.mrb[230].mxu1 }
 0x39c   :  { %v3646_v34 = vpop.f32.mrb[228].mxu0  ;;  %v5728_v25 = vpop.f32.mrb[231].mxu1 }
 0x39d   :  { %v4202_v14 = vadd.f32 %v4201_v19, %v4078_v21  ;;  %v6249_v6 = vadd.f32 %v3646_v34, %v2450_v22  ;;  %v6102_v13 = vpop.f32.mrb[229].mxu0 }
 0x39f   :  { %v3945_v28 = vadd.f32 %v6249_v6, %v3944_v47  ;;  %v4079_v27 = vmul.f32 %v6249_v6, %v6249_v6  ;;  %v2460_v4 = vpop.f32.mrb[232].mxu1 }
 0x3a0   :  { %v3651_v37 = vpop.f32.mrb[230].mxu0  ;;  %v5731_v17 = vpop.f32.mrb[233].mxu1 }
 0x3a1   :  { %v4203_v54 = vadd.f32 %v4202_v14, %v4079_v27  ;;  %v6250_v59 = vadd.f32 %v3651_v37, %v2455_v46  ;;  %v6105_v26 = vpop.f32.mrb[231].mxu0 }
 0x3a3   :  { %v3946_v39 = vadd.f32 %v6250_v59, %v3945_v28  ;;  %v4080_v23 = vmul.f32 %v6250_v59, %v6250_v59  ;;  %v2465_v51 = vpop.f32.mrb[234].mxu1 }
 0x3a4   :  { %v3656_v33 = vpop.f32.mrb[232].mxu0  ;;  %v5734_v38 = vpop.f32.mrb[235].mxu1 }
 0x3a5   :  { %v4204_v53 = vadd.f32 %v4203_v54, %v4080_v23  ;;  %v6251_v31 = vadd.f32 %v3656_v33, %v2460_v4  ;;  %v6108_v60 = vpop.f32.mrb[233].mxu0 }
 0x3a7   :  { %v3947_v55 = vadd.f32 %v6251_v31, %v3946_v39  ;;  %v4081_v9 = vmul.f32 %v6251_v31, %v6251_v31  ;;  %v2470_v32 = vpop.f32.mrb[236].mxu1 }
 0x3a8   :  { %v3661_v57 = vpop.f32.mrb[234].mxu0  ;;  %v5737_v18 = vpop.f32.mrb[237].mxu1 }
 0x3a9   :  { %v4205_v50 = vadd.f32 %v4204_v53, %v4081_v9  ;;  %v6252_v40 = vadd.f32 %v3661_v57, %v2465_v51  ;;  %v6111_v2 = vpop.f32.mrb[235].mxu0 }
 0x3ab   :  { %v3948_v8 = vadd.f32 %v6252_v40, %v3947_v55  ;;  %v4082_v10 = vmul.f32 %v6252_v40, %v6252_v40  ;;  %v2475_v36 = vpop.f32.mrb[238].mxu1 }
 0x3ac   :  { %v3666_v43 = vpop.f32.mrb[236].mxu0  ;;  %v5740_v45 = vpop.f32.mrb[239].mxu1 }
 0x3ad   :  { %v4206_v5 = vadd.f32 %v4205_v50, %v4082_v10  ;;  %v6253_v56 = vadd.f32 %v3666_v43, %v2470_v32  ;;  %v6114_v48 = vpop.f32.mrb[237].mxu0 }
 0x3af   :  { %v3949_v24 = vadd.f32 %v6253_v56, %v3948_v8  ;;  %v4083_v15 = vmul.f32 %v6253_v56, %v6253_v56  ;;  %v2480_v30 = vpop.f32.mrb[240].mxu1  ;;  %v3964_v56 = vld [vmem:[%s9033_s7] sm:$0x1] }
 0x3b0   :  { %v3671_v0 = vpop.f32.mrb[238].mxu0  ;;  %v5743_v7 = vpop.f32.mrb[241].mxu1 }
 0x3b1   :  { %v4207_v42 = vadd.f32 %v4206_v5, %v4083_v15  ;;  %v6254_v52 = vadd.f32 %v3671_v0, %v2475_v36  ;;  %v6117_v29 = vpop.f32.mrb[239].mxu0  ;;  %v3831_v36 = vld [vmem:[%s9032_s6] sm:$0x1] }
 0x3b3   :  { %v3950_v12 = vadd.f32 %v6254_v52, %v3949_v24  ;;  %v4084_v44 = vmul.f32 %v6254_v52, %v6254_v52  ;;  %v2485_v41 = vpop.f32.mrb[242].mxu1 }
 0x3b4   :  { %v3676_v58 = vpop.f32.mrb[240].mxu0  ;;  %v5746_v1 = vpop.f32.mrb[243].mxu1 }
 0x3b5   :  { %v4208_v49 = vadd.f32 %v4207_v42, %v4084_v44  ;;  %v6255_v11 = vadd.f32 %v3676_v58, %v2480_v30  ;;  %v6120_v62 = vpop.f32.mrb[241].mxu0 }
 0x3b7   :  { %v3951_v20 = vadd.f32 %v6255_v11, %v3950_v12  ;;  %v4085_v63 = vmul.f32 %v6255_v11, %v6255_v11  ;;  %v2490_v22 = vpop.f32.mrb[244].mxu1 }
 0x3b8   :  { %v3681_v61 = vpop.f32.mrb[242].mxu0  ;;  %v5749_v35 = vpop.f32.mrb[245].mxu1 }
 0x3b9   :  { %v4209_v19 = vadd.f32 %v4208_v49, %v4085_v63  ;;  %v6256_v3 = vadd.f32 %v3681_v61, %v2485_v41  ;;  %v6123_v16 = vpop.f32.mrb[243].mxu0 }
 0x3bb   :  { %v3952_v47 = vadd.f32 %v6256_v3, %v3951_v20  ;;  %v4086_v21 = vmul.f32 %v6256_v3, %v6256_v3  ;;  %v2495_v46 = vpop.f32.mrb[246].mxu1 }
 0x3bc   :  { %v3686_v34 = vpop.f32.mrb[244].mxu0  ;;  %v5752_v25 = vpop.f32.mrb[247].mxu1 }
 0x3bd   :  { %v4210_v14 = vadd.f32 %v4209_v19, %v4086_v21  ;;  %v6257_v6 = vadd.f32 %v3686_v34, %v2490_v22  ;;  %v6126_v13 = vpop.f32.mrb[245].mxu0 }
 0x3bf   :  { %v3953_v28 = vadd.f32 %v6257_v6, %v3952_v47  ;;  %v4087_v27 = vmul.f32 %v6257_v6, %v6257_v6  ;;  %v2500_v4 = vpop.f32.mrb[248].mxu1 }
 0x3c0   :  { %v3691_v37 = vpop.f32.mrb[246].mxu0  ;;  %v5755_v17 = vpop.f32.mrb[249].mxu1 }
 0x3c1   :  { %v4211_v54 = vadd.f32 %v4210_v14, %v4087_v27  ;;  %v6258_v59 = vadd.f32 %v3691_v37, %v2495_v46  ;;  %v6129_v26 = vpop.f32.mrb[247].mxu0 }
 0x3c3   :  { %v3954_v39 = vadd.f32 %v6258_v59, %v3953_v28  ;;  %v4088_v23 = vmul.f32 %v6258_v59, %v6258_v59 }
 0x3c4   :  { %v3696_v51 = vpop.f32.mrb[248].mxu0 }
 0x3c5   :  { %v4212_v33 = vadd.f32 %v4211_v54, %v4088_v23  ;;  %v6259_v53 = vadd.f32 %v3696_v51, %v2500_v4  ;;  %v6132_v31 = vpop.f32.mrb[249].mxu0 }
 0x3c7   :  { %v3955_v38 = vadd.f32 %v6259_v53, %v3954_v39  ;;  %v4089_v60 = vmul.f32 %v6259_v53, %v6259_v53 }
 0x3c9   :  { %v3956_v55 = vrot.slane %v3955_v38, 4  ;;  %v4213_v9 = vadd.f32 %v4212_v33, %v4089_v60 }
 0x3cb   :  { %v3957_v32 = vadd.f32 %v3956_v55, %v3955_v38  ;;  %v4214_v57 = vrot.slane %v4213_v9, 4 }
 0x3cd   :  { %v3958_v50 = vrot.slane %v3957_v32, 2  ;;  %v4215_v40 = vadd.f32 %v4214_v57, %v4213_v9 }
 0x3cf   :  { %v3959_v18 = vadd.f32 %v3958_v50, %v3957_v32  ;;  %v4216_v2 = vrot.slane %v4215_v40, 2 }
 0x3d1   :  { %v3960_v8 = vrot.slane %v3959_v18, 1  ;;  %v4217_v10 = vadd.f32 %v4216_v2, %v4215_v40 }
 0x3d3   :  { %v3961_v43 = vadd.f32 %v3960_v8, %v3959_v18  ;;  %v4218_v5 = vrot.slane %v4217_v10, 1 }
 0x3d5   :  { %v3962_v45 = vadd.f32 %v3961_v43, %v3831_v36  ;;  %v4219_v48 = vadd.f32 %v4218_v5, %v4217_v10 }
 0x3d7   :  { %3963 = vst [vmem:[%s9032_s6] sm:$0x1] %v3962_v45  ;;  %v4220_v24 = vadd.f32 %v4219_v48, %v3964_v56 }
 0x3d9   :  { %4221 = vst [vmem:[%s9033_s7] sm:$0x1] %v4220_v24 }

// kernel: _forward_impl.3
= control target key start
LH: loop header
LB: loop body
LE: loop exit
PB: predicated region body
PF: predicated region fallthrough
CT: control target
= control target key end

     0   :  { %vm309_vm0 = vcmask 64512   ;;  %v7831_v0 = vmov 0.0   ;;  %vm7832_vm1 = vmmov 0   ;;  %vm2942_vm2 = vcmask 1043456   ;;  %s11748_s3 = inlined_call_operand.vmem [shape: f32[8,128], index: 3, kind: input, shape index: {}]   ;;  %s11749_s0 = inlined_call_operand.vmem [shape: f32[1000,8], index: 0, kind: input, shape index: {}]   ;;  %s11750_s5 = inlined_call_operand.vmem [shape: f32[4,128], index: 5, kind: input, shape index: {}]   ;;  %s11751_s4 = inlined_call_operand.vmem [shape: f32[8,128], index: 4, kind: input, shape index: {}]   ;;  %s11752_s1 = inlined_call_operand.vmem [shape: f32[1000,8], index: 1, kind: input, shape index: {}]   ;;  %s11753_s10 = inlined_call_operand.vmem [shape: f32[128,32], index: 10, kind: input, shape index: {}]   ;;  %s11754_s2 = inlined_call_operand.vmem [shape: f32[1000,4], index: 2, kind: input, shape index: {}]   ;;  %s11755_s6 = inlined_call_operand.vmem [shape: f32[1,1,128], index: 6, kind: input, shape index: {}]   ;;  %s11756_s7 = inlined_call_operand.vmem [shape: f32[1,1,128], index: 7, kind: input, shape index: {}]   ;;  %s11757_s8 = inlined_call_operand.vmem [shape: f32[1,128], index: 8, kind: input, shape index: {}]   ;;  %s11758_s9 = inlined_call_operand.vmem [shape: f32[1,128], index: 9, kind: input, shape index: {}]   ;;  %s11759_s11 = inlined_call_operand.vmem [shape: f32[1,32], index: 11, kind: input, shape index: {}]   ;;  %s11760_s12 = inlined_call_operand.vmem [shape: f32[1000,32], index: 12, kind: output, shape index: {}]  }
   0x1   :  { %6264 = vmatprep.subr.mxu0 %v7831_v0  ;;  %v182_v1 = vld [vmem:[%s11748_s3] sm:$0xff]  ;;  %6266 = vmatprep.mubr.msk.f32.mxu0 %vm7832_vm1, %v7831_v0  ;;  %v58_v4 = vld [vmem:[%s11749_s0 + $0x8] sm:$0xff]  ;;  %v59_v5 = vld [vmem:[%s11749_s0 + $0x10] sm:$0xff]  ;;  %v7833_v30 = vmov 0.0|0.0   ;;  %vm2566_vm3 = vcmask 31744   ;;  %vm4861_vm4 = vcmask 261120  }
   0x2   :  { %v57_v2 = vld [vmem:[%s11749_s0] sm:$0xff]  ;;  %6265 = vmatpush3.msra.mxu0 %v182_v1  ;;  %5887 = vmatprep.subr.mxu1 %v7831_v0  ;;  %v60_v6 = vld [vmem:[%s11749_s0 + $0x18] sm:$0xff]  ;;  %v62_v8 = vld [vmem:[%s11749_s0 + $0x28] sm:$0xff] }
   0x3   :  { %v2565_v3 = vld [vmem:[%s11750_s5] sm:$0xf]  ;;  %6267 = vmatmul.mubr.msk.f32.vlgmr.msra.gmra.mrb[0].mxu0 %vm309_vm0, %v57_v2  ;;  %6641 = vmatprep.subr.mxu0 %v7831_v0  ;;  %v63_v9 = vld [vmem:[%s11749_s0 + $0x30] sm:$0xff]  ;;  %v64_v10 = vld [vmem:[%s11749_s0 + $0x38] sm:$0xff] }
   0x4   :  { %6642 = vmatpush3.msk.msra.mxu0 %vm2942_vm2, %v2565_v3  ;;  %6269 = vmatprep.mubr.msk.f32.mxu0 %vm7832_vm1, %v7831_v0  ;;  %v61_v7 = vld [vmem:[%s11749_s0 + $0x20] sm:$0xff]  ;;  %v66_v12 = vld [vmem:[%s11749_s0 + $0x48] sm:$0xff]  ;;  %v67_v13 = vld [vmem:[%s11749_s0 + $0x50] sm:$0xff] }
   0x5   :  { %5889 = vmatprep.mubr.msk.f32.mxu1 %vm7832_vm1, %v7831_v0  ;;  %v65_v11 = vld [vmem:[%s11749_s0 + $0x40] sm:$0xff]  ;;  %v68_v14 = vld [vmem:[%s11749_s0 + $0x58] sm:$0xff]  ;;  %v70_v16 = vld [vmem:[%s11749_s0 + $0x68] sm:$0xff] }
   0x6   :  { %v69_v15 = vld [vmem:[%s11749_s0 + $0x60] sm:$0xff]  ;;  %v71_v17 = vld [vmem:[%s11749_s0 + $0x70] sm:$0xff]  ;;  %v72_v18 = vld [vmem:[%s11749_s0 + $0x78] sm:$0xff] }
   0x7   :  { %6270 = vmatmul.mubr.msk.f32.gmra.mrb[2].mxu0 %vm309_vm0, %v58_v4  ;;  %v73_v19 = vld [vmem:[%s11749_s0 + $0x80] sm:$0xff]  ;;  %v74_v20 = vld [vmem:[%s11749_s0 + $0x88] sm:$0xff]  ;;  %v75_v21 = vld [vmem:[%s11749_s0 + $0x90] sm:$0xff] }
   0x8   :  { %6272 = vmatprep.mubr.msk.f32.mxu0 %vm7832_vm1, %v7831_v0  ;;  %v76_v22 = vld [vmem:[%s11749_s0 + $0x98] sm:$0xff]  ;;  %v77_v23 = vld [vmem:[%s11749_s0 + $0xa0] sm:$0xff]  ;;  %v78_v24 = vld [vmem:[%s11749_s0 + $0xa8] sm:$0xff] }
   0x9   :  { %v79_v25 = vld [vmem:[%s11749_s0 + $0xb0] sm:$0xff]  ;;  %v80_v26 = vld [vmem:[%s11749_s0 + $0xb8] sm:$0xff]  ;;  %v308_v27 = vld [vmem:[%s11751_s4] sm:$0xff] }
   0xa   :  { %5888 = vmatpush3.msra.mxu1 %v308_v27  ;;  %v183_v28 = vld [vmem:[%s11752_s1] sm:$0xff]  ;;  %v4149_v32 = vld [vmem:[%s11753_s10 + $0x8] sm:$0xff]  ;;  %v185_v36 = vld [vmem:[%s11752_s1 + $0x10] sm:$0xff] }
   0xb   :  { %6273 = vmatmul.mubr.msk.f32.gmra.mrb[4].mxu0 %vm309_vm0, %v59_v5  ;;  %5890 = vmatmul.mubr.msk.f32.vlgmr.msra.gmra.mrb[0].mxu1 %vm309_vm0, %v183_v28  ;;  %v81_v29 = vld [vmem:[%s11749_s0 + $0xc0] sm:$0xff]  ;;  %v184_v33 = vld [vmem:[%s11752_s1 + $0x8] sm:$0xff]  ;;  %v83_v37 = vld [vmem:[%s11749_s0 + $0xd0] sm:$0xff] }
   0xc   :  { %6275 = vmatprep.mubr.msk.f32.mxu0 %vm7832_vm1, %v7831_v0  ;;  %5892 = vmatprep.mubr.msk.f32.mxu1 %vm7832_vm1, %v7831_v0  ;;  %v4148_v31 = vld [vmem:[%s11753_s10] sm:$0xff]  ;;  %v82_v35 = vld [vmem:[%s11749_s0 + $0xc8] sm:$0xff]  ;;  %v186_v38 = vld [vmem:[%s11752_s1 + $0x18] sm:$0xff] }
   0xd   :  { %7425 = vmatprep.subr.bf16.mxu1 %v7833_v30  ;;  %v7426_v34 = vpack.c.bf16 %v4149_v32, %v4148_v31  ;;  %v84_v39 = vld [vmem:[%s11749_s0 + $0xd8] sm:$0xff]  ;;  %v187_v40 = vld [vmem:[%s11752_s1 + $0x20] sm:$0xff]  ;;  %v188_v42 = vld [vmem:[%s11752_s1 + $0x28] sm:$0xff] }
   0xe   :  { %v85_v41 = vld [vmem:[%s11749_s0 + $0xe0] sm:$0xff]  ;;  %v86_v43 = vld [vmem:[%s11749_s0 + $0xe8] sm:$0xff]  ;;  %v189_v44 = vld [vmem:[%s11752_s1 + $0x30] sm:$0xff] }
   0xf   :  { %6276 = vmatmul.mubr.msk.f32.gmra.mrb[6].mxu0 %vm309_vm0, %v60_v6  ;;  %5893 = vmatmul.mubr.msk.f32.gmra.mrb[2].mxu1 %vm309_vm0, %v184_v33  ;;  %v87_v45 = vld [vmem:[%s11749_s0 + $0xf0] sm:$0xff]  ;;  %v190_v46 = vld [vmem:[%s11752_s1 + $0x38] sm:$0xff]  ;;  %v191_v48 = vld [vmem:[%s11752_s1 + $0x40] sm:$0xff] }
  0x10   :  { %6278 = vmatprep.mubr.msk.f32.mxu0 %vm7832_vm1, %v7831_v0  ;;  %7427 = vmatpush3.bf16.msra.mxu1 %v7426_v34  ;;  %v88_v47 = vld [vmem:[%s11749_s0 + $0xf8] sm:$0xff]  ;;  %v89_v49 = vld [vmem:[%s11749_s0 + $0x100] sm:$0xff]  ;;  %v192_v50 = vld [vmem:[%s11752_s1 + $0x48] sm:$0xff] }
  0x11   :  { %5895 = vmatprep.mubr.msk.f32.mxu1 %vm7832_vm1, %v7831_v0  ;;  %7428 = vmatprep.subr.bf16.mxu1 %v7833_v30  ;;  %v90_v51 = vld [vmem:[%s11749_s0 + $0x108] sm:$0xff]  ;;  %v193_v52 = vld [vmem:[%s11752_s1 + $0x50] sm:$0xff]  ;;  %v194_v54 = vld [vmem:[%s11752_s1 + $0x58] sm:$0xff] }
  0x12   :  { %v91_v53 = vld [vmem:[%s11749_s0 + $0x110] sm:$0xff]  ;;  %v92_v55 = vld [vmem:[%s11749_s0 + $0x118] sm:$0xff]  ;;  %v195_v56 = vld [vmem:[%s11752_s1 + $0x60] sm:$0xff] }
  0x13   :  { %6279 = vmatmul.mubr.msk.f32.gmra.mrb[8].mxu0 %vm309_vm0, %v61_v7  ;;  %5896 = vmatmul.mubr.msk.f32.gmra.mrb[4].mxu1 %vm309_vm0, %v185_v36  ;;  %v93_v57 = vld [vmem:[%s11749_s0 + $0x120] sm:$0xff]  ;;  %v196_v58 = vld [vmem:[%s11752_s1 + $0x68] sm:$0xff]  ;;  %v197_v60 = vld [vmem:[%s11752_s1 + $0x70] sm:$0xff] }
  0x14   :  { %6281 = vmatprep.mubr.msk.f32.mxu0 %vm7832_vm1, %v7831_v0  ;;  %5898 = vmatprep.mubr.msk.f32.mxu1 %vm7832_vm1, %v7831_v0  ;;  %v94_v59 = vld [vmem:[%s11749_s0 + $0x128] sm:$0xff]  ;;  %v95_v61 = vld [vmem:[%s11749_s0 + $0x130] sm:$0xff]  ;;  %v198_v62 = vld [vmem:[%s11752_s1 + $0x78] sm:$0xff] }
  0x15   :  { %v96_v63 = vld [vmem:[%s11749_s0 + $0x138] sm:$0xff]  ;;  %v199_v1 = vld [vmem:[%s11752_s1 + $0x80] sm:$0xff]  ;;  %v4150_v2 = vld [vmem:[%s11753_s10 + $0x10] sm:$0xff] }
  0x16   :  { %v4151_v3 = vld [vmem:[%s11753_s10 + $0x18] sm:$0xff]  ;;  %v97_v4 = vld [vmem:[%s11749_s0 + $0x140] sm:$0xff]  ;;  %v200_v6 = vld [vmem:[%s11752_s1 + $0x88] sm:$0xff] }
  0x17   :  { %6282 = vmatmul.mubr.msk.f32.gmra.mrb[10].mxu0 %vm309_vm0, %v62_v8  ;;  %5899 = vmatmul.mubr.msk.f32.gmra.mrb[6].mxu1 %vm309_vm0, %v186_v38  ;;  %v7429_v5 = vpack.c.bf16 %v4151_v3, %v4150_v2  ;;  %v98_v7 = vld [vmem:[%s11749_s0 + $0x148] sm:$0xff]  ;;  %v201_v8 = vld [vmem:[%s11752_s1 + $0x90] sm:$0xff]  ;;  %v108_v27 = vld [vmem:[%s11749_s0 + $0x198] sm:$0xff] }
  0x18   :  { %6284 = vmatprep.mubr.msk.f32.mxu0 %vm7832_vm1, %v7831_v0  ;;  %5901 = vmatprep.mubr.msk.f32.mxu1 %vm7832_vm1, %v7831_v0  ;;  %v211_v28 = vld [vmem:[%s11752_s1 + $0xe0] sm:$0xff]  ;;  %v212_v31 = vld [vmem:[%s11752_s1 + $0xe8] sm:$0xff]  ;;  %v213_v33 = vld [vmem:[%s11752_s1 + $0xf0] sm:$0xff] }
  0x19   :  { %7430 = vmatpush3.bf16.msra.mxu1 %v7429_v5  ;;  %v110_v32 = vld [vmem:[%s11749_s0 + $0x1a8] sm:$0xff]  ;;  %v111_v34 = vld [vmem:[%s11749_s0 + $0x1b0] sm:$0xff]  ;;  %v4152_v36 = vld [vmem:[%s11753_s10 + $0x20] sm:$0xff] }
  0x1a   :  { %7431 = vmatprep.subr.bf16.mxu1 %v7833_v30  ;;  %v112_v38 = vld [vmem:[%s11749_s0 + $0x1b8] sm:$0xff]  ;;  %v125_v2 = vld [vmem:[%s11749_s0 + $0x220] sm:$0xff]  ;;  %v228_v3 = vld [vmem:[%s11752_s1 + $0x168] sm:$0xff] }
  0x1b   :  { %6285 = vmatmul.mubr.msk.f32.gmra.mrb[12].mxu0 %vm309_vm0, %v63_v9  ;;  %5902 = vmatmul.mubr.msk.f32.gmra.mrb[8].mxu1 %vm309_vm0, %v187_v40  ;;  %v99_v9 = vld [vmem:[%s11749_s0 + $0x150] sm:$0xff]  ;;  %v215_v40 = vld [vmem:[%s11752_s1 + $0x100] sm:$0xff] }
  0x1c   :  { %6287 = vmatprep.mubr.msk.f32.mxu0 %vm7832_vm1, %v7831_v0  ;;  %5904 = vmatprep.mubr.msk.f32.mxu1 %vm7832_vm1, %v7831_v0  ;;  %v229_v5 = vld [vmem:[%s11752_s1 + $0x170] sm:$0xff] }
  0x1f   :  { %6288 = vmatmul.mubr.msk.f32.gmra.mrb[14].mxu0 %vm309_vm0, %v64_v10  ;;  %5905 = vmatmul.mubr.msk.f32.gmra.mrb[10].mxu1 %vm309_vm0, %v188_v42  ;;  %v202_v10 = vld [vmem:[%s11752_s1 + $0x98] sm:$0xff]  ;;  %v216_v42 = vld [vmem:[%s11752_s1 + $0x108] sm:$0xff] }
  0x20   :  { %6290 = vmatprep.mubr.msk.f32.mxu0 %vm7832_vm1, %v7831_v0  ;;  %5907 = vmatprep.mubr.msk.f32.mxu1 %vm7832_vm1, %v7831_v0 }
  0x23   :  { %6291 = vmatmul.mubr.msk.f32.gmra.mrb[16].mxu0 %vm309_vm0, %v65_v11  ;;  %5908 = vmatmul.mubr.msk.f32.gmra.mrb[12].mxu1 %vm309_vm0, %v189_v44  ;;  %v100_v11 = vld [vmem:[%s11749_s0 + $0x158] sm:$0xff]  ;;  %v217_v44 = vld [vmem:[%s11752_s1 + $0x110] sm:$0xff] }
  0x24   :  { %6293 = vmatprep.mubr.msk.f32.mxu0 %vm7832_vm1, %v7831_v0  ;;  %5910 = vmatprep.mubr.msk.f32.mxu1 %vm7832_vm1, %v7831_v0 }
  0x27   :  { %6294 = vmatmul.mubr.msk.f32.gmra.mrb[18].mxu0 %vm309_vm0, %v66_v12  ;;  %5911 = vmatmul.mubr.msk.f32.gmra.mrb[14].mxu1 %vm309_vm0, %v190_v46  ;;  %v203_v12 = vld [vmem:[%s11752_s1 + $0xa0] sm:$0xff]  ;;  %v218_v46 = vld [vmem:[%s11752_s1 + $0x118] sm:$0xff] }
  0x28   :  { %6296 = vmatprep.mubr.msk.f32.mxu0 %vm7832_vm1, %v7831_v0  ;;  %5913 = vmatprep.mubr.msk.f32.mxu1 %vm7832_vm1, %v7831_v0 }
  0x2b   :  { %6297 = vmatmul.mubr.msk.f32.gmra.mrb[20].mxu0 %vm309_vm0, %v67_v13  ;;  %5914 = vmatmul.mubr.msk.f32.gmra.mrb[16].mxu1 %vm309_vm0, %v191_v48  ;;  %v101_v13 = vld [vmem:[%s11749_s0 + $0x160] sm:$0xff] }
  0x2c   :  { %6299 = vmatprep.mubr.msk.f32.mxu0 %vm7832_vm1, %v7831_v0  ;;  %5916 = vmatprep.mubr.msk.f32.mxu1 %vm7832_vm1, %v7831_v0  ;;  %v219_v48 = vld [vmem:[%s11752_s1 + $0x120] sm:$0xff] }
  0x2f   :  { %6300 = vmatmul.mubr.msk.f32.gmra.mrb[22].mxu0 %vm309_vm0, %v68_v14  ;;  %5917 = vmatmul.mubr.msk.f32.gmra.mrb[18].mxu1 %vm309_vm0, %v192_v50  ;;  %v204_v14 = vld [vmem:[%s11752_s1 + $0xa8] sm:$0xff] }
  0x30   :  { %6302 = vmatprep.mubr.msk.f32.mxu0 %vm7832_vm1, %v7831_v0  ;;  %5919 = vmatprep.mubr.msk.f32.mxu1 %vm7832_vm1, %v7831_v0  ;;  %v220_v50 = vld [vmem:[%s11752_s1 + $0x128] sm:$0xff] }
  0x33   :  { %6303 = vmatmul.mubr.msk.f32.gmra.mrb[24].mxu0 %vm309_vm0, %v69_v15  ;;  %5920 = vmatmul.mubr.msk.f32.gmra.mrb[20].mxu1 %vm309_vm0, %v193_v52  ;;  %v102_v15 = vld [vmem:[%s11749_s0 + $0x168] sm:$0xff]  ;;  %v221_v52 = vld [vmem:[%s11752_s1 + $0x130] sm:$0xff] }
  0x34   :  { %6305 = vmatprep.mubr.msk.f32.mxu0 %vm7832_vm1, %v7831_v0  ;;  %5922 = vmatprep.mubr.msk.f32.mxu1 %vm7832_vm1, %v7831_v0 }
  0x37   :  { %6306 = vmatmul.mubr.msk.f32.gmra.mrb[26].mxu0 %vm309_vm0, %v70_v16  ;;  %5923 = vmatmul.mubr.msk.f32.gmra.mrb[22].mxu1 %vm309_vm0, %v194_v54  ;;  %v205_v16 = vld [vmem:[%s11752_s1 + $0xb0] sm:$0xff]  ;;  %v222_v54 = vld [vmem:[%s11752_s1 + $0x138] sm:$0xff] }
  0x38   :  { %6308 = vmatprep.mubr.msk.f32.mxu0 %vm7832_vm1, %v7831_v0  ;;  %5925 = vmatprep.mubr.msk.f32.mxu1 %vm7832_vm1, %v7831_v0 }
  0x3b   :  { %6309 = vmatmul.mubr.msk.f32.gmra.mrb[28].mxu0 %vm309_vm0, %v71_v17  ;;  %5926 = vmatmul.mubr.msk.f32.gmra.mrb[24].mxu1 %vm309_vm0, %v195_v56  ;;  %v103_v17 = vld [vmem:[%s11749_s0 + $0x170] sm:$0xff]  ;;  %v223_v56 = vld [vmem:[%s11752_s1 + $0x140] sm:$0xff] }
  0x3c   :  { %6311 = vmatprep.mubr.msk.f32.mxu0 %vm7832_vm1, %v7831_v0  ;;  %5928 = vmatprep.mubr.msk.f32.mxu1 %vm7832_vm1, %v7831_v0 }
  0x3f   :  { %6312 = vmatmul.mubr.msk.f32.gmra.mrb[30].mxu0 %vm309_vm0, %v72_v18  ;;  %5929 = vmatmul.mubr.msk.f32.gmra.mrb[26].mxu1 %vm309_vm0, %v196_v58  ;;  %v206_v18 = vld [vmem:[%s11752_s1 + $0xb8] sm:$0xff]  ;;  %v224_v58 = vld [vmem:[%s11752_s1 + $0x148] sm:$0xff] }
  0x40   :  { %6314 = vmatprep.mubr.msk.f32.mxu0 %vm7832_vm1, %v7831_v0  ;;  %5931 = vmatprep.mubr.msk.f32.mxu1 %vm7832_vm1, %v7831_v0 }
  0x43   :  { %6315 = vmatmul.mubr.msk.f32.gmra.mrb[32].mxu0 %vm309_vm0, %v73_v19  ;;  %5932 = vmatmul.mubr.msk.f32.gmra.mrb[28].mxu1 %vm309_vm0, %v197_v60  ;;  %v104_v19 = vld [vmem:[%s11749_s0 + $0x178] sm:$0xff]  ;;  %v225_v60 = vld [vmem:[%s11752_s1 + $0x150] sm:$0xff] }
  0x44   :  { %6317 = vmatprep.mubr.msk.f32.mxu0 %vm7832_vm1, %v7831_v0  ;;  %5934 = vmatprep.mubr.msk.f32.mxu1 %vm7832_vm1, %v7831_v0 }
  0x47   :  { %6318 = vmatmul.mubr.msk.f32.gmra.mrb[34].mxu0 %vm309_vm0, %v74_v20  ;;  %5935 = vmatmul.mubr.msk.f32.gmra.mrb[30].mxu1 %vm309_vm0, %v198_v62  ;;  %v207_v20 = vld [vmem:[%s11752_s1 + $0xc0] sm:$0xff]  ;;  %v226_v62 = vld [vmem:[%s11752_s1 + $0x158] sm:$0xff] }
  0x48   :  { %6320 = vmatprep.mubr.msk.f32.mxu0 %vm7832_vm1, %v7831_v0  ;;  %5937 = vmatprep.mubr.msk.f32.mxu1 %vm7832_vm1, %v7831_v0 }
  0x4b   :  { %6321 = vmatmul.mubr.msk.f32.gmra.mrb[36].mxu0 %vm309_vm0, %v75_v21  ;;  %5938 = vmatmul.mubr.msk.f32.gmra.mrb[32].mxu1 %vm309_vm0, %v199_v1  ;;  %v105_v21 = vld [vmem:[%s11749_s0 + $0x180] sm:$0xff] }
  0x4c   :  { %6323 = vmatprep.mubr.msk.f32.mxu0 %vm7832_vm1, %v7831_v0  ;;  %5940 = vmatprep.mubr.msk.f32.mxu1 %vm7832_vm1, %v7831_v0  ;;  %v227_v1 = vld [vmem:[%s11752_s1 + $0x160] sm:$0xff] }
  0x4f   :  { %6324 = vmatmul.mubr.msk.f32.gmra.mrb[38].mxu0 %vm309_vm0, %v76_v22  ;;  %5941 = vmatmul.mubr.msk.f32.gmra.mrb[34].mxu1 %vm309_vm0, %v200_v6  ;;  %v208_v22 = vld [vmem:[%s11752_s1 + $0xc8] sm:$0xff]  ;;  %v127_v6 = vld [vmem:[%s11749_s0 + $0x230] sm:$0xff] }
  0x50   :  { %6326 = vmatprep.mubr.msk.f32.mxu0 %vm7832_vm1, %v7831_v0  ;;  %5943 = vmatprep.mubr.msk.f32.mxu1 %vm7832_vm1, %v7831_v0 }
  0x53   :  { %6327 = vmatmul.mubr.msk.f32.gmra.mrb[40].mxu0 %vm309_vm0, %v77_v23  ;;  %5944 = vmatmul.mubr.msk.f32.gmra.mrb[36].mxu1 %vm309_vm0, %v201_v8  ;;  %v106_v23 = vld [vmem:[%s11749_s0 + $0x188] sm:$0xff]  ;;  %v4154_v8 = vld [vmem:[%s11753_s10 + $0x30] sm:$0xff] }
  0x54   :  { %6329 = vmatprep.mubr.msk.f32.mxu0 %vm7832_vm1, %v7831_v0  ;;  %5946 = vmatprep.mubr.msk.f32.mxu1 %vm7832_vm1, %v7831_v0 }
  0x57   :  { %6330 = vmatmul.mubr.msk.f32.gmra.mrb[42].mxu0 %vm309_vm0, %v78_v24  ;;  %5947 = vmatmul.mubr.msk.f32.gmra.mrb[38].mxu1 %vm309_vm0, %v202_v10  ;;  %v209_v24 = vld [vmem:[%s11752_s1 + $0xd0] sm:$0xff]  ;;  %v128_v10 = vld [vmem:[%s11749_s0 + $0x238] sm:$0xff] }
  0x58   :  { %6332 = vmatprep.mubr.msk.f32.mxu0 %vm7832_vm1, %v7831_v0  ;;  %5949 = vmatprep.mubr.msk.f32.mxu1 %vm7832_vm1, %v7831_v0 }
  0x5b   :  { %6333 = vmatmul.mubr.msk.f32.gmra.mrb[44].mxu0 %vm309_vm0, %v79_v25  ;;  %5950 = vmatmul.mubr.msk.f32.gmra.mrb[40].mxu1 %vm309_vm0, %v203_v12  ;;  %v107_v25 = vld [vmem:[%s11749_s0 + $0x190] sm:$0xff]  ;;  %v231_v12 = vld [vmem:[%s11752_s1 + $0x180] sm:$0xff] }
  0x5c   :  { %6335 = vmatprep.mubr.msk.f32.mxu0 %vm7832_vm1, %v7831_v0  ;;  %5952 = vmatprep.mubr.msk.f32.mxu1 %vm7832_vm1, %v7831_v0 }
  0x5f   :  { %6336 = vmatmul.mubr.msk.f32.gmra.mrb[46].mxu0 %vm309_vm0, %v80_v26  ;;  %5953 = vmatmul.mubr.msk.f32.gmra.mrb[42].mxu1 %vm309_vm0, %v204_v14  ;;  %v210_v26 = vld [vmem:[%s11752_s1 + $0xd8] sm:$0xff]  ;;  %v232_v14 = vld [vmem:[%s11752_s1 + $0x188] sm:$0xff] }
  0x60   :  { %6338 = vmatprep.mubr.msk.f32.mxu0 %vm7832_vm1, %v7831_v0  ;;  %5955 = vmatprep.mubr.msk.f32.mxu1 %vm7832_vm1, %v7831_v0 }
  0x63   :  { %6339 = vmatmul.mubr.msk.f32.gmra.mrb[48].mxu0 %vm309_vm0, %v81_v29  ;;  %5956 = vmatmul.mubr.msk.f32.gmra.mrb[44].mxu1 %vm309_vm0, %v205_v16  ;;  %v109_v29 = vld [vmem:[%s11749_s0 + $0x1a0] sm:$0xff]  ;;  %v233_v16 = vld [vmem:[%s11752_s1 + $0x190] sm:$0xff] }
  0x64   :  { %6341 = vmatprep.mubr.msk.f32.mxu0 %vm7832_vm1, %v7831_v0  ;;  %5958 = vmatprep.mubr.msk.f32.mxu1 %vm7832_vm1, %v7831_v0 }
  0x67   :  { %6342 = vmatmul.mubr.msk.f32.gmra.mrb[50].mxu0 %vm309_vm0, %v82_v35  ;;  %5959 = vmatmul.mubr.msk.f32.gmra.mrb[46].mxu1 %vm309_vm0, %v206_v18  ;;  %v214_v35 = vld [vmem:[%s11752_s1 + $0xf8] sm:$0xff] }
  0x68   :  { %6344 = vmatprep.mubr.msk.f32.mxu0 %vm7832_vm1, %v7831_v0  ;;  %5961 = vmatprep.mubr.msk.f32.mxu1 %vm7832_vm1, %v7831_v0  ;;  %v234_v18 = vld [vmem:[%s11752_s1 + $0x198] sm:$0xff] }
  0x6b   :  { %6345 = vmatmul.mubr.msk.f32.gmra.mrb[52].mxu0 %vm309_vm0, %v83_v37  ;;  %5962 = vmatmul.mubr.msk.f32.gmra.mrb[48].mxu1 %vm309_vm0, %v207_v20  ;;  %v4153_v37 = vld [vmem:[%s11753_s10 + $0x28] sm:$0xff]  ;;  %v235_v20 = vld [vmem:[%s11752_s1 + $0x1a0] sm:$0xff] }
  0x6c   :  { %6347 = vmatprep.mubr.msk.f32.mxu0 %vm7832_vm1, %v7831_v0  ;;  %5964 = vmatprep.mubr.msk.f32.mxu1 %vm7832_vm1, %v7831_v0 }
  0x6f   :  { %6348 = vmatmul.mubr.msk.f32.gmra.mrb[54].mxu0 %vm309_vm0, %v84_v39  ;;  %5965 = vmatmul.mubr.msk.f32.gmra.mrb[50].mxu1 %vm309_vm0, %v208_v22  ;;  %v7432_v39 = vpack.c.bf16 %v4153_v37, %v4152_v36  ;;  %v236_v22 = vld [vmem:[%s11752_s1 + $0x1a8] sm:$0xff] }
  0x70   :  { %6350 = vmatprep.mubr.msk.f32.mxu0 %vm7832_vm1, %v7831_v0  ;;  %5967 = vmatprep.mubr.msk.f32.mxu1 %vm7832_vm1, %v7831_v0 }
  0x71   :  { %7433 = vmatpush3.bf16.msra.mxu1 %v7432_v39  ;;  %v240_v39 = vld [vmem:[%s11752_s1 + $0x1c8] sm:$0xff] }
  0x72   :  { %7434 = vmatprep.subr.bf16.mxu1 %v7833_v30 }
  0x73   :  { %6351 = vmatmul.mubr.msk.f32.gmra.mrb[56].mxu0 %vm309_vm0, %v85_v41  ;;  %5968 = vmatmul.mubr.msk.f32.gmra.mrb[52].mxu1 %vm309_vm0, %v209_v24  ;;  %v113_v41 = vld [vmem:[%s11749_s0 + $0x1c0] sm:$0xff] }
  0x74   :  { %6353 = vmatprep.mubr.msk.f32.mxu0 %vm7832_vm1, %v7831_v0  ;;  %5970 = vmatprep.mubr.msk.f32.mxu1 %vm7832_vm1, %v7831_v0 }
  0x77   :  { %6354 = vmatmul.mubr.msk.f32.gmra.mrb[58].mxu0 %vm309_vm0, %v86_v43  ;;  %5971 = vmatmul.mubr.msk.f32.gmra.mrb[54].mxu1 %vm309_vm0, %v210_v26  ;;  %v114_v43 = vld [vmem:[%s11749_s0 + $0x1c8] sm:$0xff]  ;;  %v237_v26 = vld [vmem:[%s11752_s1 + $0x1b0] sm:$0xff] }
  0x78   :  { %6356 = vmatprep.mubr.msk.f32.mxu0 %vm7832_vm1, %v7831_v0  ;;  %5973 = vmatprep.mubr.msk.f32.mxu1 %vm7832_vm1, %v7831_v0 }
  0x7b   :  { %6357 = vmatmul.mubr.msk.f32.gmra.mrb[60].mxu0 %vm309_vm0, %v87_v45  ;;  %5974 = vmatmul.mubr.msk.f32.gmra.mrb[56].mxu1 %vm309_vm0, %v211_v28  ;;  %v115_v45 = vld [vmem:[%s11749_s0 + $0x1d0] sm:$0xff] }
  0x7c   :  { %6359 = vmatprep.mubr.msk.f32.mxu0 %vm7832_vm1, %v7831_v0  ;;  %5976 = vmatprep.mubr.msk.f32.mxu1 %vm7832_vm1, %v7831_v0 }
  0x7f   :  { %6360 = vmatmul.mubr.msk.f32.gmra.mrb[62].mxu0 %vm309_vm0, %v88_v47  ;;  %5977 = vmatmul.mubr.msk.f32.gmra.mrb[58].mxu1 %vm309_vm0, %v212_v31  ;;  %v116_v47 = vld [vmem:[%s11749_s0 + $0x1d8] sm:$0xff] }
  0x80   :  { %6362 = vmatprep.mubr.msk.f32.mxu0 %vm7832_vm1, %v7831_v0  ;;  %5979 = vmatprep.mubr.msk.f32.mxu1 %vm7832_vm1, %v7831_v0  ;;  %v238_v31 = vld [vmem:[%s11752_s1 + $0x1b8] sm:$0xff] }
  0x83   :  { %6363 = vmatmul.mubr.msk.f32.gmra.mrb[64].mxu0 %vm309_vm0, %v89_v49  ;;  %5980 = vmatmul.mubr.msk.f32.gmra.mrb[60].mxu1 %vm309_vm0, %v213_v33  ;;  %v117_v49 = vld [vmem:[%s11749_s0 + $0x1e0] sm:$0xff] }
  0x84   :  { %6365 = vmatprep.mubr.msk.f32.mxu0 %vm7832_vm1, %v7831_v0  ;;  %5982 = vmatprep.mubr.msk.f32.mxu1 %vm7832_vm1, %v7831_v0 }
  0x87   :  { %6366 = vmatmul.mubr.msk.f32.gmra.mrb[66].mxu0 %vm309_vm0, %v90_v51  ;;  %5983 = vmatmul.mubr.msk.f32.gmra.mrb[62].mxu1 %vm309_vm0, %v214_v35  ;;  %v118_v51 = vld [vmem:[%s11749_s0 + $0x1e8] sm:$0xff]  ;;  %v239_v35 = vld [vmem:[%s11752_s1 + $0x1c0] sm:$0xff] }
  0x88   :  { %6368 = vmatprep.mubr.msk.f32.mxu0 %vm7832_vm1, %v7831_v0  ;;  %5985 = vmatprep.mubr.msk.f32.mxu1 %vm7832_vm1, %v7831_v0 }
  0x8b   :  { %6369 = vmatmul.mubr.msk.f32.gmra.mrb[68].mxu0 %vm309_vm0, %v91_v53  ;;  %5986 = vmatmul.mubr.msk.f32.gmra.mrb[64].mxu1 %vm309_vm0, %v215_v40  ;;  %v119_v53 = vld [vmem:[%s11749_s0 + $0x1f0] sm:$0xff] }
  0x8c   :  { %6371 = vmatprep.mubr.msk.f32.mxu0 %vm7832_vm1, %v7831_v0  ;;  %5988 = vmatprep.mubr.msk.f32.mxu1 %vm7832_vm1, %v7831_v0 }
  0x8f   :  { %6372 = vmatmul.mubr.msk.f32.gmra.mrb[70].mxu0 %vm309_vm0, %v92_v55  ;;  %5989 = vmatmul.mubr.msk.f32.gmra.mrb[66].mxu1 %vm309_vm0, %v216_v42  ;;  %v120_v55 = vld [vmem:[%s11749_s0 + $0x1f8] sm:$0xff]  ;;  %v138_v42 = vld [vmem:[%s11749_s0 + $0x288] sm:$0xff] }
  0x90   :  { %6374 = vmatprep.mubr.msk.f32.mxu0 %vm7832_vm1, %v7831_v0  ;;  %5991 = vmatprep.mubr.msk.f32.mxu1 %vm7832_vm1, %v7831_v0 }
  0x93   :  { %6375 = vmatmul.mubr.msk.f32.gmra.mrb[72].mxu0 %vm309_vm0, %v93_v57  ;;  %5992 = vmatmul.mubr.msk.f32.gmra.mrb[68].mxu1 %vm309_vm0, %v217_v44  ;;  %v121_v57 = vld [vmem:[%s11749_s0 + $0x200] sm:$0xff] }
  0x94   :  { %6377 = vmatprep.mubr.msk.f32.mxu0 %vm7832_vm1, %v7831_v0  ;;  %5994 = vmatprep.mubr.msk.f32.mxu1 %vm7832_vm1, %v7831_v0 }
  0x97   :  { %6378 = vmatmul.mubr.msk.f32.gmra.mrb[74].mxu0 %vm309_vm0, %v94_v59  ;;  %5995 = vmatmul.mubr.msk.f32.gmra.mrb[70].mxu1 %vm309_vm0, %v218_v46  ;;  %v122_v59 = vld [vmem:[%s11749_s0 + $0x208] sm:$0xff]  ;;  %v139_v46 = vld [vmem:[%s11749_s0 + $0x290] sm:$0xff] }
  0x98   :  { %6380 = vmatprep.mubr.msk.f32.mxu0 %vm7832_vm1, %v7831_v0  ;;  %5997 = vmatprep.mubr.msk.f32.mxu1 %vm7832_vm1, %v7831_v0 }
  0x9b   :  { %6381 = vmatmul.mubr.msk.f32.gmra.mrb[76].mxu0 %vm309_vm0, %v95_v61  ;;  %5998 = vmatmul.mubr.msk.f32.gmra.mrb[72].mxu1 %vm309_vm0, %v219_v48  ;;  %v123_v61 = vld [vmem:[%s11749_s0 + $0x210] sm:$0xff] }
  0x9c   :  { %6383 = vmatprep.mubr.msk.f32.mxu0 %vm7832_vm1, %v7831_v0  ;;  %6000 = vmatprep.mubr.msk.f32.mxu1 %vm7832_vm1, %v7831_v0 }
  0x9f   :  { %6384 = vmatmul.mubr.msk.f32.gmra.mrb[78].mxu0 %vm309_vm0, %v96_v63  ;;  %6001 = vmatmul.mubr.msk.f32.gmra.mrb[74].mxu1 %vm309_vm0, %v220_v50  ;;  %v124_v63 = vld [vmem:[%s11749_s0 + $0x218] sm:$0xff] }
  0xa0   :  { %6386 = vmatprep.mubr.msk.f32.mxu0 %vm7832_vm1, %v7831_v0  ;;  %6003 = vmatprep.mubr.msk.f32.mxu1 %vm7832_vm1, %v7831_v0  ;;  %v140_v50 = vld [vmem:[%s11749_s0 + $0x298] sm:$0xff] }
  0xa3   :  { %6387 = vmatmul.mubr.msk.f32.gmra.mrb[80].mxu0 %vm309_vm0, %v97_v4  ;;  %6004 = vmatmul.mubr.msk.f32.gmra.mrb[76].mxu1 %vm309_vm0, %v221_v52  ;;  %v126_v4 = vld [vmem:[%s11749_s0 + $0x228] sm:$0xff] }
  0xa4   :  { %6389 = vmatprep.mubr.msk.f32.mxu0 %vm7832_vm1, %v7831_v0  ;;  %6006 = vmatprep.mubr.msk.f32.mxu1 %vm7832_vm1, %v7831_v0 }
  0xa7   :  { %6390 = vmatmul.mubr.msk.f32.gmra.mrb[82].mxu0 %vm309_vm0, %v98_v7  ;;  %6007 = vmatmul.mubr.msk.f32.gmra.mrb[78].mxu1 %vm309_vm0, %v222_v54  ;;  %v230_v7 = vld [vmem:[%s11752_s1 + $0x178] sm:$0xff]  ;;  %v141_v54 = vld [vmem:[%s11749_s0 + $0x2a0] sm:$0xff] }
  0xa8   :  { %6392 = vmatprep.mubr.msk.f32.mxu0 %vm7832_vm1, %v7831_v0  ;;  %6009 = vmatprep.mubr.msk.f32.mxu1 %vm7832_vm1, %v7831_v0 }
  0xab   :  { %6393 = vmatmul.mubr.msk.f32.gmra.mrb[84].mxu0 %vm309_vm0, %v99_v9  ;;  %6010 = vmatmul.mubr.msk.f32.gmra.mrb[80].mxu1 %vm309_vm0, %v223_v56  ;;  %v4155_v9 = vld [vmem:[%s11753_s10 + $0x38] sm:$0xff] }
  0xac   :  { %6395 = vmatprep.mubr.msk.f32.mxu0 %vm7832_vm1, %v7831_v0  ;;  %6012 = vmatprep.mubr.msk.f32.mxu1 %vm7832_vm1, %v7831_v0 }
  0xaf   :  { %6396 = vmatmul.mubr.msk.f32.gmra.mrb[86].mxu0 %vm309_vm0, %v100_v11  ;;  %6013 = vmatmul.mubr.msk.f32.gmra.mrb[82].mxu1 %vm309_vm0, %v224_v58  ;;  %v7435_v11 = vpack.c.bf16 %v4155_v9, %v4154_v8  ;;  %v142_v58 = vld [vmem:[%s11749_s0 + $0x2a8] sm:$0xff]  ;;  %v247_v8 = vld [vmem:[%s11752_s1 + $0x200] sm:$0xff] }
  0xb0   :  { %6398 = vmatprep.mubr.msk.f32.mxu0 %vm7832_vm1, %v7831_v0  ;;  %6015 = vmatprep.mubr.msk.f32.mxu1 %vm7832_vm1, %v7831_v0 }
  0xb1   :  { %7436 = vmatpush3.bf16.msra.mxu1 %v7435_v11 }
  0xb2   :  { %7437 = vmatprep.subr.bf16.mxu1 %v7833_v30 }
  0xb3   :  { %6399 = vmatmul.mubr.msk.f32.gmra.mrb[88].mxu0 %vm309_vm0, %v101_v13  ;;  %6016 = vmatmul.mubr.msk.f32.gmra.mrb[84].mxu1 %vm309_vm0, %v225_v60  ;;  %v129_v13 = vld [vmem:[%s11749_s0 + $0x240] sm:$0xff] }
  0xb4   :  { %6401 = vmatprep.mubr.msk.f32.mxu0 %vm7832_vm1, %v7831_v0  ;;  %6018 = vmatprep.mubr.msk.f32.mxu1 %vm7832_vm1, %v7831_v0 }
  0xb7   :  { %6402 = vmatmul.mubr.msk.f32.gmra.mrb[90].mxu0 %vm309_vm0, %v102_v15  ;;  %6019 = vmatmul.mubr.msk.f32.gmra.mrb[86].mxu1 %vm309_vm0, %v226_v62  ;;  %v130_v15 = vld [vmem:[%s11749_s0 + $0x248] sm:$0xff]  ;;  %v143_v62 = vld [vmem:[%s11749_s0 + $0x2b0] sm:$0xff] }
  0xb8   :  { %6404 = vmatprep.mubr.msk.f32.mxu0 %vm7832_vm1, %v7831_v0  ;;  %6021 = vmatprep.mubr.msk.f32.mxu1 %vm7832_vm1, %v7831_v0 }
  0xbb   :  { %6405 = vmatmul.mubr.msk.f32.gmra.mrb[92].mxu0 %vm309_vm0, %v103_v17  ;;  %6022 = vmatmul.mubr.msk.f32.gmra.mrb[88].mxu1 %vm309_vm0, %v227_v1  ;;  %v131_v17 = vld [vmem:[%s11749_s0 + $0x250] sm:$0xff]  ;;  %v4157_v1 = vld [vmem:[%s11753_s10 + $0x48] sm:$0xff] }
  0xbc   :  { %6407 = vmatprep.mubr.msk.f32.mxu0 %vm7832_vm1, %v7831_v0  ;;  %6024 = vmatprep.mubr.msk.f32.mxu1 %vm7832_vm1, %v7831_v0 }
  0xbf   :  { %6408 = vmatmul.mubr.msk.f32.gmra.mrb[94].mxu0 %vm309_vm0, %v104_v19  ;;  %6025 = vmatmul.mubr.msk.f32.gmra.mrb[90].mxu1 %vm309_vm0, %v228_v3  ;;  %v132_v19 = vld [vmem:[%s11749_s0 + $0x258] sm:$0xff] }
  0xc0   :  { %6410 = vmatprep.mubr.msk.f32.mxu0 %vm7832_vm1, %v7831_v0  ;;  %6027 = vmatprep.mubr.msk.f32.mxu1 %vm7832_vm1, %v7831_v0 }
  0xc3   :  { %6411 = vmatmul.mubr.msk.f32.gmra.mrb[96].mxu0 %vm309_vm0, %v105_v21  ;;  %6028 = vmatmul.mubr.msk.f32.gmra.mrb[92].mxu1 %vm309_vm0, %v229_v5  ;;  %v133_v21 = vld [vmem:[%s11749_s0 + $0x260] sm:$0xff] }
  0xc4   :  { %6413 = vmatprep.mubr.msk.f32.mxu0 %vm7832_vm1, %v7831_v0  ;;  %6030 = vmatprep.mubr.msk.f32.mxu1 %vm7832_vm1, %v7831_v0 }
  0xc7   :  { %6414 = vmatmul.mubr.msk.f32.gmra.mrb[98].mxu0 %vm309_vm0, %v106_v23  ;;  %6031 = vmatmul.mubr.msk.f32.gmra.mrb[94].mxu1 %vm309_vm0, %v230_v7 }
  0xc8   :  { %6416 = vmatprep.mubr.msk.f32.mxu0 %vm7832_vm1, %v7831_v0  ;;  %6033 = vmatprep.mubr.msk.f32.mxu1 %vm7832_vm1, %v7831_v0 }
  0xcb   :  { %6417 = vmatmul.mubr.msk.f32.gmra.mrb[100].mxu0 %vm309_vm0, %v107_v25  ;;  %6034 = vmatmul.mubr.msk.f32.gmra.mrb[96].mxu1 %vm309_vm0, %v231_v12  ;;  %v134_v25 = vld [vmem:[%s11749_s0 + $0x268] sm:$0xff] }
  0xcc   :  { %6419 = vmatprep.mubr.msk.f32.mxu0 %vm7832_vm1, %v7831_v0  ;;  %6036 = vmatprep.mubr.msk.f32.mxu1 %vm7832_vm1, %v7831_v0  ;;  %v248_v12 = vld [vmem:[%s11752_s1 + $0x208] sm:$0xff] }
  0xcf   :  { %6420 = vmatmul.mubr.msk.f32.gmra.mrb[102].mxu0 %vm309_vm0, %v108_v27  ;;  %6037 = vmatmul.mubr.msk.f32.gmra.mrb[98].mxu1 %vm309_vm0, %v232_v14  ;;  %v146_v14 = vld [vmem:[%s11749_s0 + $0x2c8] sm:$0xff] }
  0xd0   :  { %6422 = vmatprep.mubr.msk.f32.mxu0 %vm7832_vm1, %v7831_v0  ;;  %6039 = vmatprep.mubr.msk.f32.mxu1 %vm7832_vm1, %v7831_v0 }
  0xd3   :  { %6423 = vmatmul.mubr.msk.f32.gmra.mrb[104].mxu0 %vm309_vm0, %v109_v29  ;;  %6040 = vmatmul.mubr.msk.f32.gmra.mrb[100].mxu1 %vm309_vm0, %v233_v16  ;;  %v135_v29 = vld [vmem:[%s11749_s0 + $0x270] sm:$0xff] }
  0xd4   :  { %6425 = vmatprep.mubr.msk.f32.mxu0 %vm7832_vm1, %v7831_v0  ;;  %6042 = vmatprep.mubr.msk.f32.mxu1 %vm7832_vm1, %v7831_v0  ;;  %v249_v16 = vld [vmem:[%s11752_s1 + $0x210] sm:$0xff] }
  0xd7   :  { %6426 = vmatmul.mubr.msk.f32.gmra.mrb[106].mxu0 %vm309_vm0, %v110_v32  ;;  %6043 = vmatmul.mubr.msk.f32.gmra.mrb[102].mxu1 %vm309_vm0, %v234_v18  ;;  %v147_v18 = vld [vmem:[%s11749_s0 + $0x2d0] sm:$0xff] }
  0xd8   :  { %6428 = vmatprep.mubr.msk.f32.mxu0 %vm7832_vm1, %v7831_v0  ;;  %6045 = vmatprep.mubr.msk.f32.mxu1 %vm7832_vm1, %v7831_v0 }
  0xdb   :  { %6429 = vmatmul.mubr.msk.f32.gmra.mrb[108].mxu0 %vm309_vm0, %v111_v34  ;;  %6046 = vmatmul.mubr.msk.f32.gmra.mrb[104].mxu1 %vm309_vm0, %v235_v20  ;;  %v136_v34 = vld [vmem:[%s11749_s0 + $0x278] sm:$0xff] }
  0xdc   :  { %6431 = vmatprep.mubr.msk.f32.mxu0 %vm7832_vm1, %v7831_v0  ;;  %6048 = vmatprep.mubr.msk.f32.mxu1 %vm7832_vm1, %v7831_v0  ;;  %v250_v20 = vld [vmem:[%s11752_s1 + $0x218] sm:$0xff] }
  0xde   :  { %v8724_v23 = vpop.f32.mrb[0].mxu1 }
  0xdf   :  { %6432 = vmatmul.mubr.msk.f32.gmra.mrb[110].mxu0 %vm309_vm0, %v112_v38  ;;  %v5891_v24 = vpop.f32.mrb[1].mxu1  ;;  %6049 = vmatmul.mubr.msk.f32.gmra.mrb[106].mxu1 %vm309_vm0, %v236_v22  ;;  %v137_v38 = vld [vmem:[%s11749_s0 + $0x280] sm:$0xff]  ;;  %v148_v22 = vld [vmem:[%s11749_s0 + $0x2d8] sm:$0xff] }
  0xe0   :  { %6434 = vmatprep.mubr.msk.f32.mxu0 %vm7832_vm1, %v7831_v0  ;;  %6051 = vmatprep.mubr.msk.f32.mxu1 %vm7832_vm1, %v7831_v0 }
  0xe2   :  { %v8738_v27 = vpop.f32.mrb[2].mxu1 }
  0xe3   :  { %6435 = vmatmul.mubr.msk.f32.gmra.mrb[112].mxu0 %vm309_vm0, %v113_v41  ;;  %v5894_v28 = vpop.f32.mrb[3].mxu1  ;;  %6052 = vmatmul.mubr.msk.f32.gmra.mrb[108].mxu1 %vm309_vm0, %v237_v26 }
  0xe4   :  { %6437 = vmatprep.mubr.msk.f32.mxu0 %vm7832_vm1, %v7831_v0  ;;  %6054 = vmatprep.mubr.msk.f32.mxu1 %vm7832_vm1, %v7831_v0  ;;  %v149_v28 = vld [vmem:[%s11749_s0 + $0x2e0] sm:$0xff] }
  0xe6   :  { %v8752_v32 = vpop.f32.mrb[4].mxu1 }
  0xe7   :  { %6438 = vmatmul.mubr.msk.f32.gmra.mrb[114].mxu0 %vm309_vm0, %v114_v43  ;;  %v5897_v33 = vpop.f32.mrb[5].mxu1  ;;  %6055 = vmatmul.mubr.msk.f32.gmra.mrb[110].mxu1 %vm309_vm0, %v238_v31  ;;  %v241_v43 = vld [vmem:[%s11752_s1 + $0x1d0] sm:$0xff]  ;;  %v252_v31 = vld [vmem:[%s11752_s1 + $0x228] sm:$0xff] }
  0xe8   :  { %6440 = vmatprep.mubr.msk.f32.mxu0 %vm7832_vm1, %v7831_v0  ;;  %6057 = vmatprep.mubr.msk.f32.mxu1 %vm7832_vm1, %v7831_v0 }
  0xea   :  { %v8766_v36 = vpop.f32.mrb[6].mxu1 }
  0xeb   :  { %6441 = vmatmul.mubr.msk.f32.gmra.mrb[116].mxu0 %vm309_vm0, %v115_v45  ;;  %v5900_v37 = vpop.f32.mrb[7].mxu1  ;;  %6058 = vmatmul.mubr.msk.f32.gmra.mrb[112].mxu1 %vm309_vm0, %v239_v35  ;;  %v253_v35 = vld [vmem:[%s11752_s1 + $0x230] sm:$0xff] }
  0xec   :  { %6443 = vmatprep.mubr.msk.f32.mxu0 %vm7832_vm1, %v7831_v0  ;;  %6060 = vmatprep.mubr.msk.f32.mxu1 %vm7832_vm1, %v7831_v0 }
  0xee   :  { %v8780_v40 = vpop.f32.mrb[8].mxu1 }
  0xef   :  { %6444 = vmatmul.mubr.msk.f32.gmra.mrb[118].mxu0 %vm309_vm0, %v116_v47  ;;  %v5903_v41 = vpop.f32.mrb[9].mxu1  ;;  %6061 = vmatmul.mubr.msk.f32.gmra.mrb[114].mxu1 %vm309_vm0, %v240_v39  ;;  %v242_v47 = vld [vmem:[%s11752_s1 + $0x1d8] sm:$0xff]  ;;  %v151_v39 = vld [vmem:[%s11749_s0 + $0x2f0] sm:$0xff] }
  0xf0   :  { %6446 = vmatprep.mubr.msk.f32.mxu0 %vm7832_vm1, %v7831_v0  ;;  %6063 = vmatprep.mubr.msk.f32.mxu1 %vm7832_vm1, %v7831_v0  ;;  %v254_v41 = vld [vmem:[%s11752_s1 + $0x238] sm:$0xff] }
  0xf2   :  { %v8794_v44 = vpop.f32.mrb[10].mxu1 }
  0xf3   :  { %6447 = vmatmul.mubr.msk.f32.gmra.mrb[120].mxu0 %vm309_vm0, %v117_v49  ;;  %v5906_v45 = vpop.f32.mrb[11].mxu1  ;;  %6064 = vmatmul.mubr.msk.f32.gmra.mrb[116].mxu1 %vm309_vm0, %v241_v43 }
  0xf4   :  { %6449 = vmatprep.mubr.msk.f32.mxu0 %vm7832_vm1, %v7831_v0  ;;  %6066 = vmatprep.mubr.msk.f32.mxu1 %vm7832_vm1, %v7831_v0  ;;  %v152_v45 = vld [vmem:[%s11749_s0 + $0x2f8] sm:$0xff] }
  0xf6   :  { %v8808_v48 = vpop.f32.mrb[12].mxu1 }
  0xf7   :  { %6450 = vmatmul.mubr.msk.f32.gmra.mrb[122].mxu0 %vm309_vm0, %v118_v51  ;;  %v5909_v49 = vpop.f32.mrb[13].mxu1  ;;  %6067 = vmatmul.mubr.msk.f32.gmra.mrb[118].mxu1 %vm309_vm0, %v242_v47  ;;  %v243_v51 = vld [vmem:[%s11752_s1 + $0x1e0] sm:$0xff] }
  0xf8   :  { %6452 = vmatprep.mubr.msk.f32.mxu0 %vm7832_vm1, %v7831_v0  ;;  %6069 = vmatprep.mubr.msk.f32.mxu1 %vm7832_vm1, %v7831_v0 }
  0xfa   :  { %v8822_v52 = vpop.f32.mrb[14].mxu1 }
  0xfb   :  { %6453 = vmatmul.mubr.msk.f32.gmra.mrb[124].mxu0 %vm309_vm0, %v119_v53  ;;  %v5912_v53 = vpop.f32.mrb[15].mxu1  ;;  %6070 = vmatmul.mubr.msk.f32.gmra.mrb[120].mxu1 %vm309_vm0, %v243_v51  ;;  %v256_v51 = vld [vmem:[%s11752_s1 + $0x248] sm:$0xff] }
  0xfc   :  { %6455 = vmatprep.mubr.msk.f32.mxu0 %vm7832_vm1, %v7831_v0  ;;  %6072 = vmatprep.mubr.msk.f32.mxu1 %vm7832_vm1, %v7831_v0 }
  0xfe   :  { %v8836_v56 = vpop.f32.mrb[16].mxu1 }
  0xff   :  { %6456 = vmatmul.mubr.msk.f32.gmra.mrb[126].mxu0 %vm309_vm0, %v120_v55  ;;  %v244_v55 = vld [vmem:[%s11752_s1 + $0x1e8] sm:$0xff] }
 0x100   :  { %6458 = vmatprep.mubr.msk.f32.mxu0 %vm7832_vm1, %v7831_v0  ;;  %6073 = vmatmul.mubr.msk.f32.gmra.mrb[122].mxu1 %vm309_vm0, %v244_v55  ;;  %v154_v55 = vld [vmem:[%s11749_s0 + $0x308] sm:$0xff] }
 0x101   :  { %6075 = vmatprep.mubr.msk.f32.mxu1 %vm7832_vm1, %v7831_v0 }
 0x103   :  { %6459 = vmatmul.mubr.msk.f32.gmra.mrb[128].mxu0 %vm309_vm0, %v121_v57  ;;  %v5915_v57 = vpop.f32.mrb[17].mxu1 }
 0x104   :  { %6461 = vmatprep.mubr.msk.f32.mxu0 %vm7832_vm1, %v7831_v0  ;;  %v8850_v60 = vpop.f32.mrb[18].mxu1  ;;  %v257_v57 = vld [vmem:[%s11752_s1 + $0x250] sm:$0xff] }
 0x107   :  { %6462 = vmatmul.mubr.msk.f32.gmra.mrb[130].mxu0 %vm309_vm0, %v122_v59  ;;  %v245_v59 = vld [vmem:[%s11752_s1 + $0x1f0] sm:$0xff] }
 0x108   :  { %6464 = vmatprep.mubr.msk.f32.mxu0 %vm7832_vm1, %v7831_v0  ;;  %6076 = vmatmul.mubr.msk.f32.gmra.mrb[124].mxu1 %vm309_vm0, %v245_v59 }
 0x109   :  { %6078 = vmatprep.mubr.msk.f32.mxu1 %vm7832_vm1, %v7831_v0 }
 0x10b   :  { %6465 = vmatmul.mubr.msk.f32.gmra.mrb[132].mxu0 %vm309_vm0, %v123_v61  ;;  %v5918_v61 = vpop.f32.mrb[19].mxu1 }
 0x10c   :  { %6467 = vmatprep.mubr.msk.f32.mxu0 %vm7832_vm1, %v7831_v0  ;;  %v155_v61 = vld [vmem:[%s11749_s0 + $0x310] sm:$0xff] }
 0x10f   :  { %6468 = vmatmul.mubr.msk.f32.gmra.mrb[134].mxu0 %vm309_vm0, %v124_v63  ;;  %v4156_v63 = vld [vmem:[%s11753_s10 + $0x40] sm:$0xff] }
 0x110   :  { %6470 = vmatprep.mubr.msk.f32.mxu0 %vm7832_vm1, %v7831_v0  ;;  %v7438_v3 = vpack.c.bf16 %v4157_v1, %v4156_v63 }
 0x112   :  { %7439 = vmatpush3.bf16.msra.mxu1 %v7438_v3  ;;  %v156_v3 = vld [vmem:[%s11749_s0 + $0x318] sm:$0xff] }
 0x113   :  { %6471 = vmatmul.mubr.msk.f32.gmra.mrb[136].mxu0 %vm309_vm0, %v125_v2  ;;  %v8867_v2 = vpop.f32.mrb[20].mxu1  ;;  %7440 = vmatprep.subr.bf16.mxu1 %v7833_v30 }
 0x114   :  { %6473 = vmatprep.mubr.msk.f32.mxu0 %vm7832_vm1, %v7831_v0  ;;  %v5921_v5 = vpop.f32.mrb[21].mxu1 }
 0x115   :  { %v8879_v7 = vpop.f32.mrb[22].mxu1 }
 0x116   :  { %v5924_v9 = vpop.f32.mrb[23].mxu1 }
 0x117   :  { %6474 = vmatmul.mubr.msk.f32.gmra.mrb[138].mxu0 %vm309_vm0, %v126_v4  ;;  %v246_v4 = vld [vmem:[%s11752_s1 + $0x1f8] sm:$0xff]  ;;  %v8894_v11 = vpop.f32.mrb[24].mxu1  ;;  %v260_v9 = vld [vmem:[%s11752_s1 + $0x268] sm:$0xff] }
 0x118   :  { %6476 = vmatprep.mubr.msk.f32.mxu0 %vm7832_vm1, %v7831_v0  ;;  %6079 = vmatmul.mubr.msk.f32.gmra.mrb[126].mxu1 %vm309_vm0, %v246_v4  ;;  %v259_v4 = vld [vmem:[%s11752_s1 + $0x260] sm:$0xff] }
 0x119   :  { %6081 = vmatprep.mubr.msk.f32.mxu1 %vm7832_vm1, %v7831_v0 }
 0x11b   :  { %6477 = vmatmul.mubr.msk.f32.gmra.mrb[140].mxu0 %vm309_vm0, %v127_v6  ;;  %v144_v6 = vld [vmem:[%s11749_s0 + $0x2b8] sm:$0xff] }
 0x11c   :  { %6479 = vmatprep.mubr.msk.f32.mxu0 %vm7832_vm1, %v7831_v0  ;;  %6082 = vmatmul.mubr.msk.f32.gmra.mrb[128].mxu1 %vm309_vm0, %v247_v8  ;;  %v157_v8 = vld [vmem:[%s11749_s0 + $0x320] sm:$0xff] }
 0x11d   :  { %6084 = vmatprep.mubr.msk.f32.mxu1 %vm7832_vm1, %v7831_v0 }
 0x11f   :  { %6480 = vmatmul.mubr.msk.f32.gmra.mrb[142].mxu0 %vm309_vm0, %v128_v10  ;;  %v145_v10 = vld [vmem:[%s11749_s0 + $0x2c0] sm:$0xff] }
 0x120   :  { %6482 = vmatprep.mubr.msk.f32.mxu0 %vm7832_vm1, %v7831_v0  ;;  %6085 = vmatmul.mubr.msk.f32.gmra.mrb[130].mxu1 %vm309_vm0, %v248_v12 }
 0x121   :  { %6087 = vmatprep.mubr.msk.f32.mxu1 %vm7832_vm1, %v7831_v0 }
 0x123   :  { %6483 = vmatmul.mubr.msk.f32.gmra.mrb[144].mxu0 %vm309_vm0, %v129_v13  ;;  %v5927_v13 = vpop.f32.mrb[25].mxu1 }
 0x124   :  { %6485 = vmatprep.mubr.msk.f32.mxu0 %vm7832_vm1, %v7831_v0  ;;  %6088 = vmatmul.mubr.msk.f32.gmra.mrb[132].mxu1 %vm309_vm0, %v249_v16  ;;  %v158_v13 = vld [vmem:[%s11749_s0 + $0x328] sm:$0xff] }
 0x125   :  { %6090 = vmatprep.mubr.msk.f32.mxu1 %vm7832_vm1, %v7831_v0 }
 0x127   :  { %6486 = vmatmul.mubr.msk.f32.gmra.mrb[146].mxu0 %vm309_vm0, %v130_v15  ;;  %v8908_v15 = vpop.f32.mrb[26].mxu1 }
 0x128   :  { %6488 = vmatprep.mubr.msk.f32.mxu0 %vm7832_vm1, %v7831_v0  ;;  %6091 = vmatmul.mubr.msk.f32.gmra.mrb[134].mxu1 %vm309_vm0, %v250_v20  ;;  %v4159_v20 = vld [vmem:[%s11753_s10 + $0x58] sm:$0xff] }
 0x129   :  { %6093 = vmatprep.mubr.msk.f32.mxu1 %vm7832_vm1, %v7831_v0 }
 0x12b   :  { %6489 = vmatmul.mubr.msk.f32.gmra.mrb[148].mxu0 %vm309_vm0, %v131_v17  ;;  %v5930_v17 = vpop.f32.mrb[27].mxu1 }
 0x12c   :  { %6491 = vmatprep.mubr.msk.f32.mxu0 %vm7832_vm1, %v7831_v0 }
 0x12f   :  { %6492 = vmatmul.mubr.msk.f32.gmra.mrb[150].mxu0 %vm309_vm0, %v132_v19  ;;  %v8922_v19 = vpop.f32.mrb[28].mxu1 }
 0x130   :  { %6494 = vmatprep.mubr.msk.f32.mxu0 %vm7832_vm1, %v7831_v0 }
 0x133   :  { %6495 = vmatmul.mubr.msk.f32.gmra.mrb[152].mxu0 %vm309_vm0, %v133_v21  ;;  %v5933_v21 = vpop.f32.mrb[29].mxu1 }
 0x134   :  { %6497 = vmatprep.mubr.msk.f32.mxu0 %vm7832_vm1, %v7831_v0  ;;  %v8936_v24 = vpop.f32.mrb[30].mxu1  ;;  %v159_v21 = vld [vmem:[%s11749_s0 + $0x330] sm:$0xff] }
 0x135   :  { %v5936_v26 = vpop.f32.mrb[31].mxu1 }
 0x137   :  { %6498 = vmatmul.mubr.msk.f32.gmra.mrb[154].mxu0 %vm309_vm0, %v134_v25  ;;  %v251_v25 = vld [vmem:[%s11752_s1 + $0x220] sm:$0xff] }
 0x138   :  { %6500 = vmatprep.mubr.msk.f32.mxu0 %vm7832_vm1, %v7831_v0  ;;  %6094 = vmatmul.mubr.msk.f32.gmra.mrb[136].mxu1 %vm309_vm0, %v251_v25  ;;  %v262_v25 = vld [vmem:[%s11752_s1 + $0x278] sm:$0xff] }
 0x139   :  { %6096 = vmatprep.mubr.msk.f32.mxu1 %vm7832_vm1, %v7831_v0 }
 0x13b   :  { %6501 = vmatmul.mubr.msk.f32.gmra.mrb[156].mxu0 %vm309_vm0, %v135_v29  ;;  %v8950_v29 = vpop.f32.mrb[32].mxu1 }
 0x13c   :  { %6503 = vmatprep.mubr.msk.f32.mxu0 %vm7832_vm1, %v7831_v0  ;;  %v5939_v33 = vpop.f32.mrb[33].mxu1  ;;  %6097 = vmatmul.mubr.msk.f32.gmra.mrb[138].mxu1 %vm309_vm0, %v252_v31  ;;  %v160_v31 = vld [vmem:[%s11749_s0 + $0x338] sm:$0xff] }
 0x13d   :  { %6099 = vmatprep.mubr.msk.f32.mxu1 %vm7832_vm1, %v7831_v0  ;;  %v8969_v37 = vpop.f32.mrb[34].mxu1  ;;  %v263_v33 = vld [vmem:[%s11752_s1 + $0x280] sm:$0xff] }
 0x13f   :  { %6504 = vmatmul.mubr.msk.f32.gmra.mrb[158].mxu0 %vm309_vm0, %v136_v34  ;;  %v150_v34 = vld [vmem:[%s11749_s0 + $0x2e8] sm:$0xff] }
 0x140   :  { %6506 = vmatprep.mubr.msk.f32.mxu0 %vm7832_vm1, %v7831_v0  ;;  %6100 = vmatmul.mubr.msk.f32.gmra.mrb[140].mxu1 %vm309_vm0, %v253_v35 }
 0x141   :  { %6102 = vmatprep.mubr.msk.f32.mxu1 %vm7832_vm1, %v7831_v0 }
 0x143   :  { %6507 = vmatmul.mubr.msk.f32.gmra.mrb[160].mxu0 %vm309_vm0, %v137_v38  ;;  %v5942_v38 = vpop.f32.mrb[35].mxu1 }
 0x144   :  { %6509 = vmatprep.mubr.msk.f32.mxu0 %vm7832_vm1, %v7831_v0  ;;  %6103 = vmatmul.mubr.msk.f32.gmra.mrb[142].mxu1 %vm309_vm0, %v254_v41  ;;  %v161_v38 = vld [vmem:[%s11749_s0 + $0x340] sm:$0xff] }
 0x145   :  { %6105 = vmatprep.mubr.msk.f32.mxu1 %vm7832_vm1, %v7831_v0 }
 0x147   :  { %6510 = vmatmul.mubr.msk.f32.gmra.mrb[162].mxu0 %vm309_vm0, %v138_v42  ;;  %v8983_v42 = vpop.f32.mrb[36].mxu1 }
 0x148   :  { %6512 = vmatprep.mubr.msk.f32.mxu0 %vm7832_vm1, %v7831_v0  ;;  %v5945_v43 = vpop.f32.mrb[37].mxu1 }
 0x149   :  { %v8997_v47 = vpop.f32.mrb[38].mxu1 }
 0x14a   :  { %v5948_v49 = vpop.f32.mrb[39].mxu1 }
 0x14b   :  { %6513 = vmatmul.mubr.msk.f32.gmra.mrb[164].mxu0 %vm309_vm0, %v139_v46  ;;  %v255_v46 = vld [vmem:[%s11752_s1 + $0x240] sm:$0xff]  ;;  %v9011_v53 = vpop.f32.mrb[40].mxu1 }
 0x14c   :  { %6515 = vmatprep.mubr.msk.f32.mxu0 %vm7832_vm1, %v7831_v0  ;;  %6106 = vmatmul.mubr.msk.f32.gmra.mrb[144].mxu1 %vm309_vm0, %v255_v46  ;;  %v265_v46 = vld [vmem:[%s11752_s1 + $0x290] sm:$0xff] }
 0x14d   :  { %6108 = vmatprep.mubr.msk.f32.mxu1 %vm7832_vm1, %v7831_v0 }
 0x14f   :  { %6516 = vmatmul.mubr.msk.f32.gmra.mrb[166].mxu0 %vm309_vm0, %v140_v50  ;;  %v153_v50 = vld [vmem:[%s11749_s0 + $0x300] sm:$0xff] }
 0x150   :  { %6518 = vmatprep.mubr.msk.f32.mxu0 %vm7832_vm1, %v7831_v0  ;;  %6109 = vmatmul.mubr.msk.f32.gmra.mrb[146].mxu1 %vm309_vm0, %v256_v51  ;;  %v163_v51 = vld [vmem:[%s11749_s0 + $0x350] sm:$0xff] }
 0x151   :  { %6111 = vmatprep.mubr.msk.f32.mxu1 %vm7832_vm1, %v7831_v0 }
 0x153   :  { %6519 = vmatmul.mubr.msk.f32.gmra.mrb[168].mxu0 %vm309_vm0, %v141_v54  ;;  %v5951_v54 = vpop.f32.mrb[41].mxu1 }
 0x154   :  { %6521 = vmatprep.mubr.msk.f32.mxu0 %vm7832_vm1, %v7831_v0  ;;  %6112 = vmatmul.mubr.msk.f32.gmra.mrb[148].mxu1 %vm309_vm0, %v257_v57  ;;  %v266_v54 = vld [vmem:[%s11752_s1 + $0x298] sm:$0xff] }
 0x155   :  { %6114 = vmatprep.mubr.msk.f32.mxu1 %vm7832_vm1, %v7831_v0 }
 0x157   :  { %6522 = vmatmul.mubr.msk.f32.gmra.mrb[170].mxu0 %vm309_vm0, %v142_v58  ;;  %v9025_v58 = vpop.f32.mrb[42].mxu1 }
 0x158   :  { %6524 = vmatprep.mubr.msk.f32.mxu0 %vm7832_vm1, %v7831_v0  ;;  %v5954_v59 = vpop.f32.mrb[43].mxu1 }
 0x159   :  { %v9039_v63 = vpop.f32.mrb[44].mxu1  ;;  %v164_v59 = vld [vmem:[%s11749_s0 + $0x358] sm:$0xff] }
 0x15a   :  { %v5957_v1 = vpop.f32.mrb[45].mxu1 }
 0x15b   :  { %6525 = vmatmul.mubr.msk.f32.gmra.mrb[172].mxu0 %vm309_vm0, %v143_v62  ;;  %v258_v62 = vld [vmem:[%s11752_s1 + $0x258] sm:$0xff]  ;;  %v9053_v5 = vpop.f32.mrb[46].mxu1 }
 0x15c   :  { %6527 = vmatprep.mubr.msk.f32.mxu0 %vm7832_vm1, %v7831_v0  ;;  %6115 = vmatmul.mubr.msk.f32.gmra.mrb[150].mxu1 %vm309_vm0, %v258_v62 }
 0x15d   :  { %6117 = vmatprep.mubr.msk.f32.mxu1 %vm7832_vm1, %v7831_v0 }
 0x15f   :  { %6528 = vmatmul.mubr.msk.f32.gmra.mrb[174].mxu0 %vm309_vm0, %v144_v6  ;;  %v5960_v6 = vpop.f32.mrb[47].mxu1 }
 0x160   :  { %6530 = vmatprep.mubr.msk.f32.mxu0 %vm7832_vm1, %v7831_v0  ;;  %6118 = vmatmul.mubr.msk.f32.gmra.mrb[152].mxu1 %vm309_vm0, %v259_v4  ;;  %v268_v4 = vld [vmem:[%s11752_s1 + $0x2a8] sm:$0xff] }
 0x161   :  { %6120 = vmatprep.mubr.msk.f32.mxu1 %vm7832_vm1, %v7831_v0 }
 0x163   :  { %6531 = vmatmul.mubr.msk.f32.gmra.mrb[176].mxu0 %vm309_vm0, %v145_v10  ;;  %v9067_v10 = vpop.f32.mrb[48].mxu1 }
 0x164   :  { %6533 = vmatprep.mubr.msk.f32.mxu0 %vm7832_vm1, %v7831_v0  ;;  %v5963_v12 = vpop.f32.mrb[49].mxu1  ;;  %6121 = vmatmul.mubr.msk.f32.gmra.mrb[154].mxu1 %vm309_vm0, %v260_v9  ;;  %v166_v9 = vld [vmem:[%s11749_s0 + $0x368] sm:$0xff] }
 0x165   :  { %6123 = vmatprep.mubr.msk.f32.mxu1 %vm7832_vm1, %v7831_v0  ;;  %v9081_v16 = vpop.f32.mrb[50].mxu1  ;;  %v269_v12 = vld [vmem:[%s11752_s1 + $0x2b0] sm:$0xff] }
 0x166   :  { %v5966_v17 = vpop.f32.mrb[51].mxu1 }
 0x167   :  { %6534 = vmatmul.mubr.msk.f32.gmra.mrb[178].mxu0 %vm309_vm0, %v146_v14  ;;  %v261_v14 = vld [vmem:[%s11752_s1 + $0x270] sm:$0xff]  ;;  %v9101_v26 = vpop.f32.mrb[52].mxu1 }
 0x168   :  { %6536 = vmatprep.mubr.msk.f32.mxu0 %vm7832_vm1, %v7831_v0  ;;  %6124 = vmatmul.mubr.msk.f32.gmra.mrb[156].mxu1 %vm309_vm0, %v261_v14  ;;  %v167_v17 = vld [vmem:[%s11749_s0 + $0x370] sm:$0xff] }
 0x169   :  { %6126 = vmatprep.mubr.msk.f32.mxu1 %vm7832_vm1, %v7831_v0 }
 0x16b   :  { %6537 = vmatmul.mubr.msk.f32.gmra.mrb[180].mxu0 %vm309_vm0, %v147_v18  ;;  %v4158_v18 = vld [vmem:[%s11753_s10 + $0x50] sm:$0xff] }
 0x16c   :  { %6539 = vmatprep.mubr.msk.f32.mxu0 %vm7832_vm1, %v7831_v0  ;;  %6127 = vmatmul.mubr.msk.f32.gmra.mrb[158].mxu1 %vm309_vm0, %v262_v25  ;;  %v271_v25 = vld [vmem:[%s11752_s1 + $0x2c0] sm:$0xff] }
 0x16d   :  { %6129 = vmatprep.mubr.msk.f32.mxu1 %vm7832_vm1, %v7831_v0 }
 0x16f   :  { %6540 = vmatmul.mubr.msk.f32.gmra.mrb[182].mxu0 %vm309_vm0, %v148_v22  ;;  %v7441_v22 = vpack.c.bf16 %v4159_v20, %v4158_v18  ;;  %v270_v18 = vld [vmem:[%s11752_s1 + $0x2b8] sm:$0xff] }
 0x170   :  { %6542 = vmatprep.mubr.msk.f32.mxu0 %vm7832_vm1, %v7831_v0  ;;  %6130 = vmatmul.mubr.msk.f32.gmra.mrb[160].mxu1 %vm309_vm0, %v263_v33  ;;  %v169_v33 = vld [vmem:[%s11749_s0 + $0x380] sm:$0xff] }
 0x171   :  { %7442 = vmatpush3.bf16.msra.mxu1 %v7441_v22  ;;  %6132 = vmatprep.mubr.msk.f32.mxu1 %vm7832_vm1, %v7831_v0  ;;  %v168_v22 = vld [vmem:[%s11749_s0 + $0x378] sm:$0xff] }
 0x172   :  { %7443 = vmatprep.subr.bf16.mxu1 %v7833_v30 }
 0x173   :  { %6543 = vmatmul.mubr.msk.f32.gmra.mrb[184].mxu0 %vm309_vm0, %v149_v28  ;;  %v5969_v28 = vpop.f32.mrb[53].mxu1 }
 0x174   :  { %6545 = vmatprep.mubr.msk.f32.mxu0 %vm7832_vm1, %v7831_v0 }
 0x177   :  { %6546 = vmatmul.mubr.msk.f32.gmra.mrb[186].mxu0 %vm309_vm0, %v150_v34  ;;  %v9116_v34 = vpop.f32.mrb[54].mxu1 }
 0x178   :  { %6548 = vmatprep.mubr.msk.f32.mxu0 %vm7832_vm1, %v7831_v0  ;;  %v5972_v35 = vpop.f32.mrb[55].mxu1 }
 0x179   :  { %v9130_v41 = vpop.f32.mrb[56].mxu1  ;;  %v272_v35 = vld [vmem:[%s11752_s1 + $0x2c8] sm:$0xff] }
 0x17a   :  { %v5975_v43 = vpop.f32.mrb[57].mxu1 }
 0x17b   :  { %6549 = vmatmul.mubr.msk.f32.gmra.mrb[188].mxu0 %vm309_vm0, %v151_v39  ;;  %v264_v39 = vld [vmem:[%s11752_s1 + $0x288] sm:$0xff]  ;;  %v9144_v49 = vpop.f32.mrb[58].mxu1 }
 0x17c   :  { %6551 = vmatprep.mubr.msk.f32.mxu0 %vm7832_vm1, %v7831_v0  ;;  %6133 = vmatmul.mubr.msk.f32.gmra.mrb[162].mxu1 %vm309_vm0, %v264_v39  ;;  %v170_v43 = vld [vmem:[%s11749_s0 + $0x388] sm:$0xff] }
 0x17d   :  { %6135 = vmatprep.mubr.msk.f32.mxu1 %vm7832_vm1, %v7831_v0 }
 0x17f   :  { %6552 = vmatmul.mubr.msk.f32.gmra.mrb[190].mxu0 %vm309_vm0, %v152_v45  ;;  %v162_v45 = vld [vmem:[%s11749_s0 + $0x348] sm:$0xff] }
 0x180   :  { %6554 = vmatprep.mubr.msk.f32.mxu0 %vm7832_vm1, %v7831_v0  ;;  %6136 = vmatmul.mubr.msk.f32.gmra.mrb[164].mxu1 %vm309_vm0, %v265_v46 }
 0x181   :  { %6138 = vmatprep.mubr.msk.f32.mxu1 %vm7832_vm1, %v7831_v0 }
 0x183   :  { %6555 = vmatmul.mubr.msk.f32.gmra.mrb[192].mxu0 %vm309_vm0, %v153_v50  ;;  %v5978_v50 = vpop.f32.mrb[59].mxu1 }
 0x184   :  { %6557 = vmatprep.mubr.msk.f32.mxu0 %vm7832_vm1, %v7831_v0  ;;  %6139 = vmatmul.mubr.msk.f32.gmra.mrb[166].mxu1 %vm309_vm0, %v266_v54  ;;  %v274_v54 = vld [vmem:[%s11752_s1 + $0x2d8] sm:$0xff] }
 0x185   :  { %6141 = vmatprep.mubr.msk.f32.mxu1 %vm7832_vm1, %v7831_v0 }
 0x187   :  { %6558 = vmatmul.mubr.msk.f32.gmra.mrb[194].mxu0 %vm309_vm0, %v154_v55  ;;  %v9158_v55 = vpop.f32.mrb[60].mxu1 }
 0x188   :  { %6560 = vmatprep.mubr.msk.f32.mxu0 %vm7832_vm1, %v7831_v0  ;;  %v5981_v57 = vpop.f32.mrb[61].mxu1 }
 0x189   :  { %v9172_v62 = vpop.f32.mrb[62].mxu1 }
 0x18a   :  { %v5984_v1 = vpop.f32.mrb[63].mxu1 }
 0x18b   :  { %6561 = vmatmul.mubr.msk.f32.gmra.mrb[196].mxu0 %vm309_vm0, %v155_v61  ;;  %v267_v61 = vld [vmem:[%s11752_s1 + $0x2a0] sm:$0xff]  ;;  %v9186_v6 = vpop.f32.mrb[64].mxu1 }
 0x18c   :  { %6563 = vmatprep.mubr.msk.f32.mxu0 %vm7832_vm1, %v7831_v0  ;;  %6142 = vmatmul.mubr.msk.f32.gmra.mrb[168].mxu1 %vm309_vm0, %v267_v61  ;;  %v172_v61 = vld [vmem:[%s11749_s0 + $0x398] sm:$0xff]  ;;  %v275_v1 = vld [vmem:[%s11752_s1 + $0x2e0] sm:$0xff] }
 0x18d   :  { %6144 = vmatprep.mubr.msk.f32.mxu1 %vm7832_vm1, %v7831_v0 }
 0x18f   :  { %6564 = vmatmul.mubr.msk.f32.gmra.mrb[198].mxu0 %vm309_vm0, %v156_v3  ;;  %v165_v3 = vld [vmem:[%s11749_s0 + $0x360] sm:$0xff] }
 0x190   :  { %6566 = vmatprep.mubr.msk.f32.mxu0 %vm7832_vm1, %v7831_v0  ;;  %6145 = vmatmul.mubr.msk.f32.gmra.mrb[170].mxu1 %vm309_vm0, %v268_v4 }
 0x191   :  { %6147 = vmatprep.mubr.msk.f32.mxu1 %vm7832_vm1, %v7831_v0 }
 0x193   :  { %6567 = vmatmul.mubr.msk.f32.gmra.mrb[200].mxu0 %vm309_vm0, %v157_v8  ;;  %v5987_v8 = vpop.f32.mrb[65].mxu1 }
 0x194   :  { %6569 = vmatprep.mubr.msk.f32.mxu0 %vm7832_vm1, %v7831_v0  ;;  %6148 = vmatmul.mubr.msk.f32.gmra.mrb[172].mxu1 %vm309_vm0, %v269_v12  ;;  %v173_v8 = vld [vmem:[%s11749_s0 + $0x3a0] sm:$0xff] }
 0x195   :  { %6150 = vmatprep.mubr.msk.f32.mxu1 %vm7832_vm1, %v7831_v0 }
 0x197   :  { %6570 = vmatmul.mubr.msk.f32.gmra.mrb[202].mxu0 %vm309_vm0, %v158_v13  ;;  %v9200_v13 = vpop.f32.mrb[66].mxu1 }
 0x198   :  { %6572 = vmatprep.mubr.msk.f32.mxu0 %vm7832_vm1, %v7831_v0  ;;  %v5990_v14 = vpop.f32.mrb[67].mxu1  ;;  %6151 = vmatmul.mubr.msk.f32.gmra.mrb[174].mxu1 %vm309_vm0, %v270_v18  ;;  %v277_v18 = vld [vmem:[%s11752_s1 + $0x2f0] sm:$0xff] }
 0x199   :  { %v9214_v20 = vpop.f32.mrb[68].mxu1  ;;  %6153 = vmatprep.mubr.msk.f32.mxu1 %vm7832_vm1, %v7831_v0 }
 0x19b   :  { %6573 = vmatmul.mubr.msk.f32.gmra.mrb[204].mxu0 %vm309_vm0, %v159_v21  ;;  %v5993_v21 = vpop.f32.mrb[69].mxu1 }
 0x19c   :  { %6575 = vmatprep.mubr.msk.f32.mxu0 %vm7832_vm1, %v7831_v0  ;;  %v9228_v28 = vpop.f32.mrb[70].mxu1  ;;  %6154 = vmatmul.mubr.msk.f32.gmra.mrb[176].mxu1 %vm309_vm0, %v271_v25  ;;  %v4160_v25 = vld [vmem:[%s11753_s10 + $0x60] sm:$0xff] }
 0x19d   :  { %6156 = vmatprep.mubr.msk.f32.mxu1 %vm7832_vm1, %v7831_v0 }
 0x19f   :  { %6576 = vmatmul.mubr.msk.f32.gmra.mrb[206].mxu0 %vm309_vm0, %v160_v31  ;;  %v5996_v31 = vpop.f32.mrb[71].mxu1 }
 0x1a0   :  { %6578 = vmatprep.mubr.msk.f32.mxu0 %vm7832_vm1, %v7831_v0  ;;  %6157 = vmatmul.mubr.msk.f32.gmra.mrb[178].mxu1 %vm309_vm0, %v272_v35  ;;  %v4161_v31 = vld [vmem:[%s11753_s10 + $0x68] sm:$0xff] }
 0x1a1   :  { %6159 = vmatprep.mubr.msk.f32.mxu1 %vm7832_vm1, %v7831_v0  ;;  %v7444_v35 = vpack.c.bf16 %v4161_v31, %v4160_v25 }
 0x1a3   :  { %6579 = vmatmul.mubr.msk.f32.gmra.mrb[208].mxu0 %vm309_vm0, %v161_v38  ;;  %v9242_v38 = vpop.f32.mrb[72].mxu1  ;;  %7445 = vmatpush3.bf16.msra.mxu1 %v7444_v35  ;;  %v283_v35 = vld [vmem:[%s11752_s1 + $0x320] sm:$0xff] }
 0x1a4   :  { %6581 = vmatprep.mubr.msk.f32.mxu0 %vm7832_vm1, %v7831_v0  ;;  %v5999_v39 = vpop.f32.mrb[73].mxu1  ;;  %7446 = vmatprep.subr.bf16.mxu1 %v7833_v30 }
 0x1a5   :  { %v9256_v46 = vpop.f32.mrb[74].mxu1  ;;  %v278_v39 = vld [vmem:[%s11752_s1 + $0x2f8] sm:$0xff] }
 0x1a6   :  { %v6002_v50 = vpop.f32.mrb[75].mxu1 }
 0x1a7   :  { %6582 = vmatmul.mubr.msk.f32.gmra.mrb[210].mxu0 %vm309_vm0, %v162_v45  ;;  %v273_v45 = vld [vmem:[%s11752_s1 + $0x2d0] sm:$0xff]  ;;  %v9270_v57 = vpop.f32.mrb[76].mxu1  ;;  %v176_v50 = vld [vmem:[%s11749_s0 + $0x3b8] sm:$0xff] }
 0x1a8   :  { %6584 = vmatprep.mubr.msk.f32.mxu0 %vm7832_vm1, %v7831_v0  ;;  %6160 = vmatmul.mubr.msk.f32.gmra.mrb[180].mxu1 %vm309_vm0, %v273_v45 }
 0x1a9   :  { %6162 = vmatprep.mubr.msk.f32.mxu1 %vm7832_vm1, %v7831_v0 }
 0x1ab   :  { %6585 = vmatmul.mubr.msk.f32.gmra.mrb[212].mxu0 %vm309_vm0, %v163_v51  ;;  %v171_v51 = vld [vmem:[%s11749_s0 + $0x390] sm:$0xff] }
 0x1ac   :  { %6587 = vmatprep.mubr.msk.f32.mxu0 %vm7832_vm1, %v7831_v0  ;;  %6163 = vmatmul.mubr.msk.f32.gmra.mrb[182].mxu1 %vm309_vm0, %v274_v54 }
 0x1ad   :  { %6165 = vmatprep.mubr.msk.f32.mxu1 %vm7832_vm1, %v7831_v0 }
 0x1af   :  { %6588 = vmatmul.mubr.msk.f32.gmra.mrb[214].mxu0 %vm309_vm0, %v164_v59  ;;  %v6005_v59 = vpop.f32.mrb[77].mxu1 }
 0x1b0   :  { %6590 = vmatprep.mubr.msk.f32.mxu0 %vm7832_vm1, %v7831_v0  ;;  %6166 = vmatmul.mubr.msk.f32.gmra.mrb[184].mxu1 %vm309_vm0, %v275_v1  ;;  %v177_v59 = vld [vmem:[%s11749_s0 + $0x3c0] sm:$0xff] }
 0x1b1   :  { %6168 = vmatprep.mubr.msk.f32.mxu1 %vm7832_vm1, %v7831_v0 }
 0x1b3   :  { %6591 = vmatmul.mubr.msk.f32.gmra.mrb[216].mxu0 %vm309_vm0, %v165_v3  ;;  %v9284_v3 = vpop.f32.mrb[78].mxu1 }
 0x1b4   :  { %6593 = vmatprep.mubr.msk.f32.mxu0 %vm7832_vm1, %v7831_v0  ;;  %v6008_v4 = vpop.f32.mrb[79].mxu1 }
 0x1b5   :  { %v9298_v12 = vpop.f32.mrb[80].mxu1 }
 0x1b6   :  { %v6011_v14 = vpop.f32.mrb[81].mxu1 }
 0x1b7   :  { %6594 = vmatmul.mubr.msk.f32.gmra.mrb[218].mxu0 %vm309_vm0, %v166_v9  ;;  %v276_v9 = vld [vmem:[%s11752_s1 + $0x2e8] sm:$0xff]  ;;  %v9312_v21 = vpop.f32.mrb[82].mxu1 }
 0x1b8   :  { %6596 = vmatprep.mubr.msk.f32.mxu0 %vm7832_vm1, %v7831_v0  ;;  %6169 = vmatmul.mubr.msk.f32.gmra.mrb[186].mxu1 %vm309_vm0, %v276_v9  ;;  %v281_v9 = vld [vmem:[%s11752_s1 + $0x310] sm:$0xff] }
 0x1b9   :  { %6171 = vmatprep.mubr.msk.f32.mxu1 %vm7832_vm1, %v7831_v0 }
 0x1bb   :  { %6597 = vmatmul.mubr.msk.f32.gmra.mrb[220].mxu0 %vm309_vm0, %v167_v17  ;;  %v174_v17 = vld [vmem:[%s11749_s0 + $0x3a8] sm:$0xff] }
 0x1bc   :  { %6599 = vmatprep.mubr.msk.f32.mxu0 %vm7832_vm1, %v7831_v0  ;;  %6172 = vmatmul.mubr.msk.f32.gmra.mrb[188].mxu1 %vm309_vm0, %v277_v18  ;;  %v179_v18 = vld [vmem:[%s11749_s0 + $0x3d0] sm:$0xff] }
 0x1bd   :  { %6174 = vmatprep.mubr.msk.f32.mxu1 %vm7832_vm1, %v7831_v0 }
 0x1bf   :  { %6600 = vmatmul.mubr.msk.f32.gmra.mrb[222].mxu0 %vm309_vm0, %v168_v22  ;;  %v6014_v22 = vpop.f32.mrb[83].mxu1 }
 0x1c0   :  { %6602 = vmatprep.mubr.msk.f32.mxu0 %vm7832_vm1, %v7831_v0  ;;  %6175 = vmatmul.mubr.msk.f32.gmra.mrb[190].mxu1 %vm309_vm0, %v278_v39  ;;  %v282_v22 = vld [vmem:[%s11752_s1 + $0x318] sm:$0xff] }
 0x1c1   :  { %6177 = vmatprep.mubr.msk.f32.mxu1 %vm7832_vm1, %v7831_v0 }
 0x1c3   :  { %6603 = vmatmul.mubr.msk.f32.gmra.mrb[224].mxu0 %vm309_vm0, %v169_v33  ;;  %v175_v33 = vld [vmem:[%s11749_s0 + $0x3b0] sm:$0xff] }
 0x1c4   :  { %6605 = vmatprep.mubr.msk.f32.mxu0 %vm7832_vm1, %v7831_v0 }
 0x1c7   :  { %6606 = vmatmul.mubr.msk.f32.gmra.mrb[226].mxu0 %vm309_vm0, %v170_v43  ;;  %v9332_v43 = vpop.f32.mrb[84].mxu1 }
 0x1c8   :  { %6608 = vmatprep.mubr.msk.f32.mxu0 %vm7832_vm1, %v7831_v0  ;;  %v6017_v45 = vpop.f32.mrb[85].mxu1 }
 0x1c9   :  { %v9347_v54 = vpop.f32.mrb[86].mxu1 }
 0x1ca   :  { %v6020_v30 = vpop.f32.mrb[87].mxu1 }
 0x1cb   :  { %6609 = vmatmul.mubr.msk.f32.gmra.mrb[228].mxu0 %vm309_vm0, %v171_v51  ;;  %v279_v51 = vld [vmem:[%s11752_s1 + $0x300] sm:$0xff]  ;;  %v9361_v1 = vpop.f32.mrb[88].mxu1 }
 0x1cc   :  { %6611 = vmatprep.mubr.msk.f32.mxu0 %vm7832_vm1, %v7831_v0  ;;  %6178 = vmatmul.mubr.msk.f32.gmra.mrb[192].mxu1 %vm309_vm0, %v279_v51  ;;  %v6023_v4 = vpop.f32.mrb[89].mxu1  ;;  %v284_v51 = vld [vmem:[%s11752_s1 + $0x328] sm:$0xff] }
 0x1cd   :  { %6180 = vmatprep.mubr.msk.f32.mxu1 %vm7832_vm1, %v7831_v0  ;;  %v9375_v14 = vpop.f32.mrb[90].mxu1  ;;  %v285_v4 = vld [vmem:[%s11752_s1 + $0x330] sm:$0xff] }
 0x1cf   :  { %6612 = vmatmul.mubr.msk.f32.gmra.mrb[230].mxu0 %vm309_vm0, %v172_v61  ;;  %v280_v61 = vld [vmem:[%s11752_s1 + $0x308] sm:$0xff] }
 0x1d0   :  { %6614 = vmatprep.mubr.msk.f32.mxu0 %vm7832_vm1, %v7831_v0  ;;  %6181 = vmatmul.mubr.msk.f32.gmra.mrb[194].mxu1 %vm309_vm0, %v280_v61  ;;  %v2440_v61 = vld [vmem:[%s11754_s2] sm:$0xff] }
 0x1d1   :  { %6183 = vmatprep.mubr.msk.f32.mxu1 %vm7832_vm1, %v7831_v0 }
 0x1d3   :  { %6615 = vmatmul.mubr.msk.f32.gmra.mrb[232].mxu0 %vm309_vm0, %v173_v8  ;;  %v178_v8 = vld [vmem:[%s11749_s0 + $0x3c8] sm:$0xff] }
 0x1d4   :  { %6617 = vmatprep.mubr.msk.f32.mxu0 %vm7832_vm1, %v7831_v0  ;;  %6184 = vmatmul.mubr.msk.f32.gmra.mrb[196].mxu1 %vm309_vm0, %v281_v9 }
 0x1d5   :  { %6186 = vmatprep.mubr.msk.f32.mxu1 %vm7832_vm1, %v7831_v0 }
 0x1d7   :  { %6618 = vmatmul.mubr.msk.f32.gmra.mrb[234].mxu0 %vm309_vm0, %v174_v17  ;;  %v6026_v17 = vpop.f32.mrb[91].mxu1 }
 0x1d8   :  { %6620 = vmatprep.mubr.msk.f32.mxu0 %vm7832_vm1, %v7831_v0  ;;  %v9389_v25 = vpop.f32.mrb[92].mxu1  ;;  %6187 = vmatmul.mubr.msk.f32.gmra.mrb[198].mxu1 %vm309_vm0, %v282_v22  ;;  %v2441_v17 = vld [vmem:[%s11754_s2 + $0x8] sm:$0xff] }
 0x1d9   :  { %v6029_v31 = vpop.f32.mrb[93].mxu1  ;;  %6189 = vmatprep.mubr.msk.f32.mxu1 %vm7832_vm1, %v7831_v0 }
 0x1da   :  { %v9403_v39 = vpop.f32.mrb[94].mxu1 }
 0x1db   :  { %6621 = vmatmul.mubr.msk.f32.gmra.mrb[236].mxu0 %vm309_vm0, %v175_v33  ;;  %v180_v33 = vld [vmem:[%s11749_s0 + $0x3d8] sm:$0xff]  ;;  %v6032_v45 = vpop.f32.mrb[95].mxu1 }
 0x1dc   :  { %6623 = vmatprep.mubr.msk.f32.mxu0 %vm7832_vm1, %v7831_v0  ;;  %6190 = vmatmul.mubr.msk.f32.gmra.mrb[200].mxu1 %vm309_vm0, %v283_v35  ;;  %v9417_v30 = vpop.f32.mrb[96].mxu1  ;;  %v287_v35 = vld [vmem:[%s11752_s1 + $0x340] sm:$0xff] }
 0x1dd   :  { %6192 = vmatprep.mubr.msk.f32.mxu1 %vm7832_vm1, %v7831_v0 }
 0x1df   :  { %6624 = vmatmul.mubr.msk.f32.gmra.mrb[238].mxu0 %vm309_vm0, %v176_v50  ;;  %v181_v50 = vld [vmem:[%s11749_s0 + $0x3e0] sm:$0xff] }
 0x1e0   :  { %6626 = vmatprep.mubr.msk.f32.mxu0 %vm7832_vm1, %v7831_v0  ;;  %6193 = vmatmul.mubr.msk.f32.gmra.mrb[202].mxu1 %vm309_vm0, %v284_v51  ;;  %v2443_v51 = vld [vmem:[%s11754_s2 + $0x18] sm:$0xff] }
 0x1e1   :  { %6195 = vmatprep.mubr.msk.f32.mxu1 %vm7832_vm1, %v7831_v0 }
 0x1e3   :  { %6627 = vmatmul.mubr.msk.f32.gmra.mrb[240].mxu0 %vm309_vm0, %v177_v59  ;;  %v6035_v59 = vpop.f32.mrb[97].mxu1 }
 0x1e4   :  { %6629 = vmatprep.mubr.msk.f32.mxu0 %vm7832_vm1, %v7831_v0  ;;  %6196 = vmatmul.mubr.msk.f32.gmra.mrb[204].mxu1 %vm309_vm0, %v285_v4  ;;  %v288_v59 = vld [vmem:[%s11752_s1 + $0x348] sm:$0xff] }
 0x1e5   :  { %6198 = vmatprep.mubr.msk.f32.mxu1 %vm7832_vm1, %v7831_v0 }
 0x1e7   :  { %6630 = vmatmul.mubr.msk.f32.gmra.mrb[242].mxu0 %vm309_vm0, %v178_v8  ;;  %v9431_v8 = vpop.f32.mrb[98].mxu1 }
 0x1e8   :  { %6632 = vmatprep.mubr.msk.f32.mxu0 %vm7832_vm1, %v7831_v0  ;;  %11761 = vst [vmem:[#allocation2_spill] sm:$0xff] %v9431_v8  ;;  %v6038_v9 = vpop.f32.mrb[99].mxu1 }
 0x1e9   :  { %v9445_v22 = vpop.f32.mrb[100].mxu1  ;;  %v2444_v9 = vld [vmem:[%s11754_s2 + $0x20] sm:$0xff] }
 0x1ea   :  { %11762 = vst [vmem:[#allocation3_spill] sm:$0xff] %v9445_v22  ;;  %v6041_v31 = vpop.f32.mrb[101].mxu1 }
 0x1eb   :  { %6633 = vmatmul.mubr.msk.f32.gmra.mrb[244].mxu0 %vm309_vm0, %v179_v18  ;;  %v286_v18 = vld [vmem:[%s11752_s1 + $0x338] sm:$0xff]  ;;  %v9459_v45 = vpop.f32.mrb[102].mxu1 }
 0x1ec   :  { %6635 = vmatprep.mubr.msk.f32.mxu0 %vm7832_vm1, %v7831_v0  ;;  %6199 = vmatmul.mubr.msk.f32.gmra.mrb[206].mxu1 %vm309_vm0, %v286_v18  ;;  %11763 = vst [vmem:[#allocation4_spill] sm:$0xff] %v9459_v45 }
 0x1ed   :  { %6201 = vmatprep.mubr.msk.f32.mxu1 %vm7832_vm1, %v7831_v0 }
 0x1ef   :  { %6636 = vmatmul.mubr.msk.f32.gmra.mrb[246].mxu0 %vm309_vm0, %v180_v33  ;;  %v2442_v33 = vld [vmem:[%s11754_s2 + $0x10] sm:$0xff] }
 0x1f0   :  { %6638 = vmatprep.mubr.msk.f32.mxu0 %vm7832_vm1, %v7831_v0  ;;  %6202 = vmatmul.mubr.msk.f32.gmra.mrb[208].mxu1 %vm309_vm0, %v287_v35  ;;  %v290_v35 = vld [vmem:[%s11752_s1 + $0x358] sm:$0xff] }
 0x1f1   :  { %6204 = vmatprep.mubr.msk.f32.mxu1 %vm7832_vm1, %v7831_v0 }
 0x1f3   :  { %6639 = vmatmul.mubr.msk.f32.gmra.mrb[248].mxu0 %vm309_vm0, %v181_v50  ;;  %v6044_v50 = vpop.f32.mrb[103].mxu1 }
 0x1f4   :  { %6643 = vmatprep.mubr.msk.f32.mxu0 %vm7832_vm1, %v7831_v0  ;;  %6205 = vmatmul.mubr.msk.f32.gmra.mrb[210].mxu1 %vm309_vm0, %v288_v59  ;;  %v2446_v59 = vld [vmem:[%s11754_s2 + $0x30] sm:$0xff] }
 0x1f5   :  { %6207 = vmatprep.mubr.msk.f32.mxu1 %vm7832_vm1, %v7831_v0 }
 0x1f7   :  { %6644 = vmatmul.mubr.msk.f32.vlgmr.msra.gmra.mrb[0].mxu0 %vm2566_vm3, %v2440_v61  ;;  %v9473_v61 = vpop.f32.mrb[104].mxu1 }
 0x1f8   :  { %6646 = vmatprep.mubr.msk.f32.mxu0 %vm7832_vm1, %v7831_v0  ;;  %11764 = vst [vmem:[#allocation5_spill] sm:$0xff] %v9473_v61  ;;  %v6047_v4 = vpop.f32.mrb[105].mxu1 }
 0x1f9   :  { %v9487_v18 = vpop.f32.mrb[106].mxu1  ;;  %v291_v4 = vld [vmem:[%s11752_s1 + $0x360] sm:$0xff] }
 0x1fa   :  { %11765 = vst [vmem:[#allocation6_spill] sm:$0xff] %v9487_v18  ;;  %v6050_v31 = vpop.f32.mrb[107].mxu1 }
 0x1fb   :  { %6647 = vmatmul.mubr.msk.f32.gmra.mrb[2].mxu0 %vm2566_vm3, %v2441_v17  ;;  %v289_v17 = vld [vmem:[%s11752_s1 + $0x350] sm:$0xff]  ;;  %v9501_v50 = vpop.f32.mrb[108].mxu1  ;;  %v2447_v31 = vld [vmem:[%s11754_s2 + $0x38] sm:$0xff] }
 0x1fc   :  { %6649 = vmatprep.mubr.msk.f32.mxu0 %vm7832_vm1, %v7831_v0  ;;  %6208 = vmatmul.mubr.msk.f32.gmra.mrb[212].mxu1 %vm309_vm0, %v289_v17  ;;  %11766 = vst [vmem:[#allocation7_spill] sm:$0xff] %v9501_v50 }
 0x1fd   :  { %6210 = vmatprep.mubr.msk.f32.mxu1 %vm7832_vm1, %v7831_v0 }
 0x1ff   :  { %6650 = vmatmul.mubr.msk.f32.gmra.mrb[4].mxu0 %vm2566_vm3, %v2442_v33  ;;  %v2445_v33 = vld [vmem:[%s11754_s2 + $0x28] sm:$0xff] }
 0x200   :  { %6652 = vmatprep.mubr.msk.f32.mxu0 %vm7832_vm1, %v7831_v0  ;;  %6211 = vmatmul.mubr.msk.f32.gmra.mrb[214].mxu1 %vm309_vm0, %v290_v35 }
 0x201   :  { %6213 = vmatprep.mubr.msk.f32.mxu1 %vm7832_vm1, %v7831_v0 }
 0x203   :  { %6653 = vmatmul.mubr.msk.f32.gmra.mrb[6].mxu0 %vm2566_vm3, %v2443_v51  ;;  %v6053_v51 = vpop.f32.mrb[109].mxu1 }
 0x204   :  { %6655 = vmatprep.mubr.msk.f32.mxu0 %vm7832_vm1, %v7831_v0  ;;  %6214 = vmatmul.mubr.msk.f32.gmra.mrb[216].mxu1 %vm309_vm0, %v291_v4  ;;  %v4162_v4 = vld [vmem:[%s11753_s10 + $0x70] sm:$0xff] }
 0x205   :  { %6216 = vmatprep.mubr.msk.f32.mxu1 %vm7832_vm1, %v7831_v0 }
 0x207   :  { %6656 = vmatmul.mubr.msk.f32.gmra.mrb[8].mxu0 %vm2566_vm3, %v2444_v9  ;;  %v9515_v9 = vpop.f32.mrb[110].mxu1 }
 0x208   :  { %6658 = vmatprep.mubr.msk.f32.mxu0 %vm7832_vm1, %v7831_v0  ;;  %11767 = vst [vmem:[#allocation8_spill] sm:$0xff] %v9515_v9  ;;  %v6056_v17 = vpop.f32.mrb[111].mxu1  ;;  %v2449_v9 = vld [vmem:[%s11754_s2 + $0x48] sm:$0xff] }
 0x209   :  { %v9529_v35 = vpop.f32.mrb[112].mxu1  ;;  %v4163_v17 = vld [vmem:[%s11753_s10 + $0x78] sm:$0xff] }
 0x20a   :  { %11768 = vst [vmem:[#allocation9_spill] sm:$0xff] %v9529_v35  ;;  %v6059_v51 = vpop.f32.mrb[113].mxu1 }
 0x20b   :  { %6659 = vmatmul.mubr.msk.f32.gmra.mrb[10].mxu0 %vm2566_vm3, %v2445_v33  ;;  %v292_v33 = vld [vmem:[%s11752_s1 + $0x368] sm:$0xff]  ;;  %v293_v51 = vld [vmem:[%s11752_s1 + $0x370] sm:$0xff]  ;;  %v9549_v35 = vpop.f32.mrb[114].mxu1 }
 0x20c   :  { %6661 = vmatprep.mubr.msk.f32.mxu0 %vm7832_vm1, %v7831_v0  ;;  %6217 = vmatmul.mubr.msk.f32.gmra.mrb[218].mxu1 %vm309_vm0, %v292_v33  ;;  %11769 = vst [vmem:[#allocation10_spill] sm:$0xff] %v9549_v35  ;;  %v6062_v33 = vpop.f32.mrb[115].mxu1 }
 0x20d   :  { %6219 = vmatprep.mubr.msk.f32.mxu1 %vm7832_vm1, %v7831_v0 }
 0x20f   :  { %6662 = vmatmul.mubr.msk.f32.gmra.mrb[12].mxu0 %vm2566_vm3, %v2446_v59  ;;  %v2448_v59 = vld [vmem:[%s11754_s2 + $0x40] sm:$0xff] }
 0x210   :  { %6664 = vmatprep.mubr.msk.f32.mxu0 %vm7832_vm1, %v7831_v0  ;;  %6220 = vmatmul.mubr.msk.f32.gmra.mrb[220].mxu1 %vm309_vm0, %v293_v51  ;;  %v295_v51 = vld [vmem:[%s11752_s1 + $0x380] sm:$0xff] }
 0x211   :  { %6222 = vmatprep.mubr.msk.f32.mxu1 %vm7832_vm1, %v7831_v0 }
 0x213   :  { %6665 = vmatmul.mubr.msk.f32.gmra.mrb[14].mxu0 %vm2566_vm3, %v2447_v31  ;;  %v7447_v31 = vpack.c.bf16 %v4163_v17, %v4162_v4  ;;  %v294_v4 = vld [vmem:[%s11752_s1 + $0x378] sm:$0xff]  ;;  %v9563_v17 = vpop.f32.mrb[116].mxu1 }
 0x214   :  { %6667 = vmatprep.mubr.msk.f32.mxu0 %vm7832_vm1, %v7831_v0  ;;  %11770 = vst [vmem:[#allocation11_spill] sm:$0xff] %v9563_v17  ;;  %6223 = vmatmul.mubr.msk.f32.gmra.mrb[222].mxu1 %vm309_vm0, %v294_v4  ;;  %v296_v4 = vld [vmem:[%s11752_s1 + $0x388] sm:$0xff] }
 0x215   :  { %7448 = vmatpush3.bf16.msra.mxu1 %v7447_v31  ;;  %v2450_v31 = vld [vmem:[%s11754_s2 + $0x50] sm:$0xff]  ;;  %6225 = vmatprep.mubr.msk.f32.mxu1 %vm7832_vm1, %v7831_v0 }
 0x217   :  { %6668 = vmatmul.mubr.msk.f32.gmra.mrb[16].mxu0 %vm2566_vm3, %v2448_v59  ;;  %v6065_v59 = vpop.f32.mrb[117].mxu1 }
 0x218   :  { %6670 = vmatprep.mubr.msk.f32.mxu0 %vm7832_vm1, %v7831_v0  ;;  %v9577_v33 = vpop.f32.mrb[118].mxu1  ;;  %v2451_v59 = vld [vmem:[%s11754_s2 + $0x58] sm:$0xff]  ;;  %6226 = vmatmul.mubr.msk.f32.gmra.mrb[224].mxu1 %vm309_vm0, %v295_v51  ;;  %v297_v51 = vld [vmem:[%s11752_s1 + $0x390] sm:$0xff] }
 0x219   :  { %11771 = vst [vmem:[#allocation12_spill] sm:$0xff] %v9577_v33  ;;  %6228 = vmatprep.mubr.msk.f32.mxu1 %vm7832_vm1, %v7831_v0 }
 0x21b   :  { %6671 = vmatmul.mubr.msk.f32.gmra.mrb[18].mxu0 %vm2566_vm3, %v2449_v9  ;;  %v6068_v9 = vpop.f32.mrb[119].mxu1 }
 0x21c   :  { %6673 = vmatprep.mubr.msk.f32.mxu0 %vm7832_vm1, %v7831_v0  ;;  %v9591_v33 = vpop.f32.mrb[120].mxu1  ;;  %v2452_v9 = vld [vmem:[%s11754_s2 + $0x60] sm:$0xff]  ;;  %6229 = vmatmul.mubr.msk.f32.gmra.mrb[226].mxu1 %vm309_vm0, %v296_v4  ;;  %v298_v4 = vld [vmem:[%s11752_s1 + $0x398] sm:$0xff] }
 0x21d   :  { %11772 = vst [vmem:[#allocation13_spill] sm:$0xff] %v9591_v33  ;;  %6231 = vmatprep.mubr.msk.f32.mxu1 %vm7832_vm1, %v7831_v0 }
 0x21f   :  { %6674 = vmatmul.mubr.msk.f32.gmra.mrb[20].mxu0 %vm2566_vm3, %v2450_v31  ;;  %v6071_v31 = vpop.f32.mrb[121].mxu1 }
 0x220   :  { %6676 = vmatprep.mubr.msk.f32.mxu0 %vm7832_vm1, %v7831_v0  ;;  %v9605_v33 = vpop.f32.mrb[122].mxu1  ;;  %v2453_v31 = vld [vmem:[%s11754_s2 + $0x68] sm:$0xff]  ;;  %6232 = vmatmul.mubr.msk.f32.gmra.mrb[228].mxu1 %vm309_vm0, %v297_v51  ;;  %v299_v51 = vld [vmem:[%s11752_s1 + $0x3a0] sm:$0xff] }
 0x221   :  { %11773 = vst [vmem:[#allocation14_spill] sm:$0xff] %v9605_v33  ;;  %6234 = vmatprep.mubr.msk.f32.mxu1 %vm7832_vm1, %v7831_v0 }
 0x223   :  { %6677 = vmatmul.mubr.msk.f32.gmra.mrb[22].mxu0 %vm2566_vm3, %v2451_v59  ;;  %v6074_v59 = vpop.f32.mrb[123].mxu1 }
 0x224   :  { %6679 = vmatprep.mubr.msk.f32.mxu0 %vm7832_vm1, %v7831_v0  ;;  %v9619_v33 = vpop.f32.mrb[124].mxu1  ;;  %v2454_v59 = vld [vmem:[%s11754_s2 + $0x70] sm:$0xff]  ;;  %6235 = vmatmul.mubr.msk.f32.gmra.mrb[230].mxu1 %vm309_vm0, %v298_v4  ;;  %v300_v4 = vld [vmem:[%s11752_s1 + $0x3a8] sm:$0xff] }
 0x225   :  { %11774 = vst [vmem:[#allocation15_spill] sm:$0xff] %v9619_v33  ;;  %6237 = vmatprep.mubr.msk.f32.mxu1 %vm7832_vm1, %v7831_v0 }
 0x227   :  { %6680 = vmatmul.mubr.msk.f32.gmra.mrb[24].mxu0 %vm2566_vm3, %v2452_v9  ;;  %v6077_v9 = vpop.f32.mrb[125].mxu1 }
 0x228   :  { %6682 = vmatprep.mubr.msk.f32.mxu0 %vm7832_vm1, %v7831_v0  ;;  %v2455_v9 = vld [vmem:[%s11754_s2 + $0x78] sm:$0xff]  ;;  %6238 = vmatmul.mubr.msk.f32.gmra.mrb[232].mxu1 %vm309_vm0, %v299_v51  ;;  %v301_v51 = vld [vmem:[%s11752_s1 + $0x3b0] sm:$0xff] }
 0x229   :  { %6240 = vmatprep.mubr.msk.f32.mxu1 %vm7832_vm1, %v7831_v0 }
 0x22b   :  { %6683 = vmatmul.mubr.msk.f32.gmra.mrb[26].mxu0 %vm2566_vm3, %v2453_v31  ;;  %v9634_v31 = vpop.f32.mrb[126].mxu1 }
 0x22c   :  { %6685 = vmatprep.mubr.msk.f32.mxu0 %vm7832_vm1, %v7831_v0  ;;  %11775 = vst [vmem:[#allocation16_spill] sm:$0xff] %v9634_v31  ;;  %v6080_v33 = vpop.f32.mrb[127].mxu1  ;;  %6241 = vmatmul.mubr.msk.f32.gmra.mrb[234].mxu1 %vm309_vm0, %v300_v4  ;;  %v302_v4 = vld [vmem:[%s11752_s1 + $0x3b8] sm:$0xff] }
 0x22d   :  { %v2456_v33 = vld [vmem:[%s11754_s2 + $0x80] sm:$0xff]  ;;  %6243 = vmatprep.mubr.msk.f32.mxu1 %vm7832_vm1, %v7831_v0 }
 0x22f   :  { %6686 = vmatmul.mubr.msk.f32.gmra.mrb[28].mxu0 %vm2566_vm3, %v2454_v59  ;;  %v9648_v59 = vpop.f32.mrb[128].mxu1 }
 0x230   :  { %6688 = vmatprep.mubr.msk.f32.mxu0 %vm7832_vm1, %v7831_v0  ;;  %11776 = vst [vmem:[#allocation17_spill] sm:$0xff] %v9648_v59  ;;  %v6083_v31 = vpop.f32.mrb[129].mxu1  ;;  %6244 = vmatmul.mubr.msk.f32.gmra.mrb[236].mxu1 %vm309_vm0, %v301_v51  ;;  %v303_v51 = vld [vmem:[%s11752_s1 + $0x3c0] sm:$0xff] }
 0x231   :  { %v2457_v31 = vld [vmem:[%s11754_s2 + $0x88] sm:$0xff]  ;;  %6246 = vmatprep.mubr.msk.f32.mxu1 %vm7832_vm1, %v7831_v0 }
 0x233   :  { %6689 = vmatmul.mubr.msk.f32.gmra.mrb[30].mxu0 %vm2566_vm3, %v2455_v9  ;;  %v9662_v9 = vpop.f32.mrb[130].mxu1 }
 0x234   :  { %6691 = vmatprep.mubr.msk.f32.mxu0 %vm7832_vm1, %v7831_v0  ;;  %11777 = vst [vmem:[#allocation18_spill] sm:$0xff] %v9662_v9  ;;  %v6086_v59 = vpop.f32.mrb[131].mxu1  ;;  %6247 = vmatmul.mubr.msk.f32.gmra.mrb[238].mxu1 %vm309_vm0, %v302_v4  ;;  %v304_v4 = vld [vmem:[%s11752_s1 + $0x3c8] sm:$0xff] }
 0x235   :  { %v2458_v59 = vld [vmem:[%s11754_s2 + $0x90] sm:$0xff]  ;;  %6249 = vmatprep.mubr.msk.f32.mxu1 %vm7832_vm1, %v7831_v0 }
 0x237   :  { %6692 = vmatmul.mubr.msk.f32.gmra.mrb[32].mxu0 %vm2566_vm3, %v2456_v33  ;;  %v9676_v33 = vpop.f32.mrb[132].mxu1 }
 0x238   :  { %6694 = vmatprep.mubr.msk.f32.mxu0 %vm7832_vm1, %v7831_v0  ;;  %11778 = vst [vmem:[#allocation19_spill] sm:$0xff] %v9676_v33  ;;  %v6089_v9 = vpop.f32.mrb[133].mxu1  ;;  %6250 = vmatmul.mubr.msk.f32.gmra.mrb[240].mxu1 %vm309_vm0, %v303_v51  ;;  %v305_v51 = vld [vmem:[%s11752_s1 + $0x3d0] sm:$0xff] }
 0x239   :  { %v2459_v9 = vld [vmem:[%s11754_s2 + $0x98] sm:$0xff]  ;;  %6252 = vmatprep.mubr.msk.f32.mxu1 %vm7832_vm1, %v7831_v0 }
 0x23b   :  { %6695 = vmatmul.mubr.msk.f32.gmra.mrb[34].mxu0 %vm2566_vm3, %v2457_v31  ;;  %v9690_v31 = vpop.f32.mrb[134].mxu1 }
 0x23c   :  { %6697 = vmatprep.mubr.msk.f32.mxu0 %vm7832_vm1, %v7831_v0  ;;  %11779 = vst [vmem:[#allocation20_spill] sm:$0xff] %v9690_v31  ;;  %v6092_v33 = vpop.f32.mrb[135].mxu1  ;;  %6253 = vmatmul.mubr.msk.f32.gmra.mrb[242].mxu1 %vm309_vm0, %v304_v4  ;;  %v306_v4 = vld [vmem:[%s11752_s1 + $0x3d8] sm:$0xff] }
 0x23d   :  { %v2460_v33 = vld [vmem:[%s11754_s2 + $0xa0] sm:$0xff]  ;;  %6255 = vmatprep.mubr.msk.f32.mxu1 %vm7832_vm1, %v7831_v0 }
 0x23f   :  { %6698 = vmatmul.mubr.msk.f32.gmra.mrb[36].mxu0 %vm2566_vm3, %v2458_v59  ;;  %v9704_v59 = vpop.f32.mrb[136].mxu1 }
 0x240   :  { %6700 = vmatprep.mubr.msk.f32.mxu0 %vm7832_vm1, %v7831_v0  ;;  %11780 = vst [vmem:[#allocation21_spill] sm:$0xff] %v9704_v59  ;;  %v6095_v31 = vpop.f32.mrb[137].mxu1  ;;  %6256 = vmatmul.mubr.msk.f32.gmra.mrb[244].mxu1 %vm309_vm0, %v305_v51  ;;  %v307_v51 = vld [vmem:[%s11752_s1 + $0x3e0] sm:$0xff] }
 0x241   :  { %v2461_v31 = vld [vmem:[%s11754_s2 + $0xa8] sm:$0xff]  ;;  %6258 = vmatprep.mubr.msk.f32.mxu1 %vm7832_vm1, %v7831_v0 }
 0x243   :  { %6701 = vmatmul.mubr.msk.f32.gmra.mrb[38].mxu0 %vm2566_vm3, %v2459_v9  ;;  %v9718_v9 = vpop.f32.mrb[138].mxu1 }
 0x244   :  { %6703 = vmatprep.mubr.msk.f32.mxu0 %vm7832_vm1, %v7831_v0  ;;  %11781 = vst [vmem:[#allocation22_spill] sm:$0xff] %v9718_v9  ;;  %v6098_v59 = vpop.f32.mrb[139].mxu1  ;;  %6259 = vmatmul.mubr.msk.f32.gmra.mrb[246].mxu1 %vm309_vm0, %v306_v4 }
 0x245   :  { %v2462_v59 = vld [vmem:[%s11754_s2 + $0xb0] sm:$0xff]  ;;  %6261 = vmatprep.mubr.msk.f32.mxu1 %vm7832_vm1, %v7831_v0 }
 0x247   :  { %6704 = vmatmul.mubr.msk.f32.gmra.mrb[40].mxu0 %vm2566_vm3, %v2460_v33  ;;  %v9732_v33 = vpop.f32.mrb[140].mxu1 }
 0x248   :  { %6706 = vmatprep.mubr.msk.f32.mxu0 %vm7832_vm1, %v7831_v0  ;;  %11782 = vst [vmem:[#allocation23_spill] sm:$0xff] %v9732_v33  ;;  %v6101_v9 = vpop.f32.mrb[141].mxu1  ;;  %6262 = vmatmul.mubr.msk.f32.gmra.mrb[248].mxu1 %vm309_vm0, %v307_v51  ;;  %v2465_v51 = vld [vmem:[%s11754_s2 + $0xc8] sm:$0xff] }
 0x249   :  { %v2463_v9 = vld [vmem:[%s11754_s2 + $0xb8] sm:$0xff]  ;;  %7050 = vmatprep.mubr.msk.f32.mxu1 %vm7832_vm1, %v7831_v0 }
 0x24b   :  { %6707 = vmatmul.mubr.msk.f32.gmra.mrb[42].mxu0 %vm2566_vm3, %v2461_v31  ;;  %v9746_v31 = vpop.f32.mrb[142].mxu1 }
 0x24c   :  { %6709 = vmatprep.mubr.msk.f32.mxu0 %vm7832_vm1, %v7831_v0  ;;  %11783 = vst [vmem:[#allocation24_spill] sm:$0xff] %v9746_v31  ;;  %v6104_v33 = vpop.f32.mrb[143].mxu1 }
 0x24d   :  { %v9757_v4 = vpop.f32.mrb[144].mxu1 }
 0x24e   :  { %11784 = vst [vmem:[#allocation25_spill] sm:$0xff] %v9757_v4  ;;  %v6107_v31 = vpop.f32.mrb[145].mxu1 }
 0x24f   :  { %6710 = vmatmul.mubr.msk.f32.gmra.mrb[44].mxu0 %vm2566_vm3, %v2462_v59  ;;  %v2464_v59 = vld [vmem:[%s11754_s2 + $0xc0] sm:$0xff]  ;;  %v9765_v33 = vpop.f32.mrb[146].mxu1  ;;  %v2466_v31 = vld [vmem:[%s11754_s2 + $0xd0] sm:$0xff] }
 0x250   :  { %6712 = vmatprep.mubr.msk.f32.mxu0 %vm7832_vm1, %v7831_v0  ;;  %11785 = vst [vmem:[#allocation26_spill] sm:$0xff] %v9765_v33 }
 0x253   :  { %6713 = vmatmul.mubr.msk.f32.gmra.mrb[46].mxu0 %vm2566_vm3, %v2463_v9  ;;  %v6110_v9 = vpop.f32.mrb[147].mxu1 }
 0x254   :  { %6715 = vmatprep.mubr.msk.f32.mxu0 %vm7832_vm1, %v7831_v0  ;;  %v9773_v4 = vpop.f32.mrb[148].mxu1 }
 0x255   :  { %11786 = vst [vmem:[#allocation27_spill] sm:$0xff] %v9773_v4 }
 0x257   :  { %6716 = vmatmul.mubr.msk.f32.gmra.mrb[48].mxu0 %vm2566_vm3, %v2464_v59  ;;  %v6113_v59 = vpop.f32.mrb[149].mxu1 }
 0x258   :  { %6718 = vmatprep.mubr.msk.f32.mxu0 %vm7832_vm1, %v7831_v0  ;;  %v9781_v33 = vpop.f32.mrb[150].mxu1 }
 0x259   :  { %11787 = vst [vmem:[#allocation28_spill] sm:$0xff] %v9781_v33  ;;  %v6116_v9 = vpop.f32.mrb[151].mxu1 }
 0x25a   :  { %v9789_v4 = vpop.f32.mrb[152].mxu1 }
 0x25b   :  { %6719 = vmatmul.mubr.msk.f32.gmra.mrb[50].mxu0 %vm2566_vm3, %v2465_v51  ;;  %v2467_v51 = vld [vmem:[%s11754_s2 + $0xd8] sm:$0xff]  ;;  %11788 = vst [vmem:[#allocation29_spill] sm:$0xff] %v9789_v4  ;;  %v6119_v59 = vpop.f32.mrb[153].mxu1 }
 0x25c   :  { %6721 = vmatprep.mubr.msk.f32.mxu0 %vm7832_vm1, %v7831_v0  ;;  %v9797_v33 = vpop.f32.mrb[154].mxu1 }
 0x25d   :  { %11789 = vst [vmem:[#allocation30_spill] sm:$0xff] %v9797_v33  ;;  %v6122_v9 = vpop.f32.mrb[155].mxu1 }
 0x25e   :  { %v9805_v4 = vpop.f32.mrb[156].mxu1 }
 0x25f   :  { %6722 = vmatmul.mubr.msk.f32.gmra.mrb[52].mxu0 %vm2566_vm3, %v2466_v31  ;;  %v2468_v31 = vld [vmem:[%s11754_s2 + $0xe0] sm:$0xff]  ;;  %11790 = vst [vmem:[#allocation31_spill] sm:$0xff] %v9805_v4  ;;  %v6125_v59 = vpop.f32.mrb[157].mxu1 }
 0x260   :  { %6724 = vmatprep.mubr.msk.f32.mxu0 %vm7832_vm1, %v7831_v0  ;;  %v9813_v33 = vpop.f32.mrb[158].mxu1 }
 0x261   :  { %11791 = vst [vmem:[#allocation32_spill] sm:$0xff] %v9813_v33  ;;  %v6128_v9 = vpop.f32.mrb[159].mxu1 }
 0x262   :  { %v9821_v4 = vpop.f32.mrb[160].mxu1 }
 0x263   :  { %6725 = vmatmul.mubr.msk.f32.gmra.mrb[54].mxu0 %vm2566_vm3, %v2467_v51  ;;  %v2469_v51 = vld [vmem:[%s11754_s2 + $0xe8] sm:$0xff]  ;;  %11792 = vst [vmem:[#allocation33_spill] sm:$0xff] %v9821_v4  ;;  %v6131_v59 = vpop.f32.mrb[161].mxu1 }
 0x264   :  { %6727 = vmatprep.mubr.msk.f32.mxu0 %vm7832_vm1, %v7831_v0  ;;  %v9829_v33 = vpop.f32.mrb[162].mxu1 }
 0x265   :  { %11793 = vst [vmem:[#allocation34_spill] sm:$0xff] %v9829_v33  ;;  %v6134_v9 = vpop.f32.mrb[163].mxu1 }
 0x266   :  { %v9837_v4 = vpop.f32.mrb[164].mxu1 }
 0x267   :  { %6728 = vmatmul.mubr.msk.f32.gmra.mrb[56].mxu0 %vm2566_vm3, %v2468_v31  ;;  %v2470_v31 = vld [vmem:[%s11754_s2 + $0xf0] sm:$0xff]  ;;  %11794 = vst [vmem:[#allocation35_spill] sm:$0xff] %v9837_v4  ;;  %v6137_v59 = vpop.f32.mrb[165].mxu1 }
 0x268   :  { %6730 = vmatprep.mubr.msk.f32.mxu0 %vm7832_vm1, %v7831_v0  ;;  %v9845_v33 = vpop.f32.mrb[166].mxu1 }
 0x269   :  { %11795 = vst [vmem:[#allocation36_spill] sm:$0xff] %v9845_v33  ;;  %v6140_v9 = vpop.f32.mrb[167].mxu1 }
 0x26a   :  { %v9853_v4 = vpop.f32.mrb[168].mxu1 }
 0x26b   :  { %6731 = vmatmul.mubr.msk.f32.gmra.mrb[58].mxu0 %vm2566_vm3, %v2469_v51  ;;  %v2471_v51 = vld [vmem:[%s11754_s2 + $0xf8] sm:$0xff]  ;;  %11796 = vst [vmem:[#allocation37_spill] sm:$0xff] %v9853_v4  ;;  %v6143_v59 = vpop.f32.mrb[169].mxu1 }
 0x26c   :  { %6733 = vmatprep.mubr.msk.f32.mxu0 %vm7832_vm1, %v7831_v0  ;;  %v9861_v33 = vpop.f32.mrb[170].mxu1 }
 0x26d   :  { %11797 = vst [vmem:[#allocation38_spill] sm:$0xff] %v9861_v33  ;;  %v6146_v9 = vpop.f32.mrb[171].mxu1 }
 0x26e   :  { %v9869_v4 = vpop.f32.mrb[172].mxu1 }
 0x26f   :  { %6734 = vmatmul.mubr.msk.f32.gmra.mrb[60].mxu0 %vm2566_vm3, %v2470_v31  ;;  %v2472_v31 = vld [vmem:[%s11754_s2 + $0x100] sm:$0xff]  ;;  %11798 = vst [vmem:[#allocation39_spill] sm:$0xff] %v9869_v4  ;;  %v6149_v59 = vpop.f32.mrb[173].mxu1 }
 0x270   :  { %6736 = vmatprep.mubr.msk.f32.mxu0 %vm7832_vm1, %v7831_v0  ;;  %v9877_v33 = vpop.f32.mrb[174].mxu1 }
 0x271   :  { %11799 = vst [vmem:[#allocation40_spill] sm:$0xff] %v9877_v33  ;;  %v6152_v9 = vpop.f32.mrb[175].mxu1 }
 0x272   :  { %v9885_v4 = vpop.f32.mrb[176].mxu1 }
 0x273   :  { %6737 = vmatmul.mubr.msk.f32.gmra.mrb[62].mxu0 %vm2566_vm3, %v2471_v51  ;;  %v2473_v51 = vld [vmem:[%s11754_s2 + $0x108] sm:$0xff]  ;;  %11800 = vst [vmem:[#allocation41_spill] sm:$0xff] %v9885_v4  ;;  %v6155_v59 = vpop.f32.mrb[177].mxu1  ;;  %v41_v4 = vld [vmem:[%s11755_s6] sm:$0x1] }
 0x274   :  { %6739 = vmatprep.mubr.msk.f32.mxu0 %vm7832_vm1, %v7831_v0  ;;  %v9893_v33 = vpop.f32.mrb[178].mxu1 }
 0x275   :  { %11801 = vst [vmem:[#allocation42_spill] sm:$0xff] %v9893_v33  ;;  %v6158_v9 = vpop.f32.mrb[179].mxu1  ;;  %v45_v33 = vmul.f32 0.001, %v41_v4 }
 0x277   :  { %6740 = vmatmul.mubr.msk.f32.gmra.mrb[64].mxu0 %vm2566_vm3, %v2472_v31  ;;  %v2474_v31 = vld [vmem:[%s11754_s2 + $0x110] sm:$0xff]  ;;  %v47_v18 = vmul.f32 %v45_v33, %v45_v33 }
 0x278   :  { %6742 = vmatprep.mubr.msk.f32.mxu0 %vm7832_vm1, %v7831_v0 }
 0x27b   :  { %6743 = vmatmul.mubr.msk.f32.gmra.mrb[66].mxu0 %vm2566_vm3, %v2473_v51  ;;  %v2475_v51 = vld [vmem:[%s11754_s2 + $0x118] sm:$0xff]  ;;  %v9904_v17 = vpop.f32.mrb[180].mxu1 }
 0x27c   :  { %6745 = vmatprep.mubr.msk.f32.mxu0 %vm7832_vm1, %v7831_v0  ;;  %11802 = vst [vmem:[#allocation43_spill] sm:$0xff] %v9904_v17  ;;  %v6161_v59 = vpop.f32.mrb[181].mxu1  ;;  %v2483_v17 = vld [vmem:[%s11754_s2 + $0x158] sm:$0xff] }
 0x27f   :  { %6746 = vmatmul.mubr.msk.f32.gmra.mrb[68].mxu0 %vm2566_vm3, %v2474_v31  ;;  %v2476_v31 = vld [vmem:[%s11754_s2 + $0x120] sm:$0xff]  ;;  %v9915_v9 = vpop.f32.mrb[182].mxu1 }
 0x280   :  { %6748 = vmatprep.mubr.msk.f32.mxu0 %vm7832_vm1, %v7831_v0  ;;  %11803 = vst [vmem:[#allocation44_spill] sm:$0xff] %v9915_v9  ;;  %v6164_v35 = vpop.f32.mrb[183].mxu1 }
 0x281   :  { %v2485_v35 = vld [vmem:[%s11754_s2 + $0x168] sm:$0xff] }
 0x283   :  { %6749 = vmatmul.mubr.msk.f32.gmra.mrb[70].mxu0 %vm2566_vm3, %v2475_v51  ;;  %v2477_v51 = vld [vmem:[%s11754_s2 + $0x128] sm:$0xff]  ;;  %v9923_v4 = vpop.f32.mrb[184].mxu1 }
 0x284   :  { %6751 = vmatprep.mubr.msk.f32.mxu0 %vm7832_vm1, %v7831_v0  ;;  %11804 = vst [vmem:[#allocation45_spill] sm:$0xff] %v9923_v4  ;;  %v6167_v59 = vpop.f32.mrb[185].mxu1 }
 0x287   :  { %6752 = vmatmul.mubr.msk.f32.gmra.mrb[72].mxu0 %vm2566_vm3, %v2476_v31  ;;  %v2478_v31 = vld [vmem:[%s11754_s2 + $0x130] sm:$0xff] }
 0x288   :  { %6754 = vmatprep.mubr.msk.f32.mxu0 %vm7832_vm1, %v7831_v0 }
 0x28b   :  { %6755 = vmatmul.mubr.msk.f32.gmra.mrb[74].mxu0 %vm2566_vm3, %v2477_v51  ;;  %v2479_v51 = vld [vmem:[%s11754_s2 + $0x138] sm:$0xff]  ;;  %v9931_v61 = vpop.f32.mrb[186].mxu1 }
 0x28c   :  { %6757 = vmatprep.mubr.msk.f32.mxu0 %vm7832_vm1, %v7831_v0  ;;  %11805 = vst [vmem:[#allocation46_spill] sm:$0xff] %v9931_v61 }
 0x28f   :  { %6758 = vmatmul.mubr.msk.f32.gmra.mrb[76].mxu0 %vm2566_vm3, %v2478_v31  ;;  %v2480_v31 = vld [vmem:[%s11754_s2 + $0x140] sm:$0xff] }
 0x290   :  { %6760 = vmatprep.mubr.msk.f32.mxu0 %vm7832_vm1, %v7831_v0 }
 0x293   :  { %6761 = vmatmul.mubr.msk.f32.gmra.mrb[78].mxu0 %vm2566_vm3, %v2479_v51  ;;  %v2481_v51 = vld [vmem:[%s11754_s2 + $0x148] sm:$0xff] }
 0x294   :  { %6763 = vmatprep.mubr.msk.f32.mxu0 %vm7832_vm1, %v7831_v0 }
 0x297   :  { %6764 = vmatmul.mubr.msk.f32.gmra.mrb[80].mxu0 %vm2566_vm3, %v2480_v31  ;;  %v2482_v31 = vld [vmem:[%s11754_s2 + $0x150] sm:$0xff] }
 0x298   :  { %6766 = vmatprep.mubr.msk.f32.mxu0 %vm7832_vm1, %v7831_v0 }
 0x29b   :  { %6767 = vmatmul.mubr.msk.f32.gmra.mrb[82].mxu0 %vm2566_vm3, %v2481_v51  ;;  %v43_v51 = vld [vmem:[%s11756_s7] sm:$0x1] }
 0x29c   :  { %6769 = vmatprep.mubr.msk.f32.mxu0 %vm7832_vm1, %v7831_v0  ;;  %v46_v50 = vmul.f32 0.001, %v43_v51 }
 0x29e   :  { %v48_v9 = vsub.f32 %v46_v50, %v47_v18  ;;  %v2486_v18 = vld [vmem:[%s11754_s2 + $0x170] sm:$0xff] }
 0x29f   :  { %6770 = vmatmul.mubr.msk.f32.gmra.mrb[84].mxu0 %vm2566_vm3, %v2482_v31  ;;  %v2484_v31 = vld [vmem:[%s11754_s2 + $0x160] sm:$0xff] }
 0x2a0   :  { %6772 = vmatprep.mubr.msk.f32.mxu0 %vm7832_vm1, %v7831_v0  ;;  %v49_v51 = vmax.f32 %v48_v9, 0.0  ;;  %v2487_v9 = vld [vmem:[%s11754_s2 + $0x178] sm:$0xff] }
 0x2a3   :  { %6773 = vmatmul.mubr.msk.f32.gmra.mrb[86].mxu0 %vm2566_vm3, %v2483_v17  ;;  %v6170_v17 = vpop.f32.mrb[187].mxu1 }
 0x2a4   :  { %6775 = vmatprep.mubr.msk.f32.mxu0 %vm7832_vm1, %v7831_v0  ;;  %v9939_v4 = vpop.f32.mrb[188].mxu1 }
 0x2a5   :  { %11806 = vst [vmem:[#allocation47_spill] sm:$0xff] %v9939_v4  ;;  %v6173_v50 = vpop.f32.mrb[189].mxu1 }
 0x2a6   :  { %v9947_v59 = vpop.f32.mrb[190].mxu1 }
 0x2a7   :  { %6776 = vmatmul.mubr.msk.f32.gmra.mrb[88].mxu0 %vm2566_vm3, %v2484_v31  ;;  %v50_v31 = vadd.f32 1e-05, %v49_v51  ;;  %11807 = vst [vmem:[#allocation48_spill] sm:$0xff] %v9947_v59  ;;  %v2488_v51 = vld [vmem:[%s11754_s2 + $0x180] sm:$0xff]  ;;  %v3762_v59 = vlaneseq }
 0x2a8   :  { %6778 = vmatprep.mubr.msk.f32.mxu0 %vm7832_vm1, %v7831_v0 }
 0x2a9   :  { %7827 = vrsqrt.f32 %v50_v31  ;;  %v2489_v31 = vld [vmem:[%s11754_s2 + $0x188] sm:$0xff]  ;;  %v3763_v61 = vshrl.u32 %v3762_v59, 7 }
 0x2ab   :  { %6779 = vmatmul.mubr.msk.f32.gmra.mrb[90].mxu0 %vm2566_vm3, %v2485_v35  ;;  %v6176_v35 = vpop.f32.mrb[191].mxu1 }
 0x2ac   :  { %6781 = vmatprep.mubr.msk.f32.mxu0 %vm7832_vm1, %v7831_v0  ;;  %v9955_v17 = vpop.f32.mrb[192].mxu1 }
 0x2ad   :  { %11808 = vst [vmem:[#allocation49_spill] sm:$0xff] %v9955_v17 }
 0x2af   :  { %6782 = vmatmul.mubr.msk.f32.gmra.mrb[92].mxu0 %vm2566_vm3, %v2486_v18  ;;  %v6179_v18 = vpop.f32.mrb[193].mxu1 }
 0x2b0   :  { %6784 = vmatprep.mubr.msk.f32.mxu0 %vm7832_vm1, %v7831_v0  ;;  %v9963_v50 = vpop.f32.mrb[194].mxu1  ;;  %v52_v18 = vld [vmem:[%s11757_s8] sm:$0x1] }
 0x2b1   :  { %11809 = vst [vmem:[#allocation50_spill] sm:$0xff] %v9963_v50 }
 0x2b3   :  { %6785 = vmatmul.mubr.msk.f32.gmra.mrb[94].mxu0 %vm2566_vm3, %v2487_v9  ;;  %v6182_v9 = vpop.f32.mrb[195].mxu1  ;;  %v7828_v17 = vpop.eup %7827 }
 0x2b4   :  { %6787 = vmatprep.mubr.msk.f32.mxu0 %vm7832_vm1, %v7831_v0  ;;  %v9971_v35 = vpop.f32.mrb[196].mxu1  ;;  %v53_v9 = vmul.f32 %v7828_v17, %v52_v18  ;;  %v2492_v17 = vld [vmem:[%s11754_s2 + $0x1a0] sm:$0xff]  ;;  %v3764_v18 = vsub.s32 0, %v3763_v61 }
 0x2b5   :  { %11810 = vst [vmem:[#allocation51_spill] sm:$0xff] %v9971_v35  ;;  %v6185_v50 = vpop.f32.mrb[197].mxu1  ;;  %v2491_v35 = vld [vmem:[%s11754_s2 + $0x198] sm:$0xff] }
 0x2b6   :  { %v55_v45 = vmul.f32 %v53_v9, %v45_v33  ;;  %v54_v50 = vld [vmem:[%s11758_s9] sm:$0x1]  ;;  %v2493_v33 = vld [vmem:[%s11754_s2 + $0x1a8] sm:$0xff] }
 0x2b7   :  { %6788 = vmatmul.mubr.msk.f32.gmra.mrb[96].mxu0 %vm2566_vm3, %v2488_v51  ;;  %v2490_v51 = vld [vmem:[%s11754_s2 + $0x190] sm:$0xff] }
 0x2b8   :  { %6790 = vmatprep.mubr.msk.f32.mxu0 %vm7832_vm1, %v7831_v0 }
 0x2bb   :  { %6791 = vmatmul.mubr.msk.f32.gmra.mrb[98].mxu0 %vm2566_vm3, %v2489_v31  ;;  %v9982_v31 = vpop.f32.mrb[198].mxu1 }
 0x2bc   :  { %6793 = vmatprep.mubr.msk.f32.mxu0 %vm7832_vm1, %v7831_v0  ;;  %11811 = vst [vmem:[#allocation52_spill] sm:$0xff] %v9982_v31  ;;  %v6188_v4 = vpop.f32.mrb[199].mxu1 }
 0x2bd   :  { %v9990_v22 = vpop.f32.mrb[200].mxu1  ;;  %v56_v4 = vsub.f32 %v54_v50, %v55_v45 }
 0x2be   :  { %11812 = vst [vmem:[#allocation53_spill] sm:$0xff] %v9990_v22  ;;  %v10008_v22 = vrot.slane %v53_v9, %v3764_v18 }
 0x2bf   :  { %6794 = vmatmul.mubr.msk.f32.gmra.mrb[100].mxu0 %vm2566_vm3, %v2490_v51  ;;  %v6191_v51 = vpop.f32.mrb[201].mxu1 }
 0x2c0   :  { %6796 = vmatprep.mubr.msk.f32.mxu0 %vm7832_vm1, %v7831_v0  ;;  %v10001_v59 = vpop.f32.mrb[202].mxu1  ;;  %v10011_v51 = vrot.slane %v56_v4, %v3764_v18 }
 0x2c3   :  { %6797 = vmatmul.mubr.msk.f32.gmra.mrb[102].mxu0 %vm2566_vm3, %v2491_v35  ;;  %v6194_v35 = vpop.f32.mrb[203].mxu1 }
 0x2c4   :  { %6799 = vmatprep.mubr.msk.f32.mxu0 %vm7832_vm1, %v7831_v0  ;;  %v10014_v45 = vpop.f32.mrb[204].mxu1 }
 0x2c5   :  { %11813 = vst [vmem:[#allocation54_spill] sm:$0xff] %v10014_v45  ;;  %v6197_v50 = vpop.f32.mrb[205].mxu1 }
 0x2c6   :  { %v10025_v4 = vpop.f32.mrb[206].mxu1 }
 0x2c7   :  { %6800 = vmatmul.mubr.msk.f32.gmra.mrb[104].mxu0 %vm2566_vm3, %v2492_v17  ;;  %v2494_v17 = vld [vmem:[%s11754_s2 + $0x1b0] sm:$0xff] }
 0x2c8   :  { %6802 = vmatprep.mubr.msk.f32.mxu0 %vm7832_vm1, %v7831_v0 }
 0x2ca   :  { %v3012_v31 = vpop.f32.mrb[0].mxu0 }
 0x2cb   :  { %v7449_v8 = vadd.f32 %v3012_v31, %v8724_v23  ;;  %v6645_v61 = vpop.f32.mrb[1].mxu0  ;;  %6803 = vmatmul.mubr.msk.f32.gmra.mrb[106].mxu0 %vm2566_vm3, %v2493_v33  ;;  %v2495_v33 = vld [vmem:[%s11754_s2 + $0x1b8] sm:$0xff] }
 0x2cc   :  { %6805 = vmatprep.mubr.msk.f32.mxu0 %vm7832_vm1, %v7831_v0  ;;  %v6200_v61 = vpop.f32.mrb[207].mxu1 }
 0x2cd   :  { %v3767_v9 = vmul.f32 %v7449_v8, %v10008_v22 }
 0x2ce   :  { %v3017_v35 = vpop.f32.mrb[2].mxu0 }
 0x2cf   :  { %v3898_v23 = vadd.f32 %v10011_v51, %v3767_v9  ;;  %v7450_v31 = vadd.f32 %v3017_v35, %v8738_v27  ;;  %v6648_v18 = vpop.f32.mrb[3].mxu0  ;;  %6806 = vmatmul.mubr.msk.f32.gmra.mrb[108].mxu0 %vm2566_vm3, %v2494_v17  ;;  %v10036_v35 = vpop.f32.mrb[208].mxu1 }
 0x2d0   :  { %6808 = vmatprep.mubr.msk.f32.mxu0 %vm7832_vm1, %v7831_v0 }
 0x2d1   :  { %v4023_v50 = vmax.f32 %v3898_v23, 0.0  ;;  %v3768_v8 = vmul.f32 %v7450_v31, %v10008_v22  ;;  %v2496_v23 = vld [vmem:[%s11754_s2 + $0x1c0] sm:$0xff]  ;;  %v6203_v31 = vpop.f32.mrb[209].mxu1 }
 0x2d2   :  { %v3022_v45 = vpop.f32.mrb[4].mxu0 }
 0x2d3   :  { %v7451_v9 = vadd.f32 %v3022_v45, %v8752_v32  ;;  %v6651_v27 = vpop.f32.mrb[5].mxu0  ;;  %6809 = vmatmul.mubr.msk.f32.gmra.mrb[110].mxu0 %vm2566_vm3, %v2495_v33  ;;  %7051 = vmatmul.mubr.f32.vlgmr.msra.gmra.mrb[250].mxu1 %v4023_v50  ;;  %v3899_v17 = vadd.f32 %v10011_v51, %v3768_v8  ;;  %v10049_v8 = vpop.f32.mrb[210].mxu1 }
 0x2d4   :  { %6811 = vmatprep.mubr.msk.f32.mxu0 %vm7832_vm1, %v7831_v0  ;;  %7053 = vmatprep.mubr.msk.f32.mxu1 %vm7832_vm1, %v7831_v0  ;;  %v6206_v27 = vpop.f32.mrb[211].mxu1 }
 0x2d5   :  { %v3769_v32 = vmul.f32 %v7451_v9, %v10008_v22  ;;  %v4024_v45 = vmax.f32 %v3899_v17, 0.0  ;;  %v2497_v9 = vld [vmem:[%s11754_s2 + $0x1c8] sm:$0xff] }
 0x2d6   :  { %v3027_v18 = vpop.f32.mrb[6].mxu0 }
 0x2d7   :  { %v7452_v33 = vadd.f32 %v3027_v18, %v8766_v36  ;;  %v6654_v61 = vpop.f32.mrb[7].mxu0  ;;  %6812 = vmatmul.mubr.msk.f32.gmra.mrb[112].mxu0 %vm2566_vm3, %v2496_v23  ;;  %7054 = vmatmul.mubr.f32.gmra.mrb[252].mxu1 %v4024_v45  ;;  %v3900_v50 = vadd.f32 %v10011_v51, %v3769_v32  ;;  %v10062_v18 = vpop.f32.mrb[212].mxu1 }
 0x2d8   :  { %6814 = vmatprep.mubr.msk.f32.mxu0 %vm7832_vm1, %v7831_v0  ;;  %7056 = vmatprep.mubr.msk.f32.mxu1 %vm7832_vm1, %v7831_v0  ;;  %v6209_v61 = vpop.f32.mrb[213].mxu1 }
 0x2d9   :  { %v3770_v36 = vmul.f32 %v7452_v33, %v10008_v22  ;;  %v4025_v17 = vmax.f32 %v3900_v50, 0.0  ;;  %v2498_v33 = vld [vmem:[%s11754_s2 + $0x1d0] sm:$0xff] }
 0x2da   :  { %v3032_v23 = vpop.f32.mrb[8].mxu0 }
 0x2db   :  { %v3901_v31 = vadd.f32 %v10011_v51, %v3770_v36  ;;  %v7453_v32 = vadd.f32 %v3032_v23, %v8780_v40  ;;  %v6657_v45 = vpop.f32.mrb[9].mxu0  ;;  %6815 = vmatmul.mubr.msk.f32.gmra.mrb[114].mxu0 %vm2566_vm3, %v2497_v9  ;;  %7057 = vmatmul.mubr.f32.gmra.mrb[254].mxu1 %v4025_v17  ;;  %v10075_v23 = vpop.f32.mrb[214].mxu1 }
 0x2dc   :  { %6817 = vmatprep.mubr.msk.f32.mxu0 %vm7832_vm1, %v7831_v0  ;;  %7059 = vmatprep.mubr.msk.f32.mxu1 %vm7832_vm1, %v7831_v0 }
 0x2dd   :  { %v4026_v50 = vmax.f32 %v3901_v31, 0.0  ;;  %v3771_v40 = vmul.f32 %v7453_v32, %v10008_v22  ;;  %v2499_v31 = vld [vmem:[%s11754_s2 + $0x1d8] sm:$0xff]  ;;  %v6212_v32 = vpop.f32.mrb[215].mxu1 }
 0x2de   :  { %v3037_v27 = vpop.f32.mrb[10].mxu0 }
 0x2df   :  { %v3902_v9 = vadd.f32 %v10011_v51, %v3771_v40  ;;  %v7454_v36 = vadd.f32 %v3037_v27, %v8794_v44  ;;  %v6660_v17 = vpop.f32.mrb[11].mxu0  ;;  %6818 = vmatmul.mubr.msk.f32.gmra.mrb[116].mxu0 %vm2566_vm3, %v2498_v33  ;;  %7060 = vmatmul.mubr.f32.gmra.mrb[0].mxu1 %v4026_v50  ;;  %v10088_v27 = vpop.f32.mrb[216].mxu1 }
 0x2e0   :  { %6820 = vmatprep.mubr.msk.f32.mxu0 %vm7832_vm1, %v7831_v0  ;;  %7062 = vmatprep.mubr.msk.f32.mxu1 %vm7832_vm1, %v7831_v0 }
 0x2e1   :  { %v4027_v45 = vmax.f32 %v3902_v9, 0.0  ;;  %v3772_v44 = vmul.f32 %v7454_v36, %v10008_v22  ;;  %v2500_v9 = vld [vmem:[%s11754_s2 + $0x1e0] sm:$0xff]  ;;  %v6215_v36 = vpop.f32.mrb[217].mxu1 }
 0x2e2   :  { %v3042_v61 = vpop.f32.mrb[12].mxu0 }
 0x2e3   :  { %v3903_v33 = vadd.f32 %v10011_v51, %v3772_v44  ;;  %v7455_v50 = vadd.f32 %v3042_v61, %v8808_v48  ;;  %v6663_v40 = vpop.f32.mrb[13].mxu0  ;;  %6821 = vmatmul.mubr.msk.f32.gmra.mrb[118].mxu0 %vm2566_vm3, %v2499_v31  ;;  %7063 = vmatmul.mubr.f32.gmra.mrb[2].mxu1 %v4027_v45  ;;  %v10101_v61 = vpop.f32.mrb[218].mxu1 }
 0x2e4   :  { %6823 = vmatprep.mubr.msk.f32.mxu0 %vm7832_vm1, %v7831_v0  ;;  %7065 = vmatprep.mubr.msk.f32.mxu1 %vm7832_vm1, %v7831_v0 }
 0x2e5   :  { %v4028_v17 = vmax.f32 %v3903_v33, 0.0  ;;  %v3773_v48 = vmul.f32 %v7455_v50, %v10008_v22  ;;  %v2501_v33 = vld [vmem:[%s11754_s2 + $0x1e8] sm:$0xff]  ;;  %v6218_v50 = vpop.f32.mrb[219].mxu1 }
 0x2e6   :  { %v3047_v32 = vpop.f32.mrb[14].mxu0 }
 0x2e7   :  { %v3904_v31 = vadd.f32 %v10011_v51, %v3773_v48  ;;  %v7456_v45 = vadd.f32 %v3047_v32, %v8822_v52  ;;  %v6666_v44 = vpop.f32.mrb[15].mxu0  ;;  %6824 = vmatmul.mubr.msk.f32.gmra.mrb[120].mxu0 %vm2566_vm3, %v2500_v9  ;;  %7066 = vmatmul.mubr.f32.gmra.mrb[4].mxu1 %v4028_v17  ;;  %v10114_v32 = vpop.f32.mrb[220].mxu1 }
 0x2e8   :  { %6826 = vmatprep.mubr.msk.f32.mxu0 %vm7832_vm1, %v7831_v0  ;;  %7068 = vmatprep.mubr.msk.f32.mxu1 %vm7832_vm1, %v7831_v0 }
 0x2e9   :  { %v4029_v40 = vmax.f32 %v3904_v31, 0.0  ;;  %v3774_v52 = vmul.f32 %v7456_v45, %v10008_v22  ;;  %v2502_v31 = vld [vmem:[%s11754_s2 + $0x1f0] sm:$0xff]  ;;  %v6221_v45 = vpop.f32.mrb[221].mxu1 }
 0x2ea   :  { %v3052_v36 = vpop.f32.mrb[16].mxu0 }
 0x2eb   :  { %v3905_v9 = vadd.f32 %v10011_v51, %v3774_v52  ;;  %v7457_v17 = vadd.f32 %v3052_v36, %v8836_v56  ;;  %v6669_v48 = vpop.f32.mrb[17].mxu0  ;;  %6827 = vmatmul.mubr.msk.f32.gmra.mrb[122].mxu0 %vm2566_vm3, %v2501_v33  ;;  %7069 = vmatmul.mubr.f32.gmra.mrb[6].mxu1 %v4029_v40  ;;  %v10127_v36 = vpop.f32.mrb[222].mxu1 }
 0x2ec   :  { %6829 = vmatprep.mubr.msk.f32.mxu0 %vm7832_vm1, %v7831_v0  ;;  %7071 = vmatprep.mubr.msk.f32.mxu1 %vm7832_vm1, %v7831_v0 }
 0x2ed   :  { %v4030_v44 = vmax.f32 %v3905_v9, 0.0  ;;  %v3775_v56 = vmul.f32 %v7457_v17, %v10008_v22  ;;  %v2503_v9 = vld [vmem:[%s11754_s2 + $0x1f8] sm:$0xff]  ;;  %v6224_v17 = vpop.f32.mrb[223].mxu1 }
 0x2ee   :  { %v3057_v50 = vpop.f32.mrb[18].mxu0 }
 0x2ef   :  { %v3906_v33 = vadd.f32 %v10011_v51, %v3775_v56  ;;  %v7458_v40 = vadd.f32 %v3057_v50, %v8850_v60  ;;  %v6672_v52 = vpop.f32.mrb[19].mxu0  ;;  %6830 = vmatmul.mubr.msk.f32.gmra.mrb[124].mxu0 %vm2566_vm3, %v2502_v31  ;;  %7072 = vmatmul.mubr.f32.gmra.mrb[8].mxu1 %v4030_v44  ;;  %v10140_v50 = vpop.f32.mrb[224].mxu1 }
 0x2f0   :  { %6832 = vmatprep.mubr.msk.f32.mxu0 %vm7832_vm1, %v7831_v0  ;;  %7074 = vmatprep.mubr.msk.f32.mxu1 %vm7832_vm1, %v7831_v0 }
 0x2f1   :  { %v4031_v48 = vmax.f32 %v3906_v33, 0.0  ;;  %v3776_v60 = vmul.f32 %v7458_v40, %v10008_v22  ;;  %v2504_v33 = vld [vmem:[%s11754_s2 + $0x200] sm:$0xff]  ;;  %v6227_v40 = vpop.f32.mrb[225].mxu1 }
 0x2f2   :  { %v3062_v45 = vpop.f32.mrb[20].mxu0 }
 0x2f3   :  { %v3907_v31 = vadd.f32 %v10011_v51, %v3776_v60  ;;  %v7459_v44 = vadd.f32 %v3062_v45, %v8867_v2  ;;  %v6675_v56 = vpop.f32.mrb[21].mxu0  ;;  %6833 = vmatmul.mubr.msk.f32.gmra.mrb[126].mxu0 %vm2566_vm3, %v2503_v9  ;;  %7075 = vmatmul.mubr.f32.gmra.mrb[10].mxu1 %v4031_v48  ;;  %v10153_v45 = vpop.f32.mrb[226].mxu1 }
 0x2f4   :  { %6835 = vmatprep.mubr.msk.f32.mxu0 %vm7832_vm1, %v7831_v0  ;;  %7077 = vmatprep.mubr.msk.f32.mxu1 %vm7832_vm1, %v7831_v0 }
 0x2f5   :  { %v4032_v52 = vmax.f32 %v3907_v31, 0.0  ;;  %v3777_v2 = vmul.f32 %v7459_v44, %v10008_v22  ;;  %v2505_v31 = vld [vmem:[%s11754_s2 + $0x208] sm:$0xff]  ;;  %v6230_v44 = vpop.f32.mrb[227].mxu1 }
 0x2f6   :  { %v3067_v17 = vpop.f32.mrb[22].mxu0 }
 0x2f7   :  { %v3908_v9 = vadd.f32 %v10011_v51, %v3777_v2  ;;  %v7460_v48 = vadd.f32 %v3067_v17, %v8879_v7  ;;  %v6678_v60 = vpop.f32.mrb[23].mxu0  ;;  %6836 = vmatmul.mubr.msk.f32.gmra.mrb[128].mxu0 %vm2566_vm3, %v2504_v33  ;;  %7078 = vmatmul.mubr.f32.gmra.mrb[12].mxu1 %v4032_v52  ;;  %v10166_v17 = vpop.f32.mrb[228].mxu1 }
 0x2f8   :  { %6838 = vmatprep.mubr.msk.f32.mxu0 %vm7832_vm1, %v7831_v0  ;;  %7080 = vmatprep.mubr.msk.f32.mxu1 %vm7832_vm1, %v7831_v0 }
 0x2f9   :  { %v4033_v56 = vmax.f32 %v3908_v9, 0.0  ;;  %v3778_v7 = vmul.f32 %v7460_v48, %v10008_v22  ;;  %v2506_v9 = vld [vmem:[%s11754_s2 + $0x210] sm:$0xff]  ;;  %v6233_v48 = vpop.f32.mrb[229].mxu1 }
 0x2fa   :  { %v3072_v40 = vpop.f32.mrb[24].mxu0 }
 0x2fb   :  { %v3909_v33 = vadd.f32 %v10011_v51, %v3778_v7  ;;  %v7461_v52 = vadd.f32 %v3072_v40, %v8894_v11  ;;  %v6681_v2 = vpop.f32.mrb[25].mxu0  ;;  %6839 = vmatmul.mubr.msk.f32.gmra.mrb[130].mxu0 %vm2566_vm3, %v2505_v31  ;;  %7081 = vmatmul.mubr.f32.gmra.mrb[14].mxu1 %v4033_v56  ;;  %v10179_v40 = vpop.f32.mrb[230].mxu1 }
 0x2fc   :  { %6841 = vmatprep.mubr.msk.f32.mxu0 %vm7832_vm1, %v7831_v0  ;;  %7083 = vmatprep.mubr.msk.f32.mxu1 %vm7832_vm1, %v7831_v0 }
 0x2fd   :  { %v4034_v60 = vmax.f32 %v3909_v33, 0.0  ;;  %v3779_v11 = vmul.f32 %v7461_v52, %v10008_v22  ;;  %v2507_v33 = vld [vmem:[%s11754_s2 + $0x218] sm:$0xff]  ;;  %v6236_v52 = vpop.f32.mrb[231].mxu1 }
 0x2fe   :  { %v3077_v44 = vpop.f32.mrb[26].mxu0 }
 0x2ff   :  { %v3910_v31 = vadd.f32 %v10011_v51, %v3779_v11  ;;  %v7462_v56 = vadd.f32 %v3077_v44, %v8908_v15  ;;  %v6684_v7 = vpop.f32.mrb[27].mxu0  ;;  %6842 = vmatmul.mubr.msk.f32.gmra.mrb[132].mxu0 %vm2566_vm3, %v2506_v9  ;;  %7084 = vmatmul.mubr.f32.gmra.mrb[16].mxu1 %v4034_v60  ;;  %v10192_v44 = vpop.f32.mrb[232].mxu1 }
 0x300   :  { %6844 = vmatprep.mubr.msk.f32.mxu0 %vm7832_vm1, %v7831_v0  ;;  %7086 = vmatprep.mubr.msk.f32.mxu1 %vm7832_vm1, %v7831_v0 }
 0x301   :  { %v4035_v2 = vmax.f32 %v3910_v31, 0.0  ;;  %v3780_v15 = vmul.f32 %v7462_v56, %v10008_v22  ;;  %v2508_v31 = vld [vmem:[%s11754_s2 + $0x220] sm:$0xff]  ;;  %v6239_v56 = vpop.f32.mrb[233].mxu1 }
 0x302   :  { %v3082_v48 = vpop.f32.mrb[28].mxu0 }
 0x303   :  { %v3911_v9 = vadd.f32 %v10011_v51, %v3780_v15  ;;  %v7463_v60 = vadd.f32 %v3082_v48, %v8922_v19  ;;  %v6687_v11 = vpop.f32.mrb[29].mxu0  ;;  %6845 = vmatmul.mubr.msk.f32.gmra.mrb[134].mxu0 %vm2566_vm3, %v2507_v33  ;;  %7087 = vmatmul.mubr.f32.gmra.mrb[18].mxu1 %v4035_v2  ;;  %v10205_v48 = vpop.f32.mrb[234].mxu1 }
 0x304   :  { %6847 = vmatprep.mubr.msk.f32.mxu0 %vm7832_vm1, %v7831_v0  ;;  %7089 = vmatprep.mubr.msk.f32.mxu1 %vm7832_vm1, %v7831_v0 }
 0x305   :  { %v4036_v7 = vmax.f32 %v3911_v9, 0.0  ;;  %v3781_v19 = vmul.f32 %v7463_v60, %v10008_v22  ;;  %v2509_v9 = vld [vmem:[%s11754_s2 + $0x228] sm:$0xff]  ;;  %v6242_v60 = vpop.f32.mrb[235].mxu1 }
 0x306   :  { %v3087_v52 = vpop.f32.mrb[30].mxu0 }
 0x307   :  { %v3912_v33 = vadd.f32 %v10011_v51, %v3781_v19  ;;  %v7464_v2 = vadd.f32 %v3087_v52, %v8936_v24  ;;  %v6690_v15 = vpop.f32.mrb[31].mxu0  ;;  %6848 = vmatmul.mubr.msk.f32.gmra.mrb[136].mxu0 %vm2566_vm3, %v2508_v31  ;;  %7090 = vmatmul.mubr.f32.gmra.mrb[20].mxu1 %v4036_v7  ;;  %v10218_v52 = vpop.f32.mrb[236].mxu1 }
 0x308   :  { %6850 = vmatprep.mubr.msk.f32.mxu0 %vm7832_vm1, %v7831_v0  ;;  %7092 = vmatprep.mubr.msk.f32.mxu1 %vm7832_vm1, %v7831_v0 }
 0x309   :  { %v4037_v11 = vmax.f32 %v3912_v33, 0.0  ;;  %v3782_v24 = vmul.f32 %v7464_v2, %v10008_v22  ;;  %v2510_v33 = vld [vmem:[%s11754_s2 + $0x230] sm:$0xff]  ;;  %v6245_v2 = vpop.f32.mrb[237].mxu1 }
 0x30a   :  { %v3092_v56 = vpop.f32.mrb[32].mxu0 }
 0x30b   :  { %v3913_v31 = vadd.f32 %v10011_v51, %v3782_v24  ;;  %v7465_v7 = vadd.f32 %v3092_v56, %v8950_v29  ;;  %v6693_v19 = vpop.f32.mrb[33].mxu0  ;;  %6851 = vmatmul.mubr.msk.f32.gmra.mrb[138].mxu0 %vm2566_vm3, %v2509_v9  ;;  %7093 = vmatmul.mubr.f32.gmra.mrb[22].mxu1 %v4037_v11  ;;  %v10231_v56 = vpop.f32.mrb[238].mxu1 }
 0x30c   :  { %6853 = vmatprep.mubr.msk.f32.mxu0 %vm7832_vm1, %v7831_v0  ;;  %7095 = vmatprep.mubr.msk.f32.mxu1 %vm7832_vm1, %v7831_v0 }
 0x30d   :  { %v4038_v15 = vmax.f32 %v3913_v31, 0.0  ;;  %v3783_v29 = vmul.f32 %v7465_v7, %v10008_v22  ;;  %v2511_v31 = vld [vmem:[%s11754_s2 + $0x238] sm:$0xff]  ;;  %v6248_v7 = vpop.f32.mrb[239].mxu1 }
 0x30e   :  { %v3097_v60 = vpop.f32.mrb[34].mxu0 }
 0x30f   :  { %v3914_v9 = vadd.f32 %v10011_v51, %v3783_v29  ;;  %v7466_v11 = vadd.f32 %v3097_v60, %v8969_v37  ;;  %v6696_v24 = vpop.f32.mrb[35].mxu0  ;;  %6854 = vmatmul.mubr.msk.f32.gmra.mrb[140].mxu0 %vm2566_vm3, %v2510_v33  ;;  %7096 = vmatmul.mubr.f32.gmra.mrb[24].mxu1 %v4038_v15  ;;  %v10244_v60 = vpop.f32.mrb[240].mxu1 }
 0x310   :  { %6856 = vmatprep.mubr.msk.f32.mxu0 %vm7832_vm1, %v7831_v0  ;;  %7098 = vmatprep.mubr.msk.f32.mxu1 %vm7832_vm1, %v7831_v0 }
 0x311   :  { %v4039_v19 = vmax.f32 %v3914_v9, 0.0  ;;  %v3784_v37 = vmul.f32 %v7466_v11, %v10008_v22  ;;  %v2512_v9 = vld [vmem:[%s11754_s2 + $0x240] sm:$0xff]  ;;  %v6251_v11 = vpop.f32.mrb[241].mxu1 }
 0x312   :  { %v3102_v2 = vpop.f32.mrb[36].mxu0 }
 0x313   :  { %v3915_v33 = vadd.f32 %v10011_v51, %v3784_v37  ;;  %v7467_v15 = vadd.f32 %v3102_v2, %v8983_v42  ;;  %v6699_v29 = vpop.f32.mrb[37].mxu0  ;;  %6857 = vmatmul.mubr.msk.f32.gmra.mrb[142].mxu0 %vm2566_vm3, %v2511_v31  ;;  %7099 = vmatmul.mubr.f32.gmra.mrb[26].mxu1 %v4039_v19  ;;  %v10257_v2 = vpop.f32.mrb[242].mxu1 }
 0x314   :  { %6859 = vmatprep.mubr.msk.f32.mxu0 %vm7832_vm1, %v7831_v0  ;;  %7101 = vmatprep.mubr.msk.f32.mxu1 %vm7832_vm1, %v7831_v0 }
 0x315   :  { %v4040_v24 = vmax.f32 %v3915_v33, 0.0  ;;  %v3785_v42 = vmul.f32 %v7467_v15, %v10008_v22  ;;  %v2513_v33 = vld [vmem:[%s11754_s2 + $0x248] sm:$0xff]  ;;  %v6254_v15 = vpop.f32.mrb[243].mxu1 }
 0x316   :  { %v3107_v7 = vpop.f32.mrb[38].mxu0 }
 0x317   :  { %v3916_v31 = vadd.f32 %v10011_v51, %v3785_v42  ;;  %v7468_v19 = vadd.f32 %v3107_v7, %v8997_v47  ;;  %v6702_v37 = vpop.f32.mrb[39].mxu0  ;;  %6860 = vmatmul.mubr.msk.f32.gmra.mrb[144].mxu0 %vm2566_vm3, %v2512_v9  ;;  %7102 = vmatmul.mubr.f32.gmra.mrb[28].mxu1 %v4040_v24  ;;  %v10270_v7 = vpop.f32.mrb[244].mxu1 }
 0x318   :  { %6862 = vmatprep.mubr.msk.f32.mxu0 %vm7832_vm1, %v7831_v0  ;;  %7104 = vmatprep.mubr.msk.f32.mxu1 %vm7832_vm1, %v7831_v0 }
 0x319   :  { %v4041_v29 = vmax.f32 %v3916_v31, 0.0  ;;  %v3786_v47 = vmul.f32 %v7468_v19, %v10008_v22  ;;  %v2514_v31 = vld [vmem:[%s11754_s2 + $0x250] sm:$0xff]  ;;  %v6257_v19 = vpop.f32.mrb[245].mxu1 }
 0x31a   :  { %v3112_v11 = vpop.f32.mrb[40].mxu0 }
 0x31b   :  { %v3917_v9 = vadd.f32 %v10011_v51, %v3786_v47  ;;  %v7469_v24 = vadd.f32 %v3112_v11, %v9011_v53  ;;  %v6705_v42 = vpop.f32.mrb[41].mxu0  ;;  %6863 = vmatmul.mubr.msk.f32.gmra.mrb[146].mxu0 %vm2566_vm3, %v2513_v33  ;;  %7105 = vmatmul.mubr.f32.gmra.mrb[30].mxu1 %v4041_v29  ;;  %v10283_v11 = vpop.f32.mrb[246].mxu1 }
 0x31c   :  { %6865 = vmatprep.mubr.msk.f32.mxu0 %vm7832_vm1, %v7831_v0  ;;  %7107 = vmatprep.mubr.msk.f32.mxu1 %vm7832_vm1, %v7831_v0 }
 0x31d   :  { %v4042_v37 = vmax.f32 %v3917_v9, 0.0  ;;  %v3787_v53 = vmul.f32 %v7469_v24, %v10008_v22  ;;  %v2515_v9 = vld [vmem:[%s11754_s2 + $0x258] sm:$0xff]  ;;  %v6260_v24 = vpop.f32.mrb[247].mxu1 }
 0x31e   :  { %v3117_v15 = vpop.f32.mrb[42].mxu0 }
 0x31f   :  { %v3918_v33 = vadd.f32 %v10011_v51, %v3787_v53  ;;  %v7470_v29 = vadd.f32 %v3117_v15, %v9025_v58  ;;  %v6708_v47 = vpop.f32.mrb[43].mxu0  ;;  %6866 = vmatmul.mubr.msk.f32.gmra.mrb[148].mxu0 %vm2566_vm3, %v2514_v31  ;;  %7108 = vmatmul.mubr.f32.gmra.mrb[32].mxu1 %v4042_v37  ;;  %v10296_v15 = vpop.f32.mrb[248].mxu1 }
 0x320   :  { %6868 = vmatprep.mubr.msk.f32.mxu0 %vm7832_vm1, %v7831_v0  ;;  %7110 = vmatprep.mubr.msk.f32.mxu1 %vm7832_vm1, %v7831_v0 }
 0x321   :  { %v4043_v42 = vmax.f32 %v3918_v33, 0.0  ;;  %v3788_v58 = vmul.f32 %v7470_v29, %v10008_v22  ;;  %v2516_v33 = vld [vmem:[%s11754_s2 + $0x260] sm:$0xff]  ;;  %v6263_v29 = vpop.f32.mrb[249].mxu1 }
 0x322   :  { %v3122_v19 = vpop.f32.mrb[44].mxu0 }
 0x323   :  { %v3919_v31 = vadd.f32 %v10011_v51, %v3788_v58  ;;  %v7471_v37 = vadd.f32 %v3122_v19, %v9039_v63  ;;  %v6711_v53 = vpop.f32.mrb[45].mxu0  ;;  %6869 = vmatmul.mubr.msk.f32.gmra.mrb[150].mxu0 %vm2566_vm3, %v2515_v9  ;;  %7111 = vmatmul.mubr.f32.gmra.mrb[34].mxu1 %v4043_v42  ;;  %v2517_v19 = vld [vmem:[%s11754_s2 + $0x268] sm:$0xff] }
 0x324   :  { %6871 = vmatprep.mubr.msk.f32.mxu0 %vm7832_vm1, %v7831_v0  ;;  %7113 = vmatprep.mubr.msk.f32.mxu1 %vm7832_vm1, %v7831_v0 }
 0x325   :  { %v4044_v47 = vmax.f32 %v3919_v31, 0.0  ;;  %v3789_v63 = vmul.f32 %v7471_v37, %v10008_v22 }
 0x326   :  { %v3127_v24 = vpop.f32.mrb[46].mxu0 }
 0x327   :  { %v3920_v9 = vadd.f32 %v10011_v51, %v3789_v63  ;;  %v7472_v42 = vadd.f32 %v3127_v24, %v9053_v5  ;;  %v6714_v58 = vpop.f32.mrb[47].mxu0  ;;  %6872 = vmatmul.mubr.msk.f32.gmra.mrb[152].mxu0 %vm2566_vm3, %v2516_v33  ;;  %7114 = vmatmul.mubr.f32.gmra.mrb[36].mxu1 %v4044_v47  ;;  %v2518_v47 = vld [vmem:[%s11754_s2 + $0x270] sm:$0xff] }
 0x328   :  { %6874 = vmatprep.mubr.msk.f32.mxu0 %vm7832_vm1, %v7831_v0  ;;  %7116 = vmatprep.mubr.msk.f32.mxu1 %vm7832_vm1, %v7831_v0 }
 0x329   :  { %v4045_v31 = vmax.f32 %v3920_v9, 0.0  ;;  %v3790_v37 = vmul.f32 %v7472_v42, %v10008_v22 }
 0x32a   :  { %v3132_v53 = vpop.f32.mrb[48].mxu0 }
 0x32b   :  { %v3921_v5 = vadd.f32 %v10011_v51, %v3790_v37  ;;  %v7473_v29 = vadd.f32 %v3132_v53, %v9067_v10  ;;  %v6717_v33 = vpop.f32.mrb[49].mxu0  ;;  %6875 = vmatmul.mubr.msk.f32.gmra.mrb[154].mxu0 %vm2566_vm3, %v2517_v19  ;;  %7117 = vmatmul.mubr.f32.gmra.mrb[38].mxu1 %v4045_v31  ;;  %v2519_v19 = vld [vmem:[%s11754_s2 + $0x278] sm:$0xff] }
 0x32c   :  { %6877 = vmatprep.mubr.msk.f32.mxu0 %vm7832_vm1, %v7831_v0  ;;  %7119 = vmatprep.mubr.msk.f32.mxu1 %vm7832_vm1, %v7831_v0  ;;  %v2520_v33 = vld [vmem:[%s11754_s2 + $0x280] sm:$0xff] }
 0x32d   :  { %v4046_v63 = vmax.f32 %v3921_v5, 0.0  ;;  %v3791_v24 = vmul.f32 %v7473_v29, %v10008_v22 }
 0x32e   :  { %v3137_v9 = vpop.f32.mrb[50].mxu0 }
 0x32f   :  { %v3922_v10 = vadd.f32 %v10011_v51, %v3791_v24  ;;  %v7474_v42 = vadd.f32 %v3137_v9, %v9081_v16  ;;  %v6720_v58 = vpop.f32.mrb[51].mxu0  ;;  %6878 = vmatmul.mubr.msk.f32.gmra.mrb[156].mxu0 %vm2566_vm3, %v2518_v47  ;;  %7120 = vmatmul.mubr.f32.gmra.mrb[40].mxu1 %v4046_v63 }
 0x330   :  { %6880 = vmatprep.mubr.msk.f32.mxu0 %vm7832_vm1, %v7831_v0  ;;  %7122 = vmatprep.mubr.msk.f32.mxu1 %vm7832_vm1, %v7831_v0 }
 0x331   :  { %v4047_v31 = vmax.f32 %v3922_v10, 0.0  ;;  %v3792_v37 = vmul.f32 %v7474_v42, %v10008_v22  ;;  %v2521_v42 = vld [vmem:[%s11754_s2 + $0x288] sm:$0xff] }
 0x332   :  { %v3142_v53 = vpop.f32.mrb[52].mxu0 }
 0x333   :  { %v3923_v16 = vadd.f32 %v10011_v51, %v3792_v37  ;;  %v7475_v5 = vadd.f32 %v3142_v53, %v9101_v26  ;;  %v6723_v29 = vpop.f32.mrb[53].mxu0  ;;  %6881 = vmatmul.mubr.msk.f32.gmra.mrb[158].mxu0 %vm2566_vm3, %v2519_v19  ;;  %7123 = vmatmul.mubr.f32.gmra.mrb[42].mxu1 %v4047_v31 }
 0x334   :  { %6883 = vmatprep.mubr.msk.f32.mxu0 %vm7832_vm1, %v7831_v0  ;;  %7125 = vmatprep.mubr.msk.f32.mxu1 %vm7832_vm1, %v7831_v0 }
 0x335   :  { %v4048_v47 = vmax.f32 %v3923_v16, 0.0  ;;  %v3793_v63 = vmul.f32 %v7475_v5, %v10008_v22  ;;  %v2522_v16 = vld [vmem:[%s11754_s2 + $0x290] sm:$0xff] }
 0x336   :  { %v3147_v24 = vpop.f32.mrb[54].mxu0 }
 0x337   :  { %v3924_v26 = vadd.f32 %v10011_v51, %v3793_v63  ;;  %v7476_v9 = vadd.f32 %v3147_v24, %v9116_v34  ;;  %v6726_v10 = vpop.f32.mrb[55].mxu0  ;;  %6884 = vmatmul.mubr.msk.f32.gmra.mrb[160].mxu0 %vm2566_vm3, %v2520_v33  ;;  %7126 = vmatmul.mubr.f32.gmra.mrb[44].mxu1 %v4048_v47  ;;  %v2523_v24 = vld [vmem:[%s11754_s2 + $0x298] sm:$0xff] }
 0x338   :  { %6886 = vmatprep.mubr.msk.f32.mxu0 %vm7832_vm1, %v7831_v0  ;;  %7128 = vmatprep.mubr.msk.f32.mxu1 %vm7832_vm1, %v7831_v0 }
 0x339   :  { %v4049_v58 = vmax.f32 %v3924_v26, 0.0  ;;  %v3794_v19 = vmul.f32 %v7476_v9, %v10008_v22 }
 0x33a   :  { %v3152_v31 = vpop.f32.mrb[56].mxu0 }
 0x33b   :  { %v3925_v34 = vadd.f32 %v10011_v51, %v3794_v19  ;;  %v7477_v37 = vadd.f32 %v3152_v31, %v9130_v41  ;;  %v6729_v53 = vpop.f32.mrb[57].mxu0  ;;  %6887 = vmatmul.mubr.msk.f32.gmra.mrb[162].mxu0 %vm2566_vm3, %v2521_v42  ;;  %7129 = vmatmul.mubr.f32.gmra.mrb[46].mxu1 %v4049_v58  ;;  %v2524_v19 = vld [vmem:[%s11754_s2 + $0x2a0] sm:$0xff] }
 0x33c   :  { %6889 = vmatprep.mubr.msk.f32.mxu0 %vm7832_vm1, %v7831_v0  ;;  %7131 = vmatprep.mubr.msk.f32.mxu1 %vm7832_vm1, %v7831_v0 }
 0x33d   :  { %v4050_v5 = vmax.f32 %v3925_v34, 0.0  ;;  %v3795_v29 = vmul.f32 %v7477_v37, %v10008_v22 }
 0x33e   :  { %v3157_v33 = vpop.f32.mrb[58].mxu0 }
 0x33f   :  { %v3926_v41 = vadd.f32 %v10011_v51, %v3795_v29  ;;  %v7478_v47 = vadd.f32 %v3157_v33, %v9144_v49  ;;  %v6732_v63 = vpop.f32.mrb[59].mxu0  ;;  %6890 = vmatmul.mubr.msk.f32.gmra.mrb[164].mxu0 %vm2566_vm3, %v2522_v16  ;;  %7132 = vmatmul.mubr.f32.gmra.mrb[48].mxu1 %v4050_v5  ;;  %v2525_v5 = vld [vmem:[%s11754_s2 + $0x2a8] sm:$0xff] }
 0x340   :  { %6892 = vmatprep.mubr.msk.f32.mxu0 %vm7832_vm1, %v7831_v0  ;;  %7134 = vmatprep.mubr.msk.f32.mxu1 %vm7832_vm1, %v7831_v0 }
 0x341   :  { %v4051_v26 = vmax.f32 %v3926_v41, 0.0  ;;  %v3796_v9 = vmul.f32 %v7478_v47, %v10008_v22 }
 0x342   :  { %v3162_v10 = vpop.f32.mrb[60].mxu0 }
 0x343   :  { %v3927_v49 = vadd.f32 %v10011_v51, %v3796_v9  ;;  %v7479_v42 = vadd.f32 %v3162_v10, %v9158_v55  ;;  %v6735_v58 = vpop.f32.mrb[61].mxu0  ;;  %6893 = vmatmul.mubr.msk.f32.gmra.mrb[166].mxu0 %vm2566_vm3, %v2523_v24  ;;  %7135 = vmatmul.mubr.f32.gmra.mrb[50].mxu1 %v4051_v26  ;;  %v2526_v24 = vld [vmem:[%s11754_s2 + $0x2b0] sm:$0xff] }
 0x344   :  { %6895 = vmatprep.mubr.msk.f32.mxu0 %vm7832_vm1, %v7831_v0  ;;  %7137 = vmatprep.mubr.msk.f32.mxu1 %vm7832_vm1, %v7831_v0  ;;  %v2527_v58 = vld [vmem:[%s11754_s2 + $0x2b8] sm:$0xff] }
 0x345   :  { %v4052_v31 = vmax.f32 %v3927_v49, 0.0  ;;  %v3797_v34 = vmul.f32 %v7479_v42, %v10008_v22 }
 0x346   :  { %v3167_v37 = vpop.f32.mrb[62].mxu0 }
 0x347   :  { %v3928_v55 = vadd.f32 %v10011_v51, %v3797_v34  ;;  %v7480_v53 = vadd.f32 %v3167_v37, %v9172_v62  ;;  %v6738_v16 = vpop.f32.mrb[63].mxu0  ;;  %6896 = vmatmul.mubr.msk.f32.gmra.mrb[168].mxu0 %vm2566_vm3, %v2524_v19  ;;  %7138 = vmatmul.mubr.f32.gmra.mrb[52].mxu1 %v4052_v31 }
 0x348   :  { %6898 = vmatprep.mubr.msk.f32.mxu0 %vm7832_vm1, %v7831_v0  ;;  %7140 = vmatprep.mubr.msk.f32.mxu1 %vm7832_vm1, %v7831_v0 }
 0x349   :  { %v4053_v29 = vmax.f32 %v3928_v55, 0.0  ;;  %v3798_v33 = vmul.f32 %v7480_v53, %v10008_v22  ;;  %v2528_v53 = vld [vmem:[%s11754_s2 + $0x2c0] sm:$0xff] }
 0x34a   :  { %v3172_v41 = vpop.f32.mrb[64].mxu0 }
 0x34b   :  { %v3929_v62 = vadd.f32 %v10011_v51, %v3798_v33  ;;  %v7481_v47 = vadd.f32 %v3172_v41, %v9186_v6  ;;  %v6741_v63 = vpop.f32.mrb[65].mxu0  ;;  %6899 = vmatmul.mubr.msk.f32.gmra.mrb[170].mxu0 %vm2566_vm3, %v2525_v5  ;;  %7141 = vmatmul.mubr.f32.gmra.mrb[54].mxu1 %v4053_v29 }
 0x34c   :  { %6901 = vmatprep.mubr.msk.f32.mxu0 %vm7832_vm1, %v7831_v0  ;;  %7143 = vmatprep.mubr.msk.f32.mxu1 %vm7832_vm1, %v7831_v0 }
 0x34d   :  { %v4054_v26 = vmax.f32 %v3929_v62, 0.0  ;;  %v3799_v9 = vmul.f32 %v7481_v47, %v10008_v22  ;;  %v2529_v62 = vld [vmem:[%s11754_s2 + $0x2c8] sm:$0xff] }
 0x34e   :  { %v3177_v10 = vpop.f32.mrb[66].mxu0 }
 0x34f   :  { %v3930_v6 = vadd.f32 %v10011_v51, %v3799_v9  ;;  %v7482_v49 = vadd.f32 %v3177_v10, %v9200_v13  ;;  %v6744_v42 = vpop.f32.mrb[67].mxu0  ;;  %6902 = vmatmul.mubr.msk.f32.gmra.mrb[172].mxu0 %vm2566_vm3, %v2526_v24  ;;  %7144 = vmatmul.mubr.f32.gmra.mrb[56].mxu1 %v4054_v26  ;;  %v2530_v10 = vld [vmem:[%s11754_s2 + $0x2d0] sm:$0xff] }
 0x350   :  { %6904 = vmatprep.mubr.msk.f32.mxu0 %vm7832_vm1, %v7831_v0  ;;  %7146 = vmatprep.mubr.msk.f32.mxu1 %vm7832_vm1, %v7831_v0 }
 0x351   :  { %v4055_v19 = vmax.f32 %v3930_v6, 0.0  ;;  %v3800_v31 = vmul.f32 %v7482_v49, %v10008_v22 }
 0x352   :  { %v3182_v34 = vpop.f32.mrb[68].mxu0 }
 0x353   :  { %v3931_v13 = vadd.f32 %v10011_v51, %v3800_v31  ;;  %v7483_v37 = vadd.f32 %v3182_v34, %v9214_v20  ;;  %v6747_v55 = vpop.f32.mrb[69].mxu0  ;;  %6905 = vmatmul.mubr.msk.f32.gmra.mrb[174].mxu0 %vm2566_vm3, %v2527_v58  ;;  %7147 = vmatmul.mubr.f32.gmra.mrb[58].mxu1 %v4055_v19  ;;  %v2531_v31 = vld [vmem:[%s11754_s2 + $0x2d8] sm:$0xff] }
 0x354   :  { %6907 = vmatprep.mubr.msk.f32.mxu0 %vm7832_vm1, %v7831_v0  ;;  %7149 = vmatprep.mubr.msk.f32.mxu1 %vm7832_vm1, %v7831_v0 }
 0x355   :  { %v4056_v16 = vmax.f32 %v3931_v13, 0.0  ;;  %v3801_v5 = vmul.f32 %v7483_v37, %v10008_v22 }
 0x356   :  { %v3187_v29 = vpop.f32.mrb[70].mxu0 }
 0x357   :  { %v3932_v20 = vadd.f32 %v10011_v51, %v3801_v5  ;;  %v7484_v33 = vadd.f32 %v3187_v29, %v9228_v28  ;;  %v6750_v41 = vpop.f32.mrb[71].mxu0  ;;  %6908 = vmatmul.mubr.msk.f32.gmra.mrb[176].mxu0 %vm2566_vm3, %v2528_v53  ;;  %7150 = vmatmul.mubr.f32.gmra.mrb[60].mxu1 %v4056_v16  ;;  %v2532_v16 = vld [vmem:[%s11754_s2 + $0x2e0] sm:$0xff] }
 0x358   :  { %6910 = vmatprep.mubr.msk.f32.mxu0 %vm7832_vm1, %v7831_v0  ;;  %7152 = vmatprep.mubr.msk.f32.mxu1 %vm7832_vm1, %v7831_v0 }
 0x359   :  { %v4057_v47 = vmax.f32 %v3932_v20, 0.0  ;;  %v3802_v63 = vmul.f32 %v7484_v33, %v10008_v22 }
 0x35a   :  { %v3192_v24 = vpop.f32.mrb[72].mxu0 }
 0x35b   :  { %v3933_v28 = vadd.f32 %v10011_v51, %v3802_v63  ;;  %v7485_v26 = vadd.f32 %v3192_v24, %v9242_v38  ;;  %v6753_v9 = vpop.f32.mrb[73].mxu0  ;;  %6911 = vmatmul.mubr.msk.f32.gmra.mrb[178].mxu0 %vm2566_vm3, %v2529_v62  ;;  %7153 = vmatmul.mubr.f32.gmra.mrb[62].mxu1 %v4057_v47  ;;  %v2533_v62 = vld [vmem:[%s11754_s2 + $0x2e8] sm:$0xff] }
 0x35c   :  { %6913 = vmatprep.mubr.msk.f32.mxu0 %vm7832_vm1, %v7831_v0  ;;  %7155 = vmatprep.mubr.msk.f32.mxu1 %vm7832_vm1, %v7831_v0  ;;  %v2534_v9 = vld [vmem:[%s11754_s2 + $0x2f0] sm:$0xff] }
 0x35d   :  { %v4058_v6 = vmax.f32 %v3933_v28, 0.0  ;;  %v3803_v49 = vmul.f32 %v7485_v26, %v10008_v22 }
 0x35e   :  { %v3197_v42 = vpop.f32.mrb[74].mxu0 }
 0x35f   :  { %v3934_v38 = vadd.f32 %v10011_v51, %v3803_v49  ;;  %v7486_v58 = vadd.f32 %v3197_v42, %v9256_v46  ;;  %v6756_v19 = vpop.f32.mrb[75].mxu0  ;;  %6914 = vmatmul.mubr.msk.f32.gmra.mrb[180].mxu0 %vm2566_vm3, %v2530_v10  ;;  %7156 = vmatmul.mubr.f32.gmra.mrb[64].mxu1 %v4058_v6 }
 0x360   :  { %6916 = vmatprep.mubr.msk.f32.mxu0 %vm7832_vm1, %v7831_v0  ;;  %7158 = vmatprep.mubr.msk.f32.mxu1 %vm7832_vm1, %v7831_v0 }
 0x361   :  { %v4059_v34 = vmax.f32 %v3934_v38, 0.0  ;;  %v3804_v13 = vmul.f32 %v7486_v58, %v10008_v22  ;;  %v2535_v58 = vld [vmem:[%s11754_s2 + $0x2f8] sm:$0xff] }
 0x362   :  { %v3202_v37 = vpop.f32.mrb[76].mxu0 }
 0x363   :  { %v3935_v46 = vadd.f32 %v10011_v51, %v3804_v13  ;;  %v7487_v55 = vadd.f32 %v3202_v37, %v9270_v57  ;;  %v6759_v53 = vpop.f32.mrb[77].mxu0  ;;  %6917 = vmatmul.mubr.msk.f32.gmra.mrb[182].mxu0 %vm2566_vm3, %v2531_v31  ;;  %7159 = vmatmul.mubr.f32.gmra.mrb[66].mxu1 %v4059_v34 }
 0x364   :  { %6919 = vmatprep.mubr.msk.f32.mxu0 %vm7832_vm1, %v7831_v0  ;;  %7161 = vmatprep.mubr.msk.f32.mxu1 %vm7832_vm1, %v7831_v0 }
 0x365   :  { %v4060_v5 = vmax.f32 %v3935_v46, 0.0  ;;  %v3805_v29 = vmul.f32 %v7487_v55, %v10008_v22  ;;  %v2536_v46 = vld [vmem:[%s11754_s2 + $0x300] sm:$0xff] }
 0x366   :  { %v3207_v20 = vpop.f32.mrb[78].mxu0 }
 0x367   :  { %v3936_v57 = vadd.f32 %v10011_v51, %v3805_v29  ;;  %v7488_v33 = vadd.f32 %v3207_v20, %v9284_v3  ;;  %v6762_v41 = vpop.f32.mrb[79].mxu0  ;;  %6920 = vmatmul.mubr.msk.f32.gmra.mrb[184].mxu0 %vm2566_vm3, %v2532_v16  ;;  %7162 = vmatmul.mubr.f32.gmra.mrb[68].mxu1 %v4060_v5  ;;  %v2537_v20 = vld [vmem:[%s11754_s2 + $0x308] sm:$0xff] }
 0x368   :  { %6922 = vmatprep.mubr.msk.f32.mxu0 %vm7832_vm1, %v7831_v0  ;;  %7164 = vmatprep.mubr.msk.f32.mxu1 %vm7832_vm1, %v7831_v0 }
 0x369   :  { %v4061_v47 = vmax.f32 %v3936_v57, 0.0  ;;  %v3806_v63 = vmul.f32 %v7488_v33, %v10008_v22 }
 0x36a   :  { %v3212_v24 = vpop.f32.mrb[80].mxu0 }
 0x36b   :  { %v3937_v3 = vadd.f32 %v10011_v51, %v3806_v63  ;;  %v7489_v28 = vadd.f32 %v3212_v24, %v9298_v12  ;;  %v6765_v26 = vpop.f32.mrb[81].mxu0  ;;  %6923 = vmatmul.mubr.msk.f32.gmra.mrb[186].mxu0 %vm2566_vm3, %v2533_v62  ;;  %7165 = vmatmul.mubr.f32.gmra.mrb[70].mxu1 %v4061_v47  ;;  %v2538_v63 = vld [vmem:[%s11754_s2 + $0x310] sm:$0xff] }
 0x36c   :  { %6925 = vmatprep.mubr.msk.f32.mxu0 %vm7832_vm1, %v7831_v0  ;;  %7167 = vmatprep.mubr.msk.f32.mxu1 %vm7832_vm1, %v7831_v0 }
 0x36d   :  { %v4062_v10 = vmax.f32 %v3937_v3, 0.0  ;;  %v3807_v6 = vmul.f32 %v7489_v28, %v10008_v22 }
 0x36e   :  { %v3217_v49 = vpop.f32.mrb[82].mxu0 }
 0x36f   :  { %v3938_v12 = vadd.f32 %v10011_v51, %v3807_v6  ;;  %v7490_v42 = vadd.f32 %v3217_v49, %v9312_v21  ;;  %v6768_v38 = vpop.f32.mrb[83].mxu0  ;;  %6926 = vmatmul.mubr.msk.f32.gmra.mrb[188].mxu0 %vm2566_vm3, %v2534_v9  ;;  %7168 = vmatmul.mubr.f32.gmra.mrb[72].mxu1 %v4062_v10  ;;  %v2539_v10 = vld [vmem:[%s11754_s2 + $0x318] sm:$0xff] }
 0x370   :  { %6928 = vmatprep.mubr.msk.f32.mxu0 %vm7832_vm1, %v7831_v0  ;;  %7170 = vmatprep.mubr.msk.f32.mxu1 %vm7832_vm1, %v7831_v0 }
 0x371   :  { %v4063_v19 = vmax.f32 %v3938_v12, 0.0  ;;  %v3808_v31 = vmul.f32 %v7490_v42, %v10008_v22 }
 0x372   :  { %v3222_v34 = vpop.f32.mrb[84].mxu0 }
 0x373   :  { %v3939_v21 = vadd.f32 %v10011_v51, %v3808_v31  ;;  %v7491_v13 = vadd.f32 %v3222_v34, %v9332_v43  ;;  %v6771_v37 = vpop.f32.mrb[85].mxu0  ;;  %6929 = vmatmul.mubr.msk.f32.gmra.mrb[190].mxu0 %vm2566_vm3, %v2535_v58  ;;  %7171 = vmatmul.mubr.f32.gmra.mrb[74].mxu1 %v4063_v19  ;;  %v2540_v58 = vld [vmem:[%s11754_s2 + $0x320] sm:$0xff] }
 0x374   :  { %6931 = vmatprep.mubr.msk.f32.mxu0 %vm7832_vm1, %v7831_v0  ;;  %7173 = vmatprep.mubr.msk.f32.mxu1 %vm7832_vm1, %v7831_v0  ;;  %v2541_v37 = vld [vmem:[%s11754_s2 + $0x328] sm:$0xff] }
 0x375   :  { %v4064_v55 = vmax.f32 %v3939_v21, 0.0  ;;  %v3809_v53 = vmul.f32 %v7491_v13, %v10008_v22 }
 0x376   :  { %v3227_v16 = vpop.f32.mrb[86].mxu0 }
 0x377   :  { %v3940_v43 = vadd.f32 %v10011_v51, %v3809_v53  ;;  %v7492_v5 = vadd.f32 %v3227_v16, %v9347_v54  ;;  %v6774_v29 = vpop.f32.mrb[87].mxu0  ;;  %6932 = vmatmul.mubr.msk.f32.gmra.mrb[192].mxu0 %vm2566_vm3, %v2536_v46  ;;  %7174 = vmatmul.mubr.f32.gmra.mrb[76].mxu1 %v4064_v55 }
 0x378   :  { %6934 = vmatprep.mubr.msk.f32.mxu0 %vm7832_vm1, %v7831_v0  ;;  %7176 = vmatprep.mubr.msk.f32.mxu1 %vm7832_vm1, %v7831_v0 }
 0x379   :  { %v4065_v57 = vmax.f32 %v3940_v43, 0.0  ;;  %v3810_v33 = vmul.f32 %v7492_v5, %v10008_v22  ;;  %v2542_v5 = vld [vmem:[%s11754_s2 + $0x330] sm:$0xff] }
 0x37a   :  { %v3232_v41 = vpop.f32.mrb[88].mxu0 }
 0x37b   :  { %v3941_v54 = vadd.f32 %v10011_v51, %v3810_v33  ;;  %v7493_v62 = vadd.f32 %v3232_v41, %v9361_v1  ;;  %v6777_v47 = vpop.f32.mrb[89].mxu0  ;;  %6935 = vmatmul.mubr.msk.f32.gmra.mrb[194].mxu0 %vm2566_vm3, %v2537_v20  ;;  %7177 = vmatmul.mubr.f32.gmra.mrb[78].mxu1 %v4065_v57  ;;  %v11814_v33 = vld [vmem:[#allocation2_spill] sm:$0xff] }
 0x37c   :  { %6937 = vmatprep.mubr.msk.f32.mxu0 %vm7832_vm1, %v7831_v0  ;;  %7179 = vmatprep.mubr.msk.f32.mxu1 %vm7832_vm1, %v7831_v0 }
 0x37d   :  { %v4066_v24 = vmax.f32 %v3941_v54, 0.0  ;;  %v3811_v3 = vmul.f32 %v7493_v62, %v10008_v22  ;;  %v2543_v62 = vld [vmem:[%s11754_s2 + $0x338] sm:$0xff] }
 0x37e   :  { %v3237_v28 = vpop.f32.mrb[90].mxu0 }
 0x37f   :  { %v3942_v1 = vadd.f32 %v10011_v51, %v3811_v3  ;;  %v7494_v26 = vadd.f32 %v3237_v28, %v9375_v14  ;;  %v6780_v9 = vpop.f32.mrb[91].mxu0  ;;  %6938 = vmatmul.mubr.msk.f32.gmra.mrb[196].mxu0 %vm2566_vm3, %v2538_v63  ;;  %7180 = vmatmul.mubr.f32.gmra.mrb[80].mxu1 %v4066_v24  ;;  %v11815_v28 = vld [vmem:[#allocation3_spill] sm:$0xff] }
 0x380   :  { %6940 = vmatprep.mubr.msk.f32.mxu0 %vm7832_vm1, %v7831_v0  ;;  %7182 = vmatprep.mubr.msk.f32.mxu1 %vm7832_vm1, %v7831_v0  ;;  %v2544_v9 = vld [vmem:[%s11754_s2 + $0x340] sm:$0xff] }
 0x381   :  { %v4067_v6 = vmax.f32 %v3942_v1, 0.0  ;;  %v3812_v49 = vmul.f32 %v7494_v26, %v10008_v22 }
 0x382   :  { %v3242_v12 = vpop.f32.mrb[92].mxu0 }
 0x383   :  { %v3943_v14 = vadd.f32 %v10011_v51, %v3812_v49  ;;  %v7495_v42 = vadd.f32 %v3242_v12, %v9389_v25  ;;  %v6783_v38 = vpop.f32.mrb[93].mxu0  ;;  %6941 = vmatmul.mubr.msk.f32.gmra.mrb[198].mxu0 %vm2566_vm3, %v2539_v10  ;;  %7183 = vmatmul.mubr.f32.gmra.mrb[82].mxu1 %v4067_v6 }
 0x384   :  { %6943 = vmatprep.mubr.msk.f32.mxu0 %vm7832_vm1, %v7831_v0  ;;  %7185 = vmatprep.mubr.msk.f32.mxu1 %vm7832_vm1, %v7831_v0 }
 0x385   :  { %v4068_v19 = vmax.f32 %v3943_v14, 0.0  ;;  %v3813_v31 = vmul.f32 %v7495_v42, %v10008_v22  ;;  %v11816_v14 = vld [vmem:[#allocation4_spill] sm:$0xff] }
 0x386   :  { %v3247_v34 = vpop.f32.mrb[94].mxu0 }
 0x387   :  { %v3944_v25 = vadd.f32 %v10011_v51, %v3813_v31  ;;  %v7496_v21 = vadd.f32 %v3247_v34, %v9403_v39  ;;  %v6786_v13 = vpop.f32.mrb[95].mxu0  ;;  %6944 = vmatmul.mubr.msk.f32.gmra.mrb[200].mxu0 %vm2566_vm3, %v2540_v58  ;;  %7186 = vmatmul.mubr.f32.gmra.mrb[84].mxu1 %v4068_v19  ;;  %v2545_v58 = vld [vmem:[%s11754_s2 + $0x348] sm:$0xff] }
 0x388   :  { %6946 = vmatprep.mubr.msk.f32.mxu0 %vm7832_vm1, %v7831_v0  ;;  %7188 = vmatprep.mubr.msk.f32.mxu1 %vm7832_vm1, %v7831_v0 }
 0x389   :  { %v4069_v46 = vmax.f32 %v3944_v25, 0.0  ;;  %v3814_v55 = vmul.f32 %v7496_v21, %v10008_v22  ;;  %v11817_v21 = vld [vmem:[#allocation5_spill] sm:$0xff] }
 0x38a   :  { %v3252_v53 = vpop.f32.mrb[96].mxu0 }
 0x38b   :  { %v3945_v39 = vadd.f32 %v10011_v51, %v3814_v55  ;;  %v7497_v16 = vadd.f32 %v3252_v53, %v9417_v30  ;;  %v6789_v43 = vpop.f32.mrb[97].mxu0  ;;  %6947 = vmatmul.mubr.msk.f32.gmra.mrb[202].mxu0 %vm2566_vm3, %v2541_v37  ;;  %7189 = vmatmul.mubr.f32.gmra.mrb[86].mxu1 %v4069_v46  ;;  %v2546_v46 = vld [vmem:[%s11754_s2 + $0x350] sm:$0xff] }
 0x38c   :  { %6949 = vmatprep.mubr.msk.f32.mxu0 %vm7832_vm1, %v7831_v0  ;;  %7191 = vmatprep.mubr.msk.f32.mxu1 %vm7832_vm1, %v7831_v0  ;;  %v11818_v43 = vld [vmem:[#allocation6_spill] sm:$0xff] }
 0x38d   :  { %v4070_v29 = vmax.f32 %v3945_v39, 0.0  ;;  %v3815_v20 = vmul.f32 %v7497_v16, %v10008_v22 }
 0x38e   :  { %v3257_v57 = vpop.f32.mrb[98].mxu0 }
 0x38f   :  { %v3946_v30 = vadd.f32 %v10011_v51, %v3815_v20  ;;  %v7498_v41 = vadd.f32 %v3257_v57, %v11814_v33  ;;  %v6792_v54 = vpop.f32.mrb[99].mxu0  ;;  %6950 = vmatmul.mubr.msk.f32.gmra.mrb[204].mxu0 %vm2566_vm3, %v2542_v5  ;;  %7192 = vmatmul.mubr.f32.gmra.mrb[88].mxu1 %v4070_v29  ;;  %v2547_v20 = vld [vmem:[%s11754_s2 + $0x358] sm:$0xff] }
 0x390   :  { %6952 = vmatprep.mubr.msk.f32.mxu0 %vm7832_vm1, %v7831_v0  ;;  %7194 = vmatprep.mubr.msk.f32.mxu1 %vm7832_vm1, %v7831_v0  ;;  %v11819_v54 = vld [vmem:[#allocation7_spill] sm:$0xff] }
 0x391   :  { %v4071_v47 = vmax.f32 %v3946_v30, 0.0  ;;  %v3816_v63 = vmul.f32 %v7498_v41, %v10008_v22 }
 0x392   :  { %v3262_v24 = vpop.f32.mrb[100].mxu0 }
 0x393   :  { %v3947_v3 = vadd.f32 %v10011_v51, %v3816_v63  ;;  %v7499_v1 = vadd.f32 %v3262_v24, %v11815_v28  ;;  %v6795_v26 = vpop.f32.mrb[101].mxu0  ;;  %6953 = vmatmul.mubr.msk.f32.gmra.mrb[206].mxu0 %vm2566_vm3, %v2543_v62  ;;  %7195 = vmatmul.mubr.f32.gmra.mrb[90].mxu1 %v4071_v47  ;;  %v10655_v63 = vld [vmem:[%s11759_s11] ss:$0 sm:$0xff] }
 0x394   :  { %6955 = vmatprep.mubr.msk.f32.mxu0 %vm7832_vm1, %v7831_v0  ;;  %7197 = vmatprep.mubr.msk.f32.mxu1 %vm7832_vm1, %v7831_v0  ;;  %v2548_v24 = vld [vmem:[%s11754_s2 + $0x360] sm:$0xff] }
 0x395   :  { %v4072_v10 = vmax.f32 %v3947_v3, 0.0  ;;  %v3817_v6 = vmul.f32 %v7499_v1, %v10008_v22 }
 0x396   :  { %v3267_v49 = vpop.f32.mrb[102].mxu0 }
 0x397   :  { %v3948_v12 = vadd.f32 %v10011_v51, %v3817_v6  ;;  %v7500_v42 = vadd.f32 %v3267_v49, %v11816_v14  ;;  %v6798_v38 = vpop.f32.mrb[103].mxu0  ;;  %6956 = vmatmul.mubr.msk.f32.gmra.mrb[208].mxu0 %vm2566_vm3, %v2544_v9  ;;  %7198 = vmatmul.mubr.f32.gmra.mrb[92].mxu1 %v4072_v10  ;;  %v11820_v10 = vld [vmem:[#allocation8_spill] sm:$0xff] }
 0x398   :  { %6958 = vmatprep.mubr.msk.f32.mxu0 %vm7832_vm1, %v7831_v0  ;;  %7200 = vmatprep.mubr.msk.f32.mxu1 %vm7832_vm1, %v7831_v0 }
 0x399   :  { %v4073_v19 = vmax.f32 %v3948_v12, 0.0  ;;  %v3818_v31 = vmul.f32 %v7500_v42, %v10008_v22  ;;  %v2549_v42 = vld [vmem:[%s11754_s2 + $0x368] sm:$0xff] }
 0x39a   :  { %v3272_v34 = vpop.f32.mrb[104].mxu0 }
 0x39b   :  { %v3949_v25 = vadd.f32 %v10011_v51, %v3818_v31  ;;  %v7501_v13 = vadd.f32 %v3272_v34, %v11817_v21  ;;  %v6801_v37 = vpop.f32.mrb[105].mxu0  ;;  %6959 = vmatmul.mubr.msk.f32.gmra.mrb[210].mxu0 %vm2566_vm3, %v2545_v58  ;;  %7201 = vmatmul.mubr.f32.gmra.mrb[94].mxu1 %v4073_v19 }
 0x39c   :  { %6961 = vmatprep.mubr.msk.f32.mxu0 %vm7832_vm1, %v7831_v0  ;;  %7203 = vmatprep.mubr.msk.f32.mxu1 %vm7832_vm1, %v7831_v0 }
 0x39d   :  { %v4074_v55 = vmax.f32 %v3949_v25, 0.0  ;;  %v3819_v53 = vmul.f32 %v7501_v13, %v10008_v22  ;;  %v11821_v25 = vld [vmem:[#allocation9_spill] sm:$0xff] }
 0x39e   :  { %v3277_v39 = vpop.f32.mrb[106].mxu0 }
 0x39f   :  { %v3950_v16 = vadd.f32 %v10011_v51, %v3819_v53  ;;  %v7502_v5 = vadd.f32 %v3277_v39, %v11818_v43  ;;  %v6804_v29 = vpop.f32.mrb[107].mxu0  ;;  %6962 = vmatmul.mubr.msk.f32.gmra.mrb[212].mxu0 %vm2566_vm3, %v2546_v46  ;;  %7204 = vmatmul.mubr.f32.gmra.mrb[96].mxu1 %v4074_v55  ;;  %v2550_v55 = vld [vmem:[%s11754_s2 + $0x370] sm:$0xff] }
 0x3a0   :  { %6964 = vmatprep.mubr.msk.f32.mxu0 %vm7832_vm1, %v7831_v0  ;;  %7206 = vmatprep.mubr.msk.f32.mxu1 %vm7832_vm1, %v7831_v0  ;;  %v11822_v29 = vld [vmem:[#allocation10_spill] sm:$0xff] }
 0x3a1   :  { %v4075_v57 = vmax.f32 %v3950_v16, 0.0  ;;  %v3820_v30 = vmul.f32 %v7502_v5, %v10008_v22 }
 0x3a2   :  { %v3282_v33 = vpop.f32.mrb[108].mxu0 }
 0x3a3   :  { %v3951_v41 = vadd.f32 %v10011_v51, %v3820_v30  ;;  %v7503_v62 = vadd.f32 %v3282_v33, %v11819_v54  ;;  %v6807_v47 = vpop.f32.mrb[109].mxu0  ;;  %6965 = vmatmul.mubr.msk.f32.gmra.mrb[214].mxu0 %vm2566_vm3, %v2547_v20  ;;  %7207 = vmatmul.mubr.f32.gmra.mrb[98].mxu1 %v4075_v57 }
 0x3a4   :  { %6967 = vmatprep.mubr.msk.f32.mxu0 %vm7832_vm1, %v7831_v0  ;;  %7209 = vmatprep.mubr.msk.f32.mxu1 %vm7832_vm1, %v7831_v0 }
 0x3a5   :  { %v4076_v3 = vmax.f32 %v3951_v41, 0.0  ;;  %v3821_v28 = vmul.f32 %v7503_v62, %v10008_v22  ;;  %v2551_v41 = vld [vmem:[%s11754_s2 + $0x378] sm:$0xff] }
 0x3a6   :  { %v3287_v1 = vpop.f32.mrb[110].mxu0  ;;  %v4237_v26 = vpop.f32.mrb[250].mxu1 }
 0x3a7   :  { %v3952_v9 = vadd.f32 %v10011_v51, %v3821_v28  ;;  %v7504_v6 = vadd.f32 %v3287_v1, %v11820_v10  ;;  %v4238_v49 = vadd.f32 %v10655_v63, %v4237_v26  ;;  %v6810_v12 = vpop.f32.mrb[111].mxu0  ;;  %6968 = vmatmul.mubr.msk.f32.gmra.mrb[216].mxu0 %vm2566_vm3, %v2548_v24  ;;  %v7052_v14 = vpop.f32.mrb[251].mxu1  ;;  %7210 = vmatmul.mubr.f32.gmra.mrb[100].mxu1 %v4076_v3  ;;  %v11823_v28 = vld [vmem:[#allocation11_spill] sm:$0xff] }
 0x3a8   :  { %6970 = vmatprep.mubr.msk.f32.mxu0 %vm7832_vm1, %v7831_v0  ;;  %7212 = vmatprep.mubr.msk.f32.mxu1 %vm7832_vm1, %v7831_v0 }
 0x3a9   :  { %v4077_v38 = vmax.f32 %v3952_v9, 0.0  ;;  %v3822_v58 = vmul.f32 %v7504_v6, %v10008_v22  ;;  %4862 = vst.msk [vmem:[%s11760_s12] sm:$0xff] %vm4861_vm4, %v4238_v49  ;;  %v2552_v6 = vld [vmem:[%s11754_s2 + $0x380] sm:$0xff] }
 0x3aa   :  { %v3292_v19 = vpop.f32.mrb[112].mxu0  ;;  %v4242_v31 = vpop.f32.mrb[252].mxu1 }
 0x3ab   :  { %v3953_v34 = vadd.f32 %v10011_v51, %v3822_v58  ;;  %v7505_v21 = vadd.f32 %v3292_v19, %v11821_v25  ;;  %v4243_v13 = vadd.f32 %v10655_v63, %v4242_v31  ;;  %v6813_v37 = vpop.f32.mrb[113].mxu0  ;;  %6971 = vmatmul.mubr.msk.f32.gmra.mrb[218].mxu0 %vm2566_vm3, %v2549_v42  ;;  %v7055_v46 = vpop.f32.mrb[253].mxu1  ;;  %7213 = vmatmul.mubr.f32.gmra.mrb[102].mxu1 %v4077_v38  ;;  %v11824_v58 = vld [vmem:[#allocation12_spill] sm:$0xff] }
 0x3ac   :  { %6973 = vmatprep.mubr.msk.f32.mxu0 %vm7832_vm1, %v7831_v0  ;;  %7215 = vmatprep.mubr.msk.f32.mxu1 %vm7832_vm1, %v7831_v0 }
 0x3ad   :  { %v4078_v53 = vmax.f32 %v3953_v34, 0.0  ;;  %v3823_v39 = vmul.f32 %v7505_v21, %v10008_v22  ;;  %4863 = vst.msk [vmem:[%s11760_s12 + $0x8] sm:$0xff] %vm4861_vm4, %v4243_v13  ;;  %v2553_v21 = vld [vmem:[%s11754_s2 + $0x388] sm:$0xff] }
 0x3ae   :  { %v3297_v16 = vpop.f32.mrb[114].mxu0  ;;  %v4247_v43 = vpop.f32.mrb[254].mxu1 }
 0x3af   :  { %v3954_v5 = vadd.f32 %v10011_v51, %v3823_v39  ;;  %v7506_v20 = vadd.f32 %v3297_v16, %v11822_v29  ;;  %v4248_v57 = vadd.f32 %v10655_v63, %v4247_v43  ;;  %v6816_v30 = vpop.f32.mrb[115].mxu0  ;;  %6974 = vmatmul.mubr.msk.f32.gmra.mrb[220].mxu0 %vm2566_vm3, %v2550_v55  ;;  %v7058_v33 = vpop.f32.mrb[255].mxu1  ;;  %7216 = vmatmul.mubr.f32.gmra.mrb[104].mxu1 %v4078_v53  ;;  %v11825_v39 = vld [vmem:[#allocation13_spill] sm:$0xff] }
 0x3b0   :  { %6976 = vmatprep.mubr.msk.f32.mxu0 %vm7832_vm1, %v7831_v0  ;;  %7218 = vmatprep.mubr.msk.f32.mxu1 %vm7832_vm1, %v7831_v0 }
 0x3b1   :  { %v4079_v54 = vmax.f32 %v3954_v5, 0.0  ;;  %v3824_v62 = vmul.f32 %v7506_v20, %v10008_v22  ;;  %4864 = vst.msk [vmem:[%s11760_s12 + $0x10] sm:$0xff] %vm4861_vm4, %v4248_v57  ;;  %v2554_v20 = vld [vmem:[%s11754_s2 + $0x390] sm:$0xff] }
 0x3b2   :  { %v3302_v47 = vpop.f32.mrb[116].mxu0  ;;  %v4252_v24 = vpop.f32.mrb[0].mxu1 }
 0x3b3   :  { %v3955_v3 = vadd.f32 %v10011_v51, %v3824_v62  ;;  %v7507_v1 = vadd.f32 %v3302_v47, %v11823_v28  ;;  %v4253_v26 = vadd.f32 %v10655_v63, %v4252_v24  ;;  %v6819_v9 = vpop.f32.mrb[117].mxu0  ;;  %6977 = vmatmul.mubr.msk.f32.gmra.mrb[222].mxu0 %vm2566_vm3, %v2551_v41  ;;  %v7061_v10 = vpop.f32.mrb[1].mxu1  ;;  %7219 = vmatmul.mubr.f32.gmra.mrb[106].mxu1 %v4079_v54  ;;  %v11826_v62 = vld [vmem:[#allocation14_spill] sm:$0xff] }
 0x3b4   :  { %6979 = vmatprep.mubr.msk.f32.mxu0 %vm7832_vm1, %v7831_v0  ;;  %7221 = vmatprep.mubr.msk.f32.mxu1 %vm7832_vm1, %v7831_v0 }
 0x3b5   :  { %v4080_v49 = vmax.f32 %v3955_v3, 0.0  ;;  %v3825_v12 = vmul.f32 %v7507_v1, %v10008_v22  ;;  %4865 = vst.msk [vmem:[%s11760_s12 + $0x18] sm:$0xff] %vm4861_vm4, %v4253_v26  ;;  %v2555_v1 = vld [vmem:[%s11754_s2 + $0x398] sm:$0xff] }
 0x3b6   :  { %v3307_v14 = vpop.f32.mrb[118].mxu0  ;;  %v4257_v42 = vpop.f32.mrb[2].mxu1 }
 0x3b7   :  { %v3956_v38 = vadd.f32 %v10011_v51, %v3825_v12  ;;  %v7508_v19 = vadd.f32 %v3307_v14, %v11824_v58  ;;  %v4258_v31 = vadd.f32 %v10655_v63, %v4257_v42  ;;  %v6822_v34 = vpop.f32.mrb[119].mxu0  ;;  %6980 = vmatmul.mubr.msk.f32.gmra.mrb[224].mxu0 %vm2566_vm3, %v2552_v6  ;;  %v7064_v25 = vpop.f32.mrb[3].mxu1  ;;  %7222 = vmatmul.mubr.f32.gmra.mrb[108].mxu1 %v4080_v49  ;;  %v11827_v12 = vld [vmem:[#allocation15_spill] sm:$0xff] }
 0x3b8   :  { %6982 = vmatprep.mubr.msk.f32.mxu0 %vm7832_vm1, %v7831_v0  ;;  %7224 = vmatprep.mubr.msk.f32.mxu1 %vm7832_vm1, %v7831_v0 }
 0x3b9   :  { %v4081_v13 = vmax.f32 %v3956_v38, 0.0  ;;  %v3826_v37 = vmul.f32 %v7508_v19, %v10008_v22  ;;  %4866 = vst.msk [vmem:[%s11760_s12 + $0x20] sm:$0xff] %vm4861_vm4, %v4258_v31  ;;  %v2556_v19 = vld [vmem:[%s11754_s2 + $0x3a0] sm:$0xff] }
 0x3ba   :  { %v3312_v46 = vpop.f32.mrb[120].mxu0  ;;  %v4262_v55 = vpop.f32.mrb[4].mxu1 }
 0x3bb   :  { %v3957_v53 = vadd.f32 %v10011_v51, %v3826_v37  ;;  %v7509_v16 = vadd.f32 %v3312_v46, %v11825_v39  ;;  %v4263_v43 = vadd.f32 %v10655_v63, %v4262_v55  ;;  %v6825_v5 = vpop.f32.mrb[121].mxu0  ;;  %6983 = vmatmul.mubr.msk.f32.gmra.mrb[226].mxu0 %vm2566_vm3, %v2553_v21  ;;  %v7067_v29 = vpop.f32.mrb[5].mxu1  ;;  %7225 = vmatmul.mubr.f32.gmra.mrb[110].mxu1 %v4081_v13  ;;  %v11828_v37 = vld [vmem:[#allocation16_spill] sm:$0xff] }
 0x3bc   :  { %6985 = vmatprep.mubr.msk.f32.mxu0 %vm7832_vm1, %v7831_v0  ;;  %7227 = vmatprep.mubr.msk.f32.mxu1 %vm7832_vm1, %v7831_v0 }
 0x3bd   :  { %v4082_v57 = vmax.f32 %v3957_v53, 0.0  ;;  %v3827_v30 = vmul.f32 %v7509_v16, %v10008_v22  ;;  %4867 = vst.msk [vmem:[%s11760_s12 + $0x28] sm:$0xff] %vm4861_vm4, %v4263_v43  ;;  %v2557_v16 = vld [vmem:[%s11754_s2 + $0x3a8] sm:$0xff] }
 0x3be   :  { %v3317_v33 = vpop.f32.mrb[122].mxu0  ;;  %v4267_v41 = vpop.f32.mrb[6].mxu1 }
 0x3bf   :  { %v3958_v54 = vadd.f32 %v10011_v51, %v3827_v30  ;;  %v7510_v47 = vadd.f32 %v3317_v33, %v11826_v62  ;;  %v4268_v24 = vadd.f32 %v10655_v63, %v4267_v41  ;;  %v6828_v3 = vpop.f32.mrb[123].mxu0  ;;  %6986 = vmatmul.mubr.msk.f32.gmra.mrb[228].mxu0 %vm2566_vm3, %v2554_v20  ;;  %v7070_v28 = vpop.f32.mrb[7].mxu1  ;;  %7228 = vmatmul.mubr.f32.gmra.mrb[112].mxu1 %v4082_v57  ;;  %v11829_v30 = vld [vmem:[#allocation17_spill] sm:$0xff] }
 0x3c0   :  { %6988 = vmatprep.mubr.msk.f32.mxu0 %vm7832_vm1, %v7831_v0  ;;  %7230 = vmatprep.mubr.msk.f32.mxu1 %vm7832_vm1, %v7831_v0 }
 0x3c1   :  { %v4083_v26 = vmax.f32 %v3958_v54, 0.0  ;;  %v3828_v9 = vmul.f32 %v7510_v47, %v10008_v22  ;;  %4868 = vst.msk [vmem:[%s11760_s12 + $0x30] sm:$0xff] %vm4861_vm4, %v4268_v24  ;;  %v2558_v47 = vld [vmem:[%s11754_s2 + $0x3b0] sm:$0xff] }
 0x3c2   :  { %v3322_v10 = vpop.f32.mrb[124].mxu0  ;;  %v4272_v6 = vpop.f32.mrb[8].mxu1 }
 0x3c3   :  { %v3959_v49 = vadd.f32 %v10011_v51, %v3828_v9  ;;  %v7511_v14 = vadd.f32 %v3322_v10, %v11827_v12  ;;  %v4273_v42 = vadd.f32 %v10655_v63, %v4272_v6  ;;  %v6831_v38 = vpop.f32.mrb[125].mxu0  ;;  %6989 = vmatmul.mubr.msk.f32.gmra.mrb[230].mxu0 %vm2566_vm3, %v2555_v1  ;;  %v7073_v58 = vpop.f32.mrb[9].mxu1  ;;  %7231 = vmatmul.mubr.f32.gmra.mrb[114].mxu1 %v4083_v26  ;;  %v11830_v9 = vld [vmem:[#allocation18_spill] sm:$0xff] }
 0x3c4   :  { %6991 = vmatprep.mubr.msk.f32.mxu0 %vm7832_vm1, %v7831_v0  ;;  %7233 = vmatprep.mubr.msk.f32.mxu1 %vm7832_vm1, %v7831_v0 }
 0x3c5   :  { %v4084_v31 = vmax.f32 %v3959_v49, 0.0  ;;  %v3829_v34 = vmul.f32 %v7511_v14, %v10008_v22  ;;  %4869 = vst.msk [vmem:[%s11760_s12 + $0x38] sm:$0xff] %vm4861_vm4, %v4273_v42  ;;  %v2559_v14 = vld [vmem:[%s11754_s2 + $0x3b8] sm:$0xff] }
 0x3c6   :  { %v3327_v25 = vpop.f32.mrb[126].mxu0  ;;  %v4277_v21 = vpop.f32.mrb[10].mxu1 }
 0x3c7   :  { %v3960_v13 = vadd.f32 %v10011_v51, %v3829_v34  ;;  %v7512_v46 = vadd.f32 %v3327_v25, %v11828_v37  ;;  %v4278_v55 = vadd.f32 %v10655_v63, %v4277_v21  ;;  %v6834_v53 = vpop.f32.mrb[127].mxu0  ;;  %6992 = vmatmul.mubr.msk.f32.gmra.mrb[232].mxu0 %vm2566_vm3, %v2556_v19  ;;  %v7076_v39 = vpop.f32.mrb[11].mxu1  ;;  %7234 = vmatmul.mubr.f32.gmra.mrb[116].mxu1 %v4084_v31  ;;  %v11831_v34 = vld [vmem:[#allocation19_spill] sm:$0xff] }
 0x3c8   :  { %6994 = vmatprep.mubr.msk.f32.mxu0 %vm7832_vm1, %v7831_v0  ;;  %7236 = vmatprep.mubr.msk.f32.mxu1 %vm7832_vm1, %v7831_v0 }
 0x3c9   :  { %v4085_v43 = vmax.f32 %v3960_v13, 0.0  ;;  %v3830_v5 = vmul.f32 %v7512_v46, %v10008_v22  ;;  %4870 = vst.msk [vmem:[%s11760_s12 + $0x40] sm:$0xff] %vm4861_vm4, %v4278_v55  ;;  %v2560_v46 = vld [vmem:[%s11754_s2 + $0x3c0] sm:$0xff] }
 0x3ca   :  { %v3332_v29 = vpop.f32.mrb[128].mxu0  ;;  %v4282_v20 = vpop.f32.mrb[12].mxu1 }
 0x3cb   :  { %v3961_v57 = vadd.f32 %v10011_v51, %v3830_v5  ;;  %v7513_v33 = vadd.f32 %v3332_v29, %v11829_v30  ;;  %v4283_v41 = vadd.f32 %v10655_v63, %v4282_v20  ;;  %v6837_v54 = vpop.f32.mrb[129].mxu0  ;;  %6995 = vmatmul.mubr.msk.f32.gmra.mrb[234].mxu0 %vm2566_vm3, %v2557_v16  ;;  %v7079_v62 = vpop.f32.mrb[13].mxu1  ;;  %7237 = vmatmul.mubr.f32.gmra.mrb[118].mxu1 %v4085_v43  ;;  %v11832_v5 = vld [vmem:[#allocation20_spill] sm:$0xff] }
 0x3cc   :  { %6997 = vmatprep.mubr.msk.f32.mxu0 %vm7832_vm1, %v7831_v0  ;;  %7239 = vmatprep.mubr.msk.f32.mxu1 %vm7832_vm1, %v7831_v0 }
 0x3cd   :  { %v4086_v24 = vmax.f32 %v3961_v57, 0.0  ;;  %v3831_v3 = vmul.f32 %v7513_v33, %v10008_v22  ;;  %4871 = vst.msk [vmem:[%s11760_s12 + $0x48] sm:$0xff] %vm4861_vm4, %v4283_v41  ;;  %v2561_v33 = vld [vmem:[%s11754_s2 + $0x3c8] sm:$0xff] }
 0x3ce   :  { %v3337_v28 = vpop.f32.mrb[130].mxu0  ;;  %v4287_v1 = vpop.f32.mrb[14].mxu1 }
 0x3cf   :  { %v3962_v26 = vadd.f32 %v10011_v51, %v3831_v3  ;;  %v7514_v10 = vadd.f32 %v3337_v28, %v11830_v9  ;;  %v4288_v6 = vadd.f32 %v10655_v63, %v4287_v1  ;;  %v6840_v49 = vpop.f32.mrb[131].mxu0  ;;  %6998 = vmatmul.mubr.msk.f32.gmra.mrb[236].mxu0 %vm2566_vm3, %v2558_v47  ;;  %v7082_v12 = vpop.f32.mrb[15].mxu1  ;;  %7240 = vmatmul.mubr.f32.gmra.mrb[120].mxu1 %v4086_v24  ;;  %v11833_v3 = vld [vmem:[#allocation21_spill] sm:$0xff] }
 0x3d0   :  { %7000 = vmatprep.mubr.msk.f32.mxu0 %vm7832_vm1, %v7831_v0  ;;  %7242 = vmatprep.mubr.msk.f32.mxu1 %vm7832_vm1, %v7831_v0 }
 0x3d1   :  { %v4087_v42 = vmax.f32 %v3962_v26, 0.0  ;;  %v3832_v38 = vmul.f32 %v7514_v10, %v10008_v22  ;;  %4872 = vst.msk [vmem:[%s11760_s12 + $0x50] sm:$0xff] %vm4861_vm4, %v4288_v6  ;;  %v2562_v10 = vld [vmem:[%s11754_s2 + $0x3d0] sm:$0xff] }
 0x3d2   :  { %v3342_v58 = vpop.f32.mrb[132].mxu0  ;;  %v4292_v19 = vpop.f32.mrb[16].mxu1 }
 0x3d3   :  { %v3963_v31 = vadd.f32 %v10011_v51, %v3832_v38  ;;  %v7515_v25 = vadd.f32 %v3342_v58, %v11831_v34  ;;  %v4293_v21 = vadd.f32 %v10655_v63, %v4292_v19  ;;  %v6843_v13 = vpop.f32.mrb[133].mxu0  ;;  %7001 = vmatmul.mubr.msk.f32.gmra.mrb[238].mxu0 %vm2566_vm3, %v2559_v14  ;;  %v7085_v37 = vpop.f32.mrb[17].mxu1  ;;  %7243 = vmatmul.mubr.f32.gmra.mrb[122].mxu1 %v4087_v42  ;;  %v11834_v38 = vld [vmem:[#allocation22_spill] sm:$0xff] }
 0x3d4   :  { %7003 = vmatprep.mubr.msk.f32.mxu0 %vm7832_vm1, %v7831_v0  ;;  %7245 = vmatprep.mubr.msk.f32.mxu1 %vm7832_vm1, %v7831_v0 }
 0x3d5   :  { %v4088_v55 = vmax.f32 %v3963_v31, 0.0  ;;  %v3833_v53 = vmul.f32 %v7515_v25, %v10008_v22  ;;  %4873 = vst.msk [vmem:[%s11760_s12 + $0x58] sm:$0xff] %vm4861_vm4, %v4293_v21  ;;  %v2563_v25 = vld [vmem:[%s11754_s2 + $0x3d8] sm:$0xff] }
 0x3d6   :  { %v3347_v39 = vpop.f32.mrb[134].mxu0  ;;  %v4297_v16 = vpop.f32.mrb[18].mxu1 }
 0x3d7   :  { %v3964_v43 = vadd.f32 %v10011_v51, %v3833_v53  ;;  %v7516_v29 = vadd.f32 %v3347_v39, %v11832_v5  ;;  %v4298_v20 = vadd.f32 %v10655_v63, %v4297_v16  ;;  %v6846_v57 = vpop.f32.mrb[135].mxu0  ;;  %7004 = vmatmul.mubr.msk.f32.gmra.mrb[240].mxu0 %vm2566_vm3, %v2560_v46  ;;  %v7088_v30 = vpop.f32.mrb[19].mxu1  ;;  %7246 = vmatmul.mubr.f32.gmra.mrb[124].mxu1 %v4088_v55  ;;  %v11835_v53 = vld [vmem:[#allocation23_spill] sm:$0xff] }
 0x3d8   :  { %7006 = vmatprep.mubr.msk.f32.mxu0 %vm7832_vm1, %v7831_v0  ;;  %7248 = vmatprep.mubr.msk.f32.mxu1 %vm7832_vm1, %v7831_v0 }
 0x3d9   :  { %v4089_v41 = vmax.f32 %v3964_v43, 0.0  ;;  %v3834_v54 = vmul.f32 %v7516_v29, %v10008_v22  ;;  %4874 = vst.msk [vmem:[%s11760_s12 + $0x60] sm:$0xff] %vm4861_vm4, %v4298_v20  ;;  %v2564_v29 = vld [vmem:[%s11754_s2 + $0x3e0] sm:$0xff] }
 0x3da   :  { %v3352_v62 = vpop.f32.mrb[136].mxu0  ;;  %v4302_v47 = vpop.f32.mrb[20].mxu1 }
 0x3db   :  { %v3965_v24 = vadd.f32 %v10011_v51, %v3834_v54  ;;  %v7517_v28 = vadd.f32 %v3352_v62, %v11833_v3  ;;  %v4303_v1 = vadd.f32 %v10655_v63, %v4302_v47  ;;  %v6849_v26 = vpop.f32.mrb[137].mxu0  ;;  %7007 = vmatmul.mubr.msk.f32.gmra.mrb[242].mxu0 %vm2566_vm3, %v2561_v33  ;;  %v7091_v9 = vpop.f32.mrb[21].mxu1  ;;  %7249 = vmatmul.mubr.f32.gmra.mrb[126].mxu1 %v4089_v41  ;;  %v11836_v54 = vld [vmem:[#allocation24_spill] sm:$0xff] }
 0x3dc   :  { %7009 = vmatprep.mubr.msk.f32.mxu0 %vm7832_vm1, %v7831_v0  ;;  %7251 = vmatprep.mubr.msk.f32.mxu1 %vm7832_vm1, %v7831_v0 }
 0x3dd   :  { %v4090_v6 = vmax.f32 %v3965_v24, 0.0  ;;  %v3835_v49 = vmul.f32 %v7517_v28, %v10008_v22  ;;  %4875 = vst.msk [vmem:[%s11760_s12 + $0x68] sm:$0xff] %vm4861_vm4, %v4303_v1 }
 0x3de   :  { %v3357_v12 = vpop.f32.mrb[138].mxu0  ;;  %v4307_v14 = vpop.f32.mrb[22].mxu1 }
 0x3df   :  { %v3966_v42 = vadd.f32 %v10011_v51, %v3835_v49  ;;  %v7518_v58 = vadd.f32 %v3357_v12, %v11834_v38  ;;  %v4308_v19 = vadd.f32 %v10655_v63, %v4307_v14  ;;  %v6852_v31 = vpop.f32.mrb[139].mxu0  ;;  %7010 = vmatmul.mubr.msk.f32.gmra.mrb[244].mxu0 %vm2566_vm3, %v2562_v10  ;;  %v7094_v34 = vpop.f32.mrb[23].mxu1  ;;  %7252 = vmatmul.mubr.f32.gmra.mrb[128].mxu1 %v4090_v6  ;;  %v11837_v6 = vld [vmem:[#allocation25_spill] sm:$0xff] }
 0x3e0   :  { %7012 = vmatprep.mubr.msk.f32.mxu0 %vm7832_vm1, %v7831_v0  ;;  %7254 = vmatprep.mubr.msk.f32.mxu1 %vm7832_vm1, %v7831_v0 }
 0x3e1   :  { %v4091_v21 = vmax.f32 %v3966_v42, 0.0  ;;  %v3836_v13 = vmul.f32 %v7518_v58, %v10008_v22  ;;  %4876 = vst.msk [vmem:[%s11760_s12 + $0x70] sm:$0xff] %vm4861_vm4, %v4308_v19 }
 0x3e2   :  { %v3362_v37 = vpop.f32.mrb[140].mxu0  ;;  %v4312_v46 = vpop.f32.mrb[24].mxu1 }
 0x3e3   :  { %v3967_v55 = vadd.f32 %v10011_v51, %v3836_v13  ;;  %v7519_v39 = vadd.f32 %v3362_v37, %v11835_v53  ;;  %v4313_v16 = vadd.f32 %v10655_v63, %v4312_v46  ;;  %v6855_v43 = vpop.f32.mrb[141].mxu0  ;;  %7013 = vmatmul.mubr.msk.f32.gmra.mrb[246].mxu0 %vm2566_vm3, %v2563_v25  ;;  %v7097_v5 = vpop.f32.mrb[25].mxu1  ;;  %7255 = vmatmul.mubr.f32.gmra.mrb[130].mxu1 %v4091_v21  ;;  %v11838_v25 = vld [vmem:[#allocation26_spill] sm:$0xff] }
 0x3e4   :  { %7015 = vmatprep.mubr.msk.f32.mxu0 %vm7832_vm1, %v7831_v0  ;;  %7257 = vmatprep.mubr.msk.f32.mxu1 %vm7832_vm1, %v7831_v0  ;;  %v11839_v5 = vld [vmem:[#allocation27_spill] sm:$0xff] }
 0x3e5   :  { %v4092_v20 = vmax.f32 %v3967_v55, 0.0  ;;  %v3837_v57 = vmul.f32 %v7519_v39, %v10008_v22  ;;  %4877 = vst.msk [vmem:[%s11760_s12 + $0x78] sm:$0xff] %vm4861_vm4, %v4313_v16 }
 0x3e6   :  { %v3367_v30 = vpop.f32.mrb[142].mxu0  ;;  %v4317_v33 = vpop.f32.mrb[26].mxu1 }
 0x3e7   :  { %v3968_v41 = vadd.f32 %v10011_v51, %v3837_v57  ;;  %v7520_v62 = vadd.f32 %v3367_v30, %v11836_v54  ;;  %v4318_v47 = vadd.f32 %v10655_v63, %v4317_v33  ;;  %v6858_v24 = vpop.f32.mrb[143].mxu0  ;;  %7016 = vmatmul.mubr.msk.f32.gmra.mrb[248].mxu0 %vm2566_vm3, %v2564_v29  ;;  %v7100_v3 = vpop.f32.mrb[27].mxu1  ;;  %7258 = vmatmul.mubr.f32.gmra.mrb[132].mxu1 %v4092_v20 }
 0x3e8   :  { %7260 = vmatprep.mubr.msk.f32.mxu1 %vm7832_vm1, %v7831_v0  ;;  %v11840_v24 = vld [vmem:[#allocation28_spill] sm:$0xff] }
 0x3e9   :  { %v4093_v28 = vmax.f32 %v3968_v41, 0.0  ;;  %v3838_v1 = vmul.f32 %v7520_v62, %v10008_v22  ;;  %4878 = vst.msk [vmem:[%s11760_s12 + $0x80] sm:$0xff] %vm4861_vm4, %v4318_v47 }
 0x3ea   :  { %v3372_v26 = vpop.f32.mrb[144].mxu0  ;;  %v4322_v9 = vpop.f32.mrb[28].mxu1 }
 0x3eb   :  { %v3969_v10 = vadd.f32 %v10011_v51, %v3838_v1  ;;  %v7521_v49 = vadd.f32 %v3372_v26, %v11837_v6  ;;  %v4323_v12 = vadd.f32 %v10655_v63, %v4322_v9  ;;  %v6861_v14 = vpop.f32.mrb[145].mxu0  ;;  %v7103_v42 = vpop.f32.mrb[29].mxu1  ;;  %7261 = vmatmul.mubr.f32.gmra.mrb[134].mxu1 %v4093_v28 }
 0x3ec   :  { %7263 = vmatprep.mubr.msk.f32.mxu1 %vm7832_vm1, %v7831_v0  ;;  %v11841_v14 = vld [vmem:[#allocation29_spill] sm:$0xff] }
 0x3ed   :  { %v4094_v38 = vmax.f32 %v3969_v10, 0.0  ;;  %v3839_v58 = vmul.f32 %v7521_v49, %v10008_v22  ;;  %4879 = vst.msk [vmem:[%s11760_s12 + $0x88] sm:$0xff] %vm4861_vm4, %v4323_v12 }
 0x3ee   :  { %v3377_v19 = vpop.f32.mrb[146].mxu0  ;;  %v4327_v31 = vpop.f32.mrb[30].mxu1 }
 0x3ef   :  { %v3970_v34 = vadd.f32 %v10011_v51, %v3839_v58  ;;  %v7522_v21 = vadd.f32 %v3377_v19, %v11838_v25  ;;  %v4328_v13 = vadd.f32 %v10655_v63, %v4327_v31  ;;  %v6864_v37 = vpop.f32.mrb[147].mxu0  ;;  %v7106_v46 = vpop.f32.mrb[31].mxu1  ;;  %7264 = vmatmul.mubr.f32.gmra.mrb[136].mxu1 %v4094_v38 }
 0x3f0   :  { %7266 = vmatprep.mubr.msk.f32.mxu1 %vm7832_vm1, %v7831_v0  ;;  %v11842_v37 = vld [vmem:[#allocation30_spill] sm:$0xff] }
 0x3f1   :  { %v4095_v55 = vmax.f32 %v3970_v34, 0.0  ;;  %v3840_v53 = vmul.f32 %v7522_v21, %v10008_v22  ;;  %4880 = vst.msk [vmem:[%s11760_s12 + $0x90] sm:$0xff] %vm4861_vm4, %v4328_v13 }
 0x3f2   :  { %v3382_v39 = vpop.f32.mrb[148].mxu0  ;;  %v4332_v16 = vpop.f32.mrb[32].mxu1 }
 0x3f3   :  { %v3971_v43 = vadd.f32 %v10011_v51, %v3840_v53  ;;  %v7523_v29 = vadd.f32 %v3382_v39, %v11839_v5  ;;  %v4333_v20 = vadd.f32 %v10655_v63, %v4332_v16  ;;  %v6867_v57 = vpop.f32.mrb[149].mxu0  ;;  %v7109_v30 = vpop.f32.mrb[33].mxu1  ;;  %7267 = vmatmul.mubr.f32.gmra.mrb[138].mxu1 %v4095_v55 }
 0x3f4   :  { %7269 = vmatprep.mubr.msk.f32.mxu1 %vm7832_vm1, %v7831_v0  ;;  %v11843_v57 = vld [vmem:[#allocation31_spill] sm:$0xff] }
 0x3f5   :  { %v4096_v33 = vmax.f32 %v3971_v43, 0.0  ;;  %v3841_v41 = vmul.f32 %v7523_v29, %v10008_v22  ;;  %4881 = vst.msk [vmem:[%s11760_s12 + $0x98] sm:$0xff] %vm4861_vm4, %v4333_v20 }
 0x3f6   :  { %v3387_v54 = vpop.f32.mrb[150].mxu0  ;;  %v4337_v62 = vpop.f32.mrb[34].mxu1 }
 0x3f7   :  { %v3972_v47 = vadd.f32 %v10011_v51, %v3841_v41  ;;  %v7524_v3 = vadd.f32 %v3387_v54, %v11840_v24  ;;  %v4338_v28 = vadd.f32 %v10655_v63, %v4337_v62  ;;  %v6870_v1 = vpop.f32.mrb[151].mxu0  ;;  %v7112_v26 = vpop.f32.mrb[35].mxu1  ;;  %7270 = vmatmul.mubr.f32.gmra.mrb[140].mxu1 %v4096_v33 }
 0x3f8   :  { %7272 = vmatprep.mubr.msk.f32.mxu1 %vm7832_vm1, %v7831_v0  ;;  %v11844_v1 = vld [vmem:[#allocation32_spill] sm:$0xff] }
 0x3f9   :  { %v4097_v9 = vmax.f32 %v3972_v47, 0.0  ;;  %v3842_v10 = vmul.f32 %v7524_v3, %v10008_v22  ;;  %4882 = vst.msk [vmem:[%s11760_s12 + $0xa0] sm:$0xff] %vm4861_vm4, %v4338_v28 }
 0x3fa   :  { %v3392_v6 = vpop.f32.mrb[152].mxu0  ;;  %v4342_v49 = vpop.f32.mrb[36].mxu1 }
 0x3fb   :  { %v3973_v12 = vadd.f32 %v10011_v51, %v3842_v10  ;;  %v7525_v42 = vadd.f32 %v3392_v6, %v11841_v14  ;;  %v4343_v38 = vadd.f32 %v10655_v63, %v4342_v49  ;;  %v6873_v58 = vpop.f32.mrb[153].mxu0  ;;  %v7115_v19 = vpop.f32.mrb[37].mxu1  ;;  %7273 = vmatmul.mubr.f32.gmra.mrb[142].mxu1 %v4097_v9 }
 0x3fc   :  { %7275 = vmatprep.mubr.msk.f32.mxu1 %vm7832_vm1, %v7831_v0  ;;  %v11845_v58 = vld [vmem:[#allocation33_spill] sm:$0xff] }
 0x3fd   :  { %v4098_v31 = vmax.f32 %v3973_v12, 0.0  ;;  %v3843_v34 = vmul.f32 %v7525_v42, %v10008_v22  ;;  %4883 = vst.msk [vmem:[%s11760_s12 + $0xa8] sm:$0xff] %vm4861_vm4, %v4343_v38 }
 0x3fe   :  { %v3397_v25 = vpop.f32.mrb[154].mxu0  ;;  %v4347_v21 = vpop.f32.mrb[38].mxu1 }
 0x3ff   :  { %v3974_v13 = vadd.f32 %v10011_v51, %v3843_v34  ;;  %v7526_v46 = vadd.f32 %v3397_v25, %v11842_v37  ;;  %v4348_v55 = vadd.f32 %v10655_v63, %v4347_v21  ;;  %v6876_v53 = vpop.f32.mrb[155].mxu0  ;;  %v7118_v39 = vpop.f32.mrb[39].mxu1  ;;  %7276 = vmatmul.mubr.f32.gmra.mrb[144].mxu1 %v4098_v31 }
 0x400   :  { %7278 = vmatprep.mubr.msk.f32.mxu1 %vm7832_vm1, %v7831_v0  ;;  %v11846_v53 = vld [vmem:[#allocation34_spill] sm:$0xff] }
 0x401   :  { %v4099_v16 = vmax.f32 %v3974_v13, 0.0  ;;  %v3844_v43 = vmul.f32 %v7526_v46, %v10008_v22  ;;  %4884 = vst.msk [vmem:[%s11760_s12 + $0xb0] sm:$0xff] %vm4861_vm4, %v4348_v55 }
 0x402   :  { %v3402_v5 = vpop.f32.mrb[156].mxu0  ;;  %v4352_v29 = vpop.f32.mrb[40].mxu1 }
 0x403   :  { %v3975_v20 = vadd.f32 %v10011_v51, %v3844_v43  ;;  %v7527_v30 = vadd.f32 %v3402_v5, %v11843_v57  ;;  %v4353_v33 = vadd.f32 %v10655_v63, %v4352_v29  ;;  %v6879_v41 = vpop.f32.mrb[157].mxu0  ;;  %v7121_v54 = vpop.f32.mrb[41].mxu1  ;;  %7279 = vmatmul.mubr.f32.gmra.mrb[146].mxu1 %v4099_v16 }
 0x404   :  { %7281 = vmatprep.mubr.msk.f32.mxu1 %vm7832_vm1, %v7831_v0  ;;  %v11847_v41 = vld [vmem:[#allocation35_spill] sm:$0xff] }
 0x405   :  { %v4100_v62 = vmax.f32 %v3975_v20, 0.0  ;;  %v3845_v47 = vmul.f32 %v7527_v30, %v10008_v22  ;;  %4885 = vst.msk [vmem:[%s11760_s12 + $0xb8] sm:$0xff] %vm4861_vm4, %v4353_v33 }
 0x406   :  { %v3407_v24 = vpop.f32.mrb[158].mxu0  ;;  %v4357_v3 = vpop.f32.mrb[42].mxu1 }
 0x407   :  { %v3976_v28 = vadd.f32 %v10011_v51, %v3845_v47  ;;  %v7528_v26 = vadd.f32 %v3407_v24, %v11844_v1  ;;  %v4358_v9 = vadd.f32 %v10655_v63, %v4357_v3  ;;  %v6882_v10 = vpop.f32.mrb[159].mxu0  ;;  %v7124_v6 = vpop.f32.mrb[43].mxu1  ;;  %7282 = vmatmul.mubr.f32.gmra.mrb[148].mxu1 %v4100_v62 }
 0x408   :  { %7284 = vmatprep.mubr.msk.f32.mxu1 %vm7832_vm1, %v7831_v0  ;;  %v11848_v10 = vld [vmem:[#allocation36_spill] sm:$0xff] }
 0x409   :  { %v4101_v49 = vmax.f32 %v3976_v28, 0.0  ;;  %v3846_v12 = vmul.f32 %v7528_v26, %v10008_v22  ;;  %4886 = vst.msk [vmem:[%s11760_s12 + $0xc0] sm:$0xff] %vm4861_vm4, %v4358_v9 }
 0x40a   :  { %v3412_v14 = vpop.f32.mrb[160].mxu0  ;;  %v4362_v42 = vpop.f32.mrb[44].mxu1 }
 0x40b   :  { %v3977_v38 = vadd.f32 %v10011_v51, %v3846_v12  ;;  %v7529_v19 = vadd.f32 %v3412_v14, %v11845_v58  ;;  %v4363_v31 = vadd.f32 %v10655_v63, %v4362_v42  ;;  %v6885_v34 = vpop.f32.mrb[161].mxu0  ;;  %v7127_v25 = vpop.f32.mrb[45].mxu1  ;;  %7285 = vmatmul.mubr.f32.gmra.mrb[150].mxu1 %v4101_v49 }
 0x40c   :  { %7287 = vmatprep.mubr.msk.f32.mxu1 %vm7832_vm1, %v7831_v0  ;;  %v11849_v34 = vld [vmem:[#allocation37_spill] sm:$0xff] }
 0x40d   :  { %v4102_v21 = vmax.f32 %v3977_v38, 0.0  ;;  %v3847_v13 = vmul.f32 %v7529_v19, %v10008_v22  ;;  %4887 = vst.msk [vmem:[%s11760_s12 + $0xc8] sm:$0xff] %vm4861_vm4, %v4363_v31 }
 0x40e   :  { %v3417_v37 = vpop.f32.mrb[162].mxu0  ;;  %v4367_v46 = vpop.f32.mrb[46].mxu1 }
 0x40f   :  { %v3978_v55 = vadd.f32 %v10011_v51, %v3847_v13  ;;  %v7530_v39 = vadd.f32 %v3417_v37, %v11846_v53  ;;  %v4368_v16 = vadd.f32 %v10655_v63, %v4367_v46  ;;  %v6888_v43 = vpop.f32.mrb[163].mxu0  ;;  %v7130_v5 = vpop.f32.mrb[47].mxu1  ;;  %7288 = vmatmul.mubr.f32.gmra.mrb[152].mxu1 %v4102_v21 }
 0x410   :  { %7290 = vmatprep.mubr.msk.f32.mxu1 %vm7832_vm1, %v7831_v0  ;;  %v11850_v43 = vld [vmem:[#allocation38_spill] sm:$0xff] }
 0x411   :  { %v4103_v29 = vmax.f32 %v3978_v55, 0.0  ;;  %v3848_v20 = vmul.f32 %v7530_v39, %v10008_v22  ;;  %4888 = vst.msk [vmem:[%s11760_s12 + $0xd0] sm:$0xff] %vm4861_vm4, %v4368_v16 }
 0x412   :  { %v3422_v57 = vpop.f32.mrb[164].mxu0  ;;  %v4372_v30 = vpop.f32.mrb[48].mxu1 }
 0x413   :  { %v3979_v33 = vadd.f32 %v10011_v51, %v3848_v20  ;;  %v7531_v54 = vadd.f32 %v3422_v57, %v11847_v41  ;;  %v4373_v62 = vadd.f32 %v10655_v63, %v4372_v30  ;;  %v6891_v47 = vpop.f32.mrb[165].mxu0  ;;  %v7133_v24 = vpop.f32.mrb[49].mxu1  ;;  %7291 = vmatmul.mubr.f32.gmra.mrb[154].mxu1 %v4103_v29 }
 0x414   :  { %7293 = vmatprep.mubr.msk.f32.mxu1 %vm7832_vm1, %v7831_v0  ;;  %v11851_v47 = vld [vmem:[#allocation39_spill] sm:$0xff] }
 0x415   :  { %v4104_v3 = vmax.f32 %v3979_v33, 0.0  ;;  %v3849_v28 = vmul.f32 %v7531_v54, %v10008_v22  ;;  %4889 = vst.msk [vmem:[%s11760_s12 + $0xd8] sm:$0xff] %vm4861_vm4, %v4373_v62 }
 0x416   :  { %v3427_v1 = vpop.f32.mrb[166].mxu0  ;;  %v4377_v26 = vpop.f32.mrb[50].mxu1 }
 0x417   :  { %v3980_v9 = vadd.f32 %v10011_v51, %v3849_v28  ;;  %v7532_v6 = vadd.f32 %v3427_v1, %v11848_v10  ;;  %v4378_v49 = vadd.f32 %v10655_v63, %v4377_v26  ;;  %v6894_v12 = vpop.f32.mrb[167].mxu0  ;;  %v7136_v14 = vpop.f32.mrb[51].mxu1  ;;  %7294 = vmatmul.mubr.f32.gmra.mrb[156].mxu1 %v4104_v3 }
 0x418   :  { %7296 = vmatprep.mubr.msk.f32.mxu1 %vm7832_vm1, %v7831_v0  ;;  %v11852_v12 = vld [vmem:[#allocation40_spill] sm:$0xff] }
 0x419   :  { %v4105_v42 = vmax.f32 %v3980_v9, 0.0  ;;  %v3850_v38 = vmul.f32 %v7532_v6, %v10008_v22  ;;  %4890 = vst.msk [vmem:[%s11760_s12 + $0xe0] sm:$0xff] %vm4861_vm4, %v4378_v49 }
 0x41a   :  { %v3432_v58 = vpop.f32.mrb[168].mxu0  ;;  %v4382_v19 = vpop.f32.mrb[52].mxu1 }
 0x41b   :  { %v3981_v31 = vadd.f32 %v10011_v51, %v3850_v38  ;;  %v7533_v25 = vadd.f32 %v3432_v58, %v11849_v34  ;;  %v4383_v21 = vadd.f32 %v10655_v63, %v4382_v19  ;;  %v6897_v13 = vpop.f32.mrb[169].mxu0  ;;  %v7139_v37 = vpop.f32.mrb[53].mxu1  ;;  %7297 = vmatmul.mubr.f32.gmra.mrb[158].mxu1 %v4105_v42 }
 0x41c   :  { %7299 = vmatprep.mubr.msk.f32.mxu1 %vm7832_vm1, %v7831_v0  ;;  %v11853_v13 = vld [vmem:[#allocation41_spill] sm:$0xff] }
 0x41d   :  { %v4106_v46 = vmax.f32 %v3981_v31, 0.0  ;;  %v3851_v55 = vmul.f32 %v7533_v25, %v10008_v22  ;;  %4891 = vst.msk [vmem:[%s11760_s12 + $0xe8] sm:$0xff] %vm4861_vm4, %v4383_v21 }
 0x41e   :  { %v3437_v53 = vpop.f32.mrb[170].mxu0  ;;  %v4387_v39 = vpop.f32.mrb[54].mxu1 }
 0x41f   :  { %v3982_v16 = vadd.f32 %v10011_v51, %v3851_v55  ;;  %v7534_v5 = vadd.f32 %v3437_v53, %v11850_v43  ;;  %v4388_v29 = vadd.f32 %v10655_v63, %v4387_v39  ;;  %v6900_v20 = vpop.f32.mrb[171].mxu0  ;;  %v7142_v57 = vpop.f32.mrb[55].mxu1  ;;  %7300 = vmatmul.mubr.f32.gmra.mrb[160].mxu1 %v4106_v46 }
 0x420   :  { %7302 = vmatprep.mubr.msk.f32.mxu1 %vm7832_vm1, %v7831_v0  ;;  %v11854_v20 = vld [vmem:[#allocation42_spill] sm:$0xff] }
 0x421   :  { %v4107_v30 = vmax.f32 %v3982_v16, 0.0  ;;  %v3852_v33 = vmul.f32 %v7534_v5, %v10008_v22  ;;  %4892 = vst.msk [vmem:[%s11760_s12 + $0xf0] sm:$0xff] %vm4861_vm4, %v4388_v29 }
 0x422   :  { %v3442_v41 = vpop.f32.mrb[172].mxu0  ;;  %v4392_v54 = vpop.f32.mrb[56].mxu1 }
 0x423   :  { %v3983_v62 = vadd.f32 %v10011_v51, %v3852_v33  ;;  %v7535_v24 = vadd.f32 %v3442_v41, %v11851_v47  ;;  %v4393_v3 = vadd.f32 %v10655_v63, %v4392_v54  ;;  %v6903_v28 = vpop.f32.mrb[173].mxu0  ;;  %v7145_v1 = vpop.f32.mrb[57].mxu1  ;;  %7303 = vmatmul.mubr.f32.gmra.mrb[162].mxu1 %v4107_v30 }
 0x424   :  { %7305 = vmatprep.mubr.msk.f32.mxu1 %vm7832_vm1, %v7831_v0  ;;  %v11855_v28 = vld [vmem:[#allocation43_spill] sm:$0xff] }
 0x425   :  { %v4108_v26 = vmax.f32 %v3983_v62, 0.0  ;;  %v3853_v9 = vmul.f32 %v7535_v24, %v10008_v22  ;;  %4893 = vst.msk [vmem:[%s11760_s12 + $0xf8] sm:$0xff] %vm4861_vm4, %v4393_v3 }
 0x426   :  { %v3447_v10 = vpop.f32.mrb[174].mxu0  ;;  %v4397_v6 = vpop.f32.mrb[58].mxu1 }
 0x427   :  { %v3984_v49 = vadd.f32 %v10011_v51, %v3853_v9  ;;  %v7536_v14 = vadd.f32 %v3447_v10, %v11852_v12  ;;  %v4398_v42 = vadd.f32 %v10655_v63, %v4397_v6  ;;  %v6906_v38 = vpop.f32.mrb[175].mxu0  ;;  %v7148_v58 = vpop.f32.mrb[59].mxu1  ;;  %7306 = vmatmul.mubr.f32.gmra.mrb[164].mxu1 %v4108_v26 }
 0x428   :  { %7308 = vmatprep.mubr.msk.f32.mxu1 %vm7832_vm1, %v7831_v0  ;;  %v11856_v38 = vld [vmem:[#allocation44_spill] sm:$0xff] }
 0x429   :  { %v4109_v19 = vmax.f32 %v3984_v49, 0.0  ;;  %v3854_v31 = vmul.f32 %v7536_v14, %v10008_v22  ;;  %4894 = vst.msk [vmem:[%s11760_s12 + $0x100] sm:$0xff] %vm4861_vm4, %v4398_v42 }
 0x42a   :  { %v3452_v34 = vpop.f32.mrb[176].mxu0  ;;  %v4402_v25 = vpop.f32.mrb[60].mxu1 }
 0x42b   :  { %v3985_v21 = vadd.f32 %v10011_v51, %v3854_v31  ;;  %v7537_v37 = vadd.f32 %v3452_v34, %v11853_v13  ;;  %v4403_v46 = vadd.f32 %v10655_v63, %v4402_v25  ;;  %v6909_v55 = vpop.f32.mrb[177].mxu0  ;;  %v7151_v53 = vpop.f32.mrb[61].mxu1  ;;  %7309 = vmatmul.mubr.f32.gmra.mrb[166].mxu1 %v4109_v19 }
 0x42c   :  { %7311 = vmatprep.mubr.msk.f32.mxu1 %vm7832_vm1, %v7831_v0  ;;  %v11857_v55 = vld [vmem:[#allocation45_spill] sm:$0xff] }
 0x42d   :  { %v4110_v39 = vmax.f32 %v3985_v21, 0.0  ;;  %v3855_v16 = vmul.f32 %v7537_v37, %v10008_v22  ;;  %4895 = vst.msk [vmem:[%s11760_s12 + $0x108] sm:$0xff] %vm4861_vm4, %v4403_v46 }
 0x42e   :  { %v3457_v43 = vpop.f32.mrb[178].mxu0  ;;  %v4407_v5 = vpop.f32.mrb[62].mxu1 }
 0x42f   :  { %v3986_v29 = vadd.f32 %v10011_v51, %v3855_v16  ;;  %v7538_v57 = vadd.f32 %v3457_v43, %v11854_v20  ;;  %v4408_v30 = vadd.f32 %v10655_v63, %v4407_v5  ;;  %v6912_v33 = vpop.f32.mrb[179].mxu0  ;;  %v7154_v41 = vpop.f32.mrb[63].mxu1  ;;  %7312 = vmatmul.mubr.f32.gmra.mrb[168].mxu1 %v4110_v39 }
 0x430   :  { %7314 = vmatprep.mubr.msk.f32.mxu1 %vm7832_vm1, %v7831_v0  ;;  %v11858_v33 = vld [vmem:[#allocation46_spill] sm:$0xff] }
 0x431   :  { %v4111_v54 = vmax.f32 %v3986_v29, 0.0  ;;  %v3856_v62 = vmul.f32 %v7538_v57, %v10008_v22  ;;  %4896 = vst.msk [vmem:[%s11760_s12 + $0x110] sm:$0xff] %vm4861_vm4, %v4408_v30  ;;  %v11145_v41 = vld [vmem:[%s11759_s11] ss:$0 sm:$0xff] }
 0x432   :  { %v3462_v47 = vpop.f32.mrb[180].mxu0  ;;  %v4412_v24 = vpop.f32.mrb[64].mxu1 }
 0x433   :  { %v3987_v3 = vadd.f32 %v10011_v51, %v3856_v62  ;;  %v7539_v1 = vadd.f32 %v3462_v47, %v11855_v28  ;;  %v4413_v26 = vadd.f32 %v10655_v63, %v4412_v24  ;;  %v6915_v9 = vpop.f32.mrb[181].mxu0  ;;  %v7157_v10 = vpop.f32.mrb[65].mxu1  ;;  %7315 = vmatmul.mubr.f32.gmra.mrb[170].mxu1 %v4111_v54 }
 0x434   :  { %7317 = vmatprep.mubr.msk.f32.mxu1 %vm7832_vm1, %v7831_v0  ;;  %v11859_v9 = vld [vmem:[#allocation47_spill] sm:$0xff] }
 0x435   :  { %v4112_v6 = vmax.f32 %v3987_v3, 0.0  ;;  %v3857_v49 = vmul.f32 %v7539_v1, %v10008_v22  ;;  %4897 = vst.msk [vmem:[%s11760_s12 + $0x118] sm:$0xff] %vm4861_vm4, %v4413_v26 }
 0x436   :  { %v3467_v12 = vpop.f32.mrb[182].mxu0  ;;  %v4417_v14 = vpop.f32.mrb[66].mxu1 }
 0x437   :  { %v3988_v42 = vadd.f32 %v10011_v51, %v3857_v49  ;;  %v7540_v58 = vadd.f32 %v3467_v12, %v11856_v38  ;;  %v4418_v19 = vadd.f32 %v10655_v63, %v4417_v14  ;;  %v6918_v31 = vpop.f32.mrb[183].mxu0  ;;  %v7160_v34 = vpop.f32.mrb[67].mxu1  ;;  %7318 = vmatmul.mubr.f32.gmra.mrb[172].mxu1 %v4112_v6 }
 0x438   :  { %7320 = vmatprep.mubr.msk.f32.mxu1 %vm7832_vm1, %v7831_v0  ;;  %v11860_v31 = vld [vmem:[#allocation48_spill] sm:$0xff] }
 0x439   :  { %v4113_v25 = vmax.f32 %v3988_v42, 0.0  ;;  %v3858_v21 = vmul.f32 %v7540_v58, %v10008_v22  ;;  %4898 = vst.msk [vmem:[%s11760_s12 + $0x120] sm:$0xff] %vm4861_vm4, %v4418_v19 }
 0x43a   :  { %v3472_v13 = vpop.f32.mrb[184].mxu0  ;;  %v4422_v37 = vpop.f32.mrb[68].mxu1 }
 0x43b   :  { %v3989_v46 = vadd.f32 %v10011_v51, %v3858_v21  ;;  %v7541_v53 = vadd.f32 %v3472_v13, %v11857_v55  ;;  %v4423_v39 = vadd.f32 %v10655_v63, %v4422_v37  ;;  %v6921_v16 = vpop.f32.mrb[185].mxu0  ;;  %v7163_v43 = vpop.f32.mrb[69].mxu1  ;;  %7321 = vmatmul.mubr.f32.gmra.mrb[174].mxu1 %v4113_v25 }
 0x43c   :  { %7323 = vmatprep.mubr.msk.f32.mxu1 %vm7832_vm1, %v7831_v0  ;;  %v11861_v16 = vld [vmem:[#allocation49_spill] sm:$0xff] }
 0x43d   :  { %v4114_v5 = vmax.f32 %v3989_v46, 0.0  ;;  %v3859_v29 = vmul.f32 %v7541_v53, %v10008_v22  ;;  %4899 = vst.msk [vmem:[%s11760_s12 + $0x128] sm:$0xff] %vm4861_vm4, %v4423_v39 }
 0x43e   :  { %v3477_v20 = vpop.f32.mrb[186].mxu0  ;;  %v4427_v57 = vpop.f32.mrb[70].mxu1 }
 0x43f   :  { %v3990_v30 = vadd.f32 %v10011_v51, %v3859_v29  ;;  %v7542_v63 = vadd.f32 %v3477_v20, %v11858_v33  ;;  %v4428_v54 = vadd.f32 %v11145_v41, %v4427_v57  ;;  %v6924_v62 = vpop.f32.mrb[187].mxu0  ;;  %v7166_v47 = vpop.f32.mrb[71].mxu1  ;;  %7324 = vmatmul.mubr.f32.gmra.mrb[176].mxu1 %v4114_v5 }
 0x440   :  { %7326 = vmatprep.mubr.msk.f32.mxu1 %vm7832_vm1, %v7831_v0  ;;  %v11862_v62 = vld [vmem:[#allocation50_spill] sm:$0xff] }
 0x441   :  { %v4115_v24 = vmax.f32 %v3990_v30, 0.0  ;;  %v3860_v3 = vmul.f32 %v7542_v63, %v10008_v22  ;;  %4900 = vst.msk [vmem:[%s11760_s12 + $0x130] sm:$0xff] %vm4861_vm4, %v4428_v54 }
 0x442   :  { %v3482_v28 = vpop.f32.mrb[188].mxu0  ;;  %v4432_v1 = vpop.f32.mrb[72].mxu1 }
 0x443   :  { %v3991_v26 = vadd.f32 %v10011_v51, %v3860_v3  ;;  %v7543_v10 = vadd.f32 %v3482_v28, %v11859_v9  ;;  %v4433_v6 = vadd.f32 %v11145_v41, %v4432_v1  ;;  %v6927_v49 = vpop.f32.mrb[189].mxu0  ;;  %v7169_v12 = vpop.f32.mrb[73].mxu1  ;;  %7327 = vmatmul.mubr.f32.gmra.mrb[178].mxu1 %v4115_v24 }
 0x444   :  { %7329 = vmatprep.mubr.msk.f32.mxu1 %vm7832_vm1, %v7831_v0  ;;  %v11863_v49 = vld [vmem:[#allocation51_spill] sm:$0xff] }
 0x445   :  { %v4116_v14 = vmax.f32 %v3991_v26, 0.0  ;;  %v3861_v42 = vmul.f32 %v7543_v10, %v10008_v22  ;;  %4901 = vst.msk [vmem:[%s11760_s12 + $0x138] sm:$0xff] %vm4861_vm4, %v4433_v6 }
 0x446   :  { %v3487_v38 = vpop.f32.mrb[190].mxu0  ;;  %v4437_v58 = vpop.f32.mrb[74].mxu1 }
 0x447   :  { %v3992_v19 = vadd.f32 %v10011_v51, %v3861_v42  ;;  %v7544_v34 = vadd.f32 %v3487_v38, %v11860_v31  ;;  %v4438_v25 = vadd.f32 %v11145_v41, %v4437_v58  ;;  %v6930_v21 = vpop.f32.mrb[191].mxu0  ;;  %v7172_v13 = vpop.f32.mrb[75].mxu1  ;;  %7330 = vmatmul.mubr.f32.gmra.mrb[180].mxu1 %v4116_v14 }
 0x448   :  { %7332 = vmatprep.mubr.msk.f32.mxu1 %vm7832_vm1, %v7831_v0  ;;  %v11864_v21 = vld [vmem:[#allocation52_spill] sm:$0xff] }
 0x449   :  { %v4117_v37 = vmax.f32 %v3992_v19, 0.0  ;;  %v3862_v46 = vmul.f32 %v7544_v34, %v10008_v22  ;;  %4902 = vst.msk [vmem:[%s11760_s12 + $0x140] sm:$0xff] %vm4861_vm4, %v4438_v25 }
 0x44a   :  { %v3492_v55 = vpop.f32.mrb[192].mxu0  ;;  %v4442_v53 = vpop.f32.mrb[76].mxu1 }
 0x44b   :  { %v3993_v39 = vadd.f32 %v10011_v51, %v3862_v46  ;;  %v7545_v43 = vadd.f32 %v3492_v55, %v11861_v16  ;;  %v4443_v5 = vadd.f32 %v11145_v41, %v4442_v53  ;;  %v6933_v29 = vpop.f32.mrb[193].mxu0  ;;  %v7175_v20 = vpop.f32.mrb[77].mxu1  ;;  %7333 = vmatmul.mubr.f32.gmra.mrb[182].mxu1 %v4117_v37 }
 0x44c   :  { %7335 = vmatprep.mubr.msk.f32.mxu1 %vm7832_vm1, %v7831_v0  ;;  %v11865_v29 = vld [vmem:[#allocation53_spill] sm:$0xff] }
 0x44d   :  { %v4118_v57 = vmax.f32 %v3993_v39, 0.0  ;;  %v3863_v30 = vmul.f32 %v7545_v43, %v10008_v22  ;;  %4903 = vst.msk [vmem:[%s11760_s12 + $0x148] sm:$0xff] %vm4861_vm4, %v4443_v5 }
 0x44e   :  { %v3497_v33 = vpop.f32.mrb[194].mxu0  ;;  %v4447_v63 = vpop.f32.mrb[78].mxu1 }
 0x44f   :  { %v3994_v54 = vadd.f32 %v10011_v51, %v3863_v30  ;;  %v7546_v47 = vadd.f32 %v3497_v33, %v11862_v62  ;;  %v4448_v24 = vadd.f32 %v11145_v41, %v4447_v63  ;;  %v6936_v3 = vpop.f32.mrb[195].mxu0  ;;  %v7178_v28 = vpop.f32.mrb[79].mxu1  ;;  %7336 = vmatmul.mubr.f32.gmra.mrb[184].mxu1 %v4118_v57 }
 0x450   :  { %7338 = vmatprep.mubr.msk.f32.mxu1 %vm7832_vm1, %v7831_v0 }
 0x451   :  { %v4119_v1 = vmax.f32 %v3994_v54, 0.0  ;;  %v3864_v26 = vmul.f32 %v7546_v47, %v10008_v22  ;;  %4904 = vst.msk [vmem:[%s11760_s12 + $0x150] sm:$0xff] %vm4861_vm4, %v4448_v24 }
 0x452   :  { %v3502_v9 = vpop.f32.mrb[196].mxu0  ;;  %v4452_v10 = vpop.f32.mrb[80].mxu1 }
 0x453   :  { %v3995_v6 = vadd.f32 %v10011_v51, %v3864_v26  ;;  %v7547_v12 = vadd.f32 %v3502_v9, %v11863_v49  ;;  %v4453_v14 = vadd.f32 %v11145_v41, %v4452_v10  ;;  %v6939_v42 = vpop.f32.mrb[197].mxu0  ;;  %v7181_v38 = vpop.f32.mrb[81].mxu1  ;;  %7339 = vmatmul.mubr.f32.gmra.mrb[186].mxu1 %v4119_v1 }
 0x454   :  { %7341 = vmatprep.mubr.msk.f32.mxu1 %vm7832_vm1, %v7831_v0 }
 0x455   :  { %v4120_v58 = vmax.f32 %v3995_v6, 0.0  ;;  %v3865_v19 = vmul.f32 %v7547_v12, %v10008_v22  ;;  %4905 = vst.msk [vmem:[%s11760_s12 + $0x158] sm:$0xff] %vm4861_vm4, %v4453_v14  ;;  %v11866_v12 = vld [vmem:[#allocation54_spill] sm:$0xff] }
 0x456   :  { %v3507_v31 = vpop.f32.mrb[198].mxu0  ;;  %v4457_v34 = vpop.f32.mrb[82].mxu1 }
 0x457   :  { %v3996_v25 = vadd.f32 %v10011_v51, %v3865_v19  ;;  %v7548_v13 = vadd.f32 %v3507_v31, %v11864_v21  ;;  %v4458_v37 = vadd.f32 %v11145_v41, %v4457_v34  ;;  %v6942_v46 = vpop.f32.mrb[199].mxu0  ;;  %v7184_v55 = vpop.f32.mrb[83].mxu1  ;;  %7342 = vmatmul.mubr.f32.gmra.mrb[188].mxu1 %v4120_v58 }
 0x458   :  { %7344 = vmatprep.mubr.msk.f32.mxu1 %vm7832_vm1, %v7831_v0 }
 0x459   :  { %v4121_v53 = vmax.f32 %v3996_v25, 0.0  ;;  %v3866_v39 = vmul.f32 %v7548_v13, %v10008_v22  ;;  %4906 = vst.msk [vmem:[%s11760_s12 + $0x160] sm:$0xff] %vm4861_vm4, %v4458_v37 }
 0x45a   :  { %v3512_v16 = vpop.f32.mrb[200].mxu0  ;;  %v4462_v43 = vpop.f32.mrb[84].mxu1 }
 0x45b   :  { %v3997_v5 = vadd.f32 %v10011_v51, %v3866_v39  ;;  %v7549_v20 = vadd.f32 %v3512_v16, %v11865_v29  ;;  %v4463_v57 = vadd.f32 %v11145_v41, %v4462_v43  ;;  %v6945_v30 = vpop.f32.mrb[201].mxu0  ;;  %v7187_v33 = vpop.f32.mrb[85].mxu1  ;;  %7345 = vmatmul.mubr.f32.gmra.mrb[190].mxu1 %v4121_v53 }
 0x45c   :  { %7347 = vmatprep.mubr.msk.f32.mxu1 %vm7832_vm1, %v7831_v0 }
 0x45d   :  { %v4122_v63 = vmax.f32 %v3997_v5, 0.0  ;;  %v3867_v54 = vmul.f32 %v7549_v20, %v10008_v22  ;;  %4907 = vst.msk [vmem:[%s11760_s12 + $0x168] sm:$0xff] %vm4861_vm4, %v4463_v57 }
 0x45e   :  { %v3517_v62 = vpop.f32.mrb[202].mxu0  ;;  %v4467_v47 = vpop.f32.mrb[86].mxu1 }
 0x45f   :  { %v3998_v24 = vadd.f32 %v10011_v51, %v3867_v54  ;;  %v7550_v3 = vadd.f32 %v3517_v62, %v10001_v59  ;;  %v4468_v28 = vadd.f32 %v11145_v41, %v4467_v47  ;;  %v6948_v1 = vpop.f32.mrb[203].mxu0  ;;  %v7190_v26 = vpop.f32.mrb[87].mxu1  ;;  %7348 = vmatmul.mubr.f32.gmra.mrb[192].mxu1 %v4122_v63 }
 0x460   :  { %7350 = vmatprep.mubr.msk.f32.mxu1 %vm7832_vm1, %v7831_v0 }
 0x461   :  { %v4123_v9 = vmax.f32 %v3998_v24, 0.0  ;;  %v3868_v10 = vmul.f32 %v7550_v3, %v10008_v22  ;;  %4908 = vst.msk [vmem:[%s11760_s12 + $0x170] sm:$0xff] %vm4861_vm4, %v4468_v28 }
 0x462   :  { %v3522_v6 = vpop.f32.mrb[204].mxu0  ;;  %v4472_v49 = vpop.f32.mrb[88].mxu1 }
 0x463   :  { %v3999_v59 = vadd.f32 %v10011_v51, %v3868_v10  ;;  %v7551_v14 = vadd.f32 %v3522_v6, %v11866_v12  ;;  %v4473_v42 = vadd.f32 %v11145_v41, %v4472_v49  ;;  %v6951_v38 = vpop.f32.mrb[205].mxu0  ;;  %v7193_v58 = vpop.f32.mrb[89].mxu1  ;;  %7351 = vmatmul.mubr.f32.gmra.mrb[194].mxu1 %v4123_v9 }
 0x464   :  { %7353 = vmatprep.mubr.msk.f32.mxu1 %vm7832_vm1, %v7831_v0 }
 0x465   :  { %v4124_v19 = vmax.f32 %v3999_v59, 0.0  ;;  %v3869_v31 = vmul.f32 %v7551_v14, %v10008_v22  ;;  %4909 = vst.msk [vmem:[%s11760_s12 + $0x178] sm:$0xff] %vm4861_vm4, %v4473_v42 }
 0x466   :  { %v3527_v34 = vpop.f32.mrb[206].mxu0  ;;  %v4477_v25 = vpop.f32.mrb[90].mxu1 }
 0x467   :  { %v4000_v21 = vadd.f32 %v10011_v51, %v3869_v31  ;;  %v7552_v13 = vadd.f32 %v3527_v34, %v10025_v4  ;;  %v4478_v37 = vadd.f32 %v11145_v41, %v4477_v25  ;;  %v6954_v46 = vpop.f32.mrb[207].mxu0  ;;  %v7196_v55 = vpop.f32.mrb[91].mxu1  ;;  %7354 = vmatmul.mubr.f32.gmra.mrb[196].mxu1 %v4124_v19 }
 0x468   :  { %7356 = vmatprep.mubr.msk.f32.mxu1 %vm7832_vm1, %v7831_v0 }
 0x469   :  { %v4125_v53 = vmax.f32 %v4000_v21, 0.0  ;;  %v3870_v39 = vmul.f32 %v7552_v13, %v10008_v22  ;;  %4910 = vst.msk [vmem:[%s11760_s12 + $0x180] sm:$0xff] %vm4861_vm4, %v4478_v37 }
 0x46a   :  { %v3532_v16 = vpop.f32.mrb[208].mxu0  ;;  %v4482_v43 = vpop.f32.mrb[92].mxu1 }
 0x46b   :  { %v4001_v4 = vadd.f32 %v10011_v51, %v3870_v39  ;;  %v7553_v5 = vadd.f32 %v3532_v16, %v10036_v35  ;;  %v4483_v29 = vadd.f32 %v11145_v41, %v4482_v43  ;;  %v6957_v20 = vpop.f32.mrb[209].mxu0  ;;  %v7199_v57 = vpop.f32.mrb[93].mxu1  ;;  %7357 = vmatmul.mubr.f32.gmra.mrb[198].mxu1 %v4125_v53 }
 0x46c   :  { %7359 = vmatprep.mubr.msk.f32.mxu1 %vm7832_vm1, %v7831_v0 }
 0x46d   :  { %v4126_v30 = vmax.f32 %v4001_v4, 0.0  ;;  %v3871_v33 = vmul.f32 %v7553_v5, %v10008_v22  ;;  %4911 = vst.msk [vmem:[%s11760_s12 + $0x188] sm:$0xff] %vm4861_vm4, %v4483_v29 }
 0x46e   :  { %v3537_v63 = vpop.f32.mrb[210].mxu0  ;;  %v4487_v54 = vpop.f32.mrb[94].mxu1 }
 0x46f   :  { %v4002_v35 = vadd.f32 %v10011_v51, %v3871_v33  ;;  %v7554_v62 = vadd.f32 %v3537_v63, %v10049_v8  ;;  %v4488_v47 = vadd.f32 %v11145_v41, %v4487_v54  ;;  %v6960_v24 = vpop.f32.mrb[211].mxu0  ;;  %v7202_v3 = vpop.f32.mrb[95].mxu1  ;;  %7360 = vmatmul.mubr.f32.gmra.mrb[200].mxu1 %v4126_v30 }
 0x470   :  { %7362 = vmatprep.mubr.msk.f32.mxu1 %vm7832_vm1, %v7831_v0 }
 0x471   :  { %v4127_v28 = vmax.f32 %v4002_v35, 0.0  ;;  %v3872_v1 = vmul.f32 %v7554_v62, %v10008_v22  ;;  %4912 = vst.msk [vmem:[%s11760_s12 + $0x190] sm:$0xff] %vm4861_vm4, %v4488_v47 }
 0x472   :  { %v3542_v26 = vpop.f32.mrb[212].mxu0  ;;  %v4492_v9 = vpop.f32.mrb[96].mxu1 }
 0x473   :  { %v4003_v8 = vadd.f32 %v10011_v51, %v3872_v1  ;;  %v7555_v10 = vadd.f32 %v3542_v26, %v10062_v18  ;;  %v4493_v6 = vadd.f32 %v11145_v41, %v4492_v9  ;;  %v6963_v49 = vpop.f32.mrb[213].mxu0  ;;  %v7205_v59 = vpop.f32.mrb[97].mxu1  ;;  %7363 = vmatmul.mubr.f32.gmra.mrb[202].mxu1 %v4127_v28 }
 0x474   :  { %7365 = vmatprep.mubr.msk.f32.mxu1 %vm7832_vm1, %v7831_v0 }
 0x475   :  { %v4128_v12 = vmax.f32 %v4003_v8, 0.0  ;;  %v3873_v14 = vmul.f32 %v7555_v10, %v10008_v22  ;;  %4913 = vst.msk [vmem:[%s11760_s12 + $0x198] sm:$0xff] %vm4861_vm4, %v4493_v6 }
 0x476   :  { %v3547_v42 = vpop.f32.mrb[214].mxu0  ;;  %v4497_v38 = vpop.f32.mrb[98].mxu1 }
 0x477   :  { %v4004_v18 = vadd.f32 %v10011_v51, %v3873_v14  ;;  %v7556_v58 = vadd.f32 %v3547_v42, %v10075_v23  ;;  %v4498_v19 = vadd.f32 %v11145_v41, %v4497_v38  ;;  %v6966_v31 = vpop.f32.mrb[215].mxu0  ;;  %v7208_v34 = vpop.f32.mrb[99].mxu1  ;;  %7366 = vmatmul.mubr.f32.gmra.mrb[204].mxu1 %v4128_v12 }
 0x478   :  { %7368 = vmatprep.mubr.msk.f32.mxu1 %vm7832_vm1, %v7831_v0 }
 0x479   :  { %v4129_v25 = vmax.f32 %v4004_v18, 0.0  ;;  %v3874_v21 = vmul.f32 %v7556_v58, %v10008_v22  ;;  %4914 = vst.msk [vmem:[%s11760_s12 + $0x1a0] sm:$0xff] %vm4861_vm4, %v4498_v19 }
 0x47a   :  { %v3552_v13 = vpop.f32.mrb[216].mxu0  ;;  %v4502_v37 = vpop.f32.mrb[100].mxu1 }
 0x47b   :  { %v4005_v23 = vadd.f32 %v10011_v51, %v3874_v21  ;;  %v7557_v46 = vadd.f32 %v3552_v13, %v10088_v27  ;;  %v4503_v55 = vadd.f32 %v11145_v41, %v4502_v37  ;;  %v6969_v53 = vpop.f32.mrb[217].mxu0  ;;  %v7211_v39 = vpop.f32.mrb[101].mxu1  ;;  %7369 = vmatmul.mubr.f32.gmra.mrb[206].mxu1 %v4129_v25 }
 0x47c   :  { %7371 = vmatprep.mubr.msk.f32.mxu1 %vm7832_vm1, %v7831_v0 }
 0x47d   :  { %v4130_v16 = vmax.f32 %v4005_v23, 0.0  ;;  %v3875_v43 = vmul.f32 %v7557_v46, %v10008_v22  ;;  %4915 = vst.msk [vmem:[%s11760_s12 + $0x1a8] sm:$0xff] %vm4861_vm4, %v4503_v55 }
 0x47e   :  { %v3557_v4 = vpop.f32.mrb[218].mxu0  ;;  %v4507_v5 = vpop.f32.mrb[102].mxu1 }
 0x47f   :  { %v4006_v27 = vadd.f32 %v10011_v51, %v3875_v43  ;;  %v7558_v29 = vadd.f32 %v3557_v4, %v10101_v61  ;;  %v4508_v20 = vadd.f32 %v11145_v41, %v4507_v5  ;;  %v6972_v57 = vpop.f32.mrb[219].mxu0  ;;  %v7214_v30 = vpop.f32.mrb[103].mxu1  ;;  %7372 = vmatmul.mubr.f32.gmra.mrb[208].mxu1 %v4130_v16 }
 0x480   :  { %7374 = vmatprep.mubr.msk.f32.mxu1 %vm7832_vm1, %v7831_v0 }
 0x481   :  { %v4131_v33 = vmax.f32 %v4006_v27, 0.0  ;;  %v3876_v63 = vmul.f32 %v7558_v29, %v10008_v22  ;;  %4916 = vst.msk [vmem:[%s11760_s12 + $0x1b0] sm:$0xff] %vm4861_vm4, %v4508_v20 }
 0x482   :  { %v3562_v54 = vpop.f32.mrb[220].mxu0  ;;  %v4512_v35 = vpop.f32.mrb[104].mxu1 }
 0x483   :  { %v4007_v61 = vadd.f32 %v10011_v51, %v3876_v63  ;;  %v7559_v62 = vadd.f32 %v3562_v54, %v10114_v32  ;;  %v4513_v47 = vadd.f32 %v11145_v41, %v4512_v35  ;;  %v6975_v24 = vpop.f32.mrb[221].mxu0  ;;  %v7217_v3 = vpop.f32.mrb[105].mxu1  ;;  %7375 = vmatmul.mubr.f32.gmra.mrb[210].mxu1 %v4131_v33 }
 0x484   :  { %7377 = vmatprep.mubr.msk.f32.mxu1 %vm7832_vm1, %v7831_v0 }
 0x485   :  { %v4132_v28 = vmax.f32 %v4007_v61, 0.0  ;;  %v3877_v1 = vmul.f32 %v7559_v62, %v10008_v22  ;;  %4917 = vst.msk [vmem:[%s11760_s12 + $0x1b8] sm:$0xff] %vm4861_vm4, %v4513_v47 }
 0x486   :  { %v3567_v26 = vpop.f32.mrb[222].mxu0  ;;  %v4517_v9 = vpop.f32.mrb[106].mxu1 }
 0x487   :  { %v4008_v32 = vadd.f32 %v10011_v51, %v3877_v1  ;;  %v7560_v8 = vadd.f32 %v3567_v26, %v10127_v36  ;;  %v4518_v10 = vadd.f32 %v11145_v41, %v4517_v9  ;;  %v6978_v6 = vpop.f32.mrb[223].mxu0  ;;  %v7220_v49 = vpop.f32.mrb[107].mxu1  ;;  %7378 = vmatmul.mubr.f32.gmra.mrb[212].mxu1 %v4132_v28 }
 0x488   :  { %7380 = vmatprep.mubr.msk.f32.mxu1 %vm7832_vm1, %v7831_v0 }
 0x489   :  { %v4133_v59 = vmax.f32 %v4008_v32, 0.0  ;;  %v3878_v12 = vmul.f32 %v7560_v8, %v10008_v22  ;;  %4918 = vst.msk [vmem:[%s11760_s12 + $0x1c0] sm:$0xff] %vm4861_vm4, %v4518_v10 }
 0x48a   :  { %v3572_v14 = vpop.f32.mrb[224].mxu0  ;;  %v4522_v42 = vpop.f32.mrb[108].mxu1 }
 0x48b   :  { %v4009_v36 = vadd.f32 %v10011_v51, %v3878_v12  ;;  %v7561_v38 = vadd.f32 %v3572_v14, %v10140_v50  ;;  %v4523_v18 = vadd.f32 %v11145_v41, %v4522_v42  ;;  %v6981_v58 = vpop.f32.mrb[225].mxu0  ;;  %v7223_v19 = vpop.f32.mrb[109].mxu1  ;;  %7381 = vmatmul.mubr.f32.gmra.mrb[214].mxu1 %v4133_v59 }
 0x48c   :  { %7383 = vmatprep.mubr.msk.f32.mxu1 %vm7832_vm1, %v7831_v0 }
 0x48d   :  { %v4134_v31 = vmax.f32 %v4009_v36, 0.0  ;;  %v3879_v34 = vmul.f32 %v7561_v38, %v10008_v22  ;;  %4919 = vst.msk [vmem:[%s11760_s12 + $0x1c8] sm:$0xff] %vm4861_vm4, %v4523_v18 }
 0x48e   :  { %v3577_v25 = vpop.f32.mrb[226].mxu0  ;;  %v4527_v21 = vpop.f32.mrb[110].mxu1 }
 0x48f   :  { %v4010_v50 = vadd.f32 %v10011_v51, %v3879_v34  ;;  %v7562_v13 = vadd.f32 %v3577_v25, %v10153_v45  ;;  %v4528_v37 = vadd.f32 %v11145_v41, %v4527_v21  ;;  %v6984_v23 = vpop.f32.mrb[227].mxu0  ;;  %v7226_v46 = vpop.f32.mrb[111].mxu1  ;;  %7384 = vmatmul.mubr.f32.gmra.mrb[216].mxu1 %v4134_v31 }
 0x490   :  { %7386 = vmatprep.mubr.msk.f32.mxu1 %vm7832_vm1, %v7831_v0 }
 0x491   :  { %v4135_v55 = vmax.f32 %v4010_v50, 0.0  ;;  %v3880_v53 = vmul.f32 %v7562_v13, %v10008_v22  ;;  %4920 = vst.msk [vmem:[%s11760_s12 + $0x1d0] sm:$0xff] %vm4861_vm4, %v4528_v37 }
 0x492   :  { %v3582_v39 = vpop.f32.mrb[228].mxu0  ;;  %v4532_v16 = vpop.f32.mrb[112].mxu1 }
 0x493   :  { %v4011_v45 = vadd.f32 %v10011_v51, %v3880_v53  ;;  %v7563_v43 = vadd.f32 %v3582_v39, %v10166_v17  ;;  %v4533_v4 = vadd.f32 %v11145_v41, %v4532_v16  ;;  %v6987_v5 = vpop.f32.mrb[229].mxu0  ;;  %v7229_v27 = vpop.f32.mrb[113].mxu1  ;;  %7387 = vmatmul.mubr.f32.gmra.mrb[218].mxu1 %v4135_v55 }
 0x494   :  { %7389 = vmatprep.mubr.msk.f32.mxu1 %vm7832_vm1, %v7831_v0 }
 0x495   :  { %v4136_v29 = vmax.f32 %v4011_v45, 0.0  ;;  %v3881_v20 = vmul.f32 %v7563_v43, %v10008_v22  ;;  %4921 = vst.msk [vmem:[%s11760_s12 + $0x1d8] sm:$0xff] %vm4861_vm4, %v4533_v4 }
 0x496   :  { %v3587_v57 = vpop.f32.mrb[230].mxu0  ;;  %v4537_v30 = vpop.f32.mrb[114].mxu1 }
 0x497   :  { %v4012_v17 = vadd.f32 %v10011_v51, %v3881_v20  ;;  %v7564_v33 = vadd.f32 %v3587_v57, %v10179_v40  ;;  %v4538_v63 = vadd.f32 %v11145_v41, %v4537_v30  ;;  %v6990_v54 = vpop.f32.mrb[231].mxu0  ;;  %v7232_v35 = vpop.f32.mrb[115].mxu1  ;;  %7390 = vmatmul.mubr.f32.gmra.mrb[220].mxu1 %v4136_v29 }
 0x498   :  { %7392 = vmatprep.mubr.msk.f32.mxu1 %vm7832_vm1, %v7831_v0 }
 0x499   :  { %v4137_v61 = vmax.f32 %v4012_v17, 0.0  ;;  %v3882_v62 = vmul.f32 %v7564_v33, %v10008_v22  ;;  %4922 = vst.msk [vmem:[%s11760_s12 + $0x1e0] sm:$0xff] %vm4861_vm4, %v4538_v63 }
 0x49a   :  { %v3592_v47 = vpop.f32.mrb[232].mxu0  ;;  %v4542_v24 = vpop.f32.mrb[116].mxu1 }
 0x49b   :  { %v4013_v40 = vadd.f32 %v10011_v51, %v3882_v62  ;;  %v7565_v3 = vadd.f32 %v3592_v47, %v10192_v44  ;;  %v4543_v28 = vadd.f32 %v11145_v41, %v4542_v24  ;;  %v6993_v1 = vpop.f32.mrb[233].mxu0  ;;  %v7235_v26 = vpop.f32.mrb[117].mxu1  ;;  %7393 = vmatmul.mubr.f32.gmra.mrb[222].mxu1 %v4137_v61 }
 0x49c   :  { %7395 = vmatprep.mubr.msk.f32.mxu1 %vm7832_vm1, %v7831_v0 }
 0x49d   :  { %v4138_v9 = vmax.f32 %v4013_v40, 0.0  ;;  %v3883_v32 = vmul.f32 %v7565_v3, %v10008_v22  ;;  %4923 = vst.msk [vmem:[%s11760_s12 + $0x1e8] sm:$0xff] %vm4861_vm4, %v4543_v28 }
 0x49e   :  { %v3597_v8 = vpop.f32.mrb[234].mxu0  ;;  %v4547_v10 = vpop.f32.mrb[118].mxu1 }
 0x49f   :  { %v4014_v44 = vadd.f32 %v10011_v51, %v3883_v32  ;;  %v7566_v6 = vadd.f32 %v3597_v8, %v10205_v48  ;;  %v4548_v49 = vadd.f32 %v11145_v41, %v4547_v10  ;;  %v6996_v59 = vpop.f32.mrb[235].mxu0  ;;  %v7238_v12 = vpop.f32.mrb[119].mxu1  ;;  %7396 = vmatmul.mubr.f32.gmra.mrb[224].mxu1 %v4138_v9 }
 0x4a0   :  { %7398 = vmatprep.mubr.msk.f32.mxu1 %vm7832_vm1, %v7831_v0 }
 0x4a1   :  { %v4139_v14 = vmax.f32 %v4014_v44, 0.0  ;;  %v3884_v42 = vmul.f32 %v7566_v6, %v10008_v22  ;;  %4924 = vst.msk [vmem:[%s11760_s12 + $0x1f0] sm:$0xff] %vm4861_vm4, %v4548_v49 }
 0x4a2   :  { %v3602_v36 = vpop.f32.mrb[236].mxu0  ;;  %v4552_v38 = vpop.f32.mrb[120].mxu1 }
 0x4a3   :  { %v4015_v48 = vadd.f32 %v10011_v51, %v3884_v42  ;;  %v7567_v18 = vadd.f32 %v3602_v36, %v10218_v52  ;;  %v4553_v58 = vadd.f32 %v11145_v41, %v4552_v38  ;;  %v6999_v19 = vpop.f32.mrb[237].mxu0  ;;  %v7241_v31 = vpop.f32.mrb[121].mxu1  ;;  %7399 = vmatmul.mubr.f32.gmra.mrb[226].mxu1 %v4139_v14 }
 0x4a4   :  { %7401 = vmatprep.mubr.msk.f32.mxu1 %vm7832_vm1, %v7831_v0 }
 0x4a5   :  { %v4140_v34 = vmax.f32 %v4015_v48, 0.0  ;;  %v3885_v25 = vmul.f32 %v7567_v18, %v10008_v22  ;;  %4925 = vst.msk [vmem:[%s11760_s12 + $0x1f8] sm:$0xff] %vm4861_vm4, %v4553_v58 }
 0x4a6   :  { %v3607_v21 = vpop.f32.mrb[238].mxu0  ;;  %v4557_v50 = vpop.f32.mrb[122].mxu1 }
 0x4a7   :  { %v4016_v52 = vadd.f32 %v10011_v51, %v3885_v25  ;;  %v7568_v13 = vadd.f32 %v3607_v21, %v10231_v56  ;;  %v4558_v37 = vadd.f32 %v11145_v41, %v4557_v50  ;;  %v7002_v23 = vpop.f32.mrb[239].mxu0  ;;  %v7244_v46 = vpop.f32.mrb[123].mxu1  ;;  %7402 = vmatmul.mubr.f32.gmra.mrb[228].mxu1 %v4140_v34 }
 0x4a8   :  { %7404 = vmatprep.mubr.msk.f32.mxu1 %vm7832_vm1, %v7831_v0 }
 0x4a9   :  { %v4141_v55 = vmax.f32 %v4016_v52, 0.0  ;;  %v3886_v53 = vmul.f32 %v7568_v13, %v10008_v22  ;;  %4926 = vst.msk [vmem:[%s11760_s12 + $0x200] sm:$0xff] %vm4861_vm4, %v4558_v37 }
 0x4aa   :  { %v3612_v39 = vpop.f32.mrb[240].mxu0  ;;  %v4562_v16 = vpop.f32.mrb[124].mxu1 }
 0x4ab   :  { %v4017_v56 = vadd.f32 %v10011_v51, %v3886_v53  ;;  %v7569_v45 = vadd.f32 %v3612_v39, %v10244_v60  ;;  %v4563_v43 = vadd.f32 %v11145_v41, %v4562_v16  ;;  %v7005_v4 = vpop.f32.mrb[241].mxu0  ;;  %v7247_v5 = vpop.f32.mrb[125].mxu1  ;;  %7405 = vmatmul.mubr.f32.gmra.mrb[230].mxu1 %v4141_v55 }
 0x4ac   :  { %7407 = vmatprep.mubr.msk.f32.mxu1 %vm7832_vm1, %v7831_v0 }
 0x4ad   :  { %v4142_v27 = vmax.f32 %v4017_v56, 0.0  ;;  %v3887_v29 = vmul.f32 %v7569_v45, %v10008_v22  ;;  %4927 = vst.msk [vmem:[%s11760_s12 + $0x208] sm:$0xff] %vm4861_vm4, %v4563_v43 }
 0x4ae   :  { %v3617_v20 = vpop.f32.mrb[242].mxu0  ;;  %v4567_v57 = vpop.f32.mrb[126].mxu1 }
 0x4af   :  { %v4018_v60 = vadd.f32 %v10011_v51, %v3887_v29  ;;  %v7570_v30 = vadd.f32 %v3617_v20, %v10257_v2  ;;  %v4568_v17 = vadd.f32 %v11145_v41, %v4567_v57  ;;  %v7008_v33 = vpop.f32.mrb[243].mxu0  ;;  %v7250_v63 = vpop.f32.mrb[127].mxu1  ;;  %7408 = vmatmul.mubr.f32.gmra.mrb[232].mxu1 %v4142_v27 }
 0x4b0   :  { %7410 = vmatprep.mubr.msk.f32.mxu1 %vm7832_vm1, %v7831_v0 }
 0x4b1   :  { %v4143_v54 = vmax.f32 %v4018_v60, 0.0  ;;  %v3888_v35 = vmul.f32 %v7570_v30, %v10008_v22  ;;  %4928 = vst.msk [vmem:[%s11760_s12 + $0x210] sm:$0xff] %vm4861_vm4, %v4568_v17 }
 0x4b2   :  { %v3622_v61 = vpop.f32.mrb[244].mxu0  ;;  %v4572_v62 = vpop.f32.mrb[128].mxu1 }
 0x4b3   :  { %v4019_v2 = vadd.f32 %v10011_v51, %v3888_v35  ;;  %v7571_v47 = vadd.f32 %v3622_v61, %v10270_v7  ;;  %v4573_v24 = vadd.f32 %v11145_v41, %v4572_v62  ;;  %v7011_v40 = vpop.f32.mrb[245].mxu0  ;;  %v7253_v3 = vpop.f32.mrb[129].mxu1  ;;  %7411 = vmatmul.mubr.f32.gmra.mrb[234].mxu1 %v4143_v54 }
 0x4b4   :  { %7413 = vmatprep.mubr.msk.f32.mxu1 %vm7832_vm1, %v7831_v0 }
 0x4b5   :  { %v4144_v28 = vmax.f32 %v4019_v2, 0.0  ;;  %v3889_v1 = vmul.f32 %v7571_v47, %v10008_v22  ;;  %4929 = vst.msk [vmem:[%s11760_s12 + $0x218] sm:$0xff] %vm4861_vm4, %v4573_v24 }
 0x4b6   :  { %v3627_v26 = vpop.f32.mrb[246].mxu0  ;;  %v4577_v9 = vpop.f32.mrb[130].mxu1 }
 0x4b7   :  { %v4020_v7 = vadd.f32 %v10011_v51, %v3889_v1  ;;  %v7572_v32 = vadd.f32 %v3627_v26, %v10283_v11  ;;  %v4578_v8 = vadd.f32 %v11145_v41, %v4577_v9  ;;  %v7014_v10 = vpop.f32.mrb[247].mxu0  ;;  %v7256_v44 = vpop.f32.mrb[131].mxu1  ;;  %7414 = vmatmul.mubr.f32.gmra.mrb[236].mxu1 %v4144_v28 }
 0x4b8   :  { %7416 = vmatprep.mubr.msk.f32.mxu1 %vm7832_vm1, %v7831_v0 }
 0x4b9   :  { %v4145_v6 = vmax.f32 %v4020_v7, 0.0  ;;  %v3890_v49 = vmul.f32 %v7572_v32, %v10008_v22  ;;  %4930 = vst.msk [vmem:[%s11760_s12 + $0x220] sm:$0xff] %vm4861_vm4, %v4578_v8 }
 0x4ba   :  { %v3632_v59 = vpop.f32.mrb[248].mxu0  ;;  %v4582_v12 = vpop.f32.mrb[132].mxu1 }
 0x4bb   :  { %v4021_v11 = vadd.f32 %v10011_v51, %v3890_v49  ;;  %v7573_v14 = vadd.f32 %v3632_v59, %v10296_v15  ;;  %v4583_v42 = vadd.f32 %v11145_v41, %v4582_v12  ;;  %v7017_v36 = vpop.f32.mrb[249].mxu0  ;;  %v7259_v38 = vpop.f32.mrb[133].mxu1  ;;  %7417 = vmatmul.mubr.f32.gmra.mrb[238].mxu1 %v4145_v6 }
 0x4bc   :  { %7419 = vmatprep.mubr.msk.f32.mxu1 %vm7832_vm1, %v7831_v0 }
 0x4bd   :  { %v4146_v48 = vmax.f32 %v4021_v11, 0.0  ;;  %v3891_v18 = vmul.f32 %v7573_v14, %v10008_v22  ;;  %4931 = vst.msk [vmem:[%s11760_s12 + $0x228] sm:$0xff] %vm4861_vm4, %v4583_v42 }
 0x4be   :  { %v4587_v58 = vpop.f32.mrb[134].mxu1 }
 0x4bf   :  { %v4022_v19 = vadd.f32 %v10011_v51, %v3891_v18  ;;  %v4588_v15 = vadd.f32 %v11145_v41, %v4587_v58  ;;  %v7262_v31 = vpop.f32.mrb[135].mxu1  ;;  %7420 = vmatmul.mubr.f32.gmra.mrb[240].mxu1 %v4146_v48 }
 0x4c0   :  { %7422 = vmatprep.mubr.msk.f32.mxu1 %vm7832_vm1, %v7831_v0 }
 0x4c1   :  { %v4147_v34 = vmax.f32 %v4022_v19, 0.0  ;;  %4932 = vst.msk [vmem:[%s11760_s12 + $0x230] sm:$0xff] %vm4861_vm4, %v4588_v15 }
 0x4c2   :  { %v4592_v22 = vpop.f32.mrb[136].mxu1 }
 0x4c3   :  { %v4593_v25 = vadd.f32 %v11145_v41, %v4592_v22  ;;  %v7265_v21 = vpop.f32.mrb[137].mxu1  ;;  %7423 = vmatmul.mubr.f32.gmra.mrb[242].mxu1 %v4147_v34 }
 0x4c5   :  { %4933 = vst.msk [vmem:[%s11760_s12 + $0x238] sm:$0xff] %vm4861_vm4, %v4593_v25 }
 0x4c6   :  { %v4597_v51 = vpop.f32.mrb[138].mxu1 }
 0x4c7   :  { %v4598_v50 = vadd.f32 %v11145_v41, %v4597_v51  ;;  %v7268_v0 = vpop.f32.mrb[139].mxu1 }
 0x4c9   :  { %4934 = vst.msk [vmem:[%s11760_s12 + $0x240] sm:$0xff] %vm4861_vm4, %v4598_v50 }
 0x4ca   :  { %v4602_v52 = vpop.f32.mrb[140].mxu1 }
 0x4cb   :  { %v4603_v13 = vadd.f32 %v11145_v41, %v4602_v52  ;;  %v7271_v37 = vpop.f32.mrb[141].mxu1 }
 0x4cd   :  { %4935 = vst.msk [vmem:[%s11760_s12 + $0x248] sm:$0xff] %vm4861_vm4, %v4603_v13 }
 0x4ce   :  { %v4607_v23 = vpop.f32.mrb[142].mxu1 }
 0x4cf   :  { %v4608_v46 = vadd.f32 %v11145_v41, %v4607_v23  ;;  %v7274_v55 = vpop.f32.mrb[143].mxu1 }
 0x4d1   :  { %4936 = vst.msk [vmem:[%s11760_s12 + $0x250] sm:$0xff] %vm4861_vm4, %v4608_v46 }
 0x4d2   :  { %v4612_v53 = vpop.f32.mrb[144].mxu1 }
 0x4d3   :  { %v4613_v39 = vadd.f32 %v11145_v41, %v4612_v53  ;;  %v7277_v16 = vpop.f32.mrb[145].mxu1 }
 0x4d5   :  { %4937 = vst.msk [vmem:[%s11760_s12 + $0x258] sm:$0xff] %vm4861_vm4, %v4613_v39 }
 0x4d6   :  { %v4617_v56 = vpop.f32.mrb[146].mxu1 }
 0x4d7   :  { %v4618_v45 = vadd.f32 %v11145_v41, %v4617_v56  ;;  %v7280_v43 = vpop.f32.mrb[147].mxu1 }
 0x4d9   :  { %4938 = vst.msk [vmem:[%s11760_s12 + $0x260] sm:$0xff] %vm4861_vm4, %v4618_v45 }
 0x4da   :  { %v4622_v4 = vpop.f32.mrb[148].mxu1 }
 0x4db   :  { %v4623_v5 = vadd.f32 %v11145_v41, %v4622_v4  ;;  %v7283_v27 = vpop.f32.mrb[149].mxu1 }
 0x4dd   :  { %4939 = vst.msk [vmem:[%s11760_s12 + $0x268] sm:$0xff] %vm4861_vm4, %v4623_v5 }
 0x4de   :  { %v4627_v29 = vpop.f32.mrb[150].mxu1 }
 0x4df   :  { %v4628_v20 = vadd.f32 %v11145_v41, %v4627_v29  ;;  %v7286_v57 = vpop.f32.mrb[151].mxu1 }
 0x4e1   :  { %4940 = vst.msk [vmem:[%s11760_s12 + $0x270] sm:$0xff] %vm4861_vm4, %v4628_v20 }
 0x4e2   :  { %v4632_v60 = vpop.f32.mrb[152].mxu1 }
 0x4e3   :  { %v4633_v30 = vadd.f32 %v11145_v41, %v4632_v60  ;;  %v7289_v17 = vpop.f32.mrb[153].mxu1 }
 0x4e5   :  { %4941 = vst.msk [vmem:[%s11760_s12 + $0x278] sm:$0xff] %vm4861_vm4, %v4633_v30 }
 0x4e6   :  { %v4637_v33 = vpop.f32.mrb[154].mxu1 }
 0x4e7   :  { %v4638_v63 = vadd.f32 %v11145_v41, %v4637_v33  ;;  %v7292_v54 = vpop.f32.mrb[155].mxu1 }
 0x4e9   :  { %4942 = vst.msk [vmem:[%s11760_s12 + $0x280] sm:$0xff] %vm4861_vm4, %v4638_v63 }
 0x4ea   :  { %v4642_v35 = vpop.f32.mrb[156].mxu1 }
 0x4eb   :  { %v4643_v61 = vadd.f32 %v11145_v41, %v4642_v35  ;;  %v7295_v62 = vpop.f32.mrb[157].mxu1 }
 0x4ed   :  { %4943 = vst.msk [vmem:[%s11760_s12 + $0x288] sm:$0xff] %vm4861_vm4, %v4643_v61  ;;  %v11631_v61 = vld [vmem:[%s11759_s11] ss:$0 sm:$0xff] }
 0x4ee   :  { %v4647_v2 = vpop.f32.mrb[158].mxu1 }
 0x4ef   :  { %v4648_v47 = vadd.f32 %v11145_v41, %v4647_v2  ;;  %v7298_v24 = vpop.f32.mrb[159].mxu1 }
 0x4f1   :  { %4944 = vst.msk [vmem:[%s11760_s12 + $0x290] sm:$0xff] %vm4861_vm4, %v4648_v47 }
 0x4f2   :  { %v4652_v40 = vpop.f32.mrb[160].mxu1 }
 0x4f3   :  { %v4653_v3 = vadd.f32 %v11145_v41, %v4652_v40  ;;  %v7301_v28 = vpop.f32.mrb[161].mxu1 }
 0x4f5   :  { %4945 = vst.msk [vmem:[%s11760_s12 + $0x298] sm:$0xff] %vm4861_vm4, %v4653_v3 }
 0x4f6   :  { %v4657_v1 = vpop.f32.mrb[162].mxu1 }
 0x4f7   :  { %v4658_v26 = vadd.f32 %v11145_v41, %v4657_v1  ;;  %v7304_v9 = vpop.f32.mrb[163].mxu1 }
 0x4f9   :  { %4946 = vst.msk [vmem:[%s11760_s12 + $0x2a0] sm:$0xff] %vm4861_vm4, %v4658_v26 }
 0x4fa   :  { %v4662_v7 = vpop.f32.mrb[164].mxu1 }
 0x4fb   :  { %v4663_v32 = vadd.f32 %v11145_v41, %v4662_v7  ;;  %v7307_v8 = vpop.f32.mrb[165].mxu1 }
 0x4fd   :  { %4947 = vst.msk [vmem:[%s11760_s12 + $0x2a8] sm:$0xff] %vm4861_vm4, %v4663_v32 }
 0x4fe   :  { %v4667_v10 = vpop.f32.mrb[166].mxu1 }
 0x4ff   :  { %v4668_v44 = vadd.f32 %v11145_v41, %v4667_v10  ;;  %v7310_v6 = vpop.f32.mrb[167].mxu1 }
 0x501   :  { %4948 = vst.msk [vmem:[%s11760_s12 + $0x2b0] sm:$0xff] %vm4861_vm4, %v4668_v44 }
 0x502   :  { %v4672_v49 = vpop.f32.mrb[168].mxu1 }
 0x503   :  { %v4673_v59 = vadd.f32 %v11145_v41, %v4672_v49  ;;  %v7313_v12 = vpop.f32.mrb[169].mxu1 }
 0x505   :  { %4949 = vst.msk [vmem:[%s11760_s12 + $0x2b8] sm:$0xff] %vm4861_vm4, %v4673_v59 }
 0x506   :  { %v4677_v11 = vpop.f32.mrb[170].mxu1 }
 0x507   :  { %v4678_v14 = vadd.f32 %v11145_v41, %v4677_v11  ;;  %v7316_v42 = vpop.f32.mrb[171].mxu1 }
 0x509   :  { %4950 = vst.msk [vmem:[%s11760_s12 + $0x2c0] sm:$0xff] %vm4861_vm4, %v4678_v14 }
 0x50a   :  { %v4682_v36 = vpop.f32.mrb[172].mxu1 }
 0x50b   :  { %v4683_v38 = vadd.f32 %v11145_v41, %v4682_v36  ;;  %v7319_v48 = vpop.f32.mrb[173].mxu1 }
 0x50d   :  { %4951 = vst.msk [vmem:[%s11760_s12 + $0x2c8] sm:$0xff] %vm4861_vm4, %v4683_v38 }
 0x50e   :  { %v4687_v18 = vpop.f32.mrb[174].mxu1 }
 0x50f   :  { %v4688_v58 = vadd.f32 %v11145_v41, %v4687_v18  ;;  %v7322_v19 = vpop.f32.mrb[175].mxu1 }
 0x511   :  { %4952 = vst.msk [vmem:[%s11760_s12 + $0x2d0] sm:$0xff] %vm4861_vm4, %v4688_v58 }
 0x512   :  { %v4692_v15 = vpop.f32.mrb[176].mxu1 }
 0x513   :  { %v4693_v31 = vadd.f32 %v11145_v41, %v4692_v15  ;;  %v7325_v34 = vpop.f32.mrb[177].mxu1 }
 0x515   :  { %4953 = vst.msk [vmem:[%s11760_s12 + $0x2d8] sm:$0xff] %vm4861_vm4, %v4693_v31 }
 0x516   :  { %v4697_v22 = vpop.f32.mrb[178].mxu1 }
 0x517   :  { %v4698_v25 = vadd.f32 %v11145_v41, %v4697_v22  ;;  %v7328_v21 = vpop.f32.mrb[179].mxu1 }
 0x519   :  { %4954 = vst.msk [vmem:[%s11760_s12 + $0x2e0] sm:$0xff] %vm4861_vm4, %v4698_v25 }
 0x51a   :  { %v4702_v51 = vpop.f32.mrb[180].mxu1 }
 0x51b   :  { %v4703_v50 = vadd.f32 %v11145_v41, %v4702_v51  ;;  %v7331_v0 = vpop.f32.mrb[181].mxu1 }
 0x51d   :  { %4955 = vst.msk [vmem:[%s11760_s12 + $0x2e8] sm:$0xff] %vm4861_vm4, %v4703_v50 }
 0x51e   :  { %v4707_v52 = vpop.f32.mrb[182].mxu1 }
 0x51f   :  { %v4708_v13 = vadd.f32 %v11145_v41, %v4707_v52  ;;  %v7334_v37 = vpop.f32.mrb[183].mxu1 }
 0x521   :  { %4956 = vst.msk [vmem:[%s11760_s12 + $0x2f0] sm:$0xff] %vm4861_vm4, %v4708_v13 }
 0x522   :  { %v4712_v23 = vpop.f32.mrb[184].mxu1 }
 0x523   :  { %v4713_v46 = vadd.f32 %v11145_v41, %v4712_v23  ;;  %v7337_v55 = vpop.f32.mrb[185].mxu1 }
 0x525   :  { %4957 = vst.msk [vmem:[%s11760_s12 + $0x2f8] sm:$0xff] %vm4861_vm4, %v4713_v46 }
 0x526   :  { %v4717_v53 = vpop.f32.mrb[186].mxu1 }
 0x527   :  { %v4718_v39 = vadd.f32 %v11145_v41, %v4717_v53  ;;  %v7340_v16 = vpop.f32.mrb[187].mxu1 }
 0x529   :  { %4958 = vst.msk [vmem:[%s11760_s12 + $0x300] sm:$0xff] %vm4861_vm4, %v4718_v39 }
 0x52a   :  { %v4722_v56 = vpop.f32.mrb[188].mxu1 }
 0x52b   :  { %v4723_v45 = vadd.f32 %v11145_v41, %v4722_v56  ;;  %v7343_v43 = vpop.f32.mrb[189].mxu1 }
 0x52d   :  { %4959 = vst.msk [vmem:[%s11760_s12 + $0x308] sm:$0xff] %vm4861_vm4, %v4723_v45 }
 0x52e   :  { %v4727_v4 = vpop.f32.mrb[190].mxu1 }
 0x52f   :  { %v4728_v5 = vadd.f32 %v11145_v41, %v4727_v4  ;;  %v7346_v27 = vpop.f32.mrb[191].mxu1 }
 0x531   :  { %4960 = vst.msk [vmem:[%s11760_s12 + $0x310] sm:$0xff] %vm4861_vm4, %v4728_v5 }
 0x532   :  { %v4732_v29 = vpop.f32.mrb[192].mxu1 }
 0x533   :  { %v4733_v20 = vadd.f32 %v11145_v41, %v4732_v29  ;;  %v7349_v57 = vpop.f32.mrb[193].mxu1 }
 0x535   :  { %4961 = vst.msk [vmem:[%s11760_s12 + $0x318] sm:$0xff] %vm4861_vm4, %v4733_v20 }
 0x536   :  { %v4737_v60 = vpop.f32.mrb[194].mxu1 }
 0x537   :  { %v4738_v30 = vadd.f32 %v11145_v41, %v4737_v60  ;;  %v7352_v17 = vpop.f32.mrb[195].mxu1 }
 0x539   :  { %4962 = vst.msk [vmem:[%s11760_s12 + $0x320] sm:$0xff] %vm4861_vm4, %v4738_v30 }
 0x53a   :  { %v4742_v33 = vpop.f32.mrb[196].mxu1 }
 0x53b   :  { %v4743_v63 = vadd.f32 %v11145_v41, %v4742_v33  ;;  %v7355_v54 = vpop.f32.mrb[197].mxu1 }
 0x53d   :  { %4963 = vst.msk [vmem:[%s11760_s12 + $0x328] sm:$0xff] %vm4861_vm4, %v4743_v63 }
 0x53e   :  { %v4747_v35 = vpop.f32.mrb[198].mxu1 }
 0x53f   :  { %v4748_v62 = vadd.f32 %v11631_v61, %v4747_v35  ;;  %v7358_v2 = vpop.f32.mrb[199].mxu1 }
 0x541   :  { %4964 = vst.msk [vmem:[%s11760_s12 + $0x330] sm:$0xff] %vm4861_vm4, %v4748_v62 }
 0x542   :  { %v4752_v41 = vpop.f32.mrb[200].mxu1 }
 0x543   :  { %v4753_v47 = vadd.f32 %v11631_v61, %v4752_v41  ;;  %v7361_v24 = vpop.f32.mrb[201].mxu1 }
 0x545   :  { %4965 = vst.msk [vmem:[%s11760_s12 + $0x338] sm:$0xff] %vm4861_vm4, %v4753_v47 }
 0x546   :  { %v4757_v40 = vpop.f32.mrb[202].mxu1 }
 0x547   :  { %v4758_v3 = vadd.f32 %v11631_v61, %v4757_v40  ;;  %v7364_v28 = vpop.f32.mrb[203].mxu1 }
 0x549   :  { %4966 = vst.msk [vmem:[%s11760_s12 + $0x340] sm:$0xff] %vm4861_vm4, %v4758_v3 }
 0x54a   :  { %v4762_v1 = vpop.f32.mrb[204].mxu1 }
 0x54b   :  { %v4763_v26 = vadd.f32 %v11631_v61, %v4762_v1  ;;  %v7367_v9 = vpop.f32.mrb[205].mxu1 }
 0x54d   :  { %4967 = vst.msk [vmem:[%s11760_s12 + $0x348] sm:$0xff] %vm4861_vm4, %v4763_v26 }
 0x54e   :  { %v4767_v7 = vpop.f32.mrb[206].mxu1 }
 0x54f   :  { %v4768_v32 = vadd.f32 %v11631_v61, %v4767_v7  ;;  %v7370_v8 = vpop.f32.mrb[207].mxu1 }
 0x551   :  { %4968 = vst.msk [vmem:[%s11760_s12 + $0x350] sm:$0xff] %vm4861_vm4, %v4768_v32 }
 0x552   :  { %v4772_v10 = vpop.f32.mrb[208].mxu1 }
 0x553   :  { %v4773_v44 = vadd.f32 %v11631_v61, %v4772_v10  ;;  %v7373_v6 = vpop.f32.mrb[209].mxu1 }
 0x555   :  { %4969 = vst.msk [vmem:[%s11760_s12 + $0x358] sm:$0xff] %vm4861_vm4, %v4773_v44 }
 0x556   :  { %v4777_v49 = vpop.f32.mrb[210].mxu1 }
 0x557   :  { %v4778_v59 = vadd.f32 %v11631_v61, %v4777_v49  ;;  %v7376_v12 = vpop.f32.mrb[211].mxu1 }
 0x559   :  { %4970 = vst.msk [vmem:[%s11760_s12 + $0x360] sm:$0xff] %vm4861_vm4, %v4778_v59 }
 0x55a   :  { %v4782_v11 = vpop.f32.mrb[212].mxu1 }
 0x55b   :  { %v4783_v14 = vadd.f32 %v11631_v61, %v4782_v11  ;;  %v7379_v42 = vpop.f32.mrb[213].mxu1 }
 0x55d   :  { %4971 = vst.msk [vmem:[%s11760_s12 + $0x368] sm:$0xff] %vm4861_vm4, %v4783_v14 }
 0x55e   :  { %v4787_v36 = vpop.f32.mrb[214].mxu1 }
 0x55f   :  { %v4788_v38 = vadd.f32 %v11631_v61, %v4787_v36  ;;  %v7382_v48 = vpop.f32.mrb[215].mxu1 }
 0x561   :  { %4972 = vst.msk [vmem:[%s11760_s12 + $0x370] sm:$0xff] %vm4861_vm4, %v4788_v38 }
 0x562   :  { %v4792_v18 = vpop.f32.mrb[216].mxu1 }
 0x563   :  { %v4793_v58 = vadd.f32 %v11631_v61, %v4792_v18  ;;  %v7385_v19 = vpop.f32.mrb[217].mxu1 }
 0x565   :  { %4973 = vst.msk [vmem:[%s11760_s12 + $0x378] sm:$0xff] %vm4861_vm4, %v4793_v58 }
 0x566   :  { %v4797_v15 = vpop.f32.mrb[218].mxu1 }
 0x567   :  { %v4798_v31 = vadd.f32 %v11631_v61, %v4797_v15  ;;  %v7388_v34 = vpop.f32.mrb[219].mxu1 }
 0x569   :  { %4974 = vst.msk [vmem:[%s11760_s12 + $0x380] sm:$0xff] %vm4861_vm4, %v4798_v31 }
 0x56a   :  { %v4802_v22 = vpop.f32.mrb[220].mxu1 }
 0x56b   :  { %v4803_v25 = vadd.f32 %v11631_v61, %v4802_v22  ;;  %v7391_v21 = vpop.f32.mrb[221].mxu1 }
 0x56d   :  { %4975 = vst.msk [vmem:[%s11760_s12 + $0x388] sm:$0xff] %vm4861_vm4, %v4803_v25 }
 0x56e   :  { %v4807_v51 = vpop.f32.mrb[222].mxu1 }
 0x56f   :  { %v4808_v50 = vadd.f32 %v11631_v61, %v4807_v51  ;;  %v7394_v0 = vpop.f32.mrb[223].mxu1 }
 0x571   :  { %4976 = vst.msk [vmem:[%s11760_s12 + $0x390] sm:$0xff] %vm4861_vm4, %v4808_v50 }
 0x572   :  { %v4812_v52 = vpop.f32.mrb[224].mxu1 }
 0x573   :  { %v4813_v13 = vadd.f32 %v11631_v61, %v4812_v52  ;;  %v7397_v37 = vpop.f32.mrb[225].mxu1 }
 0x575   :  { %4977 = vst.msk [vmem:[%s11760_s12 + $0x398] sm:$0xff] %vm4861_vm4, %v4813_v13 }
 0x576   :  { %v4817_v23 = vpop.f32.mrb[226].mxu1 }
 0x577   :  { %v4818_v46 = vadd.f32 %v11631_v61, %v4817_v23  ;;  %v7400_v55 = vpop.f32.mrb[227].mxu1 }
 0x579   :  { %4978 = vst.msk [vmem:[%s11760_s12 + $0x3a0] sm:$0xff] %vm4861_vm4, %v4818_v46 }
 0x57a   :  { %v4822_v53 = vpop.f32.mrb[228].mxu1 }
 0x57b   :  { %v4823_v39 = vadd.f32 %v11631_v61, %v4822_v53  ;;  %v7403_v16 = vpop.f32.mrb[229].mxu1 }
 0x57d   :  { %4979 = vst.msk [vmem:[%s11760_s12 + $0x3a8] sm:$0xff] %vm4861_vm4, %v4823_v39 }
 0x57e   :  { %v4827_v56 = vpop.f32.mrb[230].mxu1 }
 0x57f   :  { %v4828_v45 = vadd.f32 %v11631_v61, %v4827_v56  ;;  %v7406_v43 = vpop.f32.mrb[231].mxu1 }
 0x581   :  { %4980 = vst.msk [vmem:[%s11760_s12 + $0x3b0] sm:$0xff] %vm4861_vm4, %v4828_v45 }
 0x582   :  { %v4832_v4 = vpop.f32.mrb[232].mxu1 }
 0x583   :  { %v4833_v5 = vadd.f32 %v11631_v61, %v4832_v4  ;;  %v7409_v27 = vpop.f32.mrb[233].mxu1 }
 0x585   :  { %4981 = vst.msk [vmem:[%s11760_s12 + $0x3b8] sm:$0xff] %vm4861_vm4, %v4833_v5 }
 0x586   :  { %v4837_v29 = vpop.f32.mrb[234].mxu1 }
 0x587   :  { %v4838_v20 = vadd.f32 %v11631_v61, %v4837_v29  ;;  %v7412_v57 = vpop.f32.mrb[235].mxu1 }
 0x589   :  { %4982 = vst.msk [vmem:[%s11760_s12 + $0x3c0] sm:$0xff] %vm4861_vm4, %v4838_v20 }
 0x58a   :  { %v4842_v60 = vpop.f32.mrb[236].mxu1 }
 0x58b   :  { %v4843_v30 = vadd.f32 %v11631_v61, %v4842_v60  ;;  %v7415_v17 = vpop.f32.mrb[237].mxu1 }
 0x58d   :  { %4983 = vst.msk [vmem:[%s11760_s12 + $0x3c8] sm:$0xff] %vm4861_vm4, %v4843_v30 }
 0x58e   :  { %v4847_v33 = vpop.f32.mrb[238].mxu1 }
 0x58f   :  { %v4848_v63 = vadd.f32 %v11631_v61, %v4847_v33  ;;  %v7418_v54 = vpop.f32.mrb[239].mxu1 }
 0x591   :  { %4984 = vst.msk [vmem:[%s11760_s12 + $0x3d0] sm:$0xff] %vm4861_vm4, %v4848_v63 }
 0x592   :  { %v4852_v35 = vpop.f32.mrb[240].mxu1 }
 0x593   :  { %v4853_v62 = vadd.f32 %v11631_v61, %v4852_v35  ;;  %v7421_v2 = vpop.f32.mrb[241].mxu1 }
 0x595   :  { %4985 = vst.msk [vmem:[%s11760_s12 + $0x3d8] sm:$0xff] %vm4861_vm4, %v4853_v62 }
 0x596   :  { %v4857_v41 = vpop.f32.mrb[242].mxu1 }
 0x597   :  { %v4858_v47 = vadd.f32 %v11631_v61, %v4857_v41  ;;  %v7424_v24 = vpop.f32.mrb[243].mxu1 }
 0x599   :  { %4986 = vst.msk [vmem:[%s11760_s12 + $0x3e0] sm:$0xff] %vm4861_vm4, %v4858_v47 }

</bundles_post_ra>
